<compile_context>
chip_gen: v7x
topology: tpu7x:2x2x1
jax: 0.10.0
libtpu: 0.0.40
codegen_flags: <defaults>
</compile_context>

<pallas_src>
import functools

import jax
import jax.numpy as jnp
from jax.experimental import pallas as pl
from jax.experimental.pallas import tpu as pltpu


_DOT_DTYPE = jnp.bfloat16       # MXU operand dtype (accumulation stays f32)
_YA_DTYPE = jnp.bfloat16        # dtype of the single HBM intermediate


@functools.lru_cache(maxsize=1)
def _vmem_limit_bytes():
    """Generation-dependent scoped-VMEM budget (~3/4 of capacity, <=96 MiB)."""
    try:
        cap = int(pltpu.get_tpu_info().vmem_capacity_bytes)
    except Exception:
        cap = 64 * 1024 * 1024          # conservative fallback (v7x-sized)
    return min((cap * 3) // 4, 96 * 1024 * 1024)


def _compiler_params():
    return pltpu.CompilerParams(dimension_semantics=("parallel",),
                                vmem_limit_bytes=_vmem_limit_bytes())


# ---------------------------------------------------------------------------
# Kernels
# ---------------------------------------------------------------------------
def stage1_kernel(x_ref, s_ref, t_ref, w1_ref, w2a_ref, w3a_ref,
                  b1_ref, b2a_ref, b3a_ref, ya_ref, st_ref, padp_ref):
    """Per image: maxpool3(x) + fused BN+ReLU+1x1 conv for branches 1/2/3.

    x_ref    : (H, W, Cin)                    input image (batch squeezed)
    s_ref/t_ref : (3, Cin)                    BN scale/shift rows for b1/b2/b3
    w*_ref   : (Cin, ck) bf16 ; b*_ref : (1, ck) f32
    ya_ref   : (H*W, c1+c2a+c3a+Cin) bf16     [y1 | y2a | y3a | maxpool(x)]
    st_ref   : (2, c2a+c3a+Cin) f32           per-image [sum ; sum_sq] of the
                                              stage-2 BasicConv2d inputs
    padp_ref : (H+2, W+2, Cin) f32            -inf padded maxpool scratch
    """
    H, W, cin = x_ref.shape
    c1 = w1_ref.shape[1]
    x = x_ref[...].astype(jnp.float32)

    # ---- branch-4 head: MaxPool2d(3, stride 1, pad 1), separable ----------
    # Border-only init of the -inf padding; interior is overwritten by x.
    padp_ref[0:1, :, :] = jnp.full((1, W + 2, cin), -jnp.inf, jnp.float32)
    padp_ref[H + 1:H + 2, :, :] = jnp.full((1, W + 2, cin), -jnp.inf, jnp.float32)
    padp_ref[:, 0:1, :] = jnp.full((H + 2, 1, cin), -jnp.inf, jnp.float32)
    padp_ref[:, W + 1:W + 2, :] = jnp.full((H + 2, 1, cin), -jnp.inf, jnp.float32)
    padp_ref[1:H + 1, 1:W + 1, :] = x
    # horizontal max over 3 taps, then vertical max over 3 shifts (4 maxima).
    r = jnp.maximum(padp_ref[:, 0:W, :], padp_ref[:, 1:W + 1, :])
    r = jnp.maximum(r, padp_ref[:, 2:W + 2, :])                  # (H+2, W, Cin)
    pooled = jnp.maximum(jnp.maximum(r[0:H], r[1:H + 1]), r[2:H + 2])
    pooled_flat = pooled.reshape(H * W, cin)

    # ---- branches 1/2/3: BN(x)+ReLU -> 1x1 conv (three dense dots) --------
    xf = x.reshape(H * W, cin)

    def bn_relu_conv(k, w_ref, b_ref):
        a = jnp.maximum(xf * s_ref[k:k + 1, :] + t_ref[k:k + 1, :], 0.0)
        return jnp.dot(a.astype(w_ref.dtype), w_ref[...],
                       preferred_element_type=jnp.float32) + b_ref[...]

    y1 = bn_relu_conv(0, w1_ref, b1_ref)        # (H*W, c1)
    y2a = bn_relu_conv(1, w2a_ref, b2a_ref)     # (H*W, c2a)
    y3a = bn_relu_conv(2, w3a_ref, b3a_ref)     # (H*W, c3a)

    # ---- single full-slab assembly + f32 stats BEFORE the bf16 downcast ---
    slab = jnp.concatenate([y1, y2a, y3a, pooled_flat], axis=-1)  # (H*W, ca) f32
    stat_in = slab[:, c1:]                                        # stage-2 inputs
    sums = jnp.sum(stat_in, axis=0, keepdims=True)
    sqs = jnp.sum(stat_in * stat_in, axis=0, keepdims=True)
    st_ref[...] = jnp.concatenate([sums, sqs], axis=0)

    ya_ref[...] = slab.astype(ya_ref.dtype)                       # one store


def stage2_kernel(ya_ref, s_ref, t_ref, w2b_ref, b2b_ref, w3b_ref, b3b_ref,
                  w4_ref, b4_ref, o_ref, pad3_ref, pad5_ref, *, H, W):
    """Per image: 3x3 / 5x5 / 1x1 BasicConv2d second stages + final concat.

    ya_ref : (H*W, c1+c2a+c3a+Cin) bf16   stage-1 output
    s_ref/t_ref : (1, c2a+c3a+Cin)        packed BN scale/shift (b2b|b3b|b4)
    w2b_ref : (9,  c2a, c2b) bf16         3x3 weights, tap-major
    w3b_ref : (25, c3a, c3b) bf16         5x5 weights, tap-major
    w4_ref  : (Cin, c4) bf16              branch-4 1x1 weights
    o_ref   : (H*W, c1+c2b+c3b+c4) f32    final [y1 | y2 | y3 | y4]
    pad3_ref / pad5_ref : zero-padded activation scratch (borders only re-init)
    """
    c2a, c2b = w2b_ref.shape[1], w2b_ref.shape[2]
    c3a, c3b = w3b_ref.shape[1], w3b_ref.shape[2]
    cin, _ = w4_ref.shape
    ca = ya_ref.shape[-1]
    c1 = ca - c2a - c3a - cin
    dot_dt = w2b_ref.dtype

    ya = ya_ref[...].astype(jnp.float32)                   # (H*W, ca)

    # branch 1 is already final after stage 1 -> passthrough.
    y1 = ya[:, 0:c1]

    # Fused BN+ReLU for the three stage-2 BasicConv2d inputs (one affine).
    act = jnp.maximum(ya[:, c1:] * s_ref[...] + t_ref[...], 0.0)
    a2 = act[:, 0:c2a].reshape(H, W, c2a)
    a3 = act[:, c2a:c2a + c3a].reshape(H, W, c3a)
    a4 = act[:, c2a + c3a:]                                # (H*W, Cin)

    # ---- branch 2: 3x3 same-padding conv, per-tap accumulate --------------
    pad3_ref[0:1, :, :] = jnp.zeros((1, W + 2, c2a), jnp.float32)
    pad3_ref[H + 1:H + 2, :, :] = jnp.zeros((1, W + 2, c2a), jnp.float32)
    pad3_ref[:, 0:1, :] = jnp.zeros((H + 2, 1, c2a), jnp.float32)
    pad3_ref[:, W + 1:W + 2, :] = jnp.zeros((H + 2, 1, c2a), jnp.float32)
    pad3_ref[1:H + 1, 1:W + 1, :] = a2
    y2 = jnp.zeros((H * W, c2b), jnp.float32)
    for t, (dh, dw) in enumerate((i, j) for i in range(3) for j in range(3)):
        tap = pad3_ref[dh:dh + H, dw:dw + W, :].reshape(H * W, c2a)
        y2 = y2 + jnp.dot(tap.astype(dot_dt), w2b_ref[t],
                          preferred_element_type=jnp.float32)
    y2 = y2 + b2b_ref[...]

    # ---- branch 3: 5x5 same-padding conv, per-tap accumulate --------------
    pad5_ref[0:2, :, :] = jnp.zeros((2, W + 4, c3a), jnp.float32)
    pad5_ref[H + 2:H + 4, :, :] = jnp.zeros((2, W + 4, c3a), jnp.float32)
    pad5_ref[:, 0:2, :] = jnp.zeros((H + 4, 2, c3a), jnp.float32)
    pad5_ref[:, W + 2:W + 4, :] = jnp.zeros((H + 4, 2, c3a), jnp.float32)
    pad5_ref[2:H + 2, 2:W + 2, :] = a3
    y3 = jnp.zeros((H * W, c3b), jnp.float32)
    for t, (dh, dw) in enumerate((i, j) for i in range(5) for j in range(5)):
        tap = pad5_ref[dh:dh + H, dw:dw + W, :].reshape(H * W, c3a)
        y3 = y3 + jnp.dot(tap.astype(dot_dt), w3b_ref[t],
                          preferred_element_type=jnp.float32)
    y3 = y3 + b3b_ref[...]

    # ---- branch 4: 1x1 conv on BN+ReLU(maxpool(x)) -------------------------
    y4 = jnp.dot(a4.astype(dot_dt), w4_ref[...],
                 preferred_element_type=jnp.float32) + b4_ref[...]

    # ---- single full-slab store of the concatenated Inception output ------
    o_ref[...] = jnp.concatenate([y1, y2, y3, y4], axis=-1).astype(o_ref.dtype)


# ---------------------------------------------------------------------------
# pallas_call wrappers
# ---------------------------------------------------------------------------
def _param_spec(arr):
    nd = arr.ndim
    return pl.BlockSpec(arr.shape, lambda n, _nd=nd: (0,) * _nd)


def _nbytes(*arrs):
    return int(sum(a.size * a.dtype.itemsize for a in arrs))


def _stage1_call(x, s123, t123, w1, w2a, w3a, b1, b2a, b3a):
    N, H, W, cin = x.shape
    c1, c2a, c3a = w1.shape[1], w2a.shape[1], w3a.shape[1]
    ca = c1 + c2a + c3a + cin
    nstat = c2a + c3a + cin
    flops = 2 * N * H * W * cin * (c1 + c2a + c3a) + 8 * N * H * W * cin
    bytes_accessed = (_nbytes(x) + N * H * W * ca * 2 + N * 2 * nstat * 4
                      + _nbytes(s123, t123, w1, w2a, w3a, b1, b2a, b3a))
    return pl.pallas_call(
        stage1_kernel,
        out_shape=(jax.ShapeDtypeStruct((N, H * W, ca), _YA_DTYPE),
                   jax.ShapeDtypeStruct((N, 2, nstat), jnp.float32)),
        grid_spec=pltpu.PrefetchScalarGridSpec(
            num_scalar_prefetch=0,
            grid=(N,),
            in_specs=[
                pl.BlockSpec((None, H, W, cin), lambda n: (n, 0, 0, 0)),
                _param_spec(s123), _param_spec(t123),
                _param_spec(w1), _param_spec(w2a), _param_spec(w3a),
                _param_spec(b1), _param_spec(b2a), _param_spec(b3a),
            ],
            out_specs=(pl.BlockSpec((None, H * W, ca), lambda n: (n, 0, 0)),
                       pl.BlockSpec((None, 2, nstat), lambda n: (n, 0, 0))),
            scratch_shapes=[pltpu.VMEM((H + 2, W + 2, cin), jnp.float32)],
        ),
        compiler_params=_compiler_params(),
        cost_estimate=pl.CostEstimate(flops=int(flops), transcendentals=0,
                                      bytes_accessed=int(bytes_accessed)),
    )(x, s123, t123, w1, w2a, w3a, b1, b2a, b3a)


def _stage2_call(ya, s_s2, t_s2, w2b, b2b, w3b, b3b, w4, b4, *, H, W):
    N, _, ca = ya.shape
    c2a, c2b = w2b.shape[1], w2b.shape[2]
    c3a, c3b = w3b.shape[1], w3b.shape[2]
    cin, c4 = w4.shape
    c1 = ca - c2a - c3a - cin
    c_out = c1 + c2b + c3b + c4
    flops = 2 * N * H * W * (9 * c2a * c2b + 25 * c3a * c3b + cin * c4)
    bytes_accessed = (_nbytes(ya) + N * H * W * c_out * 4
                      + _nbytes(s_s2, t_s2, w2b, b2b, w3b, b3b, w4, b4))
    kern = functools.partial(stage2_kernel, H=H, W=W)
    return pl.pallas_call(
        kern,
        out_shape=jax.ShapeDtypeStruct((N, H * W, c_out), jnp.float32),
        grid_spec=pltpu.PrefetchScalarGridSpec(
            num_scalar_prefetch=0,
            grid=(N,),
            in_specs=[
                pl.BlockSpec((None, H * W, ca), lambda n: (n, 0, 0)),
                _param_spec(s_s2), _param_spec(t_s2),
                _param_spec(w2b), _param_spec(b2b),
                _param_spec(w3b), _param_spec(b3b),
                _param_spec(w4), _param_spec(b4),
            ],
            out_specs=pl.BlockSpec((None, H * W, c_out), lambda n: (n, 0, 0)),
            scratch_shapes=[pltpu.VMEM((H + 2, W + 2, c2a), jnp.float32),
                            pltpu.VMEM((H + 4, W + 4, c3a), jnp.float32)],
        ),
        compiler_params=_compiler_params(),
        cost_estimate=pl.CostEstimate(flops=int(flops), transcendentals=0,
                                      bytes_accessed=int(bytes_accessed)),
    )(ya, s_s2, t_s2, w2b, b2b, w3b, b3b, w4, b4)


# ---------------------------------------------------------------------------
# Parameter massaging (tiny, XLA)
# ---------------------------------------------------------------------------
def _conv1x1_weight(w):
    """PyTorch OIHW (co, ci, 1, 1) -> (ci, co)."""
    return jnp.transpose(w[:, :, 0, 0], (1, 0))


def _tap_major_weight(w):
    """PyTorch OIHW (co, ci, k, k) -> (k*k, ci, co), tap-major (kh*k+kw)."""
    co, ci, kh, kw = w.shape
    return jnp.transpose(w, (2, 3, 1, 0)).reshape(kh * kw, ci, co)


def _bn_scale_shift_from_x(x, gamma, beta, eps):
    """Training-mode BN of x (stats over N,H,W) folded to scale/shift."""
    axes = tuple(range(x.ndim - 1))
    mean = jnp.mean(x, axis=axes)
    var = jnp.var(x, axis=axes)
    scale = gamma * jax.lax.rsqrt(var + eps)
    return scale, beta - mean * scale


def _bn_scale_shift_from_moments(ssum, ssq, count, gamma, beta, eps):
    """BN scale/shift from in-kernel per-channel (sum, sum_sq) partials."""
    mean = ssum / count
    var = jnp.maximum(ssq / count - mean * mean, 0.0)
    scale = gamma * jax.lax.rsqrt(var + eps)
    return scale, beta - mean * scale


# ---------------------------------------------------------------------------
# Inception forward (Pallas)
# ---------------------------------------------------------------------------
def inception_forward(x_nchw, params, eps=1e-5):
    x = jnp.transpose(x_nchw, (0, 2, 3, 1)).astype(jnp.float32)   # NCHW -> NHWC
    N, H, W, cin = x.shape

    (p1,) = params["b1"]
    p2a, p2b = params["b2"]
    p3a, p3b = params["b3"]
    (p4,) = params["b4"]
    c1 = p1["w"].shape[0]
    c2a, c2b = p2a["w"].shape[0], p2b["w"].shape[0]
    c3a, c3b = p3a["w"].shape[0], p3b["w"].shape[0]
    c4 = p4["w"].shape[0]

    # ---- stage-1 BN (of x) folded to scale/shift: tiny XLA reduction over x
    s1, t1 = _bn_scale_shift_from_x(x, p1["gamma"], p1["beta"], eps)
    s2, t2 = _bn_scale_shift_from_x(x, p2a["gamma"], p2a["beta"], eps)
    s3, t3 = _bn_scale_shift_from_x(x, p3a["gamma"], p3a["beta"], eps)
    s123 = jnp.stack([s1, s2, s3])                                 # (3, Cin)
    t123 = jnp.stack([t1, t2, t3])
    w1 = _conv1x1_weight(p1["w"]).astype(_DOT_DTYPE)
    w2a = _conv1x1_weight(p2a["w"]).astype(_DOT_DTYPE)
    w3a = _conv1x1_weight(p3a["w"]).astype(_DOT_DTYPE)
    b1 = p1["b"][None, :]
    b2a = p2a["b"][None, :]
    b3a = p3a["b"][None, :]

    # y_a = [y1 | y2a | y3a | maxpool3(x)] (bf16) + per-image BN partials (f32)
    ya, stats = _stage1_call(x, s123, t123, w1, w2a, w3a, b1, b2a, b3a)

    # ---- stage-2 BN scale/shift from the kernel-produced (sum, sum_sq) -----
    count = jnp.float32(N * H * W)
    ssum = jnp.sum(stats[:, 0, :], axis=0)
    ssq = jnp.sum(stats[:, 1, :], axis=0)
    s2b, t2b = _bn_scale_shift_from_moments(ssum[0:c2a], ssq[0:c2a], count,
                                            p2b["gamma"], p2b["beta"], eps)
    s3b, t3b = _bn_scale_shift_from_moments(ssum[c2a:c2a + c3a],
                                            ssq[c2a:c2a + c3a], count,
                                            p3b["gamma"], p3b["beta"], eps)
    s4, t4 = _bn_scale_shift_from_moments(ssum[c2a + c3a:], ssq[c2a + c3a:],
                                          count, p4["gamma"], p4["beta"], eps)
    s_s2 = jnp.concatenate([s2b, s3b, s4])[None, :]                # (1, c2a+c3a+Cin)
    t_s2 = jnp.concatenate([t2b, t3b, t4])[None, :]

    w2b = _tap_major_weight(p2b["w"]).astype(_DOT_DTYPE)           # (9,  c2a, c2b)
    w3b = _tap_major_weight(p3b["w"]).astype(_DOT_DTYPE)           # (25, c3a, c3b)
    w4 = _conv1x1_weight(p4["w"]).astype(_DOT_DTYPE)               # (Cin, c4)
    b2b = p2b["b"][None, :]
    b3b = p3b["b"][None, :]
    b4 = p4["b"][None, :]

    y = _stage2_call(ya, s_s2, t_s2, w2b, b2b, w3b, b3b, w4, b4, H=H, W=W)
    y = y.reshape(N, H, W, c1 + c2b + c3b + c4)
    return jnp.transpose(y, (0, 3, 1, 2))                          # back to NCHW


# ---------------------------------------------------------------------------
# Pure-JAX (XLA) reference for numerical sanity
# ---------------------------------------------------------------------------
def _ref_basic_conv(x, p, eps=1e-5):
    mean = jnp.mean(x, axis=(0, 1, 2))
    var = jnp.var(x, axis=(0, 1, 2))
    a = jnp.maximum((x - mean) * jax.lax.rsqrt(var + eps) * p["gamma"] + p["beta"], 0.0)
    k = p["ksize"]
    pad = (k - 1) // 2
    w_hwio = jnp.transpose(p["w"], (2, 3, 1, 0))
    y = jax.lax.conv_general_dilated(a, w_hwio, window_strides=(1, 1),
                                     padding=[(pad, pad), (pad, pad)],
                                     dimension_numbers=("NHWC", "HWIO", "NHWC"))
    return y + p["b"]


def _ref_maxpool3(x):
    return jax.lax.reduce_window(x, -jnp.inf, jax.lax.max,
                                 (1, 3, 3, 1), (1, 1, 1, 1),
                                 ((0, 0), (1, 1), (1, 1), (0, 0)))


def inception_reference(x_nchw, params, eps=1e-5):
    x = jnp.transpose(x_nchw, (0, 2, 3, 1)).astype(jnp.float32)
    b1 = _ref_basic_conv(x, params["b1"][0], eps)
    b2 = _ref_basic_conv(_ref_basic_conv(x, params["b2"][0], eps), params["b2"][1], eps)
    b3 = _ref_basic_conv(_ref_basic_conv(x, params["b3"][0], eps), params["b3"][1], eps)
    b4 = _ref_basic_conv(_ref_maxpool3(x), params["b4"][0], eps)
    y = jnp.concatenate([b1, b2, b3, b4], axis=-1)
    return jnp.transpose(y, (0, 3, 1, 2))


# ---------------------------------------------------------------------------
# Deterministic parameter init (synthetic; shapes follow the PyTorch module)
# ---------------------------------------------------------------------------
def init_basic_conv2d(key, cin, cout, ksize):
    k1, k2, k3, k4 = jax.random.split(key, 4)
    return dict(
        gamma=1.0 + 0.1 * jax.random.normal(k1, (cin,), jnp.float32),
        beta=0.1 * jax.random.normal(k2, (cin,), jnp.float32),
        w=0.1 * jax.random.normal(k3, (cout, cin, ksize, ksize), jnp.float32),
        b=0.1 * jax.random.normal(k4, (cout,), jnp.float32),
        ksize=ksize,
    )


def init_inception(key, in_channels, out_channels):
    keys = jax.random.split(key, 6)
    return dict(
        b1=[init_basic_conv2d(keys[0], in_channels, out_channels[0][0], 1)],
        b2=[init_basic_conv2d(keys[1], in_channels, out_channels[1][0], 1),
            init_basic_conv2d(keys[2], out_channels[1][0], out_channels[1][1], 3)],
        b3=[init_basic_conv2d(keys[3], in_channels, out_channels[2][0], 1),
            init_basic_conv2d(keys[4], out_channels[2][0], out_channels[2][1], 5)],
        b4=[init_basic_conv2d(keys[5], in_channels, out_channels[3][0], 1)],
    )


# ---------------------------------------------------------------------------
if __name__ == "__main__":
    key = jax.random.PRNGKey(0)
    k_x, k_p = jax.random.split(key)

    N, C_in, H, W = 2, 8, 16, 16
    out_channels = [[8], [8, 16], [4, 8], [8]]   # total 40 output channels

    x = jax.random.normal(k_x, (N, C_in, H, W), jnp.float32)
    params = init_inception(k_p, C_in, out_channels)

    fwd = jax.jit(lambda xx: inception_forward(xx, params))
    y = fwd(x)
    jax.block_until_ready(y)

    expected_c = sum(oc[-1] for oc in out_channels)
    assert y.shape == (N, expected_c, H, W), y.shape
    assert bool(jnp.all(jnp.isfinite(y)))

    # Numerical sanity vs plain-XLA reference (bf16 MXU operands + bf16
    # intermediate -> loose tolerance).
    y_ref = jax.jit(lambda xx: inception_reference(xx, params))(x)
    jax.block_until_ready(y_ref)
    assert bool(jnp.allclose(y, y_ref, atol=5e-2, rtol=5e-2)), \
        float(jnp.max(jnp.abs(y - y_ref)))

    print("KERNEL_OK")
</pallas_src>

<mosaic_0001>
module attributes {stable_mosaic.version = 11 : i64} {
  func.func @stage1_kernel(%arg0: i32, %arg1: memref<1x16x16x8xf32, #tpu.memory_space<vmem>>, %arg2: memref<3x8xf32, #tpu.memory_space<vmem>>, %arg3: memref<3x8xf32, #tpu.memory_space<vmem>>, %arg4: memref<8x8xbf16, #tpu.memory_space<vmem>>, %arg5: memref<8x8xbf16, #tpu.memory_space<vmem>>, %arg6: memref<8x4xbf16, #tpu.memory_space<vmem>>, %arg7: memref<1x8xf32, #tpu.memory_space<vmem>>, %arg8: memref<1x8xf32, #tpu.memory_space<vmem>>, %arg9: memref<1x4xf32, #tpu.memory_space<vmem>>, %arg10: memref<1x256x28xbf16, #tpu.memory_space<vmem>>, %arg11: memref<1x2x20xf32, #tpu.memory_space<vmem>>, %arg12: memref<18x18x8xf32, #tpu.memory_space<vmem>>) attributes {dimension_semantics = [#tpu.dimension_semantics<parallel>], iteration_bounds = array<i64: 2>, scalar_prefetch = 0 : i64, scratch_operands = 1 : i64, tpu.core_type = #tpu.core_type<tc>, window_params = [{transform_indices = @transform_0, window_bounds = array<i64: 1, 16, 16, 8>}, {pipeline_mode = #tpu.pipeline_mode<synchronous>, transform_indices = @transform_1, window_bounds = array<i64: 3, 8>}, {pipeline_mode = #tpu.pipeline_mode<synchronous>, transform_indices = @transform_2, window_bounds = array<i64: 3, 8>}, {pipeline_mode = #tpu.pipeline_mode<synchronous>, transform_indices = @transform_3, window_bounds = array<i64: 8, 8>}, {pipeline_mode = #tpu.pipeline_mode<synchronous>, transform_indices = @transform_4, window_bounds = array<i64: 8, 8>}, {pipeline_mode = #tpu.pipeline_mode<synchronous>, transform_indices = @transform_5, window_bounds = array<i64: 8, 4>}, {pipeline_mode = #tpu.pipeline_mode<synchronous>, transform_indices = @transform_6, window_bounds = array<i64: 1, 8>}, {pipeline_mode = #tpu.pipeline_mode<synchronous>, transform_indices = @transform_7, window_bounds = array<i64: 1, 8>}, {pipeline_mode = #tpu.pipeline_mode<synchronous>, transform_indices = @transform_8, window_bounds = array<i64: 1, 4>}, {transform_indices = @transform_9, window_bounds = array<i64: 1, 256, 28>}, {transform_indices = @transform_10, window_bounds = array<i64: 1, 2, 20>}]} {
    %c0 = arith.constant 0 : index
    %c0_0 = arith.constant 0 : index
    %c0_1 = arith.constant 0 : index
    %c0_2 = arith.constant 0 : index
    %0 = vector.load %arg1[%c0, %c0_0, %c0_1, %c0_2] : memref<1x16x16x8xf32, #tpu.memory_space<vmem>>, vector<1x16x16x8xf32>
    %1 = vector.shape_cast %0 : vector<1x16x16x8xf32> to vector<16x16x8xf32>
    %cst = arith.constant 0xFF800000 : f32
    %2 = vector.broadcast %cst : f32 to vector<1x18x8xf32>
    %c0_3 = arith.constant 0 : index
    %c0_4 = arith.constant 0 : index
    %c0_5 = arith.constant 0 : index
    %3 = vector.load %arg12[%c0_3, %c0_4, %c0_5] : memref<18x18x8xf32, #tpu.memory_space<vmem>>, vector<1x18x8xf32>
    tpu.vector_store %arg12[%c0_3, %c0_4, %c0_5], %2 {strides = array<i32>} : memref<18x18x8xf32, #tpu.memory_space<vmem>>, vector<1x18x8xf32>,
    %cst_6 = arith.constant 0xFF800000 : f32
    %4 = vector.broadcast %cst_6 : f32 to vector<1x18x8xf32>
    %c17 = arith.constant 17 : index
    %c0_7 = arith.constant 0 : index
    %c0_8 = arith.constant 0 : index
    %5 = vector.load %arg12[%c17, %c0_7, %c0_8] : memref<18x18x8xf32, #tpu.memory_space<vmem>>, vector<1x18x8xf32>
    tpu.vector_store %arg12[%c17, %c0_7, %c0_8], %4 {strides = array<i32>} : memref<18x18x8xf32, #tpu.memory_space<vmem>>, vector<1x18x8xf32>,
    %cst_9 = arith.constant 0xFF800000 : f32
    %6 = vector.broadcast %cst_9 : f32 to vector<18x1x8xf32>
    %c0_10 = arith.constant 0 : index
    %c0_11 = arith.constant 0 : index
    %c0_12 = arith.constant 0 : index
    %7 = vector.load %arg12[%c0_10, %c0_11, %c0_12] : memref<18x18x8xf32, #tpu.memory_space<vmem>>, vector<18x1x8xf32>
    tpu.vector_store %arg12[%c0_10, %c0_11, %c0_12], %6 {strides = array<i32>} : memref<18x18x8xf32, #tpu.memory_space<vmem>>, vector<18x1x8xf32>,
    %cst_13 = arith.constant 0xFF800000 : f32
    %8 = vector.broadcast %cst_13 : f32 to vector<18x1x8xf32>
    %c0_14 = arith.constant 0 : index
    %c17_15 = arith.constant 17 : index
    %c0_16 = arith.constant 0 : index
    %9 = vector.load %arg12[%c0_14, %c17_15, %c0_16] : memref<18x18x8xf32, #tpu.memory_space<vmem>>, vector<18x1x8xf32>
    tpu.vector_store %arg12[%c0_14, %c17_15, %c0_16], %8 {strides = array<i32>} : memref<18x18x8xf32, #tpu.memory_space<vmem>>, vector<18x1x8xf32>,
    %c1 = arith.constant 1 : index
    %c1_17 = arith.constant 1 : index
    %c0_18 = arith.constant 0 : index
    %10 = vector.load %arg12[%c1, %c1_17, %c0_18] : memref<18x18x8xf32, #tpu.memory_space<vmem>>, vector<16x16x8xf32>
    tpu.vector_store %arg12[%c1, %c1_17, %c0_18], %1 {strides = array<i32>} : memref<18x18x8xf32, #tpu.memory_space<vmem>>, vector<16x16x8xf32>,
    %c0_19 = arith.constant 0 : index
    %c0_20 = arith.constant 0 : index
    %c0_21 = arith.constant 0 : index
    %11 = vector.load %arg12[%c0_19, %c0_20, %c0_21] : memref<18x18x8xf32, #tpu.memory_space<vmem>>, vector<18x16x8xf32>
    %c0_22 = arith.constant 0 : index
    %c1_23 = arith.constant 1 : index
    %c0_24 = arith.constant 0 : index
    %12 = vector.load %arg12[%c0_22, %c1_23, %c0_24] : memref<18x18x8xf32, #tpu.memory_space<vmem>>, vector<18x16x8xf32>
    %13 = arith.maximumf %11, %12 : vector<18x16x8xf32>
    %c0_25 = arith.constant 0 : index
    %c2 = arith.constant 2 : index
    %c0_26 = arith.constant 0 : index
    %14 = vector.load %arg12[%c0_25, %c2, %c0_26] : memref<18x18x8xf32, #tpu.memory_space<vmem>>, vector<18x16x8xf32>
    %15 = arith.maximumf %13, %14 : vector<18x16x8xf32>
    %16 = vector.extract_strided_slice %15 {offsets = [0, 0, 0], sizes = [16, 16, 8], strides = [1, 1, 1]} : vector<18x16x8xf32> to vector<16x16x8xf32>
    %17 = vector.extract_strided_slice %15 {offsets = [1, 0, 0], sizes = [16, 16, 8], strides = [1, 1, 1]} : vector<18x16x8xf32> to vector<16x16x8xf32>
    %18 = arith.maximumf %16, %17 : vector<16x16x8xf32>
    %19 = vector.extract_strided_slice %15 {offsets = [2, 0, 0], sizes = [16, 16, 8], strides = [1, 1, 1]} : vector<18x16x8xf32> to vector<16x16x8xf32>
    %20 = arith.maximumf %18, %19 : vector<16x16x8xf32>
    %21 = vector.shape_cast %20 : vector<16x16x8xf32> to vector<256x8xf32>
    %22 = vector.shape_cast %1 : vector<16x16x8xf32> to vector<256x8xf32>
    %c0_27 = arith.constant 0 : index
    %c0_28 = arith.constant 0 : index
    %23 = vector.load %arg2[%c0_27, %c0_28] : memref<3x8xf32, #tpu.memory_space<vmem>>, vector<1x8xf32>
    %24 = vector.broadcast %23 : vector<1x8xf32> to vector<256x8xf32>
    %25 = arith.mulf %22, %24 : vector<256x8xf32>
    %c0_29 = arith.constant 0 : index
    %c0_30 = arith.constant 0 : index
    %26 = vector.load %arg3[%c0_29, %c0_30] : memref<3x8xf32, #tpu.memory_space<vmem>>, vector<1x8xf32>
    %27 = vector.broadcast %26 : vector<1x8xf32> to vector<256x8xf32>
    %28 = arith.addf %25, %27 : vector<256x8xf32>
    %cst_31 = arith.constant 0.000000e+00 : f32
    %29 = vector.broadcast %cst_31 : f32 to vector<256x8xf32>
    %30 = arith.maximumf %28, %29 : vector<256x8xf32>
    %31 = arith.truncf %30 : vector<256x8xf32> to vector<256x8xbf16>
    %c0_32 = arith.constant 0 : index
    %c0_33 = arith.constant 0 : index
    %32 = vector.load %arg4[%c0_32, %c0_33] : memref<8x8xbf16, #tpu.memory_space<vmem>>, vector<8x8xbf16>
    %cst_34 = arith.constant dense<0.000000e+00> : vector<256x8xf32>
    %33 = tpu.matmul %31, %32, %cst_34 {dimension_numbers = #tpu.dot_dimension_numbers<[1], [0], [0], [1], [0, 0, 1, 1], [], []>} : vector<256x8xbf16>, vector<8x8xbf16>, vector<256x8xf32> -> vector<256x8xf32>
    %c0_35 = arith.constant 0 : index
    %c0_36 = arith.constant 0 : index
    %34 = vector.load %arg7[%c0_35, %c0_36] : memref<1x8xf32, #tpu.memory_space<vmem>>, vector<1x8xf32>
    %35 = vector.broadcast %34 : vector<1x8xf32> to vector<256x8xf32>
    %36 = arith.addf %33, %35 : vector<256x8xf32>
    %c1_37 = arith.constant 1 : index
    %c0_38 = arith.constant 0 : index
    %37 = vector.load %arg2[%c1_37, %c0_38] : memref<3x8xf32, #tpu.memory_space<vmem>>, vector<1x8xf32>
    %38 = vector.broadcast %37 : vector<1x8xf32> to vector<256x8xf32>
    %39 = arith.mulf %22, %38 : vector<256x8xf32>
    %c1_39 = arith.constant 1 : index
    %c0_40 = arith.constant 0 : index
    %40 = vector.load %arg3[%c1_39, %c0_40] : memref<3x8xf32, #tpu.memory_space<vmem>>, vector<1x8xf32>
    %41 = vector.broadcast %40 : vector<1x8xf32> to vector<256x8xf32>
    %42 = arith.addf %39, %41 : vector<256x8xf32>
    %cst_41 = arith.constant 0.000000e+00 : f32
    %43 = vector.broadcast %cst_41 : f32 to vector<256x8xf32>
    %44 = arith.maximumf %42, %43 : vector<256x8xf32>
    %45 = arith.truncf %44 : vector<256x8xf32> to vector<256x8xbf16>
    %c0_42 = arith.constant 0 : index
    %c0_43 = arith.constant 0 : index
    %46 = vector.load %arg5[%c0_42, %c0_43] : memref<8x8xbf16, #tpu.memory_space<vmem>>, vector<8x8xbf16>
    %cst_44 = arith.constant dense<0.000000e+00> : vector<256x8xf32>
    %47 = tpu.matmul %45, %46, %cst_44 {dimension_numbers = #tpu.dot_dimension_numbers<[1], [0], [0], [1], [0, 0, 1, 1], [], []>} : vector<256x8xbf16>, vector<8x8xbf16>, vector<256x8xf32> -> vector<256x8xf32>
    %c0_45 = arith.constant 0 : index
    %c0_46 = arith.constant 0 : index
    %48 = vector.load %arg8[%c0_45, %c0_46] : memref<1x8xf32, #tpu.memory_space<vmem>>, vector<1x8xf32>
    %49 = vector.broadcast %48 : vector<1x8xf32> to vector<256x8xf32>
    %50 = arith.addf %47, %49 : vector<256x8xf32>
    %c2_47 = arith.constant 2 : index
    %c0_48 = arith.constant 0 : index
    %51 = vector.load %arg2[%c2_47, %c0_48] : memref<3x8xf32, #tpu.memory_space<vmem>>, vector<1x8xf32>
    %52 = vector.broadcast %51 : vector<1x8xf32> to vector<256x8xf32>
    %53 = arith.mulf %22, %52 : vector<256x8xf32>
    %c2_49 = arith.constant 2 : index
    %c0_50 = arith.constant 0 : index
    %54 = vector.load %arg3[%c2_49, %c0_50] : memref<3x8xf32, #tpu.memory_space<vmem>>, vector<1x8xf32>
    %55 = vector.broadcast %54 : vector<1x8xf32> to vector<256x8xf32>
    %56 = arith.addf %53, %55 : vector<256x8xf32>
    %cst_51 = arith.constant 0.000000e+00 : f32
    %57 = vector.broadcast %cst_51 : f32 to vector<256x8xf32>
    %58 = arith.maximumf %56, %57 : vector<256x8xf32>
    %59 = arith.truncf %58 : vector<256x8xf32> to vector<256x8xbf16>
    %c0_52 = arith.constant 0 : index
    %c0_53 = arith.constant 0 : index
    %60 = vector.load %arg6[%c0_52, %c0_53] : memref<8x4xbf16, #tpu.memory_space<vmem>>, vector<8x4xbf16>
    %cst_54 = arith.constant dense<0.000000e+00> : vector<256x4xf32>
    %61 = tpu.matmul %59, %60, %cst_54 {dimension_numbers = #tpu.dot_dimension_numbers<[1], [0], [0], [1], [0, 0, 1, 1], [], []>} : vector<256x8xbf16>, vector<8x4xbf16>, vector<256x4xf32> -> vector<256x4xf32>
    %c0_55 = arith.constant 0 : index
    %c0_56 = arith.constant 0 : index
    %62 = vector.load %arg9[%c0_55, %c0_56] : memref<1x4xf32, #tpu.memory_space<vmem>>, vector<1x4xf32>
    %63 = vector.broadcast %62 : vector<1x4xf32> to vector<256x4xf32>
    %64 = arith.addf %61, %63 : vector<256x4xf32>
    %65 = tpu.concatenate %36, %50, %64, %21 in 1 : vector<256x8xf32>, vector<256x8xf32>, vector<256x4xf32>, vector<256x8xf32> -> vector<256x28xf32>
    %66 = vector.extract_strided_slice %65 {offsets = [0, 8], sizes = [256, 20], strides = [1, 1]} : vector<256x28xf32> to vector<256x20xf32>
    %cst_57 = arith.constant dense<0.000000e+00> : vector<20xf32>
    %67 = vector.multi_reduction <add>, %66, %cst_57 [0] : vector<256x20xf32> to vector<20xf32>
    %68 = vector.shape_cast %67 : vector<20xf32> to vector<1x20xf32>
    %69 = arith.mulf %66, %66 : vector<256x20xf32>
    %cst_58 = arith.constant dense<0.000000e+00> : vector<20xf32>
    %70 = vector.multi_reduction <add>, %69, %cst_58 [0] : vector<256x20xf32> to vector<20xf32>
    %71 = vector.shape_cast %70 : vector<20xf32> to vector<1x20xf32>
    %72 = tpu.concatenate %68, %71 in 0 : vector<1x20xf32>, vector<1x20xf32> -> vector<2x20xf32>
    %c0_59 = arith.constant 0 : index
    %c0_60 = arith.constant 0 : index
    %c0_61 = arith.constant 0 : index
    %73 = vector.load %arg11[%c0_59, %c0_60, %c0_61] : memref<1x2x20xf32, #tpu.memory_space<vmem>>, vector<1x2x20xf32>
    %74 = vector.shape_cast %73 : vector<1x2x20xf32> to vector<2x20xf32>
    %75 = vector.shape_cast %72 : vector<2x20xf32> to vector<1x2x20xf32>
    tpu.vector_store %arg11[%c0_59, %c0_60, %c0_61], %75 {strides = array<i32>} : memref<1x2x20xf32, #tpu.memory_space<vmem>>, vector<1x2x20xf32>,
    %76 = arith.truncf %65 : vector<256x28xf32> to vector<256x28xbf16>
    %c0_62 = arith.constant 0 : index
    %c0_63 = arith.constant 0 : index
    %c0_64 = arith.constant 0 : index
    %77 = vector.load %arg10[%c0_62, %c0_63, %c0_64] : memref<1x256x28xbf16, #tpu.memory_space<vmem>>, vector<1x256x28xbf16>
    %78 = vector.shape_cast %77 : vector<1x256x28xbf16> to vector<256x28xbf16>
    %79 = vector.shape_cast %76 : vector<256x28xbf16> to vector<1x256x28xbf16>
    tpu.vector_store %arg10[%c0_62, %c0_63, %c0_64], %79 {strides = array<i32>} : memref<1x256x28xbf16, #tpu.memory_space<vmem>>, vector<1x256x28xbf16>,
    return
  }
  func.func @transform_0(%arg0: i32) -> (i32, i32, i32, i32) {
    %c0_i32 = arith.constant 0 : i32
    %c0_i32_0 = arith.constant 0 : i32
    %c0_i32_1 = arith.constant 0 : i32
    %c0_i32_2 = arith.constant 0 : i32
    return %arg0, %c0_i32, %c0_i32_0, %c0_i32_1 : i32, i32, i32, i32
  }
  func.func @transform_1(%arg0: i32) -> (i32, i32) {
    %c0_i32 = arith.constant 0 : i32
    %c0_i32_0 = arith.constant 0 : i32
    %c0_i32_1 = arith.constant 0 : i32
    return %c0_i32, %c0_i32_0 : i32, i32
  }
  func.func @transform_2(%arg0: i32) -> (i32, i32) {
    %c0_i32 = arith.constant 0 : i32
    %c0_i32_0 = arith.constant 0 : i32
    %c0_i32_1 = arith.constant 0 : i32
    return %c0_i32, %c0_i32_0 : i32, i32
  }
  func.func @transform_3(%arg0: i32) -> (i32, i32) {
    %c0_i32 = arith.constant 0 : i32
    %c0_i32_0 = arith.constant 0 : i32
    %c0_i32_1 = arith.constant 0 : i32
    return %c0_i32, %c0_i32_0 : i32, i32
  }
  func.func @transform_4(%arg0: i32) -> (i32, i32) {
    %c0_i32 = arith.constant 0 : i32
    %c0_i32_0 = arith.constant 0 : i32
    %c0_i32_1 = arith.constant 0 : i32
    return %c0_i32, %c0_i32_0 : i32, i32
  }
  func.func @transform_5(%arg0: i32) -> (i32, i32) {
    %c0_i32 = arith.constant 0 : i32
    %c0_i32_0 = arith.constant 0 : i32
    %c0_i32_1 = arith.constant 0 : i32
    return %c0_i32, %c0_i32_0 : i32, i32
  }
  func.func @transform_6(%arg0: i32) -> (i32, i32) {
    %c0_i32 = arith.constant 0 : i32
    %c0_i32_0 = arith.constant 0 : i32
    %c0_i32_1 = arith.constant 0 : i32
    return %c0_i32, %c0_i32_0 : i32, i32
  }
  func.func @transform_7(%arg0: i32) -> (i32, i32) {
    %c0_i32 = arith.constant 0 : i32
    %c0_i32_0 = arith.constant 0 : i32
    %c0_i32_1 = arith.constant 0 : i32
    return %c0_i32, %c0_i32_0 : i32, i32
  }
  func.func @transform_8(%arg0: i32) -> (i32, i32) {
    %c0_i32 = arith.constant 0 : i32
    %c0_i32_0 = arith.constant 0 : i32
    %c0_i32_1 = arith.constant 0 : i32
    return %c0_i32, %c0_i32_0 : i32, i32
  }
  func.func @transform_9(%arg0: i32) -> (i32, i32, i32) {
    %c0_i32 = arith.constant 0 : i32
    %c0_i32_0 = arith.constant 0 : i32
    %c0_i32_1 = arith.constant 0 : i32
    return %arg0, %c0_i32, %c0_i32_0 : i32, i32, i32
  }
  func.func @transform_10(%arg0: i32) -> (i32, i32, i32) {
    %c0_i32 = arith.constant 0 : i32
    %c0_i32_0 = arith.constant 0 : i32
    %c0_i32_1 = arith.constant 0 : i32
    return %arg0, %c0_i32, %c0_i32_0 : i32, i32, i32
  }
}

module attributes {stable_mosaic.version = 11 : i64} {
  func.func @stage2_kernel(%arg0: i32, %arg1: memref<1x256x28xbf16, #tpu.memory_space<vmem>>, %arg2: memref<1x20xf32, #tpu.memory_space<vmem>>, %arg3: memref<1x20xf32, #tpu.memory_space<vmem>>, %arg4: memref<9x8x16xbf16, #tpu.memory_space<vmem>>, %arg5: memref<1x16xf32, #tpu.memory_space<vmem>>, %arg6: memref<25x4x8xbf16, #tpu.memory_space<vmem>>, %arg7: memref<1x8xf32, #tpu.memory_space<vmem>>, %arg8: memref<8x8xbf16, #tpu.memory_space<vmem>>, %arg9: memref<1x8xf32, #tpu.memory_space<vmem>>, %arg10: memref<1x256x40xf32, #tpu.memory_space<vmem>>, %arg11: memref<18x18x8xf32, #tpu.memory_space<vmem>>, %arg12: memref<20x20x4xf32, #tpu.memory_space<vmem>>) attributes {dimension_semantics = [#tpu.dimension_semantics<parallel>], iteration_bounds = array<i64: 2>, scalar_prefetch = 0 : i64, scratch_operands = 2 : i64, tpu.core_type = #tpu.core_type<tc>, window_params = [{transform_indices = @transform_0, window_bounds = array<i64: 1, 256, 28>}, {pipeline_mode = #tpu.pipeline_mode<synchronous>, transform_indices = @transform_1, window_bounds = array<i64: 1, 20>}, {pipeline_mode = #tpu.pipeline_mode<synchronous>, transform_indices = @transform_2, window_bounds = array<i64: 1, 20>}, {pipeline_mode = #tpu.pipeline_mode<synchronous>, transform_indices = @transform_3, window_bounds = array<i64: 9, 8, 16>}, {pipeline_mode = #tpu.pipeline_mode<synchronous>, transform_indices = @transform_4, window_bounds = array<i64: 1, 16>}, {pipeline_mode = #tpu.pipeline_mode<synchronous>, transform_indices = @transform_5, window_bounds = array<i64: 25, 4, 8>}, {pipeline_mode = #tpu.pipeline_mode<synchronous>, transform_indices = @transform_6, window_bounds = array<i64: 1, 8>}, {pipeline_mode = #tpu.pipeline_mode<synchronous>, transform_indices = @transform_7, window_bounds = array<i64: 8, 8>}, {pipeline_mode = #tpu.pipeline_mode<synchronous>, transform_indices = @transform_8, window_bounds = array<i64: 1, 8>}, {transform_indices = @transform_9, window_bounds = array<i64: 1, 256, 40>}]} {
    %c0 = arith.constant 0 : index
    %c0_0 = arith.constant 0 : index
    %c0_1 = arith.constant 0 : index
    %0 = vector.load %arg1[%c0, %c0_0, %c0_1] : memref<1x256x28xbf16, #tpu.memory_space<vmem>>, vector<1x256x28xbf16>
    %1 = vector.shape_cast %0 : vector<1x256x28xbf16> to vector<256x28xbf16>
    %2 = arith.extf %1 : vector<256x28xbf16> to vector<256x28xf32>
    %3 = vector.extract_strided_slice %2 {offsets = [0, 0], sizes = [256, 8], strides = [1, 1]} : vector<256x28xf32> to vector<256x8xf32>
    %4 = vector.extract_strided_slice %2 {offsets = [0, 8], sizes = [256, 20], strides = [1, 1]} : vector<256x28xf32> to vector<256x20xf32>
    %c0_2 = arith.constant 0 : index
    %c0_3 = arith.constant 0 : index
    %5 = vector.load %arg2[%c0_2, %c0_3] : memref<1x20xf32, #tpu.memory_space<vmem>>, vector<1x20xf32>
    %6 = vector.broadcast %5 : vector<1x20xf32> to vector<256x20xf32>
    %7 = arith.mulf %4, %6 : vector<256x20xf32>
    %c0_4 = arith.constant 0 : index
    %c0_5 = arith.constant 0 : index
    %8 = vector.load %arg3[%c0_4, %c0_5] : memref<1x20xf32, #tpu.memory_space<vmem>>, vector<1x20xf32>
    %9 = vector.broadcast %8 : vector<1x20xf32> to vector<256x20xf32>
    %10 = arith.addf %7, %9 : vector<256x20xf32>
    %cst = arith.constant 0.000000e+00 : f32
    %11 = vector.broadcast %cst : f32 to vector<256x20xf32>
    %12 = arith.maximumf %10, %11 : vector<256x20xf32>
    %13 = vector.extract_strided_slice %12 {offsets = [0, 0], sizes = [256, 8], strides = [1, 1]} : vector<256x20xf32> to vector<256x8xf32>
    %14 = vector.shape_cast %13 : vector<256x8xf32> to vector<16x16x8xf32>
    %15 = vector.extract_strided_slice %12 {offsets = [0, 8], sizes = [256, 4], strides = [1, 1]} : vector<256x20xf32> to vector<256x4xf32>
    %16 = vector.shape_cast %15 : vector<256x4xf32> to vector<16x16x4xf32>
    %17 = vector.extract_strided_slice %12 {offsets = [0, 12], sizes = [256, 8], strides = [1, 1]} : vector<256x20xf32> to vector<256x8xf32>
    %cst_6 = arith.constant 0.000000e+00 : f32
    %18 = vector.broadcast %cst_6 : f32 to vector<1x18x8xf32>
    %c0_7 = arith.constant 0 : index
    %c0_8 = arith.constant 0 : index
    %c0_9 = arith.constant 0 : index
    %19 = vector.load %arg11[%c0_7, %c0_8, %c0_9] : memref<18x18x8xf32, #tpu.memory_space<vmem>>, vector<1x18x8xf32>
    tpu.vector_store %arg11[%c0_7, %c0_8, %c0_9], %18 {strides = array<i32>} : memref<18x18x8xf32, #tpu.memory_space<vmem>>, vector<1x18x8xf32>,
    %cst_10 = arith.constant 0.000000e+00 : f32
    %20 = vector.broadcast %cst_10 : f32 to vector<1x18x8xf32>
    %c17 = arith.constant 17 : index
    %c0_11 = arith.constant 0 : index
    %c0_12 = arith.constant 0 : index
    %21 = vector.load %arg11[%c17, %c0_11, %c0_12] : memref<18x18x8xf32, #tpu.memory_space<vmem>>, vector<1x18x8xf32>
    tpu.vector_store %arg11[%c17, %c0_11, %c0_12], %20 {strides = array<i32>} : memref<18x18x8xf32, #tpu.memory_space<vmem>>, vector<1x18x8xf32>,
    %cst_13 = arith.constant 0.000000e+00 : f32
    %22 = vector.broadcast %cst_13 : f32 to vector<18x1x8xf32>
    %c0_14 = arith.constant 0 : index
    %c0_15 = arith.constant 0 : index
    %c0_16 = arith.constant 0 : index
    %23 = vector.load %arg11[%c0_14, %c0_15, %c0_16] : memref<18x18x8xf32, #tpu.memory_space<vmem>>, vector<18x1x8xf32>
    tpu.vector_store %arg11[%c0_14, %c0_15, %c0_16], %22 {strides = array<i32>} : memref<18x18x8xf32, #tpu.memory_space<vmem>>, vector<18x1x8xf32>,
    %cst_17 = arith.constant 0.000000e+00 : f32
    %24 = vector.broadcast %cst_17 : f32 to vector<18x1x8xf32>
    %c0_18 = arith.constant 0 : index
    %c17_19 = arith.constant 17 : index
    %c0_20 = arith.constant 0 : index
    %25 = vector.load %arg11[%c0_18, %c17_19, %c0_20] : memref<18x18x8xf32, #tpu.memory_space<vmem>>, vector<18x1x8xf32>
    tpu.vector_store %arg11[%c0_18, %c17_19, %c0_20], %24 {strides = array<i32>} : memref<18x18x8xf32, #tpu.memory_space<vmem>>, vector<18x1x8xf32>,
    %c1 = arith.constant 1 : index
    %c1_21 = arith.constant 1 : index
    %c0_22 = arith.constant 0 : index
    %26 = vector.load %arg11[%c1, %c1_21, %c0_22] : memref<18x18x8xf32, #tpu.memory_space<vmem>>, vector<16x16x8xf32>
    tpu.vector_store %arg11[%c1, %c1_21, %c0_22], %14 {strides = array<i32>} : memref<18x18x8xf32, #tpu.memory_space<vmem>>, vector<16x16x8xf32>,
    %cst_23 = arith.constant 0.000000e+00 : f32
    %27 = vector.broadcast %cst_23 : f32 to vector<256x16xf32>
    %c0_24 = arith.constant 0 : index
    %c0_25 = arith.constant 0 : index
    %c0_26 = arith.constant 0 : index
    %28 = vector.load %arg11[%c0_24, %c0_25, %c0_26] : memref<18x18x8xf32, #tpu.memory_space<vmem>>, vector<16x16x8xf32>
    %29 = vector.shape_cast %28 : vector<16x16x8xf32> to vector<256x8xf32>
    %30 = arith.truncf %29 : vector<256x8xf32> to vector<256x8xbf16>
    %c0_27 = arith.constant 0 : index
    %c0_28 = arith.constant 0 : index
    %c0_29 = arith.constant 0 : index
    %31 = vector.load %arg4[%c0_27, %c0_28, %c0_29] : memref<9x8x16xbf16, #tpu.memory_space<vmem>>, vector<1x8x16xbf16>
    %32 = vector.shape_cast %31 : vector<1x8x16xbf16> to vector<8x16xbf16>
    %cst_30 = arith.constant dense<0.000000e+00> : vector<256x16xf32>
    %33 = tpu.matmul %30, %32, %cst_30 {dimension_numbers = #tpu.dot_dimension_numbers<[1], [0], [0], [1], [0, 0, 1, 1], [], []>} : vector<256x8xbf16>, vector<8x16xbf16>, vector<256x16xf32> -> vector<256x16xf32>
    %34 = arith.addf %27, %33 : vector<256x16xf32>
    %c0_31 = arith.constant 0 : index
    %c1_32 = arith.constant 1 : index
    %c0_33 = arith.constant 0 : index
    %35 = vector.load %arg11[%c0_31, %c1_32, %c0_33] : memref<18x18x8xf32, #tpu.memory_space<vmem>>, vector<16x16x8xf32>
    %36 = vector.shape_cast %35 : vector<16x16x8xf32> to vector<256x8xf32>
    %37 = arith.truncf %36 : vector<256x8xf32> to vector<256x8xbf16>
    %c1_34 = arith.constant 1 : index
    %c0_35 = arith.constant 0 : index
    %c0_36 = arith.constant 0 : index
    %38 = vector.load %arg4[%c1_34, %c0_35, %c0_36] : memref<9x8x16xbf16, #tpu.memory_space<vmem>>, vector<1x8x16xbf16>
    %39 = vector.shape_cast %38 : vector<1x8x16xbf16> to vector<8x16xbf16>
    %cst_37 = arith.constant dense<0.000000e+00> : vector<256x16xf32>
    %40 = tpu.matmul %37, %39, %cst_37 {dimension_numbers = #tpu.dot_dimension_numbers<[1], [0], [0], [1], [0, 0, 1, 1], [], []>} : vector<256x8xbf16>, vector<8x16xbf16>, vector<256x16xf32> -> vector<256x16xf32>
    %41 = arith.addf %34, %40 : vector<256x16xf32>
    %c0_38 = arith.constant 0 : index
    %c2 = arith.constant 2 : index
    %c0_39 = arith.constant 0 : index
    %42 = vector.load %arg11[%c0_38, %c2, %c0_39] : memref<18x18x8xf32, #tpu.memory_space<vmem>>, vector<16x16x8xf32>
    %43 = vector.shape_cast %42 : vector<16x16x8xf32> to vector<256x8xf32>
    %44 = arith.truncf %43 : vector<256x8xf32> to vector<256x8xbf16>
    %c2_40 = arith.constant 2 : index
    %c0_41 = arith.constant 0 : index
    %c0_42 = arith.constant 0 : index
    %45 = vector.load %arg4[%c2_40, %c0_41, %c0_42] : memref<9x8x16xbf16, #tpu.memory_space<vmem>>, vector<1x8x16xbf16>
    %46 = vector.shape_cast %45 : vector<1x8x16xbf16> to vector<8x16xbf16>
    %cst_43 = arith.constant dense<0.000000e+00> : vector<256x16xf32>
    %47 = tpu.matmul %44, %46, %cst_43 {dimension_numbers = #tpu.dot_dimension_numbers<[1], [0], [0], [1], [0, 0, 1, 1], [], []>} : vector<256x8xbf16>, vector<8x16xbf16>, vector<256x16xf32> -> vector<256x16xf32>
    %48 = arith.addf %41, %47 : vector<256x16xf32>
    %c1_44 = arith.constant 1 : index
    %c0_45 = arith.constant 0 : index
    %c0_46 = arith.constant 0 : index
    %49 = vector.load %arg11[%c1_44, %c0_45, %c0_46] : memref<18x18x8xf32, #tpu.memory_space<vmem>>, vector<16x16x8xf32>
    %50 = vector.shape_cast %49 : vector<16x16x8xf32> to vector<256x8xf32>
    %51 = arith.truncf %50 : vector<256x8xf32> to vector<256x8xbf16>
    %c3 = arith.constant 3 : index
    %c0_47 = arith.constant 0 : index
    %c0_48 = arith.constant 0 : index
    %52 = vector.load %arg4[%c3, %c0_47, %c0_48] : memref<9x8x16xbf16, #tpu.memory_space<vmem>>, vector<1x8x16xbf16>
    %53 = vector.shape_cast %52 : vector<1x8x16xbf16> to vector<8x16xbf16>
    %cst_49 = arith.constant dense<0.000000e+00> : vector<256x16xf32>
    %54 = tpu.matmul %51, %53, %cst_49 {dimension_numbers = #tpu.dot_dimension_numbers<[1], [0], [0], [1], [0, 0, 1, 1], [], []>} : vector<256x8xbf16>, vector<8x16xbf16>, vector<256x16xf32> -> vector<256x16xf32>
    %55 = arith.addf %48, %54 : vector<256x16xf32>
    %c1_50 = arith.constant 1 : index
    %c1_51 = arith.constant 1 : index
    %c0_52 = arith.constant 0 : index
    %56 = vector.load %arg11[%c1_50, %c1_51, %c0_52] : memref<18x18x8xf32, #tpu.memory_space<vmem>>, vector<16x16x8xf32>
    %57 = vector.shape_cast %56 : vector<16x16x8xf32> to vector<256x8xf32>
    %58 = arith.truncf %57 : vector<256x8xf32> to vector<256x8xbf16>
    %c4 = arith.constant 4 : index
    %c0_53 = arith.constant 0 : index
    %c0_54 = arith.constant 0 : index
    %59 = vector.load %arg4[%c4, %c0_53, %c0_54] : memref<9x8x16xbf16, #tpu.memory_space<vmem>>, vector<1x8x16xbf16>
    %60 = vector.shape_cast %59 : vector<1x8x16xbf16> to vector<8x16xbf16>
    %cst_55 = arith.constant dense<0.000000e+00> : vector<256x16xf32>
    %61 = tpu.matmul %58, %60, %cst_55 {dimension_numbers = #tpu.dot_dimension_numbers<[1], [0], [0], [1], [0, 0, 1, 1], [], []>} : vector<256x8xbf16>, vector<8x16xbf16>, vector<256x16xf32> -> vector<256x16xf32>
    %62 = arith.addf %55, %61 : vector<256x16xf32>
    %c1_56 = arith.constant 1 : index
    %c2_57 = arith.constant 2 : index
    %c0_58 = arith.constant 0 : index
    %63 = vector.load %arg11[%c1_56, %c2_57, %c0_58] : memref<18x18x8xf32, #tpu.memory_space<vmem>>, vector<16x16x8xf32>
    %64 = vector.shape_cast %63 : vector<16x16x8xf32> to vector<256x8xf32>
    %65 = arith.truncf %64 : vector<256x8xf32> to vector<256x8xbf16>
    %c5 = arith.constant 5 : index
    %c0_59 = arith.constant 0 : index
    %c0_60 = arith.constant 0 : index
    %66 = vector.load %arg4[%c5, %c0_59, %c0_60] : memref<9x8x16xbf16, #tpu.memory_space<vmem>>, vector<1x8x16xbf16>
    %67 = vector.shape_cast %66 : vector<1x8x16xbf16> to vector<8x16xbf16>
    %cst_61 = arith.constant dense<0.000000e+00> : vector<256x16xf32>
    %68 = tpu.matmul %65, %67, %cst_61 {dimension_numbers = #tpu.dot_dimension_numbers<[1], [0], [0], [1], [0, 0, 1, 1], [], []>} : vector<256x8xbf16>, vector<8x16xbf16>, vector<256x16xf32> -> vector<256x16xf32>
    %69 = arith.addf %62, %68 : vector<256x16xf32>
    %c2_62 = arith.constant 2 : index
    %c0_63 = arith.constant 0 : index
    %c0_64 = arith.constant 0 : index
    %70 = vector.load %arg11[%c2_62, %c0_63, %c0_64] : memref<18x18x8xf32, #tpu.memory_space<vmem>>, vector<16x16x8xf32>
    %71 = vector.shape_cast %70 : vector<16x16x8xf32> to vector<256x8xf32>
    %72 = arith.truncf %71 : vector<256x8xf32> to vector<256x8xbf16>
    %c6 = arith.constant 6 : index
    %c0_65 = arith.constant 0 : index
    %c0_66 = arith.constant 0 : index
    %73 = vector.load %arg4[%c6, %c0_65, %c0_66] : memref<9x8x16xbf16, #tpu.memory_space<vmem>>, vector<1x8x16xbf16>
    %74 = vector.shape_cast %73 : vector<1x8x16xbf16> to vector<8x16xbf16>
    %cst_67 = arith.constant dense<0.000000e+00> : vector<256x16xf32>
    %75 = tpu.matmul %72, %74, %cst_67 {dimension_numbers = #tpu.dot_dimension_numbers<[1], [0], [0], [1], [0, 0, 1, 1], [], []>} : vector<256x8xbf16>, vector<8x16xbf16>, vector<256x16xf32> -> vector<256x16xf32>
    %76 = arith.addf %69, %75 : vector<256x16xf32>
    %c2_68 = arith.constant 2 : index
    %c1_69 = arith.constant 1 : index
    %c0_70 = arith.constant 0 : index
    %77 = vector.load %arg11[%c2_68, %c1_69, %c0_70] : memref<18x18x8xf32, #tpu.memory_space<vmem>>, vector<16x16x8xf32>
    %78 = vector.shape_cast %77 : vector<16x16x8xf32> to vector<256x8xf32>
    %79 = arith.truncf %78 : vector<256x8xf32> to vector<256x8xbf16>
    %c7 = arith.constant 7 : index
    %c0_71 = arith.constant 0 : index
    %c0_72 = arith.constant 0 : index
    %80 = vector.load %arg4[%c7, %c0_71, %c0_72] : memref<9x8x16xbf16, #tpu.memory_space<vmem>>, vector<1x8x16xbf16>
    %81 = vector.shape_cast %80 : vector<1x8x16xbf16> to vector<8x16xbf16>
    %cst_73 = arith.constant dense<0.000000e+00> : vector<256x16xf32>
    %82 = tpu.matmul %79, %81, %cst_73 {dimension_numbers = #tpu.dot_dimension_numbers<[1], [0], [0], [1], [0, 0, 1, 1], [], []>} : vector<256x8xbf16>, vector<8x16xbf16>, vector<256x16xf32> -> vector<256x16xf32>
    %83 = arith.addf %76, %82 : vector<256x16xf32>
    %c2_74 = arith.constant 2 : index
    %c2_75 = arith.constant 2 : index
    %c0_76 = arith.constant 0 : index
    %84 = vector.load %arg11[%c2_74, %c2_75, %c0_76] : memref<18x18x8xf32, #tpu.memory_space<vmem>>, vector<16x16x8xf32>
    %85 = vector.shape_cast %84 : vector<16x16x8xf32> to vector<256x8xf32>
    %86 = arith.truncf %85 : vector<256x8xf32> to vector<256x8xbf16>
    %c8 = arith.constant 8 : index
    %c0_77 = arith.constant 0 : index
    %c0_78 = arith.constant 0 : index
    %87 = vector.load %arg4[%c8, %c0_77, %c0_78] : memref<9x8x16xbf16, #tpu.memory_space<vmem>>, vector<1x8x16xbf16>
    %88 = vector.shape_cast %87 : vector<1x8x16xbf16> to vector<8x16xbf16>
    %cst_79 = arith.constant dense<0.000000e+00> : vector<256x16xf32>
    %89 = tpu.matmul %86, %88, %cst_79 {dimension_numbers = #tpu.dot_dimension_numbers<[1], [0], [0], [1], [0, 0, 1, 1], [], []>} : vector<256x8xbf16>, vector<8x16xbf16>, vector<256x16xf32> -> vector<256x16xf32>
    %90 = arith.addf %83, %89 : vector<256x16xf32>
    %c0_80 = arith.constant 0 : index
    %c0_81 = arith.constant 0 : index
    %91 = vector.load %arg5[%c0_80, %c0_81] : memref<1x16xf32, #tpu.memory_space<vmem>>, vector<1x16xf32>
    %92 = vector.broadcast %91 : vector<1x16xf32> to vector<256x16xf32>
    %93 = arith.addf %90, %92 : vector<256x16xf32>
    %cst_82 = arith.constant 0.000000e+00 : f32
    %94 = vector.broadcast %cst_82 : f32 to vector<2x20x4xf32>
    %c0_83 = arith.constant 0 : index
    %c0_84 = arith.constant 0 : index
    %c0_85 = arith.constant 0 : index
    %95 = vector.load %arg12[%c0_83, %c0_84, %c0_85] : memref<20x20x4xf32, #tpu.memory_space<vmem>>, vector<2x20x4xf32>
    tpu.vector_store %arg12[%c0_83, %c0_84, %c0_85], %94 {strides = array<i32>} : memref<20x20x4xf32, #tpu.memory_space<vmem>>, vector<2x20x4xf32>,
    %cst_86 = arith.constant 0.000000e+00 : f32
    %96 = vector.broadcast %cst_86 : f32 to vector<2x20x4xf32>
    %c18 = arith.constant 18 : index
    %c0_87 = arith.constant 0 : index
    %c0_88 = arith.constant 0 : index
    %97 = vector.load %arg12[%c18, %c0_87, %c0_88] : memref<20x20x4xf32, #tpu.memory_space<vmem>>, vector<2x20x4xf32>
    tpu.vector_store %arg12[%c18, %c0_87, %c0_88], %96 {strides = array<i32>} : memref<20x20x4xf32, #tpu.memory_space<vmem>>, vector<2x20x4xf32>,
    %cst_89 = arith.constant 0.000000e+00 : f32
    %98 = vector.broadcast %cst_89 : f32 to vector<20x2x4xf32>
    %c0_90 = arith.constant 0 : index
    %c0_91 = arith.constant 0 : index
    %c0_92 = arith.constant 0 : index
    %99 = vector.load %arg12[%c0_90, %c0_91, %c0_92] : memref<20x20x4xf32, #tpu.memory_space<vmem>>, vector<20x2x4xf32>
    tpu.vector_store %arg12[%c0_90, %c0_91, %c0_92], %98 {strides = array<i32>} : memref<20x20x4xf32, #tpu.memory_space<vmem>>, vector<20x2x4xf32>,
    %cst_93 = arith.constant 0.000000e+00 : f32
    %100 = vector.broadcast %cst_93 : f32 to vector<20x2x4xf32>
    %c0_94 = arith.constant 0 : index
    %c18_95 = arith.constant 18 : index
    %c0_96 = arith.constant 0 : index
    %101 = vector.load %arg12[%c0_94, %c18_95, %c0_96] : memref<20x20x4xf32, #tpu.memory_space<vmem>>, vector<20x2x4xf32>
    tpu.vector_store %arg12[%c0_94, %c18_95, %c0_96], %100 {strides = array<i32>} : memref<20x20x4xf32, #tpu.memory_space<vmem>>, vector<20x2x4xf32>,
    %c2_97 = arith.constant 2 : index
    %c2_98 = arith.constant 2 : index
    %c0_99 = arith.constant 0 : index
    %102 = vector.load %arg12[%c2_97, %c2_98, %c0_99] : memref<20x20x4xf32, #tpu.memory_space<vmem>>, vector<16x16x4xf32>
    tpu.vector_store %arg12[%c2_97, %c2_98, %c0_99], %16 {strides = array<i32>} : memref<20x20x4xf32, #tpu.memory_space<vmem>>, vector<16x16x4xf32>,
    %cst_100 = arith.constant 0.000000e+00 : f32
    %103 = vector.broadcast %cst_100 : f32 to vector<256x8xf32>
    %c0_101 = arith.constant 0 : index
    %c0_102 = arith.constant 0 : index
    %c0_103 = arith.constant 0 : index
    %104 = vector.load %arg12[%c0_101, %c0_102, %c0_103] : memref<20x20x4xf32, #tpu.memory_space<vmem>>, vector<16x16x4xf32>
    %105 = vector.shape_cast %104 : vector<16x16x4xf32> to vector<256x4xf32>
    %106 = arith.truncf %105 : vector<256x4xf32> to vector<256x4xbf16>
    %c0_104 = arith.constant 0 : index
    %c0_105 = arith.constant 0 : index
    %c0_106 = arith.constant 0 : index
    %107 = vector.load %arg6[%c0_104, %c0_105, %c0_106] : memref<25x4x8xbf16, #tpu.memory_space<vmem>>, vector<1x4x8xbf16>
    %108 = vector.shape_cast %107 : vector<1x4x8xbf16> to vector<4x8xbf16>
    %cst_107 = arith.constant dense<0.000000e+00> : vector<256x8xf32>
    %109 = tpu.matmul %106, %108, %cst_107 {dimension_numbers = #tpu.dot_dimension_numbers<[1], [0], [0], [1], [0, 0, 1, 1], [], []>} : vector<256x4xbf16>, vector<4x8xbf16>, vector<256x8xf32> -> vector<256x8xf32>
    %110 = arith.addf %103, %109 : vector<256x8xf32>
    %c0_108 = arith.constant 0 : index
    %c1_109 = arith.constant 1 : index
    %c0_110 = arith.constant 0 : index
    %111 = vector.load %arg12[%c0_108, %c1_109, %c0_110] : memref<20x20x4xf32, #tpu.memory_space<vmem>>, vector<16x16x4xf32>
    %112 = vector.shape_cast %111 : vector<16x16x4xf32> to vector<256x4xf32>
    %113 = arith.truncf %112 : vector<256x4xf32> to vector<256x4xbf16>
    %c1_111 = arith.constant 1 : index
    %c0_112 = arith.constant 0 : index
    %c0_113 = arith.constant 0 : index
    %114 = vector.load %arg6[%c1_111, %c0_112, %c0_113] : memref<25x4x8xbf16, #tpu.memory_space<vmem>>, vector<1x4x8xbf16>
    %115 = vector.shape_cast %114 : vector<1x4x8xbf16> to vector<4x8xbf16>
    %cst_114 = arith.constant dense<0.000000e+00> : vector<256x8xf32>
    %116 = tpu.matmul %113, %115, %cst_114 {dimension_numbers = #tpu.dot_dimension_numbers<[1], [0], [0], [1], [0, 0, 1, 1], [], []>} : vector<256x4xbf16>, vector<4x8xbf16>, vector<256x8xf32> -> vector<256x8xf32>
    %117 = arith.addf %110, %116 : vector<256x8xf32>
    %c0_115 = arith.constant 0 : index
    %c2_116 = arith.constant 2 : index
    %c0_117 = arith.constant 0 : index
    %118 = vector.load %arg12[%c0_115, %c2_116, %c0_117] : memref<20x20x4xf32, #tpu.memory_space<vmem>>, vector<16x16x4xf32>
    %119 = vector.shape_cast %118 : vector<16x16x4xf32> to vector<256x4xf32>
    %120 = arith.truncf %119 : vector<256x4xf32> to vector<256x4xbf16>
    %c2_118 = arith.constant 2 : index
    %c0_119 = arith.constant 0 : index
    %c0_120 = arith.constant 0 : index
    %121 = vector.load %arg6[%c2_118, %c0_119, %c0_120] : memref<25x4x8xbf16, #tpu.memory_space<vmem>>, vector<1x4x8xbf16>
    %122 = vector.shape_cast %121 : vector<1x4x8xbf16> to vector<4x8xbf16>
    %cst_121 = arith.constant dense<0.000000e+00> : vector<256x8xf32>
    %123 = tpu.matmul %120, %122, %cst_121 {dimension_numbers = #tpu.dot_dimension_numbers<[1], [0], [0], [1], [0, 0, 1, 1], [], []>} : vector<256x4xbf16>, vector<4x8xbf16>, vector<256x8xf32> -> vector<256x8xf32>
    %124 = arith.addf %117, %123 : vector<256x8xf32>
    %c0_122 = arith.constant 0 : index
    %c3_123 = arith.constant 3 : index
    %c0_124 = arith.constant 0 : index
    %125 = vector.load %arg12[%c0_122, %c3_123, %c0_124] : memref<20x20x4xf32, #tpu.memory_space<vmem>>, vector<16x16x4xf32>
    %126 = vector.shape_cast %125 : vector<16x16x4xf32> to vector<256x4xf32>
    %127 = arith.truncf %126 : vector<256x4xf32> to vector<256x4xbf16>
    %c3_125 = arith.constant 3 : index
    %c0_126 = arith.constant 0 : index
    %c0_127 = arith.constant 0 : index
    %128 = vector.load %arg6[%c3_125, %c0_126, %c0_127] : memref<25x4x8xbf16, #tpu.memory_space<vmem>>, vector<1x4x8xbf16>
    %129 = vector.shape_cast %128 : vector<1x4x8xbf16> to vector<4x8xbf16>
    %cst_128 = arith.constant dense<0.000000e+00> : vector<256x8xf32>
    %130 = tpu.matmul %127, %129, %cst_128 {dimension_numbers = #tpu.dot_dimension_numbers<[1], [0], [0], [1], [0, 0, 1, 1], [], []>} : vector<256x4xbf16>, vector<4x8xbf16>, vector<256x8xf32> -> vector<256x8xf32>
    %131 = arith.addf %124, %130 : vector<256x8xf32>
    %c0_129 = arith.constant 0 : index
    %c4_130 = arith.constant 4 : index
    %c0_131 = arith.constant 0 : index
    %132 = vector.load %arg12[%c0_129, %c4_130, %c0_131] : memref<20x20x4xf32, #tpu.memory_space<vmem>>, vector<16x16x4xf32>
    %133 = vector.shape_cast %132 : vector<16x16x4xf32> to vector<256x4xf32>
    %134 = arith.truncf %133 : vector<256x4xf32> to vector<256x4xbf16>
    %c4_132 = arith.constant 4 : index
    %c0_133 = arith.constant 0 : index
    %c0_134 = arith.constant 0 : index
    %135 = vector.load %arg6[%c4_132, %c0_133, %c0_134] : memref<25x4x8xbf16, #tpu.memory_space<vmem>>, vector<1x4x8xbf16>
    %136 = vector.shape_cast %135 : vector<1x4x8xbf16> to vector<4x8xbf16>
    %cst_135 = arith.constant dense<0.000000e+00> : vector<256x8xf32>
    %137 = tpu.matmul %134, %136, %cst_135 {dimension_numbers = #tpu.dot_dimension_numbers<[1], [0], [0], [1], [0, 0, 1, 1], [], []>} : vector<256x4xbf16>, vector<4x8xbf16>, vector<256x8xf32> -> vector<256x8xf32>
    %138 = arith.addf %131, %137 : vector<256x8xf32>
    %c1_136 = arith.constant 1 : index
    %c0_137 = arith.constant 0 : index
    %c0_138 = arith.constant 0 : index
    %139 = vector.load %arg12[%c1_136, %c0_137, %c0_138] : memref<20x20x4xf32, #tpu.memory_space<vmem>>, vector<16x16x4xf32>
    %140 = vector.shape_cast %139 : vector<16x16x4xf32> to vector<256x4xf32>
    %141 = arith.truncf %140 : vector<256x4xf32> to vector<256x4xbf16>
    %c5_139 = arith.constant 5 : index
    %c0_140 = arith.constant 0 : index
    %c0_141 = arith.constant 0 : index
    %142 = vector.load %arg6[%c5_139, %c0_140, %c0_141] : memref<25x4x8xbf16, #tpu.memory_space<vmem>>, vector<1x4x8xbf16>
    %143 = vector.shape_cast %142 : vector<1x4x8xbf16> to vector<4x8xbf16>
    %cst_142 = arith.constant dense<0.000000e+00> : vector<256x8xf32>
    %144 = tpu.matmul %141, %143, %cst_142 {dimension_numbers = #tpu.dot_dimension_numbers<[1], [0], [0], [1], [0, 0, 1, 1], [], []>} : vector<256x4xbf16>, vector<4x8xbf16>, vector<256x8xf32> -> vector<256x8xf32>
    %145 = arith.addf %138, %144 : vector<256x8xf32>
    %c1_143 = arith.constant 1 : index
    %c1_144 = arith.constant 1 : index
    %c0_145 = arith.constant 0 : index
    %146 = vector.load %arg12[%c1_143, %c1_144, %c0_145] : memref<20x20x4xf32, #tpu.memory_space<vmem>>, vector<16x16x4xf32>
    %147 = vector.shape_cast %146 : vector<16x16x4xf32> to vector<256x4xf32>
    %148 = arith.truncf %147 : vector<256x4xf32> to vector<256x4xbf16>
    %c6_146 = arith.constant 6 : index
    %c0_147 = arith.constant 0 : index
    %c0_148 = arith.constant 0 : index
    %149 = vector.load %arg6[%c6_146, %c0_147, %c0_148] : memref<25x4x8xbf16, #tpu.memory_space<vmem>>, vector<1x4x8xbf16>
    %150 = vector.shape_cast %149 : vector<1x4x8xbf16> to vector<4x8xbf16>
    %cst_149 = arith.constant dense<0.000000e+00> : vector<256x8xf32>
    %151 = tpu.matmul %148, %150, %cst_149 {dimension_numbers = #tpu.dot_dimension_numbers<[1], [0], [0], [1], [0, 0, 1, 1], [], []>} : vector<256x4xbf16>, vector<4x8xbf16>, vector<256x8xf32> -> vector<256x8xf32>
    %152 = arith.addf %145, %151 : vector<256x8xf32>
    %c1_150 = arith.constant 1 : index
    %c2_151 = arith.constant 2 : index
    %c0_152 = arith.constant 0 : index
    %153 = vector.load %arg12[%c1_150, %c2_151, %c0_152] : memref<20x20x4xf32, #tpu.memory_space<vmem>>, vector<16x16x4xf32>
    %154 = vector.shape_cast %153 : vector<16x16x4xf32> to vector<256x4xf32>
    %155 = arith.truncf %154 : vector<256x4xf32> to vector<256x4xbf16>
    %c7_153 = arith.constant 7 : index
    %c0_154 = arith.constant 0 : index
    %c0_155 = arith.constant 0 : index
    %156 = vector.load %arg6[%c7_153, %c0_154, %c0_155] : memref<25x4x8xbf16, #tpu.memory_space<vmem>>, vector<1x4x8xbf16>
    %157 = vector.shape_cast %156 : vector<1x4x8xbf16> to vector<4x8xbf16>
    %cst_156 = arith.constant dense<0.000000e+00> : vector<256x8xf32>
    %158 = tpu.matmul %155, %157, %cst_156 {dimension_numbers = #tpu.dot_dimension_numbers<[1], [0], [0], [1], [0, 0, 1, 1], [], []>} : vector<256x4xbf16>, vector<4x8xbf16>, vector<256x8xf32> -> vector<256x8xf32>
    %159 = arith.addf %152, %158 : vector<256x8xf32>
    %c1_157 = arith.constant 1 : index
    %c3_158 = arith.constant 3 : index
    %c0_159 = arith.constant 0 : index
    %160 = vector.load %arg12[%c1_157, %c3_158, %c0_159] : memref<20x20x4xf32, #tpu.memory_space<vmem>>, vector<16x16x4xf32>
    %161 = vector.shape_cast %160 : vector<16x16x4xf32> to vector<256x4xf32>
    %162 = arith.truncf %161 : vector<256x4xf32> to vector<256x4xbf16>
    %c8_160 = arith.constant 8 : index
    %c0_161 = arith.constant 0 : index
    %c0_162 = arith.constant 0 : index
    %163 = vector.load %arg6[%c8_160, %c0_161, %c0_162] : memref<25x4x8xbf16, #tpu.memory_space<vmem>>, vector<1x4x8xbf16>
    %164 = vector.shape_cast %163 : vector<1x4x8xbf16> to vector<4x8xbf16>
    %cst_163 = arith.constant dense<0.000000e+00> : vector<256x8xf32>
    %165 = tpu.matmul %162, %164, %cst_163 {dimension_numbers = #tpu.dot_dimension_numbers<[1], [0], [0], [1], [0, 0, 1, 1], [], []>} : vector<256x4xbf16>, vector<4x8xbf16>, vector<256x8xf32> -> vector<256x8xf32>
    %166 = arith.addf %159, %165 : vector<256x8xf32>
    %c1_164 = arith.constant 1 : index
    %c4_165 = arith.constant 4 : index
    %c0_166 = arith.constant 0 : index
    %167 = vector.load %arg12[%c1_164, %c4_165, %c0_166] : memref<20x20x4xf32, #tpu.memory_space<vmem>>, vector<16x16x4xf32>
    %168 = vector.shape_cast %167 : vector<16x16x4xf32> to vector<256x4xf32>
    %169 = arith.truncf %168 : vector<256x4xf32> to vector<256x4xbf16>
    %c9 = arith.constant 9 : index
    %c0_167 = arith.constant 0 : index
    %c0_168 = arith.constant 0 : index
    %170 = vector.load %arg6[%c9, %c0_167, %c0_168] : memref<25x4x8xbf16, #tpu.memory_space<vmem>>, vector<1x4x8xbf16>
    %171 = vector.shape_cast %170 : vector<1x4x8xbf16> to vector<4x8xbf16>
    %cst_169 = arith.constant dense<0.000000e+00> : vector<256x8xf32>
    %172 = tpu.matmul %169, %171, %cst_169 {dimension_numbers = #tpu.dot_dimension_numbers<[1], [0], [0], [1], [0, 0, 1, 1], [], []>} : vector<256x4xbf16>, vector<4x8xbf16>, vector<256x8xf32> -> vector<256x8xf32>
    %173 = arith.addf %166, %172 : vector<256x8xf32>
    %c2_170 = arith.constant 2 : index
    %c0_171 = arith.constant 0 : index
    %c0_172 = arith.constant 0 : index
    %174 = vector.load %arg12[%c2_170, %c0_171, %c0_172] : memref<20x20x4xf32, #tpu.memory_space<vmem>>, vector<16x16x4xf32>
    %175 = vector.shape_cast %174 : vector<16x16x4xf32> to vector<256x4xf32>
    %176 = arith.truncf %175 : vector<256x4xf32> to vector<256x4xbf16>
    %c10 = arith.constant 10 : index
    %c0_173 = arith.constant 0 : index
    %c0_174 = arith.constant 0 : index
    %177 = vector.load %arg6[%c10, %c0_173, %c0_174] : memref<25x4x8xbf16, #tpu.memory_space<vmem>>, vector<1x4x8xbf16>
    %178 = vector.shape_cast %177 : vector<1x4x8xbf16> to vector<4x8xbf16>
    %cst_175 = arith.constant dense<0.000000e+00> : vector<256x8xf32>
    %179 = tpu.matmul %176, %178, %cst_175 {dimension_numbers = #tpu.dot_dimension_numbers<[1], [0], [0], [1], [0, 0, 1, 1], [], []>} : vector<256x4xbf16>, vector<4x8xbf16>, vector<256x8xf32> -> vector<256x8xf32>
    %180 = arith.addf %173, %179 : vector<256x8xf32>
    %c2_176 = arith.constant 2 : index
    %c1_177 = arith.constant 1 : index
    %c0_178 = arith.constant 0 : index
    %181 = vector.load %arg12[%c2_176, %c1_177, %c0_178] : memref<20x20x4xf32, #tpu.memory_space<vmem>>, vector<16x16x4xf32>
    %182 = vector.shape_cast %181 : vector<16x16x4xf32> to vector<256x4xf32>
    %183 = arith.truncf %182 : vector<256x4xf32> to vector<256x4xbf16>
    %c11 = arith.constant 11 : index
    %c0_179 = arith.constant 0 : index
    %c0_180 = arith.constant 0 : index
    %184 = vector.load %arg6[%c11, %c0_179, %c0_180] : memref<25x4x8xbf16, #tpu.memory_space<vmem>>, vector<1x4x8xbf16>
    %185 = vector.shape_cast %184 : vector<1x4x8xbf16> to vector<4x8xbf16>
    %cst_181 = arith.constant dense<0.000000e+00> : vector<256x8xf32>
    %186 = tpu.matmul %183, %185, %cst_181 {dimension_numbers = #tpu.dot_dimension_numbers<[1], [0], [0], [1], [0, 0, 1, 1], [], []>} : vector<256x4xbf16>, vector<4x8xbf16>, vector<256x8xf32> -> vector<256x8xf32>
    %187 = arith.addf %180, %186 : vector<256x8xf32>
    %c2_182 = arith.constant 2 : index
    %c2_183 = arith.constant 2 : index
    %c0_184 = arith.constant 0 : index
    %188 = vector.load %arg12[%c2_182, %c2_183, %c0_184] : memref<20x20x4xf32, #tpu.memory_space<vmem>>, vector<16x16x4xf32>
    %189 = vector.shape_cast %188 : vector<16x16x4xf32> to vector<256x4xf32>
    %190 = arith.truncf %189 : vector<256x4xf32> to vector<256x4xbf16>
    %c12 = arith.constant 12 : index
    %c0_185 = arith.constant 0 : index
    %c0_186 = arith.constant 0 : index
    %191 = vector.load %arg6[%c12, %c0_185, %c0_186] : memref<25x4x8xbf16, #tpu.memory_space<vmem>>, vector<1x4x8xbf16>
    %192 = vector.shape_cast %191 : vector<1x4x8xbf16> to vector<4x8xbf16>
    %cst_187 = arith.constant dense<0.000000e+00> : vector<256x8xf32>
    %193 = tpu.matmul %190, %192, %cst_187 {dimension_numbers = #tpu.dot_dimension_numbers<[1], [0], [0], [1], [0, 0, 1, 1], [], []>} : vector<256x4xbf16>, vector<4x8xbf16>, vector<256x8xf32> -> vector<256x8xf32>
    %194 = arith.addf %187, %193 : vector<256x8xf32>
    %c2_188 = arith.constant 2 : index
    %c3_189 = arith.constant 3 : index
    %c0_190 = arith.constant 0 : index
    %195 = vector.load %arg12[%c2_188, %c3_189, %c0_190] : memref<20x20x4xf32, #tpu.memory_space<vmem>>, vector<16x16x4xf32>
    %196 = vector.shape_cast %195 : vector<16x16x4xf32> to vector<256x4xf32>
    %197 = arith.truncf %196 : vector<256x4xf32> to vector<256x4xbf16>
    %c13 = arith.constant 13 : index
    %c0_191 = arith.constant 0 : index
    %c0_192 = arith.constant 0 : index
    %198 = vector.load %arg6[%c13, %c0_191, %c0_192] : memref<25x4x8xbf16, #tpu.memory_space<vmem>>, vector<1x4x8xbf16>
    %199 = vector.shape_cast %198 : vector<1x4x8xbf16> to vector<4x8xbf16>
    %cst_193 = arith.constant dense<0.000000e+00> : vector<256x8xf32>
    %200 = tpu.matmul %197, %199, %cst_193 {dimension_numbers = #tpu.dot_dimension_numbers<[1], [0], [0], [1], [0, 0, 1, 1], [], []>} : vector<256x4xbf16>, vector<4x8xbf16>, vector<256x8xf32> -> vector<256x8xf32>
    %201 = arith.addf %194, %200 : vector<256x8xf32>
    %c2_194 = arith.constant 2 : index
    %c4_195 = arith.constant 4 : index
    %c0_196 = arith.constant 0 : index
    %202 = vector.load %arg12[%c2_194, %c4_195, %c0_196] : memref<20x20x4xf32, #tpu.memory_space<vmem>>, vector<16x16x4xf32>
    %203 = vector.shape_cast %202 : vector<16x16x4xf32> to vector<256x4xf32>
    %204 = arith.truncf %203 : vector<256x4xf32> to vector<256x4xbf16>
    %c14 = arith.constant 14 : index
    %c0_197 = arith.constant 0 : index
    %c0_198 = arith.constant 0 : index
    %205 = vector.load %arg6[%c14, %c0_197, %c0_198] : memref<25x4x8xbf16, #tpu.memory_space<vmem>>, vector<1x4x8xbf16>
    %206 = vector.shape_cast %205 : vector<1x4x8xbf16> to vector<4x8xbf16>
    %cst_199 = arith.constant dense<0.000000e+00> : vector<256x8xf32>
    %207 = tpu.matmul %204, %206, %cst_199 {dimension_numbers = #tpu.dot_dimension_numbers<[1], [0], [0], [1], [0, 0, 1, 1], [], []>} : vector<256x4xbf16>, vector<4x8xbf16>, vector<256x8xf32> -> vector<256x8xf32>
    %208 = arith.addf %201, %207 : vector<256x8xf32>
    %c3_200 = arith.constant 3 : index
    %c0_201 = arith.constant 0 : index
    %c0_202 = arith.constant 0 : index
    %209 = vector.load %arg12[%c3_200, %c0_201, %c0_202] : memref<20x20x4xf32, #tpu.memory_space<vmem>>, vector<16x16x4xf32>
    %210 = vector.shape_cast %209 : vector<16x16x4xf32> to vector<256x4xf32>
    %211 = arith.truncf %210 : vector<256x4xf32> to vector<256x4xbf16>
    %c15 = arith.constant 15 : index
    %c0_203 = arith.constant 0 : index
    %c0_204 = arith.constant 0 : index
    %212 = vector.load %arg6[%c15, %c0_203, %c0_204] : memref<25x4x8xbf16, #tpu.memory_space<vmem>>, vector<1x4x8xbf16>
    %213 = vector.shape_cast %212 : vector<1x4x8xbf16> to vector<4x8xbf16>
    %cst_205 = arith.constant dense<0.000000e+00> : vector<256x8xf32>
    %214 = tpu.matmul %211, %213, %cst_205 {dimension_numbers = #tpu.dot_dimension_numbers<[1], [0], [0], [1], [0, 0, 1, 1], [], []>} : vector<256x4xbf16>, vector<4x8xbf16>, vector<256x8xf32> -> vector<256x8xf32>
    %215 = arith.addf %208, %214 : vector<256x8xf32>
    %c3_206 = arith.constant 3 : index
    %c1_207 = arith.constant 1 : index
    %c0_208 = arith.constant 0 : index
    %216 = vector.load %arg12[%c3_206, %c1_207, %c0_208] : memref<20x20x4xf32, #tpu.memory_space<vmem>>, vector<16x16x4xf32>
    %217 = vector.shape_cast %216 : vector<16x16x4xf32> to vector<256x4xf32>
    %218 = arith.truncf %217 : vector<256x4xf32> to vector<256x4xbf16>
    %c16 = arith.constant 16 : index
    %c0_209 = arith.constant 0 : index
    %c0_210 = arith.constant 0 : index
    %219 = vector.load %arg6[%c16, %c0_209, %c0_210] : memref<25x4x8xbf16, #tpu.memory_space<vmem>>, vector<1x4x8xbf16>
    %220 = vector.shape_cast %219 : vector<1x4x8xbf16> to vector<4x8xbf16>
    %cst_211 = arith.constant dense<0.000000e+00> : vector<256x8xf32>
    %221 = tpu.matmul %218, %220, %cst_211 {dimension_numbers = #tpu.dot_dimension_numbers<[1], [0], [0], [1], [0, 0, 1, 1], [], []>} : vector<256x4xbf16>, vector<4x8xbf16>, vector<256x8xf32> -> vector<256x8xf32>
    %222 = arith.addf %215, %221 : vector<256x8xf32>
    %c3_212 = arith.constant 3 : index
    %c2_213 = arith.constant 2 : index
    %c0_214 = arith.constant 0 : index
    %223 = vector.load %arg12[%c3_212, %c2_213, %c0_214] : memref<20x20x4xf32, #tpu.memory_space<vmem>>, vector<16x16x4xf32>
    %224 = vector.shape_cast %223 : vector<16x16x4xf32> to vector<256x4xf32>
    %225 = arith.truncf %224 : vector<256x4xf32> to vector<256x4xbf16>
    %c17_215 = arith.constant 17 : index
    %c0_216 = arith.constant 0 : index
    %c0_217 = arith.constant 0 : index
    %226 = vector.load %arg6[%c17_215, %c0_216, %c0_217] : memref<25x4x8xbf16, #tpu.memory_space<vmem>>, vector<1x4x8xbf16>
    %227 = vector.shape_cast %226 : vector<1x4x8xbf16> to vector<4x8xbf16>
    %cst_218 = arith.constant dense<0.000000e+00> : vector<256x8xf32>
    %228 = tpu.matmul %225, %227, %cst_218 {dimension_numbers = #tpu.dot_dimension_numbers<[1], [0], [0], [1], [0, 0, 1, 1], [], []>} : vector<256x4xbf16>, vector<4x8xbf16>, vector<256x8xf32> -> vector<256x8xf32>
    %229 = arith.addf %222, %228 : vector<256x8xf32>
    %c3_219 = arith.constant 3 : index
    %c3_220 = arith.constant 3 : index
    %c0_221 = arith.constant 0 : index
    %230 = vector.load %arg12[%c3_219, %c3_220, %c0_221] : memref<20x20x4xf32, #tpu.memory_space<vmem>>, vector<16x16x4xf32>
    %231 = vector.shape_cast %230 : vector<16x16x4xf32> to vector<256x4xf32>
    %232 = arith.truncf %231 : vector<256x4xf32> to vector<256x4xbf16>
    %c18_222 = arith.constant 18 : index
    %c0_223 = arith.constant 0 : index
    %c0_224 = arith.constant 0 : index
    %233 = vector.load %arg6[%c18_222, %c0_223, %c0_224] : memref<25x4x8xbf16, #tpu.memory_space<vmem>>, vector<1x4x8xbf16>
    %234 = vector.shape_cast %233 : vector<1x4x8xbf16> to vector<4x8xbf16>
    %cst_225 = arith.constant dense<0.000000e+00> : vector<256x8xf32>
    %235 = tpu.matmul %232, %234, %cst_225 {dimension_numbers = #tpu.dot_dimension_numbers<[1], [0], [0], [1], [0, 0, 1, 1], [], []>} : vector<256x4xbf16>, vector<4x8xbf16>, vector<256x8xf32> -> vector<256x8xf32>
    %236 = arith.addf %229, %235 : vector<256x8xf32>
    %c3_226 = arith.constant 3 : index
    %c4_227 = arith.constant 4 : index
    %c0_228 = arith.constant 0 : index
    %237 = vector.load %arg12[%c3_226, %c4_227, %c0_228] : memref<20x20x4xf32, #tpu.memory_space<vmem>>, vector<16x16x4xf32>
    %238 = vector.shape_cast %237 : vector<16x16x4xf32> to vector<256x4xf32>
    %239 = arith.truncf %238 : vector<256x4xf32> to vector<256x4xbf16>
    %c19 = arith.constant 19 : index
    %c0_229 = arith.constant 0 : index
    %c0_230 = arith.constant 0 : index
    %240 = vector.load %arg6[%c19, %c0_229, %c0_230] : memref<25x4x8xbf16, #tpu.memory_space<vmem>>, vector<1x4x8xbf16>
    %241 = vector.shape_cast %240 : vector<1x4x8xbf16> to vector<4x8xbf16>
    %cst_231 = arith.constant dense<0.000000e+00> : vector<256x8xf32>
    %242 = tpu.matmul %239, %241, %cst_231 {dimension_numbers = #tpu.dot_dimension_numbers<[1], [0], [0], [1], [0, 0, 1, 1], [], []>} : vector<256x4xbf16>, vector<4x8xbf16>, vector<256x8xf32> -> vector<256x8xf32>
    %243 = arith.addf %236, %242 : vector<256x8xf32>
    %c4_232 = arith.constant 4 : index
    %c0_233 = arith.constant 0 : index
    %c0_234 = arith.constant 0 : index
    %244 = vector.load %arg12[%c4_232, %c0_233, %c0_234] : memref<20x20x4xf32, #tpu.memory_space<vmem>>, vector<16x16x4xf32>
    %245 = vector.shape_cast %244 : vector<16x16x4xf32> to vector<256x4xf32>
    %246 = arith.truncf %245 : vector<256x4xf32> to vector<256x4xbf16>
    %c20 = arith.constant 20 : index
    %c0_235 = arith.constant 0 : index
    %c0_236 = arith.constant 0 : index
    %247 = vector.load %arg6[%c20, %c0_235, %c0_236] : memref<25x4x8xbf16, #tpu.memory_space<vmem>>, vector<1x4x8xbf16>
    %248 = vector.shape_cast %247 : vector<1x4x8xbf16> to vector<4x8xbf16>
    %cst_237 = arith.constant dense<0.000000e+00> : vector<256x8xf32>
    %249 = tpu.matmul %246, %248, %cst_237 {dimension_numbers = #tpu.dot_dimension_numbers<[1], [0], [0], [1], [0, 0, 1, 1], [], []>} : vector<256x4xbf16>, vector<4x8xbf16>, vector<256x8xf32> -> vector<256x8xf32>
    %250 = arith.addf %243, %249 : vector<256x8xf32>
    %c4_238 = arith.constant 4 : index
    %c1_239 = arith.constant 1 : index
    %c0_240 = arith.constant 0 : index
    %251 = vector.load %arg12[%c4_238, %c1_239, %c0_240] : memref<20x20x4xf32, #tpu.memory_space<vmem>>, vector<16x16x4xf32>
    %252 = vector.shape_cast %251 : vector<16x16x4xf32> to vector<256x4xf32>
    %253 = arith.truncf %252 : vector<256x4xf32> to vector<256x4xbf16>
    %c21 = arith.constant 21 : index
    %c0_241 = arith.constant 0 : index
    %c0_242 = arith.constant 0 : index
    %254 = vector.load %arg6[%c21, %c0_241, %c0_242] : memref<25x4x8xbf16, #tpu.memory_space<vmem>>, vector<1x4x8xbf16>
    %255 = vector.shape_cast %254 : vector<1x4x8xbf16> to vector<4x8xbf16>
    %cst_243 = arith.constant dense<0.000000e+00> : vector<256x8xf32>
    %256 = tpu.matmul %253, %255, %cst_243 {dimension_numbers = #tpu.dot_dimension_numbers<[1], [0], [0], [1], [0, 0, 1, 1], [], []>} : vector<256x4xbf16>, vector<4x8xbf16>, vector<256x8xf32> -> vector<256x8xf32>
    %257 = arith.addf %250, %256 : vector<256x8xf32>
    %c4_244 = arith.constant 4 : index
    %c2_245 = arith.constant 2 : index
    %c0_246 = arith.constant 0 : index
    %258 = vector.load %arg12[%c4_244, %c2_245, %c0_246] : memref<20x20x4xf32, #tpu.memory_space<vmem>>, vector<16x16x4xf32>
    %259 = vector.shape_cast %258 : vector<16x16x4xf32> to vector<256x4xf32>
    %260 = arith.truncf %259 : vector<256x4xf32> to vector<256x4xbf16>
    %c22 = arith.constant 22 : index
    %c0_247 = arith.constant 0 : index
    %c0_248 = arith.constant 0 : index
    %261 = vector.load %arg6[%c22, %c0_247, %c0_248] : memref<25x4x8xbf16, #tpu.memory_space<vmem>>, vector<1x4x8xbf16>
    %262 = vector.shape_cast %261 : vector<1x4x8xbf16> to vector<4x8xbf16>
    %cst_249 = arith.constant dense<0.000000e+00> : vector<256x8xf32>
    %263 = tpu.matmul %260, %262, %cst_249 {dimension_numbers = #tpu.dot_dimension_numbers<[1], [0], [0], [1], [0, 0, 1, 1], [], []>} : vector<256x4xbf16>, vector<4x8xbf16>, vector<256x8xf32> -> vector<256x8xf32>
    %264 = arith.addf %257, %263 : vector<256x8xf32>
    %c4_250 = arith.constant 4 : index
    %c3_251 = arith.constant 3 : index
    %c0_252 = arith.constant 0 : index
    %265 = vector.load %arg12[%c4_250, %c3_251, %c0_252] : memref<20x20x4xf32, #tpu.memory_space<vmem>>, vector<16x16x4xf32>
    %266 = vector.shape_cast %265 : vector<16x16x4xf32> to vector<256x4xf32>
    %267 = arith.truncf %266 : vector<256x4xf32> to vector<256x4xbf16>
    %c23 = arith.constant 23 : index
    %c0_253 = arith.constant 0 : index
    %c0_254 = arith.constant 0 : index
    %268 = vector.load %arg6[%c23, %c0_253, %c0_254] : memref<25x4x8xbf16, #tpu.memory_space<vmem>>, vector<1x4x8xbf16>
    %269 = vector.shape_cast %268 : vector<1x4x8xbf16> to vector<4x8xbf16>
    %cst_255 = arith.constant dense<0.000000e+00> : vector<256x8xf32>
    %270 = tpu.matmul %267, %269, %cst_255 {dimension_numbers = #tpu.dot_dimension_numbers<[1], [0], [0], [1], [0, 0, 1, 1], [], []>} : vector<256x4xbf16>, vector<4x8xbf16>, vector<256x8xf32> -> vector<256x8xf32>
    %271 = arith.addf %264, %270 : vector<256x8xf32>
    %c4_256 = arith.constant 4 : index
    %c4_257 = arith.constant 4 : index
    %c0_258 = arith.constant 0 : index
    %272 = vector.load %arg12[%c4_256, %c4_257, %c0_258] : memref<20x20x4xf32, #tpu.memory_space<vmem>>, vector<16x16x4xf32>
    %273 = vector.shape_cast %272 : vector<16x16x4xf32> to vector<256x4xf32>
    %274 = arith.truncf %273 : vector<256x4xf32> to vector<256x4xbf16>
    %c24 = arith.constant 24 : index
    %c0_259 = arith.constant 0 : index
    %c0_260 = arith.constant 0 : index
    %275 = vector.load %arg6[%c24, %c0_259, %c0_260] : memref<25x4x8xbf16, #tpu.memory_space<vmem>>, vector<1x4x8xbf16>
    %276 = vector.shape_cast %275 : vector<1x4x8xbf16> to vector<4x8xbf16>
    %cst_261 = arith.constant dense<0.000000e+00> : vector<256x8xf32>
    %277 = tpu.matmul %274, %276, %cst_261 {dimension_numbers = #tpu.dot_dimension_numbers<[1], [0], [0], [1], [0, 0, 1, 1], [], []>} : vector<256x4xbf16>, vector<4x8xbf16>, vector<256x8xf32> -> vector<256x8xf32>
    %278 = arith.addf %271, %277 : vector<256x8xf32>
    %c0_262 = arith.constant 0 : index
    %c0_263 = arith.constant 0 : index
    %279 = vector.load %arg7[%c0_262, %c0_263] : memref<1x8xf32, #tpu.memory_space<vmem>>, vector<1x8xf32>
    %280 = vector.broadcast %279 : vector<1x8xf32> to vector<256x8xf32>
    %281 = arith.addf %278, %280 : vector<256x8xf32>
    %282 = arith.truncf %17 : vector<256x8xf32> to vector<256x8xbf16>
    %c0_264 = arith.constant 0 : index
    %c0_265 = arith.constant 0 : index
    %283 = vector.load %arg8[%c0_264, %c0_265] : memref<8x8xbf16, #tpu.memory_space<vmem>>, vector<8x8xbf16>
    %cst_266 = arith.constant dense<0.000000e+00> : vector<256x8xf32>
    %284 = tpu.matmul %282, %283, %cst_266 {dimension_numbers = #tpu.dot_dimension_numbers<[1], [0], [0], [1], [0, 0, 1, 1], [], []>} : vector<256x8xbf16>, vector<8x8xbf16>, vector<256x8xf32> -> vector<256x8xf32>
    %c0_267 = arith.constant 0 : index
    %c0_268 = arith.constant 0 : index
    %285 = vector.load %arg9[%c0_267, %c0_268] : memref<1x8xf32, #tpu.memory_space<vmem>>, vector<1x8xf32>
    %286 = vector.broadcast %285 : vector<1x8xf32> to vector<256x8xf32>
    %287 = arith.addf %284, %286 : vector<256x8xf32>
    %288 = tpu.concatenate %3, %93, %281, %287 in 1 : vector<256x8xf32>, vector<256x16xf32>, vector<256x8xf32>, vector<256x8xf32> -> vector<256x40xf32>
    %c0_269 = arith.constant 0 : index
    %c0_270 = arith.constant 0 : index
    %c0_271 = arith.constant 0 : index
    %289 = vector.load %arg10[%c0_269, %c0_270, %c0_271] : memref<1x256x40xf32, #tpu.memory_space<vmem>>, vector<1x256x40xf32>
    %290 = vector.shape_cast %289 : vector<1x256x40xf32> to vector<256x40xf32>
    %291 = vector.shape_cast %288 : vector<256x40xf32> to vector<1x256x40xf32>
    tpu.vector_store %arg10[%c0_269, %c0_270, %c0_271], %291 {strides = array<i32>} : memref<1x256x40xf32, #tpu.memory_space<vmem>>, vector<1x256x40xf32>,
    return
  }
  func.func @transform_0(%arg0: i32) -> (i32, i32, i32) {
    %c0_i32 = arith.constant 0 : i32
    %c0_i32_0 = arith.constant 0 : i32
    %c0_i32_1 = arith.constant 0 : i32
    return %arg0, %c0_i32, %c0_i32_0 : i32, i32, i32
  }
  func.func @transform_1(%arg0: i32) -> (i32, i32) {
    %c0_i32 = arith.constant 0 : i32
    %c0_i32_0 = arith.constant 0 : i32
    %c0_i32_1 = arith.constant 0 : i32
    return %c0_i32, %c0_i32_0 : i32, i32
  }
  func.func @transform_2(%arg0: i32) -> (i32, i32) {
    %c0_i32 = arith.constant 0 : i32
    %c0_i32_0 = arith.constant 0 : i32
    %c0_i32_1 = arith.constant 0 : i32
    return %c0_i32, %c0_i32_0 : i32, i32
  }
  func.func @transform_3(%arg0: i32) -> (i32, i32, i32) {
    %c0_i32 = arith.constant 0 : i32
    %c0_i32_0 = arith.constant 0 : i32
    %c0_i32_1 = arith.constant 0 : i32
    %c0_i32_2 = arith.constant 0 : i32
    return %c0_i32, %c0_i32_0, %c0_i32_1 : i32, i32, i32
  }
  func.func @transform_4(%arg0: i32) -> (i32, i32) {
    %c0_i32 = arith.constant 0 : i32
    %c0_i32_0 = arith.constant 0 : i32
    %c0_i32_1 = arith.constant 0 : i32
    return %c0_i32, %c0_i32_0 : i32, i32
  }
  func.func @transform_5(%arg0: i32) -> (i32, i32, i32) {
    %c0_i32 = arith.constant 0 : i32
    %c0_i32_0 = arith.constant 0 : i32
    %c0_i32_1 = arith.constant 0 : i32
    %c0_i32_2 = arith.constant 0 : i32
    return %c0_i32, %c0_i32_0, %c0_i32_1 : i32, i32, i32
  }
  func.func @transform_6(%arg0: i32) -> (i32, i32) {
    %c0_i32 = arith.constant 0 : i32
    %c0_i32_0 = arith.constant 0 : i32
    %c0_i32_1 = arith.constant 0 : i32
    return %c0_i32, %c0_i32_0 : i32, i32
  }
  func.func @transform_7(%arg0: i32) -> (i32, i32) {
    %c0_i32 = arith.constant 0 : i32
    %c0_i32_0 = arith.constant 0 : i32
    %c0_i32_1 = arith.constant 0 : i32
    return %c0_i32, %c0_i32_0 : i32, i32
  }
  func.func @transform_8(%arg0: i32) -> (i32, i32) {
    %c0_i32 = arith.constant 0 : i32
    %c0_i32_0 = arith.constant 0 : i32
    %c0_i32_1 = arith.constant 0 : i32
    return %c0_i32, %c0_i32_0 : i32, i32
  }
  func.func @transform_9(%arg0: i32) -> (i32, i32, i32) {
    %c0_i32 = arith.constant 0 : i32
    %c0_i32_0 = arith.constant 0 : i32
    %c0_i32_1 = arith.constant 0 : i32
    return %arg0, %c0_i32, %c0_i32_0 : i32, i32, i32
  }
}

</mosaic_0001>

<bundles_post_ra>
// kernel: _lambda_.2
= control target key start
LH: loop header
LB: loop body
LE: loop exit
PB: predicated region body
PF: predicated region fallthrough
CT: control target
= control target key end

     0   :  { %s3037_s13 = smov 0   ;;  %s4481_s0 = inlined_call_operand.vmem [shape: f32[2,16,16,8], index: 0, kind: input, shape index: {}]   ;;  %s4482_s1 = inlined_call_operand.vmem [shape: f32[3,8], index: 1, kind: input, shape index: {}]   ;;  %s4483_s2 = inlined_call_operand.vmem [shape: f32[3,8], index: 2, kind: input, shape index: {}]   ;;  %s4484_s3 = inlined_call_operand.vmem [shape: bf16[8,8], index: 3, kind: input, shape index: {}]   ;;  %s4485_s4 = inlined_call_operand.vmem [shape: bf16[8,8], index: 4, kind: input, shape index: {}]   ;;  %s4486_s5 = inlined_call_operand.vmem [shape: bf16[8,4], index: 5, kind: input, shape index: {}]   ;;  %s4487_s6 = inlined_call_operand.vmem [shape: f32[1,8], index: 6, kind: input, shape index: {}]   ;;  %s4488_s7 = inlined_call_operand.vmem [shape: f32[1,8], index: 7, kind: input, shape index: {}]   ;;  %s4489_s8 = inlined_call_operand.vmem [shape: f32[1,4], index: 8, kind: input, shape index: {}]   ;;  %s4490_s9 = inlined_call_operand.vmem [shape: bf16[2,256,28], index: 9, kind: output, shape index: {0}]   ;;  %s4491_s10 = inlined_call_operand.vmem [shape: f32[2,2,20], index: 10, kind: output, shape index: {1}]  }
   0x1 LB: > { %s2662_s14 = sadd.s32 4294967295, %s2975_s13   ;;  %p2666_p0 = scmp.ge.s32.totalorder %s2975_s13, 1  ;;  %s2975_s13 = sphi %s3037_s13, %s21_s13  }
   0x2   : > { %p315_p1 = scmp.lt.s32.totalorder %s2975_s13, 3 }
   0x4   : > { %p316_p2 = pnand %p2666_p0, %p315_p1 }
   0x6   : > { %319 = sbr.rel (%p316_p2) target bundleno = 664 (0x298), region = 56 }
   0xd   : > { %v849_v0 = vld [vmem:[%s4484_s3] sm:$0xf]  ;;  %vm905_vm0 = vcmask 1043456   ;;  %p357_p3 = scmp.lt.s32.totalorder %s2662_s14, 1  ;;  %vm404_vm1 = vcmask 64512   ;;  %v2977_v2 = vmov -inf  }
   0xe   : > { %2953 = vmatprep.subr.msk.bf16.mxu1 %vm905_vm0, %v849_v0  ;;  %2952 = vmatprep.subr.msk.bf16.mxu0 %vm905_vm0, %v849_v0  ;;  %v907_v1 = vsel %vm905_vm0, %v849_v0, 0  ;;  %406 = vst.msk [vmem:[#allocation2 + $0x8] sm:$0xff] %vm404_vm1, %v2977_v2  ;;  %vm407_vm2 = vcmask 58368   ;;  %405 = vst.msk [vmem:[#allocation2] sm:$0xff] %vm404_vm1, %v2977_v2  ;;  %v1192_v3 = vld [vmem:[%s4485_s4] sm:$0xf] }
   0xf   : > { %410 = vst.msk [vmem:[#allocation2 + $0x198] sm:$0xff] %vm404_vm1, %v2977_v2  ;;  %411 = vst.msk [vmem:[#allocation2 + $0x1a0] sm:$0xff] %vm404_vm1, %v2977_v2  ;;  %2951 = vmatpush3.bf16.msra.mxu1 %v907_v1  ;;  %2849 = vmatpush3.bf16.msra.mxu0 %v907_v1  ;;  %s4549_s14 = smov (!%p357_p3, %s2662_s14), 1  ;;  %vm413_vm3 = vcmask 57344   ;;  %v1534_v4 = vld [vmem:[%s4486_s5] sm:$0xf] }
  0x10   : > { %408 = vst.msk [vmem:[#allocation2 + $0x10] sm:$0x3] %vm407_vm2, %v2977_v2  ;;  %412 = vst.msk [vmem:[#allocation2 + $0x1a8] sm:$0x3] %vm407_vm2, %v2977_v2  ;;  %2954 = vmatprep.subr.msk.bf16.mxu1 %vm905_vm0, %v1192_v3  ;;  %s2763_s21 = sshll.u32 %s4549_s14, 8  ;;  %2955 = vmatprep.subr.msk.bf16.mxu0 %vm905_vm0, %v1534_v4  ;;  %v3137_v12 = vsel %vm905_vm0, %v1192_v3, 0 }
  0x11   : > { %432 = vst.msk [vmem:[#allocation2 + $0x11] sm:$0x1] %vm413_vm3, %v2977_v2  ;;  %433 = vst.msk [vmem:[#allocation2 + $0x29] sm:$0x1] %vm413_vm3, %v2977_v2  ;;  %v3104_v5 = vld [vmem:[%s4482_s1] ss:$0 sm:$0xff]  ;;  %s3115_s28 = scalar_lea.vmem %s4481_s0, %s2763_s21 }
  0x12   : > { %434 = vst.msk [vmem:[#allocation2 + $0x41] sm:$0x1] %vm413_vm3, %v2977_v2  ;;  %415 = vst.msk [vmem:[#allocation2 + $0x18] sm:$0x1] %vm413_vm3, %v2977_v2  ;;  %v3109_v6 = vld [vmem:[%s4482_s1 + $0x1] ss:$0 sm:$0xff] }
  0x13   : > { %416 = vst.msk [vmem:[#allocation2 + $0x30] sm:$0x1] %vm413_vm3, %v2977_v2  ;;  %417 = vst.msk [vmem:[#allocation2 + $0x48] sm:$0x1] %vm413_vm3, %v2977_v2  ;;  %v3120_v7 = vld [vmem:[%s4483_s2] ss:$0 sm:$0xff] }
  0x14   : > { %418 = vst.msk [vmem:[#allocation2 + $0x60] sm:$0x1] %vm413_vm3, %v2977_v2  ;;  %419 = vst.msk [vmem:[#allocation2 + $0x78] sm:$0x1] %vm413_vm3, %v2977_v2  ;;  %v3125_v8 = vld [vmem:[%s4482_s1 + $0x2] ss:$0 sm:$0xff] }
  0x15   : > { %420 = vst.msk [vmem:[#allocation2 + $0x90] sm:$0x1] %vm413_vm3, %v2977_v2  ;;  %421 = vst.msk [vmem:[#allocation2 + $0xa8] sm:$0x1] %vm413_vm3, %v2977_v2  ;;  %v3128_v9 = vld [vmem:[%s3115_s28] sm:$0xff]  ;;  %v3131_v10 = vld [vmem:[%s3115_s28 + $0x8] sm:$0xff] }
  0x16   : > { %422 = vst.msk [vmem:[#allocation2 + $0xc0] sm:$0x1] %vm413_vm3, %v2977_v2  ;;  %423 = vst.msk [vmem:[#allocation2 + $0xd8] sm:$0x1] %vm413_vm3, %v2977_v2  ;;  %v3134_v11 = vld [vmem:[%s3115_s28 + $0x80] sm:$0xff]  ;;  %v3140_v13 = vsel %vm905_vm0, %v1534_v4, 0  ;;  %v732_v14 = vmul.f32 %v3104_v5, %v3128_v9  ;;  %v733_v15 = vmul.f32 %v3104_v5, %v3131_v10  ;;  %v3161_v20 = vmul.f32 %v3109_v6, %v3128_v9 }
  0x17   : > { %424 = vst.msk [vmem:[#allocation2 + $0xf0] sm:$0x1] %vm413_vm3, %v2977_v2  ;;  %425 = vst.msk [vmem:[#allocation2 + $0x108] sm:$0x1] %vm413_vm3, %v2977_v2  ;;  %v3151_v16 = vld [vmem:[%s3115_s28 + $0x88] sm:$0xff]  ;;  %v748_v17 = vmul.f32 %v3104_v5, %v3134_v11  ;;  %v374_v18 = vld [vmem:[%s3115_s28 + $0x10] sm:$0xff] }
  0x18   : > { %426 = vst.msk [vmem:[#allocation2 + $0x120] sm:$0x1] %vm413_vm3, %v2977_v2  ;;  %427 = vst.msk [vmem:[#allocation2 + $0x138] sm:$0x1] %vm413_vm3, %v2977_v2  ;;  %v375_v19 = vld [vmem:[%s3115_s28 + $0x18] sm:$0xff]  ;;  %v749_v21 = vmul.f32 %v3104_v5, %v3151_v16  ;;  %v734_v22 = vmul.f32 %v3104_v5, %v374_v18  ;;  %v3172_v24 = vmul.f32 %v3109_v6, %v374_v18  ;;  %v3175_v25 = vld [vmem:[%s3115_s28 + $0x90] sm:$0xff] }
  0x19   : > { %428 = vst.msk [vmem:[#allocation2 + $0x150] sm:$0x1] %vm413_vm3, %v2977_v2  ;;  %429 = vst.msk [vmem:[#allocation2 + $0x168] sm:$0x1] %vm413_vm3, %v2977_v2  ;;  %v735_v23 = vmul.f32 %v3104_v5, %v375_v19  ;;  %v3178_v26 = vld [vmem:[%s3115_s28 + $0x98] sm:$0xff]  ;;  %v3181_v27 = vld [vmem:[%s3115_s28 + $0x20] sm:$0xff]  ;;  %v769_v28 = vadd.f32 %v3120_v7, %v732_v14  ;;  %v770_v29 = vadd.f32 %v3120_v7, %v733_v15 }
  0x1a   : > { %430 = vst.msk [vmem:[#allocation2 + $0x180] sm:$0x1] %vm413_vm3, %v2977_v2  ;;  %435 = vst.msk [vmem:[#allocation2 + $0x59] sm:$0x1] %vm413_vm3, %v2977_v2  ;;  %v785_v30 = vadd.f32 %v3120_v7, %v748_v17  ;;  %v3187_v31 = vmul.f32 %v3109_v6, %v375_v19  ;;  %v3194_v32 = vld [vmem:[%s3115_s28 + $0x28] sm:$0xff]  ;;  %v3199_v33 = vld [vmem:[%s3115_s28 + $0xa0] sm:$0xff]  ;;  %v786_v35 = vadd.f32 %v3120_v7, %v749_v21 }
  0x1b   : > { %436 = vst.msk [vmem:[#allocation2 + $0x71] sm:$0x1] %vm413_vm3, %v2977_v2  ;;  %437 = vst.msk [vmem:[#allocation2 + $0x89] sm:$0x1] %vm413_vm3, %v2977_v2  ;;  %v3202_v34 = vld [vmem:[%s3115_s28 + $0xa8] sm:$0xff]  ;;  %v771_v36 = vadd.f32 %v3120_v7, %v734_v22  ;;  %v772_v37 = vadd.f32 %v3120_v7, %v735_v23  ;;  %v3208_v38 = vmul.f32 %v3125_v8, %v374_v18  ;;  %v3217_v39 = vld [vmem:[%s3115_s28 + $0x30] sm:$0xff] }
  0x1c   : > { %438 = vst.msk [vmem:[#allocation2 + $0xa1] sm:$0x1] %vm413_vm3, %v2977_v2  ;;  %439 = vst.msk [vmem:[#allocation2 + $0xb9] sm:$0x1] %vm413_vm3, %v2977_v2  ;;  %v3220_v40 = vld [vmem:[%s3115_s28 + $0x38] sm:$0xff]  ;;  %v3223_v41 = vld [vmem:[%s3115_s28 + $0xb0] sm:$0xff]  ;;  %v3226_v45 = vmul.f32 %v3125_v8, %v375_v19  ;;  %v750_v52 = vmul.f32 %v3104_v5, %v3175_v25  ;;  %v751_v57 = vmul.f32 %v3104_v5, %v3178_v26 }
  0x1d   : > { %440 = vst.msk [vmem:[#allocation2 + $0xd1] sm:$0x1] %vm413_vm3, %v2977_v2  ;;  %441 = vst.msk [vmem:[#allocation2 + $0xe9] sm:$0x1] %vm413_vm3, %v2977_v2  ;;  %v801_v42 = vmax.f32 %v769_v28, 0.0  ;;  %v802_v43 = vmax.f32 %v770_v29, 0.0  ;;  %v736_v58 = vmul.f32 %v3104_v5, %v3181_v27  ;;  %v737_v59 = vmul.f32 %v3104_v5, %v3194_v32 }
  0x1e   : > { %442 = vst.msk [vmem:[#allocation2 + $0x101] sm:$0x1] %vm413_vm3, %v2977_v2  ;;  %443 = vst.msk [vmem:[#allocation2 + $0x119] sm:$0x1] %vm413_vm3, %v2977_v2  ;;  %v817_v44 = vmax.f32 %v785_v30, 0.0  ;;  %v3233_v46 = vld [vmem:[%s3115_s28 + $0xb8] sm:$0xff]  ;;  %v787_v1 = vadd.f32 %v3120_v7, %v750_v52  ;;  %v788_v15 = vadd.f32 %v3120_v7, %v751_v57  ;;  %v738_v30 = vmul.f32 %v3104_v5, %v3217_v39 }
  0x1f   : > { %444 = vst.msk [vmem:[#allocation2 + $0x131] sm:$0x1] %vm413_vm3, %v2977_v2  ;;  %445 = vst.msk [vmem:[#allocation2 + $0x149] sm:$0x1] %vm413_vm3, %v2977_v2  ;;  %v3238_v47 = vld [vmem:[%s3115_s28 + $0x40] sm:$0xff]  ;;  %v3241_v48 = vld [vmem:[%s3115_s28 + $0x48] sm:$0xff]  ;;  %v833_v56 = vpack.c.bf16 %v802_v43, %v801_v42  ;;  %v773_v17 = vadd.f32 %v3120_v7, %v736_v58 }
  0x20   : > { %446 = vst.msk [vmem:[#allocation2 + $0x161] sm:$0x1] %vm413_vm3, %v2977_v2  ;;  %447 = vst.msk [vmem:[#allocation2 + $0x179] sm:$0x1] %vm413_vm3, %v2977_v2  ;;  %v818_v49 = vmax.f32 %v786_v35, 0.0  ;;  %v803_v50 = vmax.f32 %v771_v36, 0.0  ;;  %v739_v35 = vmul.f32 %v3104_v5, %v3220_v40 }
  0x21   : > { %448 = vst.msk [vmem:[#allocation2 + $0x191] sm:$0x1] %vm413_vm3, %v2977_v2  ;;  %414 = vst.msk [vmem:[#allocation2] sm:$0x1] %vm413_vm3, %v2977_v2  ;;  %v804_v51 = vmax.f32 %v772_v37, 0.0  ;;  %v3252_v53 = vld [vmem:[%s3115_s28 + $0xc0] sm:$0xff]  ;;  %2850 = vmatprep.mubr.msk.bf16.mxu0 %vm404_vm1, %v833_v56  ;;  %v754_v56 = vmul.f32 %v3104_v5, %v3223_v41 }
  0x22   : > { %431 = vst.msk [vmem:[#allocation2 + $0x198] sm:$0x1] %vm413_vm3, %v2977_v2  ;;  %449 = vst.msk [vmem:[#allocation2 + $0x1a9] sm:$0x1] %vm413_vm3, %v2977_v2  ;;  %v3255_v54 = vld [vmem:[%s3115_s28 + $0xc8] sm:$0xff]  ;;  %v3258_v55 = vld [vmem:[%s3115_s28 + $0x50] sm:$0xff]  ;;  %v841_v63 = vpack.c.bf16 %v818_v49, %v817_v44  ;;  %v752_v2 = vmul.f32 %v3104_v5, %v3199_v33  ;;  %v776_v52 = vadd.f32 %v3120_v7, %v739_v35 }
  0x23   : > { %451 = vst.msk [vmem:[#allocation2 + $0x19] sm:$0xff] %vm404_vm1, %v3128_v9  ;;  %452 = vst.msk [vmem:[#allocation2 + $0x21] sm:$0xff] %vm404_vm1, %v3131_v10  ;;  %v3271_v60 = vld [vmem:[%s3115_s28 + $0x58] sm:$0xff]  ;;  %v3276_v61 = vld [vmem:[%s3115_s28 + $0xd0] sm:$0xff]  ;;  %v834_v0 = vpack.c.bf16 %v804_v51, %v803_v50  ;;  %v819_v28 = vmax.f32 %v787_v1, 0.0  ;;  %v820_v42 = vmax.f32 %v788_v15, 0.0  ;;  %v775_v51 = vadd.f32 %v3120_v7, %v738_v30 }
  0x24   : > { %467 = vst.msk [vmem:[#allocation2 + $0xd9] sm:$0xff] %vm404_vm1, %v3134_v11  ;;  %468 = vst.msk [vmem:[#allocation2 + $0xe1] sm:$0xff] %vm404_vm1, %v3151_v16  ;;  %v3279_v62 = vld [vmem:[%s3115_s28 + $0xd8] sm:$0xff]  ;;  %v3291_v3 = vld [vmem:[%s3115_s28 + $0x60] sm:$0xff]  ;;  %2866 = vmatprep.mubr.msk.bf16.mxu1 %vm404_vm1, %v841_v63  ;;  %v789_v29 = vadd.f32 %v3120_v7, %v752_v2  ;;  %v805_v43 = vmax.f32 %v773_v17, 0.0  ;;  %v791_v1 = vadd.f32 %v3120_v7, %v754_v56  ;;  %s2978_s19 = smov 20  }
  0x25   : > { %453 = vst.msk [vmem:[#allocation2 + $0x31] sm:$0xff] %vm404_vm1, %v374_v18  ;;  %454 = vst.msk [vmem:[#allocation2 + $0x39] sm:$0xff] %vm404_vm1, %v375_v19  ;;  %v3294_v4 = vld [vmem:[%s3115_s28 + $0x68] sm:$0xff]  ;;  %v3297_v14 = vld [vmem:[%s3115_s28 + $0xe0] sm:$0xff]  ;;  %v774_v18 = vadd.f32 %v3120_v7, %v737_v59  ;;  %v753_v19 = vmul.f32 %v3104_v5, %v3202_v34  ;;  %2851 = vmatmul.mubr.msk.bf16.vlgmr.msra.gmra.mrb[0].mxu0 %vm404_vm1, %v834_v0  ;;  %v842_v57 = vpack.c.bf16 %v820_v42, %v819_v28  ;;  %s2979_s26 = smov 16   ;;  %s2980_s27 = smov 8  }
  0x26   : > { %469 = vst.msk [vmem:[#allocation2 + $0xf1] sm:$0xff] %vm404_vm1, %v3175_v25  ;;  %470 = vst.msk [vmem:[#allocation2 + $0xf9] sm:$0xff] %vm404_vm1, %v3178_v26  ;;  %v3310_v21 = vld [vmem:[%s3115_s28 + $0xe8] sm:$0xff]  ;;  %v3315_v22 = vld [vmem:[%s3115_s28 + $0x70] sm:$0xff]  ;;  %2917 = vmatpush3.bf16.msra.mxu0 %v3140_v13  ;;  %v821_v50 = vmax.f32 %v789_v29, 0.0  ;;  %v755_v59 = vmul.f32 %v3104_v5, %v3233_v46  ;;  %v807_v63 = vmax.f32 %v775_v51, 0.0  ;;  %v740_v2 = vmul.f32 %v3104_v5, %v3238_v47 }
  0x27   : > { %455 = vst.msk [vmem:[#allocation2 + $0x49] sm:$0xff] %vm404_vm1, %v3181_v27  ;;  %456 = vst.msk [vmem:[#allocation2 + $0x51] sm:$0xff] %vm404_vm1, %v3194_v32  ;;  %v3318_v23 = vld [vmem:[%s3115_s28 + $0x78] sm:$0xff]  ;;  %v3334_v36 = vld [vmem:[%s3115_s28 + $0xf0] sm:$0xff]  ;;  %v806_v44 = vmax.f32 %v774_v18, 0.0  ;;  %v790_v49 = vadd.f32 %v3120_v7, %v753_v19  ;;  %v808_v0 = vmax.f32 %v776_v52, 0.0  ;;  %2867 = vmatmul.mubr.msk.bf16.vlgmr.msra.gmra.mrb[0].mxu1 %vm404_vm1, %v842_v57  ;;  %v741_v18 = vmul.f32 %v3104_v5, %v3241_v48 }
  0x28   : > { %471 = vst.msk [vmem:[#allocation2 + $0x109] sm:$0xff] %vm404_vm1, %v3199_v33  ;;  %472 = vst.msk [vmem:[#allocation2 + $0x111] sm:$0xff] %vm404_vm1, %v3202_v34  ;;  %v3337_v37 = vld [vmem:[%s3115_s28 + $0xf8] sm:$0xff]  ;;  %v792_v17 = vadd.f32 %v3120_v7, %v755_v59  ;;  %2883 = vmatpush3.bf16.msra.mxu1 %v3137_v12  ;;  %v823_v28 = vmax.f32 %v791_v1, 0.0  ;;  %v777_v29 = vadd.f32 %v3120_v7, %v740_v2  ;;  %vm2170_vm4 = vcmask 130048   ;;  %s2764_s28 = sshll.u32 %s4549_s14, 7 }
  0x29   : > { %457 = vst.msk [vmem:[#allocation2 + $0x61] sm:$0xff] %vm404_vm1, %v3217_v39  ;;  %458 = vst.msk [vmem:[#allocation2 + $0x69] sm:$0xff] %vm404_vm1, %v3220_v40  ;;  %v835_v13 = vpack.c.bf16 %v806_v44, %v805_v43  ;;  %v822_v58 = vmax.f32 %v790_v49, 0.0  ;;  %v836_v19 = vpack.c.bf16 %v808_v0, %v807_v63  ;;  %v756_v30 = vmul.f32 %v3104_v5, %v3252_v53  ;;  %s4132_s11 = scalar_lea.vmem %s4490_s9, %s2764_s28  ;;  %s2981_s12 = smov 120  }
  0x2a   : > { %473 = vst.msk [vmem:[#allocation2 + $0x121] sm:$0xff] %vm404_vm1, %v3223_v41  ;;  %474 = vst.msk [vmem:[#allocation2 + $0x129] sm:$0xff] %vm404_vm1, %v3233_v46  ;;  %v824_v35 = vmax.f32 %v792_v17, 0.0  ;;  %v778_v42 = vadd.f32 %v3120_v7, %v741_v18  ;;  %v757_v43 = vmul.f32 %v3104_v5, %v3255_v54  ;;  %v742_v44 = vmul.f32 %v3104_v5, %v3258_v55  ;;  %s2671_s15 = sshll.u32 %s4549_s14, 1 }
  0x2b   : > { %459 = vst.msk [vmem:[#allocation2 + $0x79] sm:$0xff] %vm404_vm1, %v3238_v47  ;;  %460 = vst.msk [vmem:[#allocation2 + $0x81] sm:$0xff] %vm404_vm1, %v3241_v48  ;;  %2854 = vmatprep.mubr.msk.bf16.mxu0 %vm404_vm1, %v835_v13  ;;  %v843_v15 = vpack.c.bf16 %v822_v58, %v821_v50  ;;  %v809_v12 = vmax.f32 %v777_v29, 0.0  ;;  %v793_v49 = vadd.f32 %v3120_v7, %v756_v30  ;;  %vm2203_vm5 = vcmask 162816   ;;  %s370_s18 = scalar_lea.vmem %s4491_s10, %s2671_s15 }
  0x2c   : > { %475 = vst.msk [vmem:[#allocation2 + $0x139] sm:$0xff] %vm404_vm1, %v3252_v53  ;;  %476 = vst.msk [vmem:[#allocation2 + $0x141] sm:$0xff] %vm404_vm1, %v3255_v54  ;;  %v743_v50 = vmul.f32 %v3104_v5, %v3271_v60  ;;  %v758_v51 = vmul.f32 %v3104_v5, %v3276_v61  ;;  %v844_v52 = vpack.c.bf16 %v824_v35, %v823_v28  ;;  %v810_v56 = vmax.f32 %v778_v42, 0.0 }
  0x2d   : > { %461 = vst.msk [vmem:[#allocation2 + $0x91] sm:$0xff] %vm404_vm1, %v3258_v55  ;;  %462 = vst.msk [vmem:[#allocation2 + $0x99] sm:$0xff] %vm404_vm1, %v3271_v60  ;;  %2870 = vmatprep.mubr.msk.bf16.mxu1 %vm404_vm1, %v843_v15  ;;  %2855 = vmatmul.mubr.msk.bf16.gmra.mrb[4].mxu0 %vm404_vm1, %v836_v19  ;;  %v794_v57 = vadd.f32 %v3120_v7, %v757_v43  ;;  %v779_v13 = vadd.f32 %v3120_v7, %v742_v44  ;;  %v825_v58 = vmax.f32 %v793_v49, 0.0  ;;  %vm2543_vm6 = vcmask 224256  }
  0x2e   : > { %477 = vst.msk [vmem:[#allocation2 + $0x151] sm:$0xff] %vm404_vm1, %v3276_v61  ;;  %478 = vst.msk [vmem:[#allocation2 + $0x159] sm:$0xff] %vm404_vm1, %v3279_v62  ;;  %v780_v59 = vadd.f32 %v3120_v7, %v743_v50  ;;  %v759_v63 = vmul.f32 %v3104_v5, %v3279_v62  ;;  %v795_v0 = vadd.f32 %v3120_v7, %v758_v51  ;;  %vm2236_vm7 = vcmask 228416  }
  0x2f   : > { %463 = vst.msk [vmem:[#allocation2 + $0xa9] sm:$0xff] %vm404_vm1, %v3291_v3  ;;  %464 = vst.msk [vmem:[#allocation2 + $0xb1] sm:$0xff] %vm404_vm1, %v3294_v4  ;;  %v837_v1 = vpack.c.bf16 %v810_v56, %v809_v12  ;;  %v826_v2 = vmax.f32 %v794_v57, 0.0  ;;  %v811_v15 = vmax.f32 %v779_v13, 0.0  ;;  %v744_v17 = vmul.f32 %v3104_v5, %v3291_v3  ;;  %2871 = vmatmul.mubr.msk.bf16.gmra.mrb[4].mxu1 %vm404_vm1, %v844_v52 }
  0x30   : > { %479 = vst.msk [vmem:[#allocation2 + $0x169] sm:$0xff] %vm404_vm1, %v3297_v14  ;;  %480 = vst.msk [vmem:[#allocation2 + $0x171] sm:$0xff] %vm404_vm1, %v3310_v21  ;;  %v812_v18 = vmax.f32 %v780_v59, 0.0  ;;  %v796_v19 = vadd.f32 %v3120_v7, %v759_v63  ;;  %v827_v28 = vmax.f32 %v795_v0, 0.0  ;;  %v745_v29 = vmul.f32 %v3104_v5, %v3294_v4  ;;  %v3407_v63 = vld [vmem:[%s4483_s2 + $0x1] ss:$0 sm:$0xff] }
  0x31   : > { %465 = vst.msk [vmem:[#allocation2 + $0xc1] sm:$0xff] %vm404_vm1, %v3315_v22  ;;  %466 = vst.msk [vmem:[#allocation2 + $0xc9] sm:$0xff] %vm404_vm1, %v3318_v23  ;;  %2858 = vmatprep.mubr.msk.bf16.mxu0 %vm404_vm1, %v837_v1  ;;  %v845_v30 = vpack.c.bf16 %v826_v2, %v825_v58  ;;  %v781_v35 = vadd.f32 %v3120_v7, %v744_v17  ;;  %v760_v42 = vmul.f32 %v3104_v5, %v3297_v14  ;;  %vm2407_vm8 = vcmask 1040384  }
  0x32   : > { %481 = vst.msk [vmem:[#allocation2 + $0x181] sm:$0xff] %vm404_vm1, %v3334_v36  ;;  %482 = vst.msk [vmem:[#allocation2 + $0x189] sm:$0xff] %vm404_vm1, %v3337_v37  ;;  %v838_v43 = vpack.c.bf16 %v812_v18, %v811_v15  ;;  %v828_v44 = vmax.f32 %v796_v19, 0.0  ;;  %v782_v12 = vadd.f32 %v3120_v7, %v745_v29  ;;  %v761_v49 = vmul.f32 %v3104_v5, %v3310_v21 }
  0x33   : > { %2874 = vmatprep.mubr.msk.bf16.mxu1 %vm404_vm1, %v845_v30  ;;  %v813_v50 = vmax.f32 %v781_v35, 0.0  ;;  %v797_v51 = vadd.f32 %v3120_v7, %v760_v42  ;;  %v746_v52 = vmul.f32 %v3104_v5, %v3315_v22  ;;  %v747_v56 = vmul.f32 %v3104_v5, %v3318_v23 }
  0x34   : > { %v846_v57 = vpack.c.bf16 %v828_v44, %v827_v28  ;;  %v814_v13 = vmax.f32 %v782_v12, 0.0  ;;  %v798_v58 = vadd.f32 %v3120_v7, %v761_v49  ;;  %v762_v59 = vmul.f32 %v3104_v5, %v3334_v36 }
  0x35   : > { %2859 = vmatmul.mubr.msk.bf16.gmra.mrb[8].mxu0 %vm404_vm1, %v838_v43  ;;  %v829_v0 = vmax.f32 %v797_v51, 0.0  ;;  %v783_v1 = vadd.f32 %v3120_v7, %v746_v52  ;;  %v784_v2 = vadd.f32 %v3120_v7, %v747_v56  ;;  %v763_v15 = vmul.f32 %v3104_v5, %v3337_v37  ;;  %v3422_v43 = vld [vmem:[%s4483_s2 + $0x2] ss:$0 sm:$0xff] }
  0x36   : > { %v839_v17 = vpack.c.bf16 %v814_v13, %v813_v50  ;;  %v830_v18 = vmax.f32 %v798_v58, 0.0  ;;  %v799_v19 = vadd.f32 %v3120_v7, %v762_v59  ;;  %v1076_v28 = vmul.f32 %v3109_v6, %v3131_v10 }
  0x37   : > { %v815_v29 = vmax.f32 %v783_v1, 0.0  ;;  %v816_v30 = vmax.f32 %v784_v2, 0.0  ;;  %v800_v35 = vadd.f32 %v3120_v7, %v763_v15  ;;  %v1112_v42 = vadd.f32 %v3407_v63, %v3161_v20  ;;  %2875 = vmatmul.mubr.msk.bf16.gmra.mrb[8].mxu1 %vm404_vm1, %v846_v57 }
  0x38   : > { %2862 = vmatprep.mubr.msk.bf16.mxu0 %vm404_vm1, %v839_v17  ;;  %v847_v5 = vpack.c.bf16 %v830_v18, %v829_v0  ;;  %v831_v44 = vmax.f32 %v799_v19, 0.0  ;;  %v1113_v12 = vadd.f32 %v3407_v63, %v1076_v28  ;;  %v1417_v49 = vmul.f32 %v3125_v8, %v3128_v9 }
  0x39   : > { %v840_v7 = vpack.c.bf16 %v816_v30, %v815_v29  ;;  %v832_v50 = vmax.f32 %v800_v35, 0.0  ;;  %v1144_v51 = vmax.f32 %v1112_v42, 0.0  ;;  %v1418_v20 = vmul.f32 %v3125_v8, %v3131_v10 }
  0x3a   : > { %2878 = vmatprep.mubr.msk.bf16.mxu1 %vm404_vm1, %v847_v5  ;;  %v1145_v52 = vmax.f32 %v1113_v12, 0.0  ;;  %v1454_v56 = vadd.f32 %v3422_v43, %v1417_v49  ;;  %v1114_v13 = vadd.f32 %v3407_v63, %v3172_v24  ;;  %v1115_v58 = vadd.f32 %v3407_v63, %v3187_v31 }
  0x3b   : > { %v848_v9 = vpack.c.bf16 %v832_v50, %v831_v44  ;;  %v1455_v57 = vadd.f32 %v3422_v43, %v1418_v20  ;;  %v1456_v59 = vadd.f32 %v3422_v43, %v3208_v38  ;;  %v1457_v10 = vadd.f32 %v3422_v43, %v3226_v45 }
  0x3c   : > { %v1176_v0 = vpack.c.bf16 %v1145_v52, %v1144_v51  ;;  %v1486_v1 = vmax.f32 %v1454_v56, 0.0  ;;  %v1146_v2 = vmax.f32 %v1114_v13, 0.0  ;;  %v1147_v15 = vmax.f32 %v1115_v58, 0.0 }
  0x3d   : > { %2863 = vmatmul.mubr.msk.bf16.gmra.mrb[12].mxu0 %vm404_vm1, %v840_v7  ;;  %v1487_v17 = vmax.f32 %v1455_v57, 0.0  ;;  %v1488_v24 = vmax.f32 %v1456_v59, 0.0  ;;  %v1489_v18 = vmax.f32 %v1457_v10, 0.0  ;;  %v1079_v31 = vmul.f32 %v3109_v6, %v3181_v27 }
  0x3e   : > { %v1177_v19 = vpack.c.bf16 %v1147_v15, %v1146_v2  ;;  %v1080_v28 = vmul.f32 %v3109_v6, %v3194_v32  ;;  %v1081_v38 = vmul.f32 %v3109_v6, %v3217_v39  ;;  %v1082_v45 = vmul.f32 %v3109_v6, %v3220_v40 }
  0x3f   : > { %v1518_v29 = vpack.c.bf16 %v1487_v17, %v1486_v1  ;;  %v1519_v30 = vpack.c.bf16 %v1489_v18, %v1488_v24  ;;  %v1116_v35 = vadd.f32 %v3407_v63, %v1079_v31  ;;  %v1421_v42 = vmul.f32 %v3125_v8, %v3181_v27  ;;  %2879 = vmatmul.mubr.msk.bf16.gmra.mrb[12].mxu1 %vm404_vm1, %v848_v9 }
  0x40   : > { %v1117_v5 = vadd.f32 %v3407_v63, %v1080_v28  ;;  %v1118_v44 = vadd.f32 %v3407_v63, %v1081_v38  ;;  %v1119_v12 = vadd.f32 %v3407_v63, %v1082_v45  ;;  %v1422_v49 = vmul.f32 %v3125_v8, %v3194_v32  ;;  %2884 = vmatprep.mubr.msk.bf16.mxu1 %vm404_vm1, %v1176_v0 }
  0x41   : > { %2918 = vmatprep.mubr.msk.bf16.mxu0 %vm404_vm1, %v1518_v29  ;;  %v1148_v7 = vmax.f32 %v1116_v35, 0.0  ;;  %v1458_v50 = vadd.f32 %v3422_v43, %v1421_v42  ;;  %v1423_v51 = vmul.f32 %v3125_v8, %v3217_v39  ;;  %v1424_v27 = vmul.f32 %v3125_v8, %v3220_v40 }
  0x42   : > { %v1149_v20 = vmax.f32 %v1117_v5, 0.0  ;;  %v1150_v52 = vmax.f32 %v1118_v44, 0.0  ;;  %v1151_v56 = vmax.f32 %v1119_v12, 0.0  ;;  %v1459_v32 = vadd.f32 %v3422_v43, %v1422_v49 }
  0x43   : > { %v1490_v13 = vmax.f32 %v1458_v50, 0.0  ;;  %v1460_v58 = vadd.f32 %v3422_v43, %v1423_v51  ;;  %v1461_v9 = vadd.f32 %v3422_v43, %v1424_v27  ;;  %v1083_v57 = vmul.f32 %v3109_v6, %v3238_v47 }
  0x44   : > { %v1178_v39 = vpack.c.bf16 %v1149_v20, %v1148_v7  ;;  %v1179_v59 = vpack.c.bf16 %v1151_v56, %v1150_v52  ;;  %v1491_v40 = vmax.f32 %v1459_v32, 0.0  ;;  %v1084_v10 = vmul.f32 %v3109_v6, %v3241_v48 }
  0x45   : > { %2919 = vmatmul.mubr.msk.bf16.vlgmr.msra.gmra.mrb[16].mxu0 %vm404_vm1, %v1519_v30  ;;  %v1492_v0 = vmax.f32 %v1460_v58, 0.0  ;;  %v1493_v1 = vmax.f32 %v1461_v9, 0.0  ;;  %v1120_v2 = vadd.f32 %v3407_v63, %v1083_v57  ;;  %v1085_v15 = vmul.f32 %v3109_v6, %v3258_v55 }
  0x46   : > { %v1520_v17 = vpack.c.bf16 %v1491_v40, %v1490_v13  ;;  %v1121_v24 = vadd.f32 %v3407_v63, %v1084_v10  ;;  %v1086_v18 = vmul.f32 %v3109_v6, %v3271_v60  ;;  %v1425_v31 = vmul.f32 %v3125_v8, %v3238_v47 }
  0x47   : > { %v1521_v28 = vpack.c.bf16 %v1493_v1, %v1492_v0  ;;  %v1152_v38 = vmax.f32 %v1120_v2, 0.0  ;;  %v1122_v45 = vadd.f32 %v3407_v63, %v1085_v15  ;;  %v1426_v29 = vmul.f32 %v3125_v8, %v3241_v48  ;;  %2885 = vmatmul.mubr.msk.bf16.vlgmr.msra.gmra.mrb[16].mxu1 %vm404_vm1, %v1177_v19 }
  0x48   : > { %2922 = vmatprep.mubr.msk.bf16.mxu0 %vm404_vm1, %v1520_v17  ;;  %v1153_v30 = vmax.f32 %v1121_v24, 0.0  ;;  %v1123_v35 = vadd.f32 %v3407_v63, %v1086_v18  ;;  %v1462_v42 = vadd.f32 %v3422_v43, %v1425_v31  ;;  %v1427_v5 = vmul.f32 %v3125_v8, %v3258_v55  ;;  %2888 = vmatprep.mubr.msk.bf16.mxu1 %vm404_vm1, %v1178_v39 }
  0x49   : > { %v1154_v47 = vmax.f32 %v1122_v45, 0.0  ;;  %v1463_v44 = vadd.f32 %v3422_v43, %v1426_v29  ;;  %v1428_v12 = vmul.f32 %v3125_v8, %v3271_v60  ;;  %v1087_v48 = vmul.f32 %v3109_v6, %v3291_v3 }
  0x4a   : > { %v1180_v49 = vpack.c.bf16 %v1153_v30, %v1152_v38  ;;  %v1155_v7 = vmax.f32 %v1123_v35, 0.0  ;;  %v1494_v50 = vmax.f32 %v1462_v42, 0.0  ;;  %v1464_v51 = vadd.f32 %v3422_v43, %v1427_v5 }
  0x4b   : > { %v1495_v27 = vmax.f32 %v1463_v44, 0.0  ;;  %v1465_v55 = vadd.f32 %v3422_v43, %v1428_v12  ;;  %v1088_v19 = vmul.f32 %v3109_v6, %v3294_v4  ;;  %v1124_v20 = vadd.f32 %v3407_v63, %v1087_v48 }
  0x4c   : > { %v1181_v60 = vpack.c.bf16 %v1155_v7, %v1154_v47  ;;  %v1496_v52 = vmax.f32 %v1464_v51, 0.0  ;;  %v1089_v56 = vmul.f32 %v3109_v6, %v3315_v22  ;;  %v1090_v32 = vmul.f32 %v3109_v6, %v3318_v23 }
  0x4d   : > { %2923 = vmatmul.mubr.msk.bf16.gmra.mrb[20].mxu0 %vm404_vm1, %v1521_v28  ;;  %v1522_v13 = vpack.c.bf16 %v1495_v27, %v1494_v50  ;;  %v1497_v58 = vmax.f32 %v1465_v55, 0.0  ;;  %v1125_v9 = vadd.f32 %v3407_v63, %v1088_v19  ;;  %v1156_v57 = vmax.f32 %v1124_v20, 0.0 }
  0x4e   : > { %v1126_v39 = vadd.f32 %v3407_v63, %v1089_v56  ;;  %v1127_v40 = vadd.f32 %v3407_v63, %v1090_v32  ;;  %v1429_v10 = vmul.f32 %v3125_v8, %v3291_v3  ;;  %v1430_v0 = vmul.f32 %v3125_v8, %v3294_v4 }
  0x4f   : > { %2926 = vmatprep.mubr.msk.bf16.mxu0 %vm404_vm1, %v1522_v13  ;;  %v1523_v1 = vpack.c.bf16 %v1497_v58, %v1496_v52  ;;  %v1157_v2 = vmax.f32 %v1125_v9, 0.0  ;;  %v1431_v15 = vmul.f32 %v3125_v8, %v3315_v22  ;;  %v1432_v17 = vmul.f32 %v3125_v8, %v3318_v23  ;;  %2889 = vmatmul.mubr.msk.bf16.gmra.mrb[20].mxu1 %vm404_vm1, %v1179_v59 }
  0x50   : > { %v1158_v24 = vmax.f32 %v1126_v39, 0.0  ;;  %v1159_v18 = vmax.f32 %v1127_v40, 0.0  ;;  %v1466_v31 = vadd.f32 %v3422_v43, %v1429_v10  ;;  %v1467_v28 = vadd.f32 %v3422_v43, %v1430_v0  ;;  %2892 = vmatprep.mubr.msk.bf16.mxu1 %vm404_vm1, %v1180_v49 }
  0x51   : > { %v1182_v3 = vpack.c.bf16 %v1157_v2, %v1156_v57  ;;  %v1468_v4 = vadd.f32 %v3422_v43, %v1431_v15  ;;  %v1469_v38 = vadd.f32 %v3422_v43, %v1432_v17  ;;  %v1091_v45 = vmul.f32 %v3109_v6, %v3134_v11 }
  0x52   : > { %v3528_v22 = vpack.c.bf16 %v1159_v18, %v1158_v24  ;;  %v1498_v23 = vmax.f32 %v1466_v31, 0.0  ;;  %v1499_v29 = vmax.f32 %v1467_v28, 0.0  ;;  %v1092_v30 = vmul.f32 %v3109_v6, %v3151_v16 }
  0x53   : > { %v1500_v35 = vmax.f32 %v1468_v4, 0.0  ;;  %v1501_v42 = vmax.f32 %v1469_v38, 0.0  ;;  %v1128_v59 = vadd.f32 %v3407_v63, %v1091_v45  ;;  %v1093_v5 = vmul.f32 %v3109_v6, %v3175_v25 }
  0x54   : > { %v1524_v47 = vpack.c.bf16 %v1499_v29, %v1498_v23  ;;  %v1129_v44 = vadd.f32 %v3407_v63, %v1092_v30  ;;  %v1094_v12 = vmul.f32 %v3109_v6, %v3178_v26  ;;  %v1433_v48 = vmul.f32 %v3125_v8, %v3134_v11 }
  0x55   : > { %2927 = vmatmul.mubr.msk.bf16.gmra.mrb[24].mxu0 %vm404_vm1, %v1523_v1  ;;  %v1525_v49 = vpack.c.bf16 %v1501_v42, %v1500_v35  ;;  %v1160_v7 = vmax.f32 %v1128_v59, 0.0  ;;  %v1130_v50 = vadd.f32 %v3407_v63, %v1093_v5  ;;  %v1434_v51 = vmul.f32 %v3125_v8, %v3151_v16 }
  0x56   : > { %2930 = vmatprep.mubr.msk.bf16.mxu0 %vm404_vm1, %v1524_v47  ;;  %v1161_v27 = vmax.f32 %v1129_v44, 0.0  ;;  %v1131_v55 = vadd.f32 %v3407_v63, %v1094_v12  ;;  %v1470_v19 = vadd.f32 %v3422_v43, %v1433_v48  ;;  %v1435_v20 = vmul.f32 %v3125_v8, %v3175_v25 }
  0x57   : > { %v1162_v52 = vmax.f32 %v1130_v50, 0.0  ;;  %v1471_v11 = vadd.f32 %v3422_v43, %v1434_v51  ;;  %v1436_v56 = vmul.f32 %v3125_v8, %v3178_v26  ;;  %v1095_v32 = vmul.f32 %v3109_v6, %v3199_v33  ;;  %2893 = vmatmul.mubr.msk.bf16.gmra.mrb[24].mxu1 %vm404_vm1, %v1181_v60 }
  0x58   : > { %v1184_v16 = vpack.c.bf16 %v1161_v27, %v1160_v7  ;;  %v1163_v13 = vmax.f32 %v1131_v55, 0.0  ;;  %v1502_v58 = vmax.f32 %v1470_v19, 0.0  ;;  %v1472_v9 = vadd.f32 %v3422_v43, %v1435_v20  ;;  %2896 = vmatprep.mubr.msk.bf16.mxu1 %vm404_vm1, %v1182_v3 }
  0x59   : > { %v1503_v57 = vmax.f32 %v1471_v11, 0.0  ;;  %v1473_v39 = vadd.f32 %v3422_v43, %v1436_v56  ;;  %v1096_v25 = vmul.f32 %v3109_v6, %v3202_v34  ;;  %v1132_v40 = vadd.f32 %v3407_v63, %v1095_v32 }
  0x5a   : > { %v1185_v26 = vpack.c.bf16 %v1163_v13, %v1162_v52  ;;  %v1504_v10 = vmax.f32 %v1472_v9, 0.0  ;;  %v1097_v0 = vmul.f32 %v3109_v6, %v3223_v41  ;;  %v1098_v1 = vmul.f32 %v3109_v6, %v3233_v46 }
  0x5b   : > { %v1526_v2 = vpack.c.bf16 %v1503_v57, %v1502_v58  ;;  %v1505_v60 = vmax.f32 %v1473_v39, 0.0  ;;  %v1133_v15 = vadd.f32 %v3407_v63, %v1096_v25  ;;  %v1164_v17 = vmax.f32 %v1132_v40, 0.0 }
  0x5c   : > { %v1134_v24 = vadd.f32 %v3407_v63, %v1097_v0  ;;  %v1135_v18 = vadd.f32 %v3407_v63, %v1098_v1  ;;  %v1437_v31 = vmul.f32 %v3125_v8, %v3199_v33  ;;  %v1438_v28 = vmul.f32 %v3125_v8, %v3202_v34  ;;  %v484_v1 = vld [vmem:[#allocation2 + $0x8] sm:$0xff] }
  0x5d   : > { %2931 = vmatmul.mubr.msk.bf16.gmra.mrb[28].mxu0 %vm404_vm1, %v1525_v49  ;;  %v1527_v3 = vpack.c.bf16 %v1505_v60, %v1504_v10  ;;  %v1165_v4 = vmax.f32 %v1133_v15, 0.0  ;;  %v1439_v38 = vmul.f32 %v3125_v8, %v3223_v41  ;;  %v1440_v45 = vmul.f32 %v3125_v8, %v3233_v46 }
  0x5e   : > { %2934 = vmatprep.mubr.msk.bf16.mxu0 %vm404_vm1, %v1526_v2  ;;  %v1166_v23 = vmax.f32 %v1134_v24, 0.0  ;;  %v1167_v29 = vmax.f32 %v1135_v18, 0.0  ;;  %v1474_v30 = vadd.f32 %v3422_v43, %v1437_v31  ;;  %v1475_v35 = vadd.f32 %v3422_v43, %v1438_v28  ;;  %v486_v2 = vld [vmem:[#allocation2 + $0x20] sm:$0xff]  ;;  %v488_v18 = vld [vmem:[#allocation2 + $0x38] sm:$0xff] }
  0x5f   : > { %v1186_v33 = vpack.c.bf16 %v1165_v4, %v1164_v17  ;;  %v1476_v42 = vadd.f32 %v3422_v43, %v1439_v38  ;;  %v1477_v34 = vadd.f32 %v3422_v43, %v1440_v45  ;;  %v1099_v59 = vmul.f32 %v3109_v6, %v3252_v53  ;;  %2897 = vmatmul.mubr.msk.bf16.gmra.mrb[28].mxu1 %vm404_vm1, %v3528_v22  ;;  %v522_v31 = vld [vmem:[#allocation2 + $0x21] sm:$0xff]  ;;  %v524_v28 = vld [vmem:[#allocation2 + $0x39] sm:$0xff] }
  0x60   : > { %v3584_v5 = vpack.c.bf16 %v1167_v29, %v1166_v23  ;;  %v1506_v41 = vmax.f32 %v1474_v30, 0.0  ;;  %v1507_v47 = vmax.f32 %v1475_v35, 0.0  ;;  %v1100_v46 = vmul.f32 %v3109_v6, %v3255_v54  ;;  %2900 = vmatprep.mubr.msk.bf16.mxu1 %vm404_vm1, %v1184_v16  ;;  %v592_v23 = vld [vmem:[#allocation2 + $0xa] sm:$0xff]  ;;  %v483_v29 = vld [vmem:[#allocation2] sm:$0xff] }
  0x61   : > { %v1508_v44 = vmax.f32 %v1476_v42, 0.0  ;;  %v1509_v12 = vmax.f32 %v1477_v34, 0.0  ;;  %v1136_v48 = vadd.f32 %v3407_v63, %v1099_v59  ;;  %v1101_v49 = vmul.f32 %v3109_v6, %v3276_v61  ;;  %v596_v42 = vld [vmem:[#allocation2 + $0x3a] sm:$0xff] }
  0x62   : > { %v1528_v7 = vpack.c.bf16 %v1507_v47, %v1506_v41  ;;  %v1137_v50 = vadd.f32 %v3407_v63, %v1100_v46  ;;  %v1102_v51 = vmul.f32 %v3109_v6, %v3279_v62  ;;  %v1441_v27 = vmul.f32 %v3125_v8, %v3252_v53  ;;  %v485_v34 = vld [vmem:[#allocation2 + $0x18] sm:$0xff]  ;;  %v519_v59 = vld [vmem:[#allocation2 + $0x1] sm:$0xff] }
  0x63   : > { %v1529_v55 = vpack.c.bf16 %v1509_v12, %v1508_v44  ;;  %v1138_v22 = vadd.f32 %v3407_v63, %v1101_v49  ;;  %v1442_v19 = vmul.f32 %v3125_v8, %v3255_v54  ;;  %v1168_v20 = vmax.f32 %v1136_v48, 0.0  ;;  %v523_v46 = vld [vmem:[#allocation2 + $0x31] sm:$0xff]  ;;  %v591_v44 = vld [vmem:[#allocation2 + $0x2] sm:$0xff] }
  0x64   : > { %v1139_v52 = vadd.f32 %v3407_v63, %v1102_v51  ;;  %v1478_v11 = vadd.f32 %v3422_v43, %v1441_v27  ;;  %v1443_v56 = vmul.f32 %v3125_v8, %v3276_v61  ;;  %v1169_v32 = vmax.f32 %v1137_v50, 0.0  ;;  %v593_v50 = vld [vmem:[#allocation2 + $0x1a] sm:$0xff]  ;;  %v490_v51 = vld [vmem:[#allocation2 + $0x50] sm:$0xff] }
  0x65   : > { %2935 = vmatmul.mubr.msk.bf16.gmra.mrb[32].mxu0 %vm404_vm1, %v1527_v3  ;;  %v1479_v53 = vadd.f32 %v3422_v43, %v1442_v19  ;;  %v1444_v16 = vmul.f32 %v3125_v8, %v3279_v62  ;;  %v1103_v54 = vmul.f32 %v3109_v6, %v3297_v14  ;;  %v1170_v13 = vmax.f32 %v1138_v22, 0.0  ;;  %v526_v27 = vld [vmem:[#allocation2 + $0x51] sm:$0xff] }
  0x66   : > { %2938 = vmatprep.mubr.msk.bf16.mxu0 %vm404_vm1, %v1528_v7  ;;  %v1510_v58 = vmax.f32 %v1478_v11, 0.0  ;;  %v1480_v9 = vadd.f32 %v3422_v43, %v1443_v56  ;;  %v1171_v57 = vmax.f32 %v1139_v52, 0.0  ;;  %v1104_v61 = vmul.f32 %v3109_v6, %v3310_v21  ;;  %v595_v52 = vld [vmem:[#allocation2 + $0x32] sm:$0xff]  ;;  %v525_v11 = vld [vmem:[#allocation2 + $0x49] sm:$0xff] }
  0x67   : > { %v1511_v39 = vmax.f32 %v1479_v53, 0.0  ;;  %v1481_v25 = vadd.f32 %v3422_v43, %v1444_v16  ;;  %v3618_v40 = vadd.f32 %v3407_v63, %v1103_v54  ;;  %2901 = vmatmul.mubr.msk.bf16.gmra.mrb[32].mxu1 %vm404_vm1, %v1185_v26  ;;  %v3621_v62 = vpack.c.bf16 %v1169_v32, %v1168_v20  ;;  %v520_v26 = vld [vmem:[#allocation2 + $0x9] sm:$0xff]  ;;  %v598_v54 = vld [vmem:[#allocation2 + $0x52] sm:$0xff] }
  0x68   : > { %v1105_v0 = vmul.f32 %v3109_v6, %v3334_v36  ;;  %2904 = vmatprep.mubr.msk.bf16.mxu1 %vm404_vm1, %v1186_v33  ;;  %v1512_v60 = vmax.f32 %v1480_v9, 0.0  ;;  %v1445_v17 = vmul.f32 %v3125_v8, %v3297_v14  ;;  %v1446_v24 = vmul.f32 %v3125_v8, %v3310_v21  ;;  %v594_v14 = vld [vmem:[#allocation2 + $0x22] sm:$0xff] }
  0x69   : > { %v1530_v10 = vpack.c.bf16 %v1511_v39, %v1510_v58  ;;  %v1513_v15 = vmax.f32 %v1481_v25, 0.0  ;;  %v3630_v3 = vpack.c.bf16 %v1171_v57, %v1170_v13  ;;  %v3633_v4 = vadd.f32 %v3407_v63, %v1104_v61  ;;  %v492_v13 = vld [vmem:[#allocation2 + $0x68] sm:$0xff] }
  0x6a   : > { %v1447_v38 = vmul.f32 %v3125_v8, %v3334_v36  ;;  %v1448_v45 = vmul.f32 %v3125_v8, %v3337_v37  ;;  %v1172_v21 = vmax.f32 %v3618_v40, 0.0  ;;  %v1106_v30 = vmul.f32 %v3109_v6, %v3337_v37  ;;  %v487_v36 = vld [vmem:[#allocation2 + $0x30] sm:$0xff]  ;;  %v521_v37 = vld [vmem:[#allocation2 + $0x19] sm:$0xff] }
  0x6b   : > { %v1482_v35 = vadd.f32 %v3422_v43, %v1445_v17  ;;  %v1483_v33 = vadd.f32 %v3422_v43, %v1446_v24  ;;  %v3647_v8 = vadd.f32 %v3407_v63, %v1105_v0  ;;  %v556_v6 = vmax.f32 %v484_v1, %v520_v26  ;;  %v528_v58 = vld [vmem:[#allocation2 + $0x69] sm:$0xff]  ;;  %v527_v0 = vld [vmem:[#allocation2 + $0x61] sm:$0xff] }
  0x6c   : > { %v3650_v41 = vadd.f32 %v3422_v43, %v1447_v38  ;;  %v3653_v47 = vadd.f32 %v3422_v43, %v1448_v45  ;;  %v1531_v12 = vpack.c.bf16 %v1513_v15, %v1512_v60  ;;  %v558_v7 = vmax.f32 %v486_v2, %v522_v31  ;;  %v489_v43 = vld [vmem:[#allocation2 + $0x48] sm:$0xff] }
  0x6d   : > { %2939 = vmatmul.mubr.msk.bf16.gmra.mrb[36].mxu0 %vm404_vm1, %v1529_v55  ;;  %v1514_v48 = vmax.f32 %v1482_v35, 0.0  ;;  %v1515_v49 = vmax.f32 %v1483_v33, 0.0  ;;  %v1173_v55 = vmax.f32 %v3633_v4, 0.0  ;;  %v560_v19 = vmax.f32 %v488_v18, %v524_v28  ;;  %v597_v61 = vld [vmem:[#allocation2 + $0x4a] sm:$0xff]  ;;  %v530_v28 = vld [vmem:[#allocation2 + $0x81] sm:$0xff] }
  0x6e   : > { %2942 = vmatprep.mubr.msk.bf16.mxu0 %vm404_vm1, %v1530_v10  ;;  %v1516_v22 = vmax.f32 %v3650_v41, 0.0  ;;  %v628_v20 = vmax.f32 %v556_v6, %v592_v23  ;;  %v1517_v56 = vmax.f32 %v3653_v47, 0.0  ;;  %v630_v32 = vmax.f32 %v558_v7, %v594_v14  ;;  %v491_v10 = vld [vmem:[#allocation2 + $0x60] sm:$0xff]  ;;  %v600_v17 = vld [vmem:[#allocation2 + $0x6a] sm:$0xff] }
  0x6f   : > { %v555_v53 = vmax.f32 %v483_v29, %v519_v59  ;;  %v557_v16 = vmax.f32 %v485_v34, %v521_v37  ;;  %2905 = vmatmul.mubr.msk.bf16.gmra.mrb[36].mxu1 %vm404_vm1, %v3584_v5  ;;  %v1532_v9 = vpack.c.bf16 %v1515_v49, %v1514_v48  ;;  %v632_v57 = vmax.f32 %v560_v19, %v596_v42  ;;  %v494_v5 = vld [vmem:[#allocation2 + $0x80] sm:$0xff]  ;;  %v493_v42 = vld [vmem:[#allocation2 + $0x78] sm:$0xff] }
  0x70   : > { %v559_v39 = vmax.f32 %v487_v36, %v523_v46  ;;  %v562_v25 = vmax.f32 %v490_v51, %v526_v27  ;;  %2908 = vmatprep.mubr.msk.bf16.mxu1 %vm404_vm1, %v3621_v62  ;;  %v664_v1 = vmax.f32 %v628_v20, %v630_v32  ;;  %v561_v15 = vmax.f32 %v489_v43, %v525_v11  ;;  %v599_v14 = vld [vmem:[#allocation2 + $0x62] sm:$0xff]  ;;  %v529_v34 = vld [vmem:[#allocation2 + $0x79] sm:$0xff]  ;;  %v531_v51 = vld [vmem:[#allocation2 + $0x91] sm:$0xff] }
  0x71   : > { %v627_v2 = vmax.f32 %v555_v53, %v591_v44  ;;  %v629_v60 = vmax.f32 %v557_v16, %v593_v50  ;;  %v666_v26 = vmax.f32 %v630_v32, %v632_v57  ;;  %v564_v31 = vmax.f32 %v492_v13, %v528_v58  ;;  %v532_v46 = vld [vmem:[#allocation2 + $0x99] sm:$0xff]  ;;  %v495_v50 = vld [vmem:[#allocation2 + $0x90] sm:$0xff]  ;;  %v497_v53 = vld [vmem:[#allocation2 + $0xa8] sm:$0xff] }
  0x72   : > { %v631_v24 = vmax.f32 %v559_v39, %v595_v52  ;;  %v634_v18 = vmax.f32 %v562_v25, %v598_v54  ;;  %v696_v4 = vmax.f32 %v664_v1, %v632_v57  ;;  %v633_v45 = vmax.f32 %v561_v15, %v597_v61  ;;  %v601_v7 = vld [vmem:[#allocation2 + $0x7a] sm:$0xff]  ;;  %v498_v52 = vld [vmem:[#allocation2 + $0xb0] sm:$0xff]  ;;  %v500_v39 = vld [vmem:[#allocation2 + $0xc8] sm:$0xff] }
  0x73   : > { %v663_v38 = vmax.f32 %v627_v2, %v629_v60  ;;  %v563_v23 = vmax.f32 %v491_v10, %v527_v0  ;;  %v1143_v62 = vadd.f32 %v3407_v63, %v1106_v30  ;;  %v3665_v35 = vmax.f32 %v564_v31, %v600_v17  ;;  %v602_v63 = vld [vmem:[#allocation2 + $0x82] sm:$0xff]  ;;  %v496_v30 = vld [vmem:[#allocation2 + $0x98] sm:$0xff]  ;;  %v605_v2 = vld [vmem:[#allocation2 + $0xaa] sm:$0xff] }
  0x74   : > { %v665_v29 = vmax.f32 %v629_v60, %v631_v24  ;;  %v668_v33 = vmax.f32 %v632_v57, %v634_v18  ;;  %v1190_v36 = vpack.c.bf16 %v1173_v55, %v1172_v21  ;;  %2044 = vrot.lane.b32.xlu0 %v696_v4, %s2978_s19  ;;  %v698_v41 = vmax.f32 %v666_v26, %v634_v18  ;;  %v604_v20 = vld [vmem:[#allocation2 + $0x9a] sm:$0xff]  ;;  %v603_v32 = vld [vmem:[#allocation2 + $0x92] sm:$0xff]  ;;  %v533_v16 = vld [vmem:[#allocation2 + $0xa9] sm:$0xff] }
  0x75   : > { %2943 = vmatmul.mubr.msk.bf16.gmra.mrb[40].mxu0 %vm404_vm1, %v1531_v12  ;;  %v695_v59 = vmax.f32 %v663_v38, %v631_v24  ;;  %v566_v47 = vmax.f32 %v494_v5, %v530_v28  ;;  %v635_v6 = vmax.f32 %v563_v23, %v599_v14  ;;  %v667_v37 = vmax.f32 %v631_v24, %v633_v45  ;;  %v606_v57 = vld [vmem:[#allocation2 + $0xb2] sm:$0xff]  ;;  %v536_v25 = vld [vmem:[#allocation2 + $0xc9] sm:$0xff]  ;;  %v499_v60 = vld [vmem:[#allocation2 + $0xc0] sm:$0xff] }
  0x76   : > { %2946 = vmatprep.mubr.msk.bf16.mxu0 %vm404_vm1, %v1532_v9  ;;  %v1533_v44 = vpack.c.bf16 %v1517_v56, %v1516_v22  ;;  %v697_v12 = vmax.f32 %v665_v29, %v633_v45  ;;  %v565_v48 = vmax.f32 %v493_v42, %v529_v34  ;;  %v1174_v40 = vmax.f32 %v3647_v8, 0.0  ;;  %v535_v15 = vld [vmem:[#allocation2 + $0xc1] sm:$0xff]  ;;  %v608_v31 = vld [vmem:[#allocation2 + $0xca] sm:$0xff]  ;;  %v537_v29 = vld [vmem:[#allocation2 + $0xd9] sm:$0xff] }
  0x77   : > { %2042 = vrot.lane.b32.xlu1 %v695_v59, %s2978_s19  ;;  %2909 = vmatmul.mubr.msk.bf16.gmra.mrb[40].mxu1 %vm404_vm1, %v3630_v3  ;;  %v1175_v21 = vmax.f32 %v1143_v62, 0.0  ;;  %v700_v49 = vmax.f32 %v668_v33, %v3665_v35  ;;  %v638_v27 = vmax.f32 %v566_v47, %v602_v63  ;;  %v670_v55 = vmax.f32 %v634_v18, %v3665_v35  ;;  %v534_v3 = vld [vmem:[#allocation2 + $0xb1] sm:$0xff]  ;;  %v502_v5 = vld [vmem:[#allocation2 + $0xe0] sm:$0xff] }
  0x78   : > { %2912 = vmatprep.mubr.msk.bf16.mxu1 %vm404_vm1, %v1190_v36  ;;  %2048 = vrot.lane.b32.xlu0 %v698_v41, %s2978_s19  ;;  %v568_v22 = vmax.f32 %v496_v30, %v532_v46  ;;  %v699_v19 = vmax.f32 %v667_v37, %v635_v6  ;;  %v637_v8 = vmax.f32 %v565_v48, %v601_v7  ;;  %v538_v28 = vld [vmem:[#allocation2 + $0xe1] sm:$0xff]  ;;  %v501_v62 = vld [vmem:[#allocation2 + $0xd8] sm:$0xff]  ;;  %v503_v46 = vld [vmem:[#allocation2 + $0xf0] sm:$0xff]  ;;  %vm2413_vm9 = vcmask 156672  }
  0x79   : > { %v669_v43 = vmax.f32 %v633_v45, %v635_v6  ;;  %v567_v11 = vmax.f32 %v495_v50, %v531_v51  ;;  %v1191_v56 = vpack.c.bf16 %v1175_v21, %v1174_v40  ;;  %v702_v54 = vmax.f32 %v670_v55, %v638_v27  ;;  %v607_v14 = vld [vmem:[#allocation2 + $0xc2] sm:$0xff]  ;;  %v504_v59 = vld [vmem:[#allocation2 + $0xf8] sm:$0xff]  ;;  %v506_v7 = vld [vmem:[#allocation2 + $0x110] sm:$0xff] }
  0x7a   : > { %v640_v13 = vmax.f32 %v568_v22, %v604_v20  ;;  %v672_v58 = vmax.f32 %v3665_v35, %v638_v27  ;;  %v570_v9 = vmax.f32 %v498_v52, %v534_v3  ;;  %v671_v0 = vmax.f32 %v635_v6, %v637_v8  ;;  %v610_v36 = vld [vmem:[#allocation2 + $0xe2] sm:$0xff]  ;;  %v540_v41 = vld [vmem:[#allocation2 + $0xf9] sm:$0xff]  ;;  %v542_v50 = vld [vmem:[#allocation2 + $0x111] sm:$0xff] }
  0x7b   : > { %2046 = vrot.lane.b32.xlu1 %v697_v12, %s2978_s19  ;;  %v701_v61 = vmax.f32 %v669_v43, %v637_v8  ;;  %v639_v10 = vmax.f32 %v567_v11, %v603_v32  ;;  %v569_v1 = vmax.f32 %v497_v53, %v533_v16  ;;  %v572_v26 = vmax.f32 %v500_v39, %v536_v25  ;;  %v609_v30 = vld [vmem:[#allocation2 + $0xda] sm:$0xff]  ;;  %v505_v20 = vld [vmem:[#allocation2 + $0x108] sm:$0xff] }
  0x7c   : > { %2052 = vrot.lane.b32.xlu0 %v700_v49, %s2978_s19  ;;  %v704_v17 = vmax.f32 %v672_v58, %v640_v13  ;;  %v642_v24 = vmax.f32 %v570_v9, %v606_v57  ;;  %v674_v18 = vmax.f32 %v638_v27, %v640_v13  ;;  %v571_v23 = vmax.f32 %v499_v60, %v535_v15  ;;  %v612_v49 = vld [vmem:[#allocation2 + $0xfa] sm:$0xff]  ;;  %v541_v52 = vld [vmem:[#allocation2 + $0x109] sm:$0xff] }
  0x7d   : > { %2947 = vmatmul.mubr.msk.bf16.gmra.mrb[44].mxu0 %vm404_vm1, %v1533_v44  ;;  %v703_v4 = vmax.f32 %v671_v0, %v639_v10  ;;  %v641_v38 = vmax.f32 %v569_v1, %v605_v2  ;;  %v673_v45 = vmax.f32 %v637_v8, %v639_v10  ;;  %v644_v33 = vmax.f32 %v572_v26, %v608_v31  ;;  %v539_v44 = vld [vmem:[#allocation2 + $0xf1] sm:$0xff]  ;;  %v508_v32 = vld [vmem:[#allocation2 + $0x128] sm:$0xff]  ;;  %v507_v57 = vld [vmem:[#allocation2 + $0x120] sm:$0xff] }
  0x7e   : > { %v706_v35 = vmax.f32 %v674_v18, %v642_v24  ;;  %v676_v42 = vmax.f32 %v640_v13, %v642_v24  ;;  %v574_v34 = vmax.f32 %v502_v5, %v538_v28  ;;  %v643_v6 = vmax.f32 %v571_v23, %v607_v14  ;;  %v544_v53 = vld [vmem:[#allocation2 + $0x129] sm:$0xff]  ;;  %v543_v39 = vld [vmem:[#allocation2 + $0x121] sm:$0xff]  ;;  %v509_v31 = vld [vmem:[#allocation2 + $0x138] sm:$0xff] }
  0x7f   : > { %2050 = vrot.lane.b32.xlu1 %v699_v19, %s2978_s19  ;;  %2913 = vmatmul.mubr.msk.bf16.gmra.mrb[44].mxu1 %vm404_vm1, %v1191_v56  ;;  %v705_v47 = vmax.f32 %v673_v45, %v641_v38  ;;  %v675_v37 = vmax.f32 %v639_v10, %v641_v38  ;;  %v573_v63 = vmax.f32 %v501_v62, %v537_v29  ;;  %v611_v19 = vld [vmem:[#allocation2 + $0xf2] sm:$0xff]  ;;  %v613_v9 = vld [vmem:[#allocation2 + $0x10a] sm:$0xff]  ;;  %v510_v2 = vld [vmem:[#allocation2 + $0x140] sm:$0xff] }
  0x80   : > { %2056 = vrot.lane.b32.xlu0 %v702_v54, %s2978_s19  ;;  %v708_v12 = vmax.f32 %v676_v42, %v644_v33  ;;  %v646_v48 = vmax.f32 %v574_v34, %v610_v36  ;;  %v678_v40 = vmax.f32 %v642_v24, %v644_v33  ;;  %v576_v21 = vmax.f32 %v504_v59, %v540_v41  ;;  %v614_v56 = vld [vmem:[#allocation2 + $0x112] sm:$0xff]  ;;  %v616_v1 = vld [vmem:[#allocation2 + $0x12a] sm:$0xff]  ;;  %v546_v60 = vld [vmem:[#allocation2 + $0x141] sm:$0xff] }
  0x81   : > { %v707_v51 = vmax.f32 %v675_v37, %v643_v6  ;;  %v645_v27 = vmax.f32 %v573_v63, %v609_v30  ;;  %v677_v55 = vmax.f32 %v641_v38, %v643_v6  ;;  %v575_v22 = vmax.f32 %v503_v46, %v539_v44  ;;  %v615_v26 = vld [vmem:[#allocation2 + $0x122] sm:$0xff]  ;;  %v545_v5 = vld [vmem:[#allocation2 + $0x139] sm:$0xff]  ;;  %v511_v36 = vld [vmem:[#allocation2 + $0x150] sm:$0xff] }
  0x82   : > { %v710_v3 = vmax.f32 %v678_v40, %v646_v48  ;;  %v648_v8 = vmax.f32 %v576_v21, %v612_v49  ;;  %v680_v43 = vmax.f32 %v644_v33, %v646_v48  ;;  %v578_v11 = vmax.f32 %v506_v7, %v542_v50  ;;  %v618_v23 = vld [vmem:[#allocation2 + $0x142] sm:$0xff]  ;;  %v512_v14 = vld [vmem:[#allocation2 + $0x158] sm:$0xff]  ;;  %v514_v30 = vld [vmem:[#allocation2 + $0x170] sm:$0xff] }
  0x83   : > { %2054 = vrot.lane.b32.xlu1 %v701_v61, %s2978_s19  ;;  %v709_v16 = vmax.f32 %v677_v55, %v645_v27  ;;  %v647_v54 = vmax.f32 %v575_v22, %v611_v19  ;;  %v679_v13 = vmax.f32 %v643_v6, %v645_v27  ;;  %v577_v58 = vmax.f32 %v505_v20, %v541_v52  ;;  %v548_v62 = vld [vmem:[#allocation2 + $0x159] sm:$0xff]  ;;  %v547_v59 = vld [vmem:[#allocation2 + $0x151] sm:$0xff]  ;;  %v513_v49 = vld [vmem:[#allocation2 + $0x168] sm:$0xff] }
  0x84   : > { %2060 = vrot.lane.b32.xlu0 %v704_v17, %s2978_s19  ;;  %v712_v25 = vmax.f32 %v680_v43, %v648_v8  ;;  %v650_v61 = vmax.f32 %v578_v11, %v614_v56  ;;  %v682_v10 = vmax.f32 %v646_v48, %v648_v8  ;;  %v580_v0 = vmax.f32 %v508_v32, %v544_v53  ;;  %v617_v34 = vld [vmem:[#allocation2 + $0x13a] sm:$0xff]  ;;  %v550_v46 = vld [vmem:[#allocation2 + $0x171] sm:$0xff]  ;;  %v549_v7 = vld [vmem:[#allocation2 + $0x169] sm:$0xff] }
  0x85   : > { %v711_v15 = vmax.f32 %v679_v13, %v647_v54  ;;  %v649_v17 = vmax.f32 %v577_v58, %v613_v9  ;;  %v681_v24 = vmax.f32 %v645_v27, %v647_v54  ;;  %v579_v18 = vmax.f32 %v507_v57, %v543_v39  ;;  %v620_v63 = vld [vmem:[#allocation2 + $0x15a] sm:$0xff]  ;;  %v619_v21 = vld [vmem:[#allocation2 + $0x152] sm:$0xff]  ;;  %v516_v19 = vld [vmem:[#allocation2 + $0x188] sm:$0xff] }
  0x86   : > { %v714_v28 = vmax.f32 %v682_v10, %v650_v61  ;;  %v684_v38 = vmax.f32 %v648_v8, %v650_v61  ;;  %v582_v45 = vmax.f32 %v510_v2, %v546_v60  ;;  %v581_v42 = vmax.f32 %v509_v31, %v545_v5  ;;  %v622_v22 = vld [vmem:[#allocation2 + $0x172] sm:$0xff]  ;;  %v552_v20 = vld [vmem:[#allocation2 + $0x189] sm:$0xff]  ;;  %v515_v56 = vld [vmem:[#allocation2 + $0x180] sm:$0xff] }
  0x87   : > { %2058 = vrot.lane.b32.xlu1 %v703_v4, %s2978_s19  ;;  %v652_v4 = vmax.f32 %v580_v0, %v616_v1  ;;  %v713_v29 = vmax.f32 %v681_v24, %v649_v17  ;;  %v683_v33 = vmax.f32 %v647_v54, %v649_v17  ;;  %v584_v37 = vmax.f32 %v512_v14, %v548_v62  ;;  %v621_v11 = vld [vmem:[#allocation2 + $0x16a] sm:$0xff]  ;;  %v551_v32 = vld [vmem:[#allocation2 + $0x181] sm:$0xff] }
  0x88   : > { %2064 = vrot.lane.b32.xlu0 %v706_v35, %s2978_s19  ;;  %v651_v35 = vmax.f32 %v579_v18, %v615_v26  ;;  %v583_v40 = vmax.f32 %v511_v36, %v547_v59  ;;  %v586_v55 = vmax.f32 %v514_v30, %v550_v46  ;;  %v585_v43 = vmax.f32 %v513_v49, %v549_v7  ;;  %v624_v58 = vld [vmem:[#allocation2 + $0x18a] sm:$0xff] }
  0x89   : > { %v716_v41 = vmax.f32 %v684_v38, %v652_v4  ;;  %v686_v6 = vmax.f32 %v650_v61, %v652_v4  ;;  %v588_v13 = vmax.f32 %v516_v19, %v552_v20  ;;  %v623_v61 = vld [vmem:[#allocation2 + $0x182] sm:$0xff] }
  0x8a   : > { %v715_v44 = vmax.f32 %v683_v33, %v651_v35  ;;  %v685_v48 = vmax.f32 %v649_v17, %v651_v35  ;;  %v3704_v57 = vmax.f32 %v585_v43, %v621_v11  ;;  %v3800_v11 = vld [vmem:[%s4489_s8] ss:$0 sm:$0xff] }
  0x8b   : > { %2062 = vrot.lane.b32.xlu1 %v705_v47, %s2978_s19  ;;  %v654_v47 = vmax.f32 %v582_v45, %v618_v23  ;;  %v3708_v0 = vmax.f32 %v588_v13, %v624_v58 }
  0x8c   : > { %2068 = vrot.lane.b32.xlu0 %v708_v12, %s2978_s19  ;;  %v653_v12 = vmax.f32 %v581_v42, %v617_v34 }
  0x8d   : > { %v718_v50 = vmax.f32 %v686_v6, %v654_v47  ;;  %v688_v27 = vmax.f32 %v652_v4, %v654_v47 }
  0x8e   : > { %v717_v52 = vmax.f32 %v685_v48, %v653_v12  ;;  %v687_v8 = vmax.f32 %v651_v35, %v653_v12 }
  0x8f   : > { %2066 = vrot.lane.b32.xlu1 %v707_v51, %s2978_s19  ;;  %v656_v51 = vmax.f32 %v584_v37, %v620_v63 }
  0x90   : > { %2072 = vrot.lane.b32.xlu0 %v710_v3, %s2978_s19  ;;  %v655_v3 = vmax.f32 %v583_v40, %v619_v21 }
  0x91   : > { %v720_v53 = vmax.f32 %v688_v27, %v656_v51  ;;  %v690_v54 = vmax.f32 %v654_v47, %v656_v51 }
  0x92   : > { %v719_v9 = vmax.f32 %v687_v8, %v655_v3  ;;  %v689_v39 = vmax.f32 %v653_v12, %v655_v3 }
  0x93   : > { %2070 = vrot.lane.b32.xlu1 %v709_v16, %s2978_s19  ;;  %v3701_v16 = vmax.f32 %v586_v55, %v622_v22 }
  0x94   : > { %2076 = vrot.lane.b32.xlu0 %v712_v25, %s2978_s19  ;;  %v587_v25 = vmax.f32 %v515_v56, %v551_v32  ;;  %v721_v2 = vmax.f32 %v689_v39, %v3704_v57 }
  0x95   : > { %v722_v10 = vmax.f32 %v690_v54, %v3701_v16  ;;  %v692_v1 = vmax.f32 %v656_v51, %v3701_v16 }
  0x96   : > { %v3713_v60 = vmax.f32 %v587_v25, %v623_v61  ;;  %v3815_v61 = vld [vmem:[%s4488_s7] ss:$0 sm:$0xff] }
  0x97   : > { %2074 = vrot.lane.b32.xlu1 %v711_v15, %s2978_s19  ;;  %v691_v15 = vmax.f32 %v655_v3, %v3704_v57  ;;  %v724_v17 = vmax.f32 %v692_v1, %v3708_v0 }
  0x98   : > { %2080 = vrot.lane.b32.xlu0 %v714_v28, %s2978_s19  ;;  %v3733_v28 = vld [vmem:[%s4487_s6] ss:$0 sm:$0xff] }
  0x99   : > { %v723_v24 = vmax.f32 %v691_v15, %v3713_v60 }
  0x9b   : > { %2078 = vrot.lane.b32.xlu1 %v713_v29, %s2978_s19 }
  0x9c   : > { %2084 = vrot.lane.b32.xlu0 %v716_v41, %s2978_s19 }
  0x9f   : > { %2082 = vrot.lane.b32.xlu1 %v715_v44, %s2978_s19 }
  0xa0   : > { %2088 = vrot.lane.b32.xlu0 %v718_v50, %s2978_s19 }
  0xa3   : > { %2086 = vrot.lane.b32.xlu1 %v717_v52, %s2978_s19 }
  0xa4   : > { %2092 = vrot.lane.b32.xlu0 %v720_v53, %s2978_s19 }
  0xa7   : > { %2090 = vrot.lane.b32.xlu1 %v719_v9, %s2978_s19 }
  0xa8   : > { %2096 = vrot.lane.b32.xlu0 %v722_v10, %s2978_s19 }
  0xab   : > { %2094 = vrot.lane.b32.xlu1 %v721_v2, %s2978_s19 }
  0xac   : > { %2100 = vrot.lane.b32.xlu0 %v724_v17, %s2978_s19 }
  0xaf   : > { %2098 = vrot.lane.b32.xlu1 %v723_v24, %s2978_s19 }
  0xf8   : > { %v3722_v18 = vpop.f32.mrb[0].mxu0 }
  0xf9   : > { %v3724_v26 = vpop.f32.mrb[1].mxu0 }
  0xfa   : > { %v3726_v31 = vpop.f32.mrb[2].mxu0  ;;  %v3735_v4 = vpop.f32.mrb[0].mxu1 }
  0xfb   : > { %v3728_v5 = vpop.f32.mrb[3].mxu0  ;;  %4492 = vst [vmem:[#allocation3_spill] sm:$0xff] %v3735_v4  ;;  %v1007_v38 = vpop.f32.mrb[1].mxu1 }
  0xfc   : > { %v3738_v45 = vadd.f32 %v3733_v28, %v1007_v38  ;;  %v2869_v23 = vpop.f32.mrb[2].mxu1 }
  0xfd   : > { %v3741_v14 = vadd.f32 %v2869_v23, %v3733_v28  ;;  %v1010_v62 = vpop.f32.mrb[3].mxu1 }
  0xfe   : > { %4493 = vst [vmem:[#allocation4_spill] sm:$0xff] %v3738_v45  ;;  %v3746_v35 = vadd.f32 %v3733_v28, %v1010_v62 }
  0xff   : > { %4494 = vst [vmem:[#allocation5_spill] sm:$0xff] %v3741_v14 }
 0x100   : > { %v3743_v29 = vpop.f32.mrb[4].mxu0  ;;  %4495 = vst [vmem:[#allocation6_spill] sm:$0xff] %v3746_v35 }
 0x101   : > { %v3748_v33 = vpop.f32.mrb[5].mxu0 }
 0x102   : > { %v3750_v42 = vpop.f32.mrb[6].mxu0  ;;  %v2872_v36 = vpop.f32.mrb[4].mxu1 }
 0x103   : > { %v3752_v34 = vpop.f32.mrb[7].mxu0  ;;  %v3755_v59 = vadd.f32 %v2872_v36, %v3733_v28  ;;  %v1023_v41 = vpop.f32.mrb[5].mxu1 }
 0x104   : > { %4496 = vst [vmem:[#allocation7_spill] sm:$0xff] %v3752_v34  ;;  %v3758_v47 = vadd.f32 %v3733_v28, %v1023_v41  ;;  %v2873_v6 = vpop.f32.mrb[6].mxu1 }
 0x105   : > { %4497 = vst [vmem:[#allocation8_spill] sm:$0xff] %v3755_v59  ;;  %v3761_v37 = vadd.f32 %v2873_v6, %v3733_v28  ;;  %v1026_v63 = vpop.f32.mrb[7].mxu1 }
 0x106   : > { %4498 = vst [vmem:[#allocation9_spill] sm:$0xff] %v3758_v47  ;;  %v3766_v46 = vadd.f32 %v3733_v28, %v1026_v63 }
 0x107   : > { %4499 = vst [vmem:[#allocation10_spill] sm:$0xff] %v3761_v37 }
 0x108   : > { %v3763_v30 = vpop.f32.mrb[8].mxu0  ;;  %4500 = vst [vmem:[#allocation11_spill] sm:$0xff] %v3766_v46 }
 0x109   : > { %v3768_v44 = vpop.f32.mrb[9].mxu0 }
 0x10a   : > { %4501 = vst [vmem:[#allocation12_spill] sm:$0xff] %v3768_v44  ;;  %v3770_v12 = vpop.f32.mrb[10].mxu0  ;;  %v2876_v40 = vpop.f32.mrb[8].mxu1 }
 0x10b   : > { %4502 = vst [vmem:[#allocation13_spill] sm:$0xff] %v3770_v12  ;;  %v3772_v48 = vpop.f32.mrb[11].mxu0  ;;  %v3775_v21 = vadd.f32 %v2876_v40, %v3733_v28  ;;  %v1039_v49 = vpop.f32.mrb[9].mxu1 }
 0x10c   : > { %4503 = vst [vmem:[#allocation14_spill] sm:$0xff] %v3772_v48  ;;  %v3778_v7 = vadd.f32 %v3733_v28, %v1039_v49  ;;  %v2877_v50 = vpop.f32.mrb[10].mxu1 }
 0x10d   : > { %4504 = vst [vmem:[#allocation15_spill] sm:$0xff] %v3775_v21  ;;  %v3781_v51 = vadd.f32 %v2877_v50, %v3733_v28  ;;  %v1042_v27 = vpop.f32.mrb[11].mxu1 }
 0x10e   : > { %4505 = vst [vmem:[#allocation16_spill] sm:$0xff] %v3778_v7  ;;  %v3786_v22 = vadd.f32 %v3733_v28, %v1042_v27 }
 0x10f   : > { %4506 = vst [vmem:[#allocation17_spill] sm:$0xff] %v3781_v51 }
 0x110   : > { %v3783_v55 = vpop.f32.mrb[12].mxu0  ;;  %4508 = vst [vmem:[#allocation19_spill] sm:$0xff] %v3786_v22 }
 0x111   : > { %4507 = vst [vmem:[#allocation18_spill] sm:$0xff] %v3783_v55  ;;  %v3788_v19 = vpop.f32.mrb[13].mxu0 }
 0x112   : > { %4509 = vst [vmem:[#allocation20_spill] sm:$0xff] %v3788_v19  ;;  %v3790_v20 = vpop.f32.mrb[14].mxu0  ;;  %v2880_v3 = vpop.f32.mrb[12].mxu1 }
 0x113   : > { %4510 = vst [vmem:[#allocation21_spill] sm:$0xff] %v3790_v20  ;;  %v3792_v52 = vpop.f32.mrb[15].mxu0  ;;  %v3795_v8 = vadd.f32 %v2880_v3, %v3733_v28  ;;  %v1055_v43 = vpop.f32.mrb[13].mxu1 }
 0x114   : > { %4511 = vst [vmem:[#allocation22_spill] sm:$0xff] %v3792_v52  ;;  %v3803_v56 = vadd.f32 %v3733_v28, %v1055_v43  ;;  %v2881_v32 = vpop.f32.mrb[14].mxu1 }
 0x115   : > { %4512 = vst [vmem:[#allocation23_spill] sm:$0xff] %v3795_v8  ;;  %v3806_v53 = vadd.f32 %v2881_v32, %v3733_v28  ;;  %v1058_v54 = vpop.f32.mrb[15].mxu1 }
 0x116   : > { %4513 = vst [vmem:[#allocation24_spill] sm:$0xff] %v3803_v56  ;;  %v3809_v58 = vadd.f32 %v3733_v28, %v1058_v54 }
 0x117   : > { %4514 = vst [vmem:[#allocation25_spill] sm:$0xff] %v3806_v53 }
 0x118   : > { %v2920_v13 = vpop.f32.mrb[16].mxu0  ;;  %4515 = vst [vmem:[#allocation26_spill] sm:$0xff] %v3809_v58 }
 0x119   : > { %v1636_v9 = vadd.f32 %v2920_v13, %v3800_v11  ;;  %v1627_v39 = vpop.f32.mrb[17].mxu0 }
 0x11a   : > { %v2921_v25 = vpop.f32.mrb[18].mxu0  ;;  %v2886_v1 = vpop.f32.mrb[16].mxu1  ;;  %v1628_v2 = vadd.f32 %v3800_v11, %v1627_v39 }
 0x11b   : > { %v1630_v10 = vpop.f32.mrb[19].mxu0  ;;  %1918 = vrot.lane.b32.xlu1 %v1636_v9, %s2979_s26  ;;  %v1294_v15 = vadd.f32 %v2886_v1, %v3815_v61  ;;  %v1285_v17 = vpop.f32.mrb[17].mxu1  ;;  %v1639_v9 = vadd.f32 %v2921_v25, %v3800_v11 }
 0x11c   : > { %v2887_v24 = vpop.f32.mrb[18].mxu1  ;;  %v1631_v62 = vadd.f32 %v3800_v11, %v1630_v10  ;;  %v1286_v41 = vadd.f32 %v3815_v61, %v1285_v17 }
 0x11d   : > { %v1288_v38 = vpop.f32.mrb[19].mxu1  ;;  %1790 = vrot.lane.b32.xlu0 %v1294_v15, %s2980_s27  ;;  %v1297_v49 = vadd.f32 %v2887_v24, %v3815_v61 }
 0x11f   : > { %1914 = vrot.lane.b32.xlu1 %v1628_v2, %s2979_s26  ;;  %v1289_v2 = vadd.f32 %v3815_v61, %v1288_v38 }
 0x120   : > { %v2924_v23 = vpop.f32.mrb[20].mxu0 }
 0x121   : > { %v1643_v36 = vpop.f32.mrb[21].mxu0  ;;  %1786 = vrot.lane.b32.xlu0 %v1286_v41, %s2980_s27  ;;  %v1652_v32 = vadd.f32 %v2924_v23, %v3800_v11 }
 0x122   : > { %v2925_v6 = vpop.f32.mrb[22].mxu0  ;;  %v2890_v40 = vpop.f32.mrb[20].mxu1 }
 0x123   : > { %1916 = vrot.lane.b32.xlu1 %v1631_v62, %s2979_s26  ;;  %v1646_v63 = vpop.f32.mrb[23].mxu0  ;;  %v1310_v50 = vadd.f32 %v2890_v40, %v3815_v61  ;;  %v1301_v27 = vpop.f32.mrb[21].mxu1  ;;  %v1644_v40 = vadd.f32 %v3800_v11, %v1643_v36 }
 0x124   : > { %v2891_v3 = vpop.f32.mrb[22].mxu1  ;;  %v1302_v15 = vadd.f32 %v3815_v61, %v1301_v27 }
 0x125   : > { %1792 = vrot.lane.b32.xlu0 %v1297_v49, %s2980_s27  ;;  %v1304_v43 = vpop.f32.mrb[23].mxu1  ;;  %v1313_v41 = vadd.f32 %v2891_v3, %v3815_v61 }
 0x126   : > { %v1305_v58 = vadd.f32 %v3815_v61, %v1304_v43  ;;  %v1647_v43 = vadd.f32 %v3800_v11, %v1646_v63 }
 0x127   : > { %1798 = vrot.lane.b32.xlu1 %v1310_v50, %s2980_s27  ;;  %v3854_v50 = vpop.permute.xlu1 %2042 }
 0x128   : > { %v2928_v54 = vpop.f32.mrb[24].mxu0 }
 0x129   : > { %v3831_v13 = vpop.f32.mrb[25].mxu0  ;;  %1920 = vrot.lane.b32.xlu0 %v1639_v9, %s2979_s26 }
 0x12a   : > { %v3834_v39 = vpop.f32.mrb[26].mxu0  ;;  %v2894_v1 = vpop.f32.mrb[24].mxu1  ;;  %v1660_v37 = vadd.f32 %v3800_v11, %v3831_v13 }
 0x12b   : > { %v3836_v10 = vpop.f32.mrb[27].mxu0  ;;  %1926 = vrot.lane.b32.xlu1 %v1652_v32, %s2979_s26  ;;  %v1317_v17 = vpop.f32.mrb[25].mxu1  ;;  %v1326_v27 = vadd.f32 %v2894_v1, %v3815_v61  ;;  %v1671_v35 = vadd.f32 %v3834_v39, %v3800_v11 }
 0x12c   : > { %v2895_v24 = vpop.f32.mrb[26].mxu1 }
 0x12d   : > { %1788 = vrot.lane.b32.xlu0 %v1289_v2, %s2980_s27  ;;  %v3844_v25 = vpop.f32.mrb[27].mxu1  ;;  %v1655_v2 = vadd.f32 %v2925_v6, %v3800_v11  ;;  %v1329_v21 = vadd.f32 %v2895_v24, %v3815_v61 }
 0x12f   : > { %1794 = vrot.lane.b32.xlu1 %v1302_v15, %s2980_s27  ;;  %v3867_v15 = vpop.permute.xlu0 %2044 }
 0x130   : > { %v3846_v23 = vpop.f32.mrb[28].mxu0 }
 0x131   : > { %v3848_v62 = vpop.f32.mrb[29].mxu0  ;;  %1800 = vrot.lane.b32.xlu0 %v1313_v41, %s2980_s27  ;;  %v1668_v41 = vadd.f32 %v2928_v54, %v3800_v11 }
 0x132   : > { %v3852_v49 = vpop.f32.mrb[30].mxu0  ;;  %v2898_v9 = vpop.f32.mrb[28].mxu1 }
 0x133   : > { %v1678_v38 = vpop.f32.mrb[31].mxu0  ;;  %1922 = vrot.lane.b32.xlu1 %v1644_v40, %s2979_s26  ;;  %v3863_v3 = vpop.f32.mrb[29].mxu1 }
 0x134   : > { %v3860_v32 = vadd.f32 %v3800_v11, %v1678_v38  ;;  %v3865_v36 = vpop.f32.mrb[30].mxu1  ;;  %v3874_v38 = vpop.permute.xlu1 %2046 }
 0x135   : > { %1928 = vrot.lane.b32.xlu0 %v1655_v2, %s2979_s26  ;;  %v3872_v1 = vpop.f32.mrb[31].mxu1  ;;  %v3893_v22 = vpop.permute.xlu0 %2048 }
 0x137   : > { %1806 = vrot.lane.b32.xlu1 %v1326_v27, %s2980_s27 }
 0x138   : > { %v2936_v40 = vpop.f32.mrb[32].mxu0  ;;  %v3900_v46 = vpop.permute.xlu1 %2050 }
 0x139   : > { %v3877_v53 = vadd.f32 %v2936_v40, %v3800_v11  ;;  %v1691_v6 = vpop.f32.mrb[33].mxu0  ;;  %1796 = vrot.lane.b32.xlu0 %v1305_v58, %s2980_s27 }
 0x13a   : > { %v3881_v8 = vadd.f32 %v3800_v11, %v1691_v6  ;;  %v2937_v56 = vpop.f32.mrb[34].mxu0  ;;  %v3891_v40 = vpop.f32.mrb[32].mxu1  ;;  %v1318_v6 = vadd.f32 %v3815_v61, %v1317_v17 }
 0x13b   : > { %v3884_v2 = vadd.f32 %v2937_v56, %v3800_v11  ;;  %v1694_v54 = vpop.f32.mrb[35].mxu0  ;;  %1934 = vrot.lane.b32.xlu1 %v1668_v41, %s2979_s26  ;;  %v1349_v51 = vpop.f32.mrb[33].mxu1 }
 0x13c   : > { %v3889_v27 = vadd.f32 %v3800_v11, %v1694_v54  ;;  %v3898_v56 = vadd.f32 %v3815_v61, %v1349_v51  ;;  %v2903_v7 = vpop.f32.mrb[34].mxu1  ;;  %v3930_v13 = vpop.permute.xlu1 %2054 }
 0x13d   : > { %1924 = vrot.lane.b32.xlu0 %v1647_v43, %s2979_s26  ;;  %v3905_v58 = vadd.f32 %v2903_v7, %v3815_v61  ;;  %v1352_v41 = vpop.f32.mrb[35].mxu1  ;;  %v3919_v7 = vpop.permute.xlu0 %2052 }
 0x13e   : > { %v3908_v63 = vadd.f32 %v3815_v61, %v1352_v41  ;;  %4516 = vst [vmem:[#allocation27_spill] sm:$0xff] %v3919_v7 }
 0x13f   : > { %1802 = vrot.lane.b32.xlu1 %v1318_v6, %s2980_s27 }
 0x140   : > { %v2940_v54 = vpop.f32.mrb[36].mxu0 }
 0x141   : > { %v3911_v17 = vadd.f32 %v2940_v54, %v3800_v11  ;;  %v1707_v51 = vpop.f32.mrb[37].mxu0  ;;  %1808 = vrot.lane.b32.xlu0 %v1329_v21, %s2980_s27  ;;  %v1342_v54 = vadd.f32 %v2898_v9, %v3815_v61  ;;  %v3947_v45 = vpop.permute.xlu0 %2056 }
 0x142   : > { %v3917_v43 = vadd.f32 %v3800_v11, %v1707_v51  ;;  %v2941_v6 = vpop.f32.mrb[38].mxu0  ;;  %v2906_v51 = vpop.f32.mrb[36].mxu1 }
 0x143   : > { %v3922_v47 = vadd.f32 %v2941_v6, %v3800_v11  ;;  %v1710_v41 = vpop.f32.mrb[39].mxu0  ;;  %1930 = vrot.lane.b32.xlu1 %v1660_v37, %s2979_s26  ;;  %v3935_v59 = vadd.f32 %v2906_v51, %v3815_v61  ;;  %v1365_v6 = vpop.f32.mrb[37].mxu1  ;;  %v1684_v37 = vadd.f32 %v3846_v23, %v3800_v11 }
 0x144   : > { %v3928_v24 = vadd.f32 %v3800_v11, %v1710_v41  ;;  %v3938_v14 = vadd.f32 %v3815_v61, %v1365_v6  ;;  %v2907_v21 = vpop.f32.mrb[38].mxu1 }
 0x145   : > { %1936 = vrot.lane.b32.xlu0 %v1671_v35, %s2979_s26  ;;  %v3945_v9 = vadd.f32 %v2907_v21, %v3815_v61  ;;  %v1368_v41 = vpop.f32.mrb[39].mxu1  ;;  %v1321_v35 = vadd.f32 %v3815_v61, %v3844_v25  ;;  %v3960_v21 = vpop.permute.xlu1 %2058  ;;  %v1663_v25 = vadd.f32 %v3800_v11, %v3836_v10 }
 0x146   : > { %v3950_v51 = vadd.f32 %v3815_v61, %v1368_v41  ;;  %4517 = vst [vmem:[#allocation28_spill] sm:$0xff] %v3960_v21 }
 0x147   : > { %1814 = vrot.lane.b32.xlu1 %v1342_v54, %s2980_s27 }
 0x148   : > { %v2944_v39 = vpop.f32.mrb[40].mxu0 }
 0x149   : > { %v3953_v6 = vadd.f32 %v2944_v39, %v3800_v11  ;;  %v1723_v52 = vpop.f32.mrb[41].mxu0  ;;  %1804 = vrot.lane.b32.xlu0 %v1321_v35, %s2980_s27  ;;  %v3985_v21 = vpop.permute.xlu1 %2062 }
 0x14a   : > { %v3958_v23 = vadd.f32 %v3800_v11, %v1723_v52  ;;  %v2945_v54 = vpop.f32.mrb[42].mxu0  ;;  %v2910_v39 = vpop.f32.mrb[40].mxu1  ;;  %v1334_v52 = vadd.f32 %v3815_v61, %v3863_v3  ;;  %4519 = vst [vmem:[#allocation30_spill] sm:$0xff] %v3985_v21 }
 0x14b   : > { %v3963_v4 = vadd.f32 %v2945_v54, %v3800_v11  ;;  %v1726_v20 = vpop.f32.mrb[43].mxu0  ;;  %1942 = vrot.lane.b32.xlu1 %v1684_v37, %s2979_s26  ;;  %v1390_v19 = vadd.f32 %v2910_v39, %v3815_v61  ;;  %v1381_v48 = vpop.f32.mrb[41].mxu1 }
 0x14c   : > { %v3968_v41 = vadd.f32 %v3800_v11, %v1726_v20  ;;  %v3975_v54 = vpop.permute.xlu0 %2060  ;;  %v3978_v55 = vadd.f32 %v3815_v61, %v1381_v48  ;;  %v2911_v35 = vpop.f32.mrb[42].mxu1 }
 0x14d   : > { %4518 = vst [vmem:[#allocation29_spill] sm:$0xff] %v3975_v54  ;;  %1932 = vrot.lane.b32.xlu0 %v1663_v25, %s2979_s26  ;;  %v3983_v20 = vadd.f32 %v2911_v35, %v3815_v61  ;;  %v1384_v10 = vpop.f32.mrb[43].mxu1  ;;  %v1345_v54 = vadd.f32 %v3865_v36, %v3815_v61  ;;  %v1676_v25 = vadd.f32 %v3800_v11, %v3848_v62  ;;  %v4015_v21 = vpop.permute.xlu1 %2066 }
 0x14e   : > { %v3988_v3 = vadd.f32 %v3815_v61, %v1384_v10  ;;  %v1358_v10 = vadd.f32 %v3891_v40, %v3815_v61  ;;  %v1687_v62 = vadd.f32 %v3852_v49, %v3800_v11  ;;  %v1337_v49 = vadd.f32 %v3815_v61, %v3872_v1 }
 0x14f   : > { %1810 = vrot.lane.b32.xlu1 %v1334_v52, %s2980_s27 }
 0x150   : > { %v2948_v37 = vpop.f32.mrb[44].mxu0 }
 0x151   : > { %v3991_v39 = vadd.f32 %v2948_v37, %v3800_v11  ;;  %v1739_v48 = vpop.f32.mrb[45].mxu0  ;;  %1816 = vrot.lane.b32.xlu0 %v1345_v54, %s2980_s27 }
 0x152   : > { %v3998_v52 = vadd.f32 %v3800_v11, %v1739_v48  ;;  %v2949_v35 = vpop.f32.mrb[46].mxu0  ;;  %v2914_v37 = vpop.f32.mrb[44].mxu1 }
 0x153   : > { %v4001_v12 = vadd.f32 %v2949_v35, %v3800_v11  ;;  %v1742_v7 = vpop.f32.mrb[47].mxu0  ;;  %1938 = vrot.lane.b32.xlu1 %v1676_v25, %s2979_s26  ;;  %v4012_v48 = vpop.permute.xlu0 %2064  ;;  %v1406_v35 = vadd.f32 %v2914_v37, %v3815_v61 }
 0x154   : > { %v4008_v36 = vadd.f32 %v3800_v11, %v1742_v7  ;;  %v1397_v44 = vpop.f32.mrb[45].mxu1  ;;  %v4033_v25 = vpop.permute.xlu1 %2070 }
 0x155   : > { %v1398_v54 = vadd.f32 %v3815_v61, %v1397_v44  ;;  %v2915_v34 = vpop.f32.mrb[46].mxu1  ;;  %1944 = vrot.lane.b32.xlu0 %v1687_v62, %s2979_s26 }
 0x156   : > { %v4021_v40 = vadd.f32 %v2915_v34, %v3815_v61  ;;  %v1400_v7 = vpop.f32.mrb[47].mxu1 }
 0x157   : > { %1822 = vrot.lane.b32.xlu1 %v1358_v10, %s2980_s27  ;;  %v4024_v11 = vadd.f32 %v3815_v61, %v1400_v7  ;;  %v4031_v44 = vpop.permute.xlu0 %2068 }
 0x158   : > { %v4041_v10 = vpop.permute.xlu1 %2074 }
 0x159   : > { %1812 = vrot.lane.b32.xlu0 %v1337_v49, %s2980_s27 }
 0x15b   : > { %1950 = vrot.lane.b32.xlu1 %v3877_v53, %s2979_s26  ;;  %v4039_v34 = vpop.permute.xlu0 %2072 }
 0x15c   : > { %v4053_v61 = vpop.permute.xlu1 %2078 }
 0x15d   : > { %1940 = vrot.lane.b32.xlu0 %v3860_v32, %s2979_s26 }
 0x15f   : > { %1818 = vrot.lane.b32.xlu1 %v3898_v56, %s2980_s27  ;;  %v4051_v53 = vpop.permute.xlu0 %2076 }
 0x160   : > { %v4061_v1 = vpop.permute.xlu1 %2082 }
 0x161   : > { %1824 = vrot.lane.b32.xlu0 %v3905_v58, %s2980_s27  ;;  %v553_v58 = vld [vmem:[#allocation2 + $0x199] sm:$0xff] }
 0x163   : > { %1946 = vrot.lane.b32.xlu1 %v3881_v8, %s2979_s26  ;;  %v4059_v32 = vpop.permute.xlu0 %2080 }
 0x164   : > { %v4073_v8 = vpop.permute.xlu1 %2086 }
 0x165   : > { %1952 = vrot.lane.b32.xlu0 %v3884_v2, %s2979_s26 }
 0x167   : > { %1830 = vrot.lane.b32.xlu1 %v3935_v59, %s2980_s27  ;;  %v4071_v59 = vpop.permute.xlu0 %2084 }
 0x169   : > { %1820 = vrot.lane.b32.xlu0 %v3908_v63, %s2980_s27 }
 0x16b   : > { %1958 = vrot.lane.b32.xlu1 %v3911_v17, %s2979_s26  ;;  %v4078_v2 = vpop.permute.xlu0 %2088 }
 0x16d   : > { %1948 = vrot.lane.b32.xlu0 %v3889_v27, %s2979_s26  ;;  %v4080_v27 = vpop.permute.xlu1 %2090 }
 0x16f   : > { %1826 = vrot.lane.b32.xlu1 %v3938_v14, %s2980_s27  ;;  %v4090_v14 = vpop.permute.xlu0 %2092 }
 0x171   : > { %1832 = vrot.lane.b32.xlu0 %v3945_v9, %s2980_s27  ;;  %v518_v9 = vld [vmem:[#allocation2 + $0x1a0] sm:$0xff] }
 0x173   : > { %1954 = vrot.lane.b32.xlu1 %v3917_v43, %s2979_s26  ;;  %v625_v43 = vld [vmem:[#allocation2 + $0x19a] sm:$0xff] }
 0x175   : > { %1960 = vrot.lane.b32.xlu0 %v3922_v47, %s2979_s26  ;;  %v4092_v47 = vpop.permute.xlu1 %2094 }
 0x177   : > { %1838 = vrot.lane.b32.xlu1 %v1390_v19, %s2980_s27  ;;  %v4098_v19 = vpop.permute.xlu0 %2096 }
 0x179   : > { %1828 = vrot.lane.b32.xlu0 %v3950_v51, %s2980_s27  ;;  %v4100_v56 = vpop.permute.xlu1 %2098  ;;  %v554_v51 = vld [vmem:[#allocation2 + $0x1a1] sm:$0xff] }
 0x17b   : > { %1966 = vrot.lane.b32.xlu1 %v3953_v6, %s2979_s26  ;;  %v4107_v17 = vpop.permute.xlu0 %2100 }
 0x17d   : > { %1956 = vrot.lane.b32.xlu0 %v3928_v24, %s2979_s26 }
 0x17f   : > { %1834 = vrot.lane.b32.xlu1 %v3978_v55, %s2980_s27  ;;  %v517_v55 = vld [vmem:[#allocation2 + $0x198] sm:$0xff] }
 0x180   : > { %v589_v63 = vmax.f32 %v517_v55, %v553_v58 }
 0x181   : > { %1840 = vrot.lane.b32.xlu0 %v3983_v20, %s2980_s27  ;;  %v952_v20 = vadd.f32 %v3722_v18, %v3733_v28  ;;  %v694_v18 = vmax.f32 %v3701_v16, %v3708_v0 }
 0x182   : > { %v661_v6 = vmax.f32 %v589_v63, %v625_v43  ;;  %v955_v63 = vadd.f32 %v3726_v31, %v3733_v28  ;;  %v968_v43 = vadd.f32 %v3743_v29, %v3733_v28 }
 0x183   : > { %1962 = vrot.lane.b32.xlu1 %v3958_v23, %s2979_s26  ;;  %v590_v23 = vmax.f32 %v518_v9, %v554_v51 }
 0x185   : > { %1968 = vrot.lane.b32.xlu0 %v3963_v4, %s2979_s26  ;;  %v693_v4 = vmax.f32 %v3704_v57, %v3713_v60 }
 0x187   : > { %1846 = vrot.lane.b32.xlu1 %v1406_v35, %s2980_s27  ;;  %v725_v35 = vmax.f32 %v693_v4, %v661_v6  ;;  %v947_v6 = vadd.f32 %v3733_v28, %v3728_v5 }
 0x189   : > { %1836 = vrot.lane.b32.xlu0 %v3988_v3, %s2980_s27 }
 0x18b   : > { %1974 = vrot.lane.b32.xlu1 %v3991_v39, %s2979_s26  ;;  %v626_v39 = vld [vmem:[#allocation2 + $0x1a2] sm:$0xff] }
 0x18c   : > { %v662_v60 = vmax.f32 %v590_v23, %v626_v39 }
 0x18d   : > { %v1919_v24 = vpop.permute.xlu1 %1918  ;;  %1964 = vrot.lane.b32.xlu0 %v3968_v41, %s2979_s26  ;;  %v944_v41 = vadd.f32 %v3733_v28, %v3724_v26 }
 0x18e   : > { %v726_v0 = vmax.f32 %v694_v18, %v662_v60 }
 0x18f   : > { %1842 = vrot.lane.b32.xlu1 %v1398_v54, %s2980_s27  ;;  %v1791_v37 = vpop.permute.xlu0 %1790 }
 0x190   : > { %v2140_v62 = vsel %vm404_vm1, %v952_v20, %v1791_v37 }
 0x191   : > { %v1915_v3 = vpop.permute.xlu1 %1914  ;;  %v2173_v57 = vsel %vm2170_vm4, %v2140_v62, %v1919_v24  ;;  %1848 = vrot.lane.b32.xlu0 %v4021_v40, %s2980_s27 }
 0x192   : > { %v2206_v54 = vsel %vm2203_vm5, %v2173_v57, %v3874_v38 }
 0x193   : > { %1970 = vrot.lane.b32.xlu1 %v3998_v52, %s2979_s26  ;;  %v2767_v52 = vpack.c.bf16 %v2206_v54, %v2206_v54  ;;  %v1787_v7 = vpop.permute.xlu0 %1786  ;;  %v2308_v5 = vmul.f32 %v2206_v54, %v2206_v54 }
 0x194   : > { %v2138_v49 = vsel %vm404_vm1, %v944_v41, %v1787_v7 }
 0x195   : > { %v1917_v40 = vpop.permute.xlu1 %1916  ;;  %2546 = vst.msk [vmem:[%s4132_s11 + $0x8] sm:$0xf] %vm2543_vm6, %v2767_v52  ;;  %v2171_v16 = vsel %vm2170_vm4, %v2138_v49, %v1915_v3  ;;  %1844 = vrot.lane.b32.xlu0 %v4024_v11, %s2980_s27  ;;  %v2240_v52 = vsel %vm2236_vm7, %v2206_v54, 0.0 }
 0x196   : > { %v2204_v26 = vsel %vm2203_vm5, %v2171_v16, %v3854_v50 }
 0x197   : > { %2102 = vrot.lane.b32.xlu1 %v725_v35, %s2978_s19  ;;  %v2765_v38 = vpack.c.bf16 %v2204_v26, %v2204_v26  ;;  %v1793_v55 = vpop.permute.xlu0 %1792  ;;  %v2306_v39 = vmul.f32 %v2204_v26, %v2204_v26  ;;  %v2237_v37 = vsel %vm2236_vm7, %v2204_v26, 0.0 }
 0x198   : > { %v2141_v11 = vsel %vm404_vm1, %v955_v63, %v1793_v55 }
 0x199   : > { %v1799_v58 = vpop.permute.xlu1 %1798  ;;  %2544 = vst.msk [vmem:[%s4132_s11] sm:$0xf] %vm2543_vm6, %v2765_v38  ;;  %1972 = vrot.lane.b32.xlu0 %v4008_v36, %s2979_s26  ;;  %v2338_v16 = vsel %vm2236_vm7, %v2306_v39, 0.0 }
 0x19a   : > { %v2144_v24 = vsel %vm404_vm1, %v968_v43, %v1799_v58 }
 0x19b   : > { %2104 = vrot.lane.b32.xlu1 %v726_v0, %s2978_s19  ;;  %v1921_v50 = vpop.permute.xlu0 %1920 }
 0x19c   : > { %v2174_v51 = vsel %vm2170_vm4, %v2141_v11, %v1921_v50 }
 0x19d   : > { %v1927_v9 = vpop.permute.xlu1 %1926  ;;  %v2207_v29 = vsel %vm2203_vm5, %v2174_v51, %v3893_v22  ;;  %1976 = vrot.lane.b32.xlu0 %v4001_v12, %s2979_s26  ;;  %v960_v12 = vadd.f32 %v3733_v28, %v3748_v33 }
 0x19e   : > { %v2177_v31 = vsel %vm2170_vm4, %v2144_v24, %v1927_v9  ;;  %v2768_v4 = vpack.c.bf16 %v2207_v29, %v2207_v29  ;;  %v2309_v0 = vmul.f32 %v2207_v29, %v2207_v29  ;;  %v2242_v54 = vsel %vm2236_vm7, %v2207_v29, 0.0 }
 0x19f   : > { %v4164_v36 = vsel %vm2203_vm5, %v2177_v31, %v3930_v13  ;;  %v1789_v23 = vpop.permute.xlu0 %1788  ;;  %v984_v31 = vadd.f32 %v3763_v30, %v3733_v28 }
 0x1a0   : > { %v2771_v20 = vpack.c.bf16 %v4164_v36, %v4164_v36  ;;  %2547 = vst.msk [vmem:[%s4132_s11 + $0xc] sm:$0xf] %vm2543_vm6, %v2768_v4  ;;  %v2139_v22 = vsel %vm404_vm1, %v947_v6, %v1789_v23  ;;  %v2343_v6 = vsel %vm2236_vm7, %v2309_v0, 0.0 }
 0x1a1   : > { %v1795_v3 = vpop.permute.xlu1 %1794  ;;  %v2172_v13 = vsel %vm2170_vm4, %v2139_v22, %v1917_v40  ;;  %v971_v40 = vadd.f32 %v3750_v42, %v3733_v28  ;;  %v2341_v42 = vsel %vm2236_vm7, %v2308_v5, 0.0  ;;  %v4520_v5 = vld [vmem:[#allocation7_spill] sm:$0xff] }
 0x1a2   : > { %2550 = vst.msk [vmem:[%s4132_s11 + $0x18] sm:$0xf] %vm2543_vm6, %v2771_v20  ;;  %v2205_v62 = vsel %vm2203_vm5, %v2172_v13, %v3867_v15  ;;  %v2142_v33 = vsel %vm404_vm1, %v960_v12, %v1795_v3 }
 0x1a3   : > { %v2238_v35 = vsel %vm2236_vm7, %v2205_v62, 0.0  ;;  %v2307_v57 = vmul.f32 %v2205_v62, %v2205_v62  ;;  %v2766_v60 = vpack.c.bf16 %v2205_v62, %v2205_v62  ;;  %v1801_v18 = vpop.permute.xlu0 %1800 }
 0x1a4   : > { %v2239_v7 = vadd.f32 %v2238_v35, %v2237_v37  ;;  %v2145_v63 = vsel %vm404_vm1, %v971_v40, %v1801_v18  ;;  %v4521_v37 = vld [vmem:[#allocation30_spill] sm:$0xff] }
 0x1a5   : > { %v1923_v41 = vpop.permute.xlu1 %1922  ;;  %v2339_v15 = vsel %vm2236_vm7, %v2307_v57, 0.0  ;;  %2545 = vst.msk [vmem:[%s4132_s11 + $0x4] sm:$0xf] %vm2543_vm6, %v2766_v60 }
 0x1a6   : > { %v2175_v49 = vsel %vm2170_vm4, %v2142_v33, %v1923_v41  ;;  %v2340_v38 = vadd.f32 %v2339_v15, %v2338_v16  ;;  %v2241_v55 = vadd.f32 %v2240_v52, %v2239_v7  ;;  %v4522_v41 = vld [vmem:[#allocation12_spill] sm:$0xff]  ;;  %v2312_v52 = vmul.f32 %v4164_v36, %v4164_v36  ;;  %v4523_v7 = vld [vmem:[#allocation27_spill] sm:$0xff] }
 0x1a7   : > { %v2208_v26 = vsel %vm2203_vm5, %v2175_v49, %v3900_v46  ;;  %v1929_v43 = vpop.permute.xlu0 %1928  ;;  %v976_v40 = vadd.f32 %v3733_v28, %v4522_v41 }
 0x1a8   : > { %v2310_v58 = vmul.f32 %v2208_v26, %v2208_v26  ;;  %v2769_v11 = vpack.c.bf16 %v2208_v26, %v2208_v26  ;;  %v2178_v24 = vsel %vm2170_vm4, %v2145_v63, %v1929_v43  ;;  %v2243_v9 = vadd.f32 %v2242_v54, %v2241_v55 }
 0x1a9   : > { %v1807_v50 = vpop.permute.xlu1 %1806  ;;  %v2342_v51 = vadd.f32 %v2341_v42, %v2340_v38  ;;  %v2244_v46 = vsel %vm2236_vm7, %v2208_v26, 0.0  ;;  %v2211_v29 = vsel %vm2203_vm5, %v2178_v24, %v3947_v45  ;;  %v963_v45 = vadd.f32 %v3733_v28, %v4520_v5  ;;  %v4524_v26 = vld [vmem:[#allocation13_spill] sm:$0xff] }
 0x1aa   : > { %v2345_v4 = vsel %vm2236_vm7, %v2310_v58, 0.0  ;;  %2548 = vst.msk [vmem:[%s4132_s11 + $0x10] sm:$0xf] %vm2543_vm6, %v2769_v11  ;;  %v2772_v23 = vpack.c.bf16 %v2211_v29, %v2211_v29  ;;  %v2245_v3 = vadd.f32 %v2244_v46, %v2243_v9  ;;  %v2148_v12 = vsel %vm404_vm1, %v984_v31, %v1807_v50  ;;  %v4525_v46 = vld [vmem:[#allocation28_spill] sm:$0xff] }
 0x1ab   : > { %v2344_v20 = vadd.f32 %v2343_v6, %v2342_v51  ;;  %v1797_v22 = vpop.permute.xlu0 %1796  ;;  %v987_v38 = vadd.f32 %v4524_v26, %v3733_v28  ;;  %v2248_v63 = vsel %vm2236_vm7, %v4164_v36, 0.0  ;;  %v2313_v43 = vmul.f32 %v2211_v29, %v2211_v29 }
 0x1ac   : > { %2551 = vst.msk [vmem:[%s4132_s11 + $0x1c] sm:$0xf] %vm2543_vm6, %v2772_v23  ;;  %v2143_v57 = vsel %vm404_vm1, %v963_v45, %v1797_v22  ;;  %v2349_v24 = vsel %vm2236_vm7, %v2312_v52, 0.0  ;;  %v2250_v6 = vsel %vm2236_vm7, %v2211_v29, 0.0  ;;  %v4526_v29 = vld [vmem:[#allocation18_spill] sm:$0xff] }
 0x1ad   : > { %v1935_v39 = vpop.permute.xlu1 %1934  ;;  %v2346_v30 = vadd.f32 %v2345_v4, %v2344_v20  ;;  %v1000_v45 = vadd.f32 %v4526_v29, %v3733_v28 }
 0x1ae   : > { %v2181_v13 = vsel %vm2170_vm4, %v2148_v12, %v1935_v39 }
 0x1af   : > { %v4214_v62 = vsel %vm2203_vm5, %v2181_v13, %v4521_v37  ;;  %v1925_v60 = vpop.permute.xlu0 %1924  ;;  %v2351_v13 = vsel %vm2236_vm7, %v2313_v43, 0.0 }
 0x1b0   : > { %v2775_v35 = vpack.c.bf16 %v4214_v62, %v4214_v62  ;;  %v2176_v33 = vsel %vm2170_vm4, %v2143_v57, %v1925_v60 }
 0x1b1   : > { %v1803_v18 = vpop.permute.xlu1 %1802  ;;  %v2209_v49 = vsel %vm2203_vm5, %v2176_v33, %v4523_v7  ;;  %v4527_v7 = vld [vmem:[#allocation14_spill] sm:$0xff] }
 0x1b2   : > { %2554 = vst.msk [vmem:[%s4132_s11 + $0x28] sm:$0xf] %vm2543_vm6, %v2775_v35  ;;  %v2246_v16 = vsel %vm2236_vm7, %v2209_v49, 0.0  ;;  %v2311_v0 = vmul.f32 %v2209_v49, %v2209_v49  ;;  %v2770_v15 = vpack.c.bf16 %v2209_v49, %v2209_v49  ;;  %v2146_v42 = vsel %vm404_vm1, %v976_v40, %v1803_v18 }
 0x1b3   : > { %v2247_v55 = vadd.f32 %v2246_v16, %v2245_v3  ;;  %v1809_v58 = vpop.permute.xlu0 %1808  ;;  %v979_v49 = vadd.f32 %v3733_v28, %v4527_v7 }
 0x1b4   : > { %v2347_v11 = vsel %vm2236_vm7, %v2311_v0, 0.0  ;;  %2549 = vst.msk [vmem:[%s4132_s11 + $0x14] sm:$0xf] %vm2543_vm6, %v2770_v15  ;;  %v2149_v3 = vsel %vm404_vm1, %v987_v38, %v1809_v58 }
 0x1b5   : > { %v1931_v54 = vpop.permute.xlu1 %1930  ;;  %v2249_v9 = vadd.f32 %v2248_v63, %v2247_v55  ;;  %v2348_v51 = vadd.f32 %v2347_v11, %v2346_v30  ;;  %v4528_v55 = vld [vmem:[#allocation20_spill] sm:$0xff] }
 0x1b6   : > { %v2179_v50 = vsel %vm2170_vm4, %v2146_v42, %v1931_v54  ;;  %v992_v58 = vadd.f32 %v3733_v28, %v4528_v55  ;;  %v2316_v42 = vmul.f32 %v4214_v62, %v4214_v62 }
 0x1b7   : > { %v2212_v31 = vsel %vm2203_vm5, %v2179_v50, %v4525_v46  ;;  %v2350_v20 = vadd.f32 %v2349_v24, %v2348_v51  ;;  %v1937_v22 = vpop.permute.xlu0 %1936  ;;  %v2251_v12 = vadd.f32 %v2250_v6, %v2249_v9  ;;  %v4530_v50 = vld [vmem:[#allocation21_spill] sm:$0xff]  ;;  %v2256_v6 = vsel %vm2236_vm7, %v4214_v62, 0.0 }
 0x1b8   : > { %v2252_v4 = vsel %vm2236_vm7, %v2212_v31, 0.0  ;;  %v2314_v36 = vmul.f32 %v2212_v31, %v2212_v31  ;;  %v2773_v23 = vpack.c.bf16 %v2212_v31, %v2212_v31  ;;  %v2182_v30 = vsel %vm2170_vm4, %v2149_v3, %v1937_v22 }
 0x1b9   : > { %v1815_v39 = vpop.permute.xlu1 %1814  ;;  %v2215_v37 = vsel %vm2203_vm5, %v2182_v30, %v4012_v48  ;;  %v2352_v35 = vadd.f32 %v2351_v13, %v2350_v20  ;;  %v2253_v57 = vadd.f32 %v2252_v4, %v2251_v12  ;;  %v1003_v24 = vadd.f32 %v4530_v50, %v3733_v28 }
 0x1ba   : > { %v2353_v5 = vsel %vm2236_vm7, %v2314_v36, 0.0  ;;  %2552 = vst.msk [vmem:[%s4132_s11 + $0x20] sm:$0xf] %vm2543_vm6, %v2773_v23  ;;  %v2776_v60 = vpack.c.bf16 %v2215_v37, %v2215_v37  ;;  %v2152_v41 = vsel %vm404_vm1, %v1000_v45, %v1815_v39  ;;  %v2317_v4 = vmul.f32 %v2215_v37, %v2215_v37 }
 0x1bb   : > { %v2354_v18 = vadd.f32 %v2353_v5, %v2352_v35  ;;  %v1805_v33 = vpop.permute.xlu0 %1804  ;;  %v2357_v20 = vsel %vm2236_vm7, %v2316_v42, 0.0  ;;  %v2258_v39 = vsel %vm2236_vm7, %v2215_v37, 0.0 }
 0x1bc   : > { %2555 = vst.msk [vmem:[%s4132_s11 + $0x2c] sm:$0xf] %vm2543_vm6, %v2776_v60  ;;  %v2147_v0 = vsel %vm404_vm1, %v979_v49, %v1805_v33  ;;  %v2359_v60 = vsel %vm2236_vm7, %v2317_v4, 0.0 }
 0x1bd   : > { %v1943_v40 = vpop.permute.xlu1 %1942 }
 0x1be   : > { %v2185_v52 = vsel %vm2170_vm4, %v2152_v41, %v1943_v40 }
 0x1bf   : > { %v4261_v16 = vsel %vm2203_vm5, %v2185_v52, %v4033_v25  ;;  %v1933_v15 = vpop.permute.xlu0 %1932  ;;  %v4529_v25 = vld [vmem:[#allocation29_spill] sm:$0xff] }
 0x1c0   : > { %v2779_v48 = vpack.c.bf16 %v4261_v16, %v4261_v16  ;;  %v2180_v38 = vsel %vm2170_vm4, %v2147_v0, %v1933_v15 }
 0x1c1   : > { %v1811_v26 = vpop.permute.xlu1 %1810  ;;  %v2213_v54 = vsel %vm2203_vm5, %v2180_v38, %v4529_v25  ;;  %v4532_v38 = vld [vmem:[#allocation22_spill] sm:$0xff] }
 0x1c2   : > { %2558 = vst.msk [vmem:[%s4132_s11 + $0x38] sm:$0xf] %vm2543_vm6, %v2779_v48  ;;  %v2254_v63 = vsel %vm2236_vm7, %v2213_v54, 0.0  ;;  %v2315_v43 = vmul.f32 %v2213_v54, %v2213_v54  ;;  %v2774_v11 = vpack.c.bf16 %v2213_v54, %v2213_v54  ;;  %v2150_v46 = vsel %vm404_vm1, %v992_v58, %v1811_v26 }
 0x1c3   : > { %v2255_v9 = vadd.f32 %v2254_v63, %v2253_v57  ;;  %v1817_v51 = vpop.permute.xlu0 %1816  ;;  %v995_v55 = vadd.f32 %v3733_v28, %v4532_v38 }
 0x1c4   : > { %v2355_v36 = vsel %vm2236_vm7, %v2315_v43, 0.0  ;;  %2553 = vst.msk [vmem:[%s4132_s11 + $0x24] sm:$0xf] %vm2543_vm6, %v2774_v11  ;;  %v2153_v29 = vsel %vm404_vm1, %v1003_v24, %v1817_v51  ;;  %v2320_v43 = vmul.f32 %v4261_v16, %v4261_v16  ;;  %v4533_v51 = vld [vmem:[#allocation4_spill] sm:$0xff] }
 0x1c5   : > { %v1939_v31 = vpop.permute.xlu1 %1938  ;;  %v2257_v3 = vadd.f32 %v2256_v6, %v2255_v9  ;;  %v2356_v22 = vadd.f32 %v2355_v36, %v2354_v18  ;;  %v2264_v6 = vsel %vm2236_vm7, %v4261_v16, 0.0 }
 0x1c6   : > { %v2183_v23 = vsel %vm2170_vm4, %v2150_v46, %v1939_v31 }
 0x1c7   : > { %v2216_v12 = vsel %vm2203_vm5, %v2183_v23, %v4015_v21  ;;  %v2358_v5 = vadd.f32 %v2357_v20, %v2356_v22  ;;  %v1945_v45 = vpop.permute.xlu0 %1944  ;;  %v2259_v35 = vadd.f32 %v2258_v39, %v2257_v3  ;;  %v4531_v21 = vld [vmem:[#allocation3_spill] sm:$0xff]  ;;  %v2365_v23 = vsel %vm2236_vm7, %v2320_v43, 0.0 }
 0x1c8   : > { %v2260_v13 = vsel %vm2236_vm7, %v2216_v12, 0.0  ;;  %v2318_v62 = vmul.f32 %v2216_v12, %v2216_v12  ;;  %v2777_v30 = vpack.c.bf16 %v2216_v12, %v2216_v12  ;;  %v2186_v18 = vsel %vm2170_vm4, %v2153_v29, %v1945_v45 }
 0x1c9   : > { %v1823_v57 = vpop.permute.xlu1 %1822  ;;  %v1016_v37 = vadd.f32 %v4531_v21, %v3733_v28  ;;  %v2219_v41 = vsel %vm2203_vm5, %v2186_v18, %v4039_v34  ;;  %v2360_v40 = vadd.f32 %v2359_v60, %v2358_v5  ;;  %v2261_v52 = vadd.f32 %v2260_v13, %v2259_v35 }
 0x1ca   : > { %v2361_v33 = vsel %vm2236_vm7, %v2318_v62, 0.0  ;;  %2556 = vst.msk [vmem:[%s4132_s11 + $0x30] sm:$0xf] %vm2543_vm6, %v2777_v30  ;;  %v2780_v7 = vpack.c.bf16 %v2219_v41, %v2219_v41  ;;  %v2321_v4 = vmul.f32 %v2219_v41, %v2219_v41  ;;  %v2266_v12 = vsel %vm2236_vm7, %v2219_v41, 0.0  ;;  %v4534_v30 = vld [vmem:[#allocation5_spill] sm:$0xff] }
 0x1cb   : > { %v2362_v49 = vadd.f32 %v2361_v33, %v2360_v40  ;;  %v1813_v48 = vpop.permute.xlu0 %1812  ;;  %v2156_v0 = vsel %vm404_vm1, %v1016_v37, %v1823_v57 }
 0x1cc   : > { %2559 = vst.msk [vmem:[%s4132_s11 + $0x3c] sm:$0xf] %vm2543_vm6, %v2780_v7  ;;  %v2151_v42 = vsel %vm404_vm1, %v995_v55, %v1813_v48  ;;  %v2367_v57 = vsel %vm2236_vm7, %v2321_v4, 0.0 }
 0x1cd   : > { %v1951_v15 = vpop.permute.xlu1 %1950 }
 0x1ce   : > { %v2189_v26 = vsel %vm2170_vm4, %v2156_v0, %v1951_v15  ;;  %v4536_v15 = vld [vmem:[#allocation6_spill] sm:$0xff] }
 0x1cf   : > { %v4308_v58 = vsel %vm2203_vm5, %v2189_v26, %v4053_v61  ;;  %v1941_v25 = vpop.permute.xlu0 %1940 }
 0x1d0   : > { %v2783_v34 = vpack.c.bf16 %v4308_v58, %v4308_v58  ;;  %v2184_v63 = vsel %vm2170_vm4, %v2151_v42, %v1941_v25  ;;  %v2324_v42 = vmul.f32 %v4308_v58, %v4308_v58 }
 0x1d1   : > { %v1819_v54 = vpop.permute.xlu1 %1818  ;;  %v2217_v28 = vsel %vm2203_vm5, %v2184_v63, %v4031_v44 }
 0x1d2   : > { %2562 = vst.msk [vmem:[%s4132_s11 + $0x48] sm:$0xf] %vm2543_vm6, %v2783_v34  ;;  %v2262_v61 = vsel %vm2236_vm7, %v2217_v28, 0.0  ;;  %v2319_v11 = vmul.f32 %v2217_v28, %v2217_v28  ;;  %v2778_v50 = vpack.c.bf16 %v2217_v28, %v2217_v28  ;;  %v2154_v46 = vsel %vm404_vm1, %v4533_v51, %v1819_v54 }
 0x1d3   : > { %v2263_v24 = vadd.f32 %v2262_v61, %v2261_v52  ;;  %v1825_v9 = vpop.permute.xlu0 %1824  ;;  %v4535_v52 = vld [vmem:[#allocation8_spill] sm:$0xff]  ;;  %v4537_v61 = vld [vmem:[#allocation9_spill] sm:$0xff] }
 0x1d4   : > { %v2363_v36 = vsel %vm2236_vm7, %v2319_v11, 0.0  ;;  %2557 = vst.msk [vmem:[%s4132_s11 + $0x34] sm:$0xf] %vm2543_vm6, %v2778_v50  ;;  %v2157_v5 = vsel %vm404_vm1, %v4534_v30, %v1825_v9 }
 0x1d5   : > { %v1947_v31 = vpop.permute.xlu1 %1946  ;;  %v2265_v20 = vadd.f32 %v2264_v6, %v2263_v24  ;;  %v2364_v3 = vadd.f32 %v2363_v36, %v2362_v49  ;;  %v2272_v24 = vsel %vm2236_vm7, %v4308_v58, 0.0 }
 0x1d6   : > { %v2187_v44 = vsel %vm2170_vm4, %v2154_v46, %v1947_v31  ;;  %v2373_v46 = vsel %vm2236_vm7, %v2324_v42, 0.0 }
 0x1d7   : > { %v2220_v22 = vsel %vm2203_vm5, %v2187_v44, %v4041_v10  ;;  %v2366_v62 = vadd.f32 %v2365_v23, %v2364_v3  ;;  %v1953_v29 = vpop.permute.xlu0 %1952  ;;  %v2267_v45 = vadd.f32 %v2266_v12, %v2265_v20  ;;  %v4538_v3 = vld [vmem:[#allocation10_spill] sm:$0xff] }
 0x1d8   : > { %v2268_v39 = vsel %vm2236_vm7, %v2220_v22, 0.0  ;;  %v2322_v16 = vmul.f32 %v2220_v22, %v2220_v22  ;;  %v2781_v13 = vpack.c.bf16 %v2220_v22, %v2220_v22  ;;  %v2190_v60 = vsel %vm2170_vm4, %v2157_v5, %v1953_v29 }
 0x1d9   : > { %v1831_v35 = vpop.permute.xlu1 %1830  ;;  %v2223_v18 = vsel %vm2203_vm5, %v2190_v60, %v4059_v32  ;;  %v2368_v33 = vadd.f32 %v2367_v57, %v2366_v62  ;;  %v2269_v21 = vadd.f32 %v2268_v39, %v2267_v45  ;;  %v4539_v60 = vld [vmem:[#allocation15_spill] sm:$0xff] }
 0x1da   : > { %v2369_v10 = vsel %vm2236_vm7, %v2322_v16, 0.0  ;;  %2560 = vst.msk [vmem:[%s4132_s11 + $0x40] sm:$0xf] %vm2543_vm6, %v2781_v13  ;;  %v2784_v37 = vpack.c.bf16 %v2223_v18, %v2223_v18  ;;  %v2160_v7 = vsel %vm404_vm1, %v4535_v52, %v1831_v35  ;;  %v2325_v9 = vmul.f32 %v2223_v18, %v2223_v18 }
 0x1db   : > { %v2370_v41 = vadd.f32 %v2369_v10, %v2368_v33  ;;  %v1821_v40 = vpop.permute.xlu0 %1820  ;;  %v2274_v36 = vsel %vm2236_vm7, %v2223_v18, 0.0 }
 0x1dc   : > { %2563 = vst.msk [vmem:[%s4132_s11 + $0x4c] sm:$0xf] %vm2543_vm6, %v2784_v37  ;;  %v2155_v26 = vsel %vm404_vm1, %v4536_v15, %v1821_v40  ;;  %v2375_v13 = vsel %vm2236_vm7, %v2325_v9, 0.0 }
 0x1dd   : > { %v1959_v49 = vpop.permute.xlu1 %1958 }
 0x1de   : > { %v2193_v48 = vsel %vm2170_vm4, %v2160_v7, %v1959_v49 }
 0x1df   : > { %v4350_v0 = vsel %vm2203_vm5, %v2193_v48, %v4073_v8  ;;  %v1949_v38 = vpop.permute.xlu0 %1948 }
 0x1e0   : > { %v2787_v32 = vpack.c.bf16 %v4350_v0, %v4350_v0  ;;  %v2188_v34 = vsel %vm2170_vm4, %v2155_v26, %v1949_v38  ;;  %v2328_v49 = vmul.f32 %v4350_v0, %v4350_v0 }
 0x1e1   : > { %v1827_v55 = vpop.permute.xlu1 %1826  ;;  %v2221_v8 = vsel %vm2203_vm5, %v2188_v34, %v4051_v53 }
 0x1e2   : > { %2566 = vst.msk [vmem:[%s4132_s11 + $0x58] sm:$0xf] %vm2543_vm6, %v2787_v32  ;;  %v2270_v25 = vsel %vm2236_vm7, %v2221_v8, 0.0  ;;  %v2323_v54 = vmul.f32 %v2221_v8, %v2221_v8  ;;  %v2782_v63 = vpack.c.bf16 %v2221_v8, %v2221_v8  ;;  %v2158_v11 = vsel %vm404_vm1, %v4537_v61, %v1827_v55  ;;  %v4541_v55 = vld [vmem:[#allocation16_spill] sm:$0xff] }
 0x1e3   : > { %v2271_v43 = vadd.f32 %v2270_v25, %v2269_v21  ;;  %v1833_v28 = vpop.permute.xlu0 %1832  ;;  %v2280_v8 = vsel %vm2236_vm7, %v4350_v0, 0.0 }
 0x1e4   : > { %v2371_v51 = vsel %vm2236_vm7, %v2323_v54, 0.0  ;;  %2561 = vst.msk [vmem:[%s4132_s11 + $0x44] sm:$0xf] %vm2543_vm6, %v2782_v63  ;;  %v2161_v22 = vsel %vm404_vm1, %v4538_v3, %v1833_v28  ;;  %v2381_v63 = vsel %vm2236_vm7, %v2328_v49, 0.0 }
 0x1e5   : > { %v1955_v50 = vpop.permute.xlu1 %1954  ;;  %v2273_v31 = vadd.f32 %v2272_v24, %v2271_v43  ;;  %v2372_v6 = vadd.f32 %v2371_v51, %v2370_v41  ;;  %v4540_v41 = vld [vmem:[#allocation11_spill] sm:$0xff]  ;;  %v4542_v51 = vld [vmem:[#allocation17_spill] sm:$0xff] }
 0x1e6   : > { %v2191_v53 = vsel %vm2170_vm4, %v2158_v11, %v1955_v50 }
 0x1e7   : > { %v2224_v4 = vsel %vm2203_vm5, %v2191_v53, %v4061_v1  ;;  %v2374_v20 = vadd.f32 %v2373_v46, %v2372_v6  ;;  %v1961_v12 = vpop.permute.xlu0 %1960  ;;  %v2275_v39 = vadd.f32 %v2274_v36, %v2273_v31 }
 0x1e8   : > { %v2276_v44 = vsel %vm2236_vm7, %v2224_v4, 0.0  ;;  %v2326_v58 = vmul.f32 %v2224_v4, %v2224_v4  ;;  %v2785_v23 = vpack.c.bf16 %v2224_v4, %v2224_v4  ;;  %v2194_v62 = vsel %vm2170_vm4, %v2161_v22, %v1961_v12 }
 0x1e9   : > { %v1839_v16 = vpop.permute.xlu1 %1838  ;;  %v2227_v30 = vsel %vm2203_vm5, %v2194_v62, %v4078_v2  ;;  %v2376_v5 = vadd.f32 %v2375_v13, %v2374_v20  ;;  %v2277_v29 = vadd.f32 %v2276_v44, %v2275_v39  ;;  %v4543_v39 = vld [vmem:[#allocation19_spill] sm:$0xff] }
 0x1ea   : > { %v2377_v1 = vsel %vm2236_vm7, %v2326_v58, 0.0  ;;  %2564 = vst.msk [vmem:[%s4132_s11 + $0x50] sm:$0xf] %vm2543_vm6, %v2785_v23  ;;  %v2788_v45 = vpack.c.bf16 %v2227_v30, %v2227_v30  ;;  %v2164_v10 = vsel %vm404_vm1, %v4539_v60, %v1839_v16  ;;  %v2329_v25 = vmul.f32 %v2227_v30, %v2227_v30 }
 0x1eb   : > { %v2378_v35 = vadd.f32 %v2377_v1, %v2376_v5  ;;  %v1829_v57 = vpop.permute.xlu0 %1828  ;;  %v2282_v11 = vsel %vm2236_vm7, %v2227_v30, 0.0 }
 0x1ec   : > { %2567 = vst.msk [vmem:[%s4132_s11 + $0x5c] sm:$0xf] %vm2543_vm6, %v2788_v45  ;;  %v2159_v2 = vsel %vm404_vm1, %v4540_v41, %v1829_v57  ;;  %v2383_v4 = vsel %vm2236_vm7, %v2329_v25, 0.0 }
 0x1ed   : > { %v1967_v18 = vpop.permute.xlu1 %1966 }
 0x1ee   : > { %v2197_v33 = vsel %vm2170_vm4, %v2164_v10, %v1967_v18  ;;  %v4544_v10 = vld [vmem:[#allocation24_spill] sm:$0xff] }
 0x1ef   : > { %v2230_v21 = vsel %vm2203_vm5, %v2197_v33, %v4092_v47  ;;  %v1957_v40 = vpop.permute.xlu0 %1956 }
 0x1f0   : > { %v2791_v37 = vpack.c.bf16 %v2230_v21, %v2230_v21  ;;  %v2192_v7 = vsel %vm2170_vm4, %v2159_v2, %v1957_v40  ;;  %v2332_v1 = vmul.f32 %v2230_v21, %v2230_v21  ;;  %v4545_v40 = vld [vmem:[#allocation23_spill] sm:$0xff] }
 0x1f1   : > { %v1835_v52 = vpop.permute.xlu1 %1834  ;;  %v2225_v48 = vsel %vm2203_vm5, %v2192_v7, %v4071_v59 }
 0x1f2   : > { %2570 = vst.msk [vmem:[%s4132_s11 + $0x68] sm:$0xf] %vm2543_vm6, %v2791_v37  ;;  %v2278_v32 = vsel %vm2236_vm7, %v2225_v48, 0.0  ;;  %v2327_v47 = vmul.f32 %v2225_v48, %v2225_v48  ;;  %v2786_v15 = vpack.c.bf16 %v2225_v48, %v2225_v48  ;;  %v2162_v34 = vsel %vm404_vm1, %v4541_v55, %v1835_v52 }
 0x1f3   : > { %v2279_v26 = vadd.f32 %v2278_v32, %v2277_v29  ;;  %v1841_v38 = vpop.permute.xlu0 %1840  ;;  %v2389_v37 = vsel %vm2236_vm7, %v2332_v1, 0.0 }
 0x1f4   : > { %v2379_v54 = vsel %vm2236_vm7, %v2327_v47, 0.0  ;;  %2565 = vst.msk [vmem:[%s4132_s11 + $0x54] sm:$0xf] %vm2543_vm6, %v2786_v15  ;;  %v2165_v53 = vsel %vm404_vm1, %v4542_v51, %v1841_v38 }
 0x1f5   : > { %v1963_v42 = vpop.permute.xlu1 %1962  ;;  %v2281_v43 = vadd.f32 %v2280_v8, %v2279_v26  ;;  %v2380_v28 = vadd.f32 %v2379_v54, %v2378_v35  ;;  %v2288_v35 = vsel %vm2236_vm7, %v2230_v21, 0.0 }
 0x1f6   : > { %v2195_v59 = vsel %vm2170_vm4, %v2162_v34, %v1963_v42 }
 0x1f7   : > { %v2228_v61 = vsel %vm2203_vm5, %v2195_v59, %v4080_v27  ;;  %v2382_v9 = vadd.f32 %v2381_v63, %v2380_v28  ;;  %v1969_v46 = vpop.permute.xlu0 %1968  ;;  %v2283_v31 = vadd.f32 %v2282_v11, %v2281_v43  ;;  %v4546_v43 = vld [vmem:[#allocation26_spill] sm:$0xff] }
 0x1f8   : > { %v2284_v50 = vsel %vm2236_vm7, %v2228_v61, 0.0  ;;  %v2330_v0 = vmul.f32 %v2228_v61, %v2228_v61  ;;  %v2789_v24 = vpack.c.bf16 %v2228_v61, %v2228_v61  ;;  %v2198_v36 = vsel %vm2170_vm4, %v2165_v53, %v1969_v46 }
 0x1f9   : > { %v1847_v6 = vpop.permute.xlu1 %1846  ;;  %v2231_v44 = vsel %vm2203_vm5, %v2198_v36, %v4098_v19  ;;  %v2384_v58 = vadd.f32 %v2383_v4, %v2382_v9  ;;  %v2285_v23 = vadd.f32 %v2284_v50, %v2283_v31  ;;  %v4547_v31 = vld [vmem:[#allocation25_spill] sm:$0xff] }
 0x1fa   : > { %v2385_v27 = vsel %vm2236_vm7, %v2330_v0, 0.0  ;;  %2568 = vst.msk [vmem:[%s4132_s11 + $0x60] sm:$0xf] %vm2543_vm6, %v2789_v24  ;;  %v2792_v20 = vpack.c.bf16 %v2231_v44, %v2231_v44  ;;  %v2333_v41 = vmul.f32 %v2231_v44, %v2231_v44  ;;  %v2168_v52 = vsel %vm404_vm1, %v4545_v40, %v1847_v6 }
 0x1fb   : > { %v2386_v3 = vadd.f32 %v2385_v27, %v2384_v58  ;;  %v1837_v22 = vpop.permute.xlu0 %1836  ;;  %v2290_v48 = vsel %vm2236_vm7, %v2231_v44, 0.0 }
 0x1fc   : > { %2571 = vst.msk [vmem:[%s4132_s11 + $0x6c] sm:$0xf] %vm2543_vm6, %v2792_v20  ;;  %v2163_v16 = vsel %vm404_vm1, %v4543_v39, %v1837_v22  ;;  %v2391_v8 = vsel %vm2236_vm7, %v2333_v41, 0.0 }
 0x1fd   : > { %v1975_v12 = vpop.permute.xlu1 %1974 }
 0x1fe   : > { %v2201_v38 = vsel %vm2170_vm4, %v2168_v52, %v1975_v12 }
 0x1ff   : > { %v1965_v13 = vpop.permute.xlu0 %1964 }
 0x200   : > { %v2196_v30 = vsel %vm2170_vm4, %v2163_v16, %v1965_v13 }
 0x201   : > { %v1843_v62 = vpop.permute.xlu1 %1842  ;;  %v2229_v19 = vsel %vm2203_vm5, %v2196_v30, %v4090_v14 }
 0x202   : > { %v2286_v5 = vsel %vm2236_vm7, %v2229_v19, 0.0  ;;  %v2331_v29 = vmul.f32 %v2229_v19, %v2229_v19  ;;  %v2790_v45 = vpack.c.bf16 %v2229_v19, %v2229_v19  ;;  %v2166_v18 = vsel %vm404_vm1, %v4544_v10, %v1843_v62 }
 0x203   : > { %v2287_v57 = vadd.f32 %v2286_v5, %v2285_v23  ;;  %v1849_v60 = vpop.permute.xlu0 %1848 }
 0x204   : > { %v2387_v2 = vsel %vm2236_vm7, %v2331_v29, 0.0  ;;  %2569 = vst.msk [vmem:[%s4132_s11 + $0x64] sm:$0xf] %vm2543_vm6, %v2790_v45  ;;  %v2169_v6 = vsel %vm404_vm1, %v4547_v31, %v1849_v60 }
 0x205   : > { %v1971_v33 = vpop.permute.xlu1 %1970  ;;  %v2289_v21 = vadd.f32 %v2288_v35, %v2287_v57  ;;  %v2388_v7 = vadd.f32 %v2387_v2, %v2386_v3 }
 0x206   : > { %v2199_v14 = vsel %vm2170_vm4, %v2166_v18, %v1971_v33 }
 0x207   : > { %v2232_v49 = vsel %vm2203_vm5, %v2199_v14, %v4100_v56  ;;  %v2390_v26 = vadd.f32 %v2389_v37, %v2388_v7  ;;  %v1845_v55 = vpop.permute.xlu0 %1844  ;;  %v2291_v34 = vadd.f32 %v2290_v48, %v2289_v21 }
 0x208   : > { %v2292_v32 = vsel %vm2236_vm7, %v2232_v49, 0.0  ;;  %v2334_v47 = vmul.f32 %v2232_v49, %v2232_v49  ;;  %v2793_v15 = vpack.c.bf16 %v2232_v49, %v2232_v49  ;;  %v2167_v28 = vsel %vm404_vm1, %v4546_v43, %v1845_v55 }
 0x209   : > { %v2103_v42 = vpop.permute.xlu1 %2102  ;;  %v2392_v54 = vadd.f32 %v2391_v8, %v2390_v26  ;;  %v2293_v59 = vadd.f32 %v2292_v32, %v2291_v34 }
 0x20a   : > { %v2393_v25 = vsel %vm2236_vm7, %v2334_v47, 0.0  ;;  %2572 = vst.msk [vmem:[%s4132_s11 + $0x70] sm:$0xf] %vm2543_vm6, %v2793_v15  ;;  %v2234_v56 = vsel %vm2203_vm5, %v2201_v38, %v2103_v42 }
 0x20b   : > { %v2795_v63 = vpack.c.bf16 %v2234_v56, %v2234_v56  ;;  %v2394_v61 = vadd.f32 %v2393_v25, %v2392_v54  ;;  %v1973_v11 = vpop.permute.xlu0 %1972  ;;  %v2336_v53 = vmul.f32 %v2234_v56, %v2234_v56  ;;  %v2296_v44 = vsel %vm2236_vm7, %v2234_v56, 0.0 }
 0x20c   : > { %v2200_v50 = vsel %vm2170_vm4, %v2167_v28, %v1973_v11 }
 0x20d   : > { %2574 = vst.msk [vmem:[%s4132_s11 + $0x78] sm:$0xf] %vm2543_vm6, %v2795_v63  ;;  %v2233_v0 = vsel %vm2203_vm5, %v2200_v50, %v4107_v17  ;;  %v2105_v46 = vpop.permute.xlu1 %2104  ;;  %v2397_v3 = vsel %vm2236_vm7, %v2336_v53, 0.0 }
 0x20e   : > { %v2294_v24 = vsel %vm2236_vm7, %v2233_v0, 0.0  ;;  %v2335_v9 = vmul.f32 %v2233_v0, %v2233_v0  ;;  %v2794_v51 = vpack.c.bf16 %v2233_v0, %v2233_v0 }
 0x20f   : > { %v2295_v4 = vadd.f32 %v2294_v24, %v2293_v59  ;;  %v1977_v36 = vpop.permute.xlu0 %1976 }
 0x210   : > { %v2395_v27 = vsel %vm2236_vm7, %v2335_v9, 0.0  ;;  %2573 = vst.msk [vmem:[%s4132_s11 + $0x74] sm:$0xf] %vm2543_vm6, %v2794_v51  ;;  %v2202_v17 = vsel %vm2170_vm4, %v2169_v6, %v1977_v36 }
 0x211   : > { %v2396_v58 = vadd.f32 %v2395_v27, %v2394_v61  ;;  %v2297_v23 = vadd.f32 %v2296_v44, %v2295_v4  ;;  %v2235_v20 = vsel %vm2203_vm5, %v2202_v17, %v2105_v46 }
 0x212   : > { %v2298_v22 = vsel %vm2236_vm7, %v2235_v20, 0.0  ;;  %v2337_v12 = vmul.f32 %v2235_v20, %v2235_v20  ;;  %v2796_v39 = vpack.c.bf16 %v2235_v20, %v2235_v20 }
 0x213   : > { %v2398_v16 = vadd.f32 %v2397_v3, %v2396_v58  ;;  %v2299_v13 = vadd.f32 %v2298_v22, %v2297_v23 }
 0x214   : > { %v2399_v62 = vsel %vm2236_vm7, %v2337_v12, 0.0  ;;  %2575 = vst.msk [vmem:[%s4132_s11 + $0x7c] sm:$0xf] %vm2543_vm6, %v2796_v39 }
 0x215   : > { %v2300_v1 = vrot.slane %v2299_v13, 4  ;;  %v2400_v30 = vadd.f32 %v2399_v62, %v2398_v16 }
 0x217   : > { %v2301_v19 = vadd.f32 %v2300_v1, %v2299_v13  ;;  %v2401_v5 = vrot.slane %v2400_v30, 4 }
 0x219   : > { %v2302_v29 = vrot.slane %v2301_v19, 2  ;;  %v2402_v45 = vadd.f32 %v2401_v5, %v2400_v30 }
 0x21b   : > { %v2303_v35 = vadd.f32 %v2302_v29, %v2301_v19  ;;  %v2403_v57 = vrot.slane %v2402_v45, 2 }
 0x21d   : > { %v2304_v60 = vrot.slane %v2303_v35, 1  ;;  %v2404_v10 = vadd.f32 %v2403_v57, %v2402_v45 }
 0x21f   : > { %v2405_v18 = vrot.slane %v2404_v10, 1  ;;  %v2305_v33 = vadd.f32 %v2304_v60, %v2303_v35 }
 0x221   : > { %v2406_v37 = vadd.f32 %v2405_v18, %v2404_v10 }
 0x223   : > { %v2408_v41 = vsel %vm2407_vm8, %v2305_v33, %v2406_v37 }
 0x224   : > { %2410 = vrot.lane.b32.xlu0 %v2408_v41, %s2981_s12 }
 0x296   : > { %v2411_v2 = vpop.permute.xlu0 %2410 }
 0x297   : > { %2414 = vst.msk [vmem:[%s370_s18] sm:$0x3] %vm2413_vm9, %v2411_v2 }
 0x298 PF: > { %s21_s13 = sadd.s32 1, %s2975_s13  }
 0x299   : > { %p18_p4 = scmp.ge.s32.totalorder %s21_s13, 4  }
 0x29b   :  { %20 = sbr.rel (!%p18_p4) target bundleno = 1 (0x1), region = 100 }

// kernel: _lambda_.3
= control target key start
LH: loop header
LB: loop body
LE: loop exit
PB: predicated region body
PF: predicated region fallthrough
CT: control target
= control target key end

     0   :  { %14 = vsyncpa [#allocation5], 0  ;;  %s18435_s0 = inlined_call_operand.vmem [shape: bf16[2,256,28], index: 0, kind: input, shape index: {}]   ;;  %s18436_s1 = inlined_call_operand.vmem [shape: f32[1,20], index: 1, kind: input, shape index: {}]   ;;  %s18437_s2 = inlined_call_operand.vmem [shape: f32[1,20], index: 2, kind: input, shape index: {}]   ;;  %s18438_s3 = inlined_call_operand.vmem [shape: bf16[9,8,16], index: 3, kind: input, shape index: {}]   ;;  %s18439_s4 = inlined_call_operand.vmem [shape: f32[1,16], index: 4, kind: input, shape index: {}]   ;;  %s18440_s5 = inlined_call_operand.vmem [shape: bf16[25,4,8], index: 5, kind: input, shape index: {}]   ;;  %s18441_s6 = inlined_call_operand.vmem [shape: f32[1,8], index: 6, kind: input, shape index: {}]   ;;  %s18442_s7 = inlined_call_operand.vmem [shape: bf16[8,8], index: 7, kind: input, shape index: {}]   ;;  %s18443_s8 = inlined_call_operand.vmem [shape: f32[1,8], index: 8, kind: input, shape index: {}]   ;;  %s18444_s9 = inlined_call_operand.hbm [shape: f32[2,256,40], index: 9, kind: output, shape index: {}]  }
   0x1   :  { %16 = vsyncpa [#allocation5 + $0x1], 0  ;;  %s15435_s30 = smov 0   ;;  %s15437_s10 = smov 0  }
   0x2   :  { %s15439_s11 = smov 0   ;;  %s15441_s12 = smov 0  }
   0x3 LB: > { %s15456_s13 = sadd.s32 4294967295, %s15374_s12   ;;  %s11727_s14 = sadd.s32 4294967294, %s15374_s12   ;;  %s15374_s12 = sphi %s15441_s12, %s18551_s12   ;;  %s15370_s11 = sphi %s15439_s11, %s18550_s11   ;;  %s15366_s10 = sphi %s15437_s10, %s18549_s10   ;;  %s15362_s30 = sphi %s15435_s30, %s18548_s30  }
   0x4   : > { %s15460_s15 = sadd.s32 1, %s15374_s12   ;;  %s223_s16 = sadd.s32 1, %s15370_s11 }
   0x5   : > { %s220_s17 = ssub.s32 %s15374_s12, %s15460_s15  ;;  %p233_p0 = scmp.ne.s32.totalorder %s15370_s11, %s15366_s10 }
   0x6   : > { %p221_p1 = scmp.eq.s32.totalorder %s220_s17, 0  ;;  %p234_p2 = scmp.eq.s32.totalorder %s15456_s13, 1 }
   0x7   : > { %p239_p3 = scmp.ne.s32.totalorder %s15366_s10, %s15362_s30  ;;  %p240_p4 = scmp.eq.s32.totalorder %s11727_s14, 1 }
   0x8   : > { %s15471_s18 = scalar_select %p221_p1, %s15370_s11, %s223_s16  }
   0x9   : > { %p15473_p5 = por %p234_p2, %p233_p0  ;;  %p15477_p6 = por %p240_p4, %p239_p3 }
   0xa   : > { %p11730_p7 = scmp.ge.s32.totalorder %s15374_s12, 1  ;;  %p290_p8 = scmp.lt.s32.totalorder %s15374_s12, 3 }
   0xc   : > { %p291_p9 = pnand %p11730_p7, %p290_p8 }
   0xe   : > { %294 = sbr.rel (%p291_p9) target bundleno = 1861 (0x745), region = 56 }
  0x15   : > { %v11734_v0 = vld [vmem:[%s18436_s1] ss:$0 sm:$0xff]  ;;  %s15376_s23 = smov 8   ;;  %p326_p10 = scmp.lt.s32.totalorder %s15456_s13, 1  ;;  %vm3671_vm0 = vcmask 1041408   ;;  %vm3339_vm1 = vcmask 31744  }
  0x16   : > { %402 = vrot.lane.b32.xlu0 %v11734_v0, %s15376_s23  ;;  %v11735_v1 = vld [vmem:[%s18437_s2] ss:$0 sm:$0xff]  ;;  %s15377_s16 = smov 112   ;;  %v12007_v31 = vld [vmem:[%s18440_s5 + $0xe] sm:$0x3]  ;;  %s15378_s22 = smov 120  }
  0x17   : > { %s327_s26 = scalar_select %p326_p10, %s15456_s13, 1  ;;  %15245 = vmatprep.subr.msk.bf16.mxu1 %vm3671_vm0, %v12007_v31  ;;  %vm864_vm2 = vcmask 1043456   ;;  %vm510_vm3 = vcmask 64512   ;;  %vm513_vm4 = vcmask 58368   ;;  %vm519_vm5 = vcmask 57344  }
  0x18   : > { %vm3354_vm6 = vcmask 25600   ;;  %vm3342_vm7 = vcmask 27648   ;;  %s15381_s21 = smov 32   ;;  %s15382_s25 = smov 24   ;;  %vm11552_vm8 = vcmask 195584   ;;  %vm11585_vm9 = vcmask 261120  }
  0x19   : > { %s12336_s27 = sshll.u32 %s327_s26, 7  ;;  %s323_s26 = sand.u32 1, %s15366_s10   ;;  %vm11618_vm10 = vcmask 326656  }
  0x1a   : > { %443 = vrot.lane.b32.xlu0 %v11735_v1, %s15376_s23  ;;  %s15496_s14 = scalar_lea.vmem %s18435_s0, %s12336_s27  ;;  %s11731_s27 = sshll.u32 %s323_s26, 8 }
  0x1b   : > { %v15499_v2 = vld [vmem:[%s15496_s14 + $0x40] sm:$0xff]   ;;  %v15502_v3 = vld [vmem:[%s15496_s14 + $0x38] sm:$0xff]   ;;  %v15514_v10 = vld [vmem:[%s15496_s14 + $0x48] sm:$0xff]   ;;  %s18132_s28 = scalar_lea.vmem [#allocation4], %s11731_s27  ;;  %s12337_s29 = sshll.u32 %s15456_s13, 12 }
  0x1c   : > { %18497 = vst [vmem:[#allocation7_spill] sm:$0xff] %v15499_v2  ;;  %v15505_v4 = vld [vmem:[%s15496_s14] sm:$0xff]   ;;  %v18452_v5 = vunpack.c.l.bf16 %v15499_v2  ;;  %v18457_v6 = vunpack.c.l.bf16 %v15502_v3  ;;  %v18456_v8 = vunpack.c.h.bf16 %v15502_v3  ;;  %18498 = vst [vmem:[#allocation8_spill] sm:$0xff] %v15514_v10  ;;  %v18451_v14 = vunpack.c.h.bf16 %v15499_v2  ;;  %v15535_v20 = vld [vmem:[%s15496_s14 + $0x50] sm:$0xff]   ;;  %s18381_s17 = scalar_lea.hbm %s18444_s9, %s12337_s29  ;;  %s15383_s24 = smov [#allocation4]  }
  0x1d   : > { %v18472_v9 = vunpack.c.l.bf16 %v15505_v4  ;;  %v18455_v15 = vunpack.c.l.bf16 %v15514_v10  ;;  %18499 = vst [vmem:[#allocation9_spill] sm:$0xff] %v15535_v20  ;;  %v15544_v25 = vld [vmem:[%s15496_s14 + $0x10] sm:$0xff]   ;;  %v18471_v26 = vunpack.c.h.bf16 %v15505_v4  ;;  %v18447_v29 = vunpack.c.l.bf16 %v15535_v20  ;;  %v15559_v30 = vld [vmem:[%s15496_s14 + $0x8] sm:$0xff]   ;;  %v15614_v54 = vld [vmem:[%s15496_s14 + $0x58] sm:$0xff]  }
  0x1e   : > { %v18462_v32 = vunpack.c.l.bf16 %v15544_v25  ;;  %v18461_v33 = vunpack.c.h.bf16 %v15544_v25  ;;  %v18475_v38 = vunpack.c.l.bf16 %v15559_v30  ;;  %v18473_v39 = vunpack.c.h.bf16 %v15559_v30  ;;  %18500 = vst [vmem:[#allocation10_spill] sm:$0xff] %v15614_v54  ;;  %v15637_v1 = vld [vmem:[%s15496_s14 + $0x60] sm:$0xff]  }
  0x1f   : > { %v18453_v42 = vunpack.c.h.bf16 %v15514_v10  ;;  %v18446_v52 = vunpack.c.h.bf16 %v15535_v20  ;;  %v18450_v61 = vunpack.c.l.bf16 %v15614_v54  ;;  %18501 = vst [vmem:[#allocation11_spill] sm:$0xff] %v15637_v1 }
  0x88   : > { %v15509_v7 = vpop.permute.xlu0 %402 }
  0x89   : > { %v421_v11 = vmul.f32 %v18452_v5, %v15509_v7  ;;  %v419_v12 = vmul.f32 %v18457_v6, %v15509_v7  ;;  %v420_v18 = vmul.f32 %v18456_v8, %v15509_v7  ;;  %v405_v19 = vmul.f32 %v18472_v9, %v15509_v7 }
  0x8a   : > { %v422_v27 = vmul.f32 %v18451_v14, %v15509_v7  ;;  %v423_v28 = vmul.f32 %v18455_v15, %v15509_v7  ;;  %v406_v40 = vmul.f32 %v18471_v26, %v15509_v7  ;;  %v425_v41 = vmul.f32 %v18447_v29, %v15509_v7  ;;  %v15942_v15 = vld [vmem:[%s15496_s14 + $0x30] sm:$0xff]  }
  0x8b   : > { %v409_v43 = vmul.f32 %v18462_v32, %v15509_v7  ;;  %v410_v44 = vmul.f32 %v18461_v33, %v15509_v7  ;;  %v407_v49 = vmul.f32 %v18475_v38, %v15509_v7  ;;  %v408_v50 = vmul.f32 %v18473_v39, %v15509_v7  ;;  %18504 = vst [vmem:[#allocation14_spill] sm:$0xff] %v15942_v15 }
  0x8c   : > { %v15522_v13 = vpop.permute.xlu0 %443  ;;  %v424_v51 = vmul.f32 %v18453_v42, %v15509_v7  ;;  %v426_v62 = vmul.f32 %v18446_v52, %v15509_v7 }
  0x8d   : > { %v462_v16 = vadd.f32 %v15522_v13, %v421_v11  ;;  %v460_v17 = vadd.f32 %v15522_v13, %v419_v12  ;;  %v461_v23 = vadd.f32 %v15522_v13, %v420_v18  ;;  %v446_v24 = vadd.f32 %v15522_v13, %v405_v19  ;;  %v11736_v19 = vld [vmem:[%s18438_s3 + $0x4] sm:$0xf] }
  0x8e   : > { %v463_v36 = vadd.f32 %v15522_v13, %v422_v27  ;;  %v464_v37 = vadd.f32 %v15522_v13, %v423_v28  ;;  %v447_v47 = vadd.f32 %v15522_v13, %v406_v40  ;;  %v466_v48 = vadd.f32 %v15522_v13, %v425_v41  ;;  %15228 = vmatprep.subr.msk.bf16.mxu0 %vm864_vm2, %v11736_v19 }
  0x8f   : > { %v15537_v21 = vmax.f32 %v462_v16, 0.0  ;;  %v15539_v22 = vmax.f32 %v460_v17, 0.0  ;;  %v15567_v34 = vmax.f32 %v461_v23, 0.0  ;;  %v15569_v35 = vmax.f32 %v446_v24, 0.0 }
  0x90   : > { %v15592_v45 = vmax.f32 %v463_v36, 0.0  ;;  %v15594_v46 = vmax.f32 %v464_v37, 0.0  ;;  %v450_v53 = vadd.f32 %v15522_v13, %v409_v43  ;;  %v451_v55 = vadd.f32 %v15522_v13, %v410_v44 }
  0x91   : > { %3427 = vrot.lane.b32.xlu0 %v15537_v21, %s15377_s16  ;;  %3423 = vrot.lane.b32.xlu1 %v15539_v22, %s15377_s16  ;;  %v448_v56 = vadd.f32 %v15522_v13, %v407_v49  ;;  %v449_v57 = vadd.f32 %v15522_v13, %v408_v50  ;;  %v15619_v58 = vmax.f32 %v447_v47, 0.0  ;;  %v15621_v59 = vmax.f32 %v466_v48, 0.0 }
  0x92   : > { %v465_v60 = vadd.f32 %v15522_v13, %v424_v51  ;;  %v15632_v63 = vmax.f32 %v450_v53, 0.0  ;;  %v15634_v0 = vmax.f32 %v451_v55, 0.0  ;;  %v15640_v11 = vsel %vm3671_vm0, %v12007_v31, 0  ;;  %v15666_v31 = vld [vmem:[%s15496_s14 + $0x18] sm:$0xff]   ;;  %v15789_v51 = vld [vmem:[%s15496_s14 + $0x20] sm:$0xff]  }
  0x93   : > { %v15642_v12 = vmax.f32 %v448_v56, 0.0  ;;  %v15644_v16 = vmax.f32 %v449_v57, 0.0  ;;  %14203 = vmatpush3.bf16.msra.mxu1 %v15640_v11  ;;  %v467_v18 = vadd.f32 %v15522_v13, %v426_v62  ;;  %v18445_v23 = vunpack.c.l.bf16 %v15637_v1 }
  0x94   : > { %v15647_v17 = vmax.f32 %v465_v60, 0.0  ;;  %v427_v24 = vmul.f32 %v18450_v61, %v15509_v7  ;;  %v10852_v27 = vpack.c.bf16 %v15619_v58, %v15569_v35  ;;  %v10854_v28 = vpack.c.bf16 %v15634_v0, %v15632_v63 }
  0x95   : > { %3425 = vrot.lane.b32.xlu1 %v15567_v34, %s15377_s16  ;;  %588 = vrot.lane.b32.xlu0 %v15569_v35, %s15378_s22  ;;  %v10853_v36 = vpack.c.bf16 %v15644_v16, %v15642_v12  ;;  %v866_v37 = vsel %vm864_vm2, %v11736_v19, 0  ;;  %v15672_v40 = vmax.f32 %v467_v18, 0.0  ;;  %v15379_v43 = vmov 0.0   ;;  %v15880_v18 = vld [vmem:[%s15496_s14 + $0x68] sm:$0xff]  }
  0x96   : > { %v15675_v41 = vadd.f32 %v15522_v13, %v427_v24  ;;  %13013 = vmatpush3.bf16.msra.mxu0 %v866_v37  ;;  %511 = vst.msk [vmem:[#allocation2] sm:$0xff] %vm510_vm3, %v15379_v43  ;;  %512 = vst.msk [vmem:[#allocation2 + $0x8] sm:$0xff] %vm510_vm3, %v15379_v43  ;;  %v10860_v44 = vpack.c.bf16 %v15592_v45, %v15537_v21  ;;  %v429_v48 = vmul.f32 %v18445_v23, %v15509_v7 }
  0x97   : > { %516 = vst.msk [vmem:[#allocation2 + $0x198] sm:$0xff] %vm510_vm3, %v15379_v43  ;;  %517 = vst.msk [vmem:[#allocation2 + $0x1a0] sm:$0xff] %vm510_vm3, %v15379_v43  ;;  %v18448_v49 = vunpack.c.h.bf16 %v15614_v54  ;;  %v18468_v50 = vunpack.c.l.bf16 %v15666_v31  ;;  %v18449_v60 = vunpack.c.h.bf16 %v15637_v1  ;;  %v18458_v62 = vunpack.c.l.bf16 %v15789_v51 }
  0x98   : > { %3340 = vst.msk [vmem:[#allocation3] sm:$0xff] %vm3339_vm1, %v15379_v43  ;;  %3341 = vst.msk [vmem:[#allocation3 + $0x8] sm:$0xff] %vm3339_vm1, %v15379_v43  ;;  %v15864_v53 = vmax.f32 %v15675_v41, 0.0  ;;  %v470_v55 = vadd.f32 %v15522_v13, %v429_v48 }
  0x99   : > { %3429 = vrot.lane.b32.xlu1 %v15592_v45, %s15377_s16  ;;  %3431 = vrot.lane.b32.xlu0 %v15594_v46, %s15377_s16  ;;  %3344 = vst.msk [vmem:[#allocation3 + $0x18] sm:$0xff] %vm3339_vm1, %v15379_v43  ;;  %3345 = vst.msk [vmem:[#allocation3 + $0x20] sm:$0xff] %vm3339_vm1, %v15379_v43  ;;  %v428_v56 = vmul.f32 %v18448_v49, %v15509_v7  ;;  %v411_v57 = vmul.f32 %v18468_v50, %v15509_v7 }
  0x9a   : > { %3348 = vst.msk [vmem:[#allocation3 + $0x1b0] sm:$0xff] %vm3339_vm1, %v15379_v43  ;;  %3349 = vst.msk [vmem:[#allocation3 + $0x1b8] sm:$0xff] %vm3339_vm1, %v15379_v43  ;;  %v15882_v24 = vmax.f32 %v470_v55, 0.0  ;;  %v430_v52 = vmul.f32 %v18449_v60, %v15509_v7  ;;  %v413_v55 = vmul.f32 %v18458_v62, %v15509_v7 }
  0x9b   : > { %3351 = vst.msk [vmem:[#allocation3 + $0x1c8] sm:$0xff] %vm3339_vm1, %v15379_v43  ;;  %3352 = vst.msk [vmem:[#allocation3 + $0x1d0] sm:$0xff] %vm3339_vm1, %v15379_v43  ;;  %v469_v37 = vadd.f32 %v15522_v13, %v428_v56  ;;  %v452_v41 = vadd.f32 %v15522_v13, %v411_v57  ;;  %v18465_v56 = vunpack.c.h.bf16 %v15666_v31  ;;  %v18454_v57 = vunpack.c.l.bf16 %v15880_v18 }
  0x9c   : > { %514 = vst.msk [vmem:[#allocation2 + $0x10] sm:$0x3] %vm513_vm4, %v15379_v43  ;;  %518 = vst.msk [vmem:[#allocation2 + $0x1a8] sm:$0x3] %vm513_vm4, %v15379_v43  ;;  %v471_v49 = vadd.f32 %v15522_v13, %v430_v52  ;;  %v454_v60 = vadd.f32 %v15522_v13, %v413_v55 }
  0x9d   : > { %590 = vrot.lane.b32.xlu1 %v15619_v58, %s15378_s22  ;;  %3435 = vrot.lane.b32.xlu0 %v15621_v59, %s15377_s16  ;;  %520 = vst.msk [vmem:[#allocation2] sm:$0x1] %vm519_vm5, %v15379_v43  ;;  %521 = vst.msk [vmem:[#allocation2 + $0x18] sm:$0x1] %vm519_vm5, %v15379_v43  ;;  %v766_v19 = vld [vmem:[#allocation2 + $0x1] sm:$0xff]  ;;  %v15904_v29 = vmax.f32 %v452_v41, 0.0  ;;  %v412_v61 = vmul.f32 %v18465_v56, %v15509_v7 }
  0x9e   : > { %522 = vst.msk [vmem:[#allocation2 + $0x30] sm:$0x1] %vm519_vm5, %v15379_v43  ;;  %523 = vst.msk [vmem:[#allocation2 + $0x48] sm:$0x1] %vm519_vm5, %v15379_v43  ;;  %v15921_v41 = vld [vmem:[%s15496_s14 + $0x28] sm:$0xff]   ;;  %v15923_v55 = vmax.f32 %v471_v49, 0.0 }
  0x9f   : > { %524 = vst.msk [vmem:[#allocation2 + $0x60] sm:$0x1] %vm519_vm5, %v15379_v43  ;;  %525 = vst.msk [vmem:[#allocation2 + $0x78] sm:$0x1] %vm519_vm5, %v15379_v43  ;;  %v15925_v14 = vmax.f32 %v454_v60, 0.0  ;;  %v453_v5 = vadd.f32 %v15522_v13, %v412_v61  ;;  %v18463_v60 = vunpack.c.h.bf16 %v15880_v18  ;;  %v18464_v61 = vunpack.c.l.bf16 %v15921_v41 }
  0xa0   : > { %526 = vst.msk [vmem:[#allocation2 + $0x90] sm:$0x1] %vm519_vm5, %v15379_v43  ;;  %527 = vst.msk [vmem:[#allocation2 + $0xa8] sm:$0x1] %vm519_vm5, %v15379_v43 }
  0xa1   : > { %3433 = vrot.lane.b32.xlu1 %v15647_v17, %s15377_s16  ;;  %592 = vrot.lane.b32.xlu0 %v15642_v12, %s15378_s22  ;;  %528 = vst.msk [vmem:[#allocation2 + $0xc0] sm:$0x1] %vm519_vm5, %v15379_v43  ;;  %529 = vst.msk [vmem:[#allocation2 + $0xd8] sm:$0x1] %vm519_vm5, %v15379_v43 }
  0xa2   : > { %530 = vst.msk [vmem:[#allocation2 + $0xf0] sm:$0x1] %vm519_vm5, %v15379_v43  ;;  %531 = vst.msk [vmem:[#allocation2 + $0x108] sm:$0x1] %vm519_vm5, %v15379_v43 }
  0xa3   : > { %532 = vst.msk [vmem:[#allocation2 + $0x120] sm:$0x1] %vm519_vm5, %v15379_v43  ;;  %533 = vst.msk [vmem:[#allocation2 + $0x138] sm:$0x1] %vm519_vm5, %v15379_v43  ;;  %v767_v48 = vld [vmem:[#allocation2 + $0x9] sm:$0xff] }
  0xa4   : > { %534 = vst.msk [vmem:[#allocation2 + $0x150] sm:$0x1] %vm519_vm5, %v15379_v43  ;;  %535 = vst.msk [vmem:[#allocation2 + $0x168] sm:$0x1] %vm519_vm5, %v15379_v43  ;;  %v798_v23 = vpack.c.bf16 %v767_v48, %v766_v19  ;;  %v15899_v19 = vld [vmem:[%s15496_s14 + $0x70] sm:$0xff]   ;;  %v15902_v48 = vmax.f32 %v469_v37, 0.0  ;;  %v18460_v37 = vunpack.c.h.bf16 %v15789_v51 }
  0xa5   : > { %536 = vst.msk [vmem:[#allocation2 + $0x180] sm:$0x1] %vm519_vm5, %v15379_v43  ;;  %539 = vst.msk [vmem:[#allocation2 + $0x29] sm:$0x1] %vm519_vm5, %v15379_v43  ;;  %3437 = vrot.lane.b32.xlu1 %v15672_v40, %s15377_s16  ;;  %596 = vrot.lane.b32.xlu0 %v15632_v63, %s15378_s22  ;;  %v18459_v52 = vunpack.c.l.bf16 %v15899_v19 }
  0xa6   : > { %540 = vst.msk [vmem:[#allocation2 + $0x41] sm:$0x1] %vm519_vm5, %v15379_v43  ;;  %541 = vst.msk [vmem:[#allocation2 + $0x59] sm:$0x1] %vm519_vm5, %v15379_v43  ;;  %13014 = vmatprep.mubr.msk.bf16.mxu0 %vm510_vm3, %v798_v23  ;;  %v431_v23 = vmul.f32 %v18454_v57, %v15509_v7  ;;  %v414_v57 = vmul.f32 %v18460_v37, %v15509_v7 }
  0xa7   : > { %542 = vst.msk [vmem:[#allocation2 + $0x71] sm:$0x1] %vm519_vm5, %v15379_v43  ;;  %543 = vst.msk [vmem:[#allocation2 + $0x89] sm:$0x1] %vm519_vm5, %v15379_v43  ;;  %v433_v49 = vmul.f32 %v18459_v52, %v15509_v7  ;;  %v432_v52 = vmul.f32 %v18463_v60, %v15509_v7 }
  0xa8   : > { %544 = vst.msk [vmem:[#allocation2 + $0xa1] sm:$0x1] %vm519_vm5, %v15379_v43  ;;  %545 = vst.msk [vmem:[#allocation2 + $0xb9] sm:$0x1] %vm519_vm5, %v15379_v43  ;;  %v472_v42 = vadd.f32 %v15522_v13, %v431_v23  ;;  %v15944_v23 = vmax.f32 %v453_v5, 0.0  ;;  %v455_v6 = vadd.f32 %v15522_v13, %v414_v57  ;;  %v415_v5 = vmul.f32 %v18464_v61, %v15509_v7 }
  0xa9   : > { %546 = vst.msk [vmem:[#allocation2 + $0xd1] sm:$0x1] %vm519_vm5, %v15379_v43  ;;  %547 = vst.msk [vmem:[#allocation2 + $0xe9] sm:$0x1] %vm519_vm5, %v15379_v43  ;;  %594 = vrot.lane.b32.xlu1 %v15644_v16, %s15378_s22  ;;  %3439 = vrot.lane.b32.xlu0 %v15864_v53, %s15377_s16  ;;  %v474_v62 = vadd.f32 %v15522_v13, %v433_v49  ;;  %v18467_v57 = vunpack.c.l.bf16 %v15942_v15  ;;  %v473_v33 = vadd.f32 %v15522_v13, %v432_v52 }
  0xaa   : > { %548 = vst.msk [vmem:[#allocation2 + $0x101] sm:$0x1] %vm519_vm5, %v15379_v43  ;;  %549 = vst.msk [vmem:[#allocation2 + $0x119] sm:$0x1] %vm519_vm5, %v15379_v43  ;;  %v15946_v8 = vmax.f32 %v472_v42, 0.0  ;;  %v18466_v42 = vunpack.c.h.bf16 %v15899_v19  ;;  %v15962_v37 = vmax.f32 %v455_v6, 0.0  ;;  %v456_v32 = vadd.f32 %v15522_v13, %v415_v5 }
  0xab   : > { %550 = vst.msk [vmem:[#allocation2 + $0x131] sm:$0x1] %vm519_vm5, %v15379_v43  ;;  %551 = vst.msk [vmem:[#allocation2 + $0x149] sm:$0x1] %vm519_vm5, %v15379_v43  ;;  %v15964_v49 = vmax.f32 %v474_v62, 0.0  ;;  %v417_v6 = vmul.f32 %v18467_v57, %v15509_v7  ;;  %v18469_v62 = vunpack.c.h.bf16 %v15921_v41  ;;  %v15979_v61 = vmax.f32 %v473_v33, 0.0 }
  0xac   : > { %552 = vst.msk [vmem:[#allocation2 + $0x161] sm:$0x1] %vm519_vm5, %v15379_v43  ;;  %553 = vst.msk [vmem:[#allocation2 + $0x179] sm:$0x1] %vm519_vm5, %v15379_v43  ;;  %v434_v60 = vmul.f32 %v18466_v42, %v15509_v7  ;;  %v15981_v52 = vmax.f32 %v456_v32, 0.0  ;;  %v18470_v57 = vunpack.c.h.bf16 %v15942_v15 }
  0xad   : > { %554 = vst.msk [vmem:[#allocation2 + $0x191] sm:$0x1] %vm519_vm5, %v15379_v43  ;;  %537 = vst.msk [vmem:[#allocation2 + $0x198] sm:$0x1] %vm519_vm5, %v15379_v43  ;;  %598 = vrot.lane.b32.xlu1 %v15634_v0, %s15378_s22  ;;  %3443 = vrot.lane.b32.xlu0 %v15882_v24, %s15377_s16  ;;  %v458_v56 = vadd.f32 %v15522_v13, %v417_v6  ;;  %v416_v42 = vmul.f32 %v18469_v62, %v15509_v7 }
  0xae   : > { %538 = vst.msk [vmem:[#allocation2 + $0x11] sm:$0x1] %vm519_vm5, %v15379_v43  ;;  %555 = vst.msk [vmem:[#allocation2 + $0x1a9] sm:$0x1] %vm519_vm5, %v15379_v43  ;;  %v475_v5 = vadd.f32 %v15522_v13, %v434_v60  ;;  %v418_v6 = vmul.f32 %v18470_v57, %v15509_v7 }
  0xaf   : > { %3355 = vst.msk [vmem:[#allocation3] sm:$0x3] %vm3354_vm6, %v15379_v43  ;;  %3356 = vst.msk [vmem:[#allocation3 + $0x18] sm:$0x3] %vm3354_vm6, %v15379_v43  ;;  %v15995_v32 = vmax.f32 %v458_v56, 0.0  ;;  %v457_v60 = vadd.f32 %v15522_v13, %v416_v42 }
  0xb0   : > { %3357 = vst.msk [vmem:[#allocation3 + $0x30] sm:$0x3] %vm3354_vm6, %v15379_v43  ;;  %3358 = vst.msk [vmem:[#allocation3 + $0x48] sm:$0x3] %vm3354_vm6, %v15379_v43  ;;  %v15993_v33 = vmax.f32 %v475_v5, 0.0  ;;  %v459_v62 = vadd.f32 %v15522_v13, %v418_v6 }
  0xb1   : > { %3359 = vst.msk [vmem:[#allocation3 + $0x60] sm:$0x3] %vm3354_vm6, %v15379_v43  ;;  %3360 = vst.msk [vmem:[#allocation3 + $0x78] sm:$0x3] %vm3354_vm6, %v15379_v43  ;;  %3441 = vrot.lane.b32.xlu1 %v15902_v48, %s15377_s16  ;;  %600 = vrot.lane.b32.xlu0 %v15904_v29, %s15378_s22  ;;  %v16005_v50 = vmax.f32 %v457_v60, 0.0 }
  0xb2   : > { %3361 = vst.msk [vmem:[#allocation3 + $0x90] sm:$0x3] %vm3354_vm6, %v15379_v43  ;;  %3362 = vst.msk [vmem:[#allocation3 + $0xa8] sm:$0x3] %vm3354_vm6, %v15379_v43  ;;  %v16015_v56 = vld [vmem:[%s18440_s5 + $0x10] sm:$0x3] }
  0xb3   : > { %3363 = vst.msk [vmem:[#allocation3 + $0xc0] sm:$0x3] %vm3354_vm6, %v15379_v43  ;;  %3364 = vst.msk [vmem:[#allocation3 + $0xd8] sm:$0x3] %vm3354_vm6, %v15379_v43  ;;  %v16017_v42 = vmax.f32 %v459_v62, 0.0  ;;  %15246 = vmatprep.subr.msk.bf16.mxu1 %vm3671_vm0, %v16015_v56 }
  0xb4   : > { %3365 = vst.msk [vmem:[#allocation3 + $0xf0] sm:$0x3] %vm3354_vm6, %v15379_v43  ;;  %3366 = vst.msk [vmem:[#allocation3 + $0x108] sm:$0x3] %vm3354_vm6, %v15379_v43  ;;  %v16024_v5 = vld [vmem:[%s18438_s3] sm:$0xf] }
  0xb5   : > { %3367 = vst.msk [vmem:[#allocation3 + $0x120] sm:$0x3] %vm3354_vm6, %v15379_v43  ;;  %3368 = vst.msk [vmem:[#allocation3 + $0x138] sm:$0x3] %vm3354_vm6, %v15379_v43  ;;  %3445 = vrot.lane.b32.xlu1 %v15923_v55, %s15377_s16  ;;  %604 = vrot.lane.b32.xlu0 %v15925_v14, %s15378_s22 }
  0xb6   : > { %3369 = vst.msk [vmem:[#allocation3 + $0x150] sm:$0x3] %vm3354_vm6, %v15379_v43  ;;  %3370 = vst.msk [vmem:[#allocation3 + $0x168] sm:$0x3] %vm3354_vm6, %v15379_v43  ;;  %15229 = vmatprep.subr.msk.bf16.mxu0 %vm864_vm2, %v16024_v5 }
  0xb7   : > { %3371 = vst.msk [vmem:[#allocation3 + $0x180] sm:$0x3] %vm3354_vm6, %v15379_v43  ;;  %3372 = vst.msk [vmem:[#allocation3 + $0x198] sm:$0x3] %vm3354_vm6, %v15379_v43 }
  0xb8   : > { %3373 = vst.msk [vmem:[#allocation3 + $0x1b0] sm:$0x3] %vm3354_vm6, %v15379_v43  ;;  %3374 = vst.msk [vmem:[#allocation3 + $0x1c8] sm:$0x3] %vm3354_vm6, %v15379_v43 }
  0xb9   : > { %3377 = vst.msk [vmem:[#allocation3 + $0x42] sm:$0x3] %vm3354_vm6, %v15379_v43  ;;  %3378 = vst.msk [vmem:[#allocation3 + $0x5a] sm:$0x3] %vm3354_vm6, %v15379_v43  ;;  %602 = vrot.lane.b32.xlu1 %v15944_v23, %s15378_s22  ;;  %3447 = vrot.lane.b32.xlu0 %v15946_v8, %s15377_s16 }
  0xba   : > { %3379 = vst.msk [vmem:[#allocation3 + $0x72] sm:$0x3] %vm3354_vm6, %v15379_v43  ;;  %3380 = vst.msk [vmem:[#allocation3 + $0x8a] sm:$0x3] %vm3354_vm6, %v15379_v43 }
  0xbb   : > { %3381 = vst.msk [vmem:[#allocation3 + $0xa2] sm:$0x3] %vm3354_vm6, %v15379_v43  ;;  %3382 = vst.msk [vmem:[#allocation3 + $0xba] sm:$0x3] %vm3354_vm6, %v15379_v43 }
  0xbc   : > { %3383 = vst.msk [vmem:[#allocation3 + $0xd2] sm:$0x3] %vm3354_vm6, %v15379_v43  ;;  %3384 = vst.msk [vmem:[#allocation3 + $0xea] sm:$0x3] %vm3354_vm6, %v15379_v43 }
  0xbd   : > { %3385 = vst.msk [vmem:[#allocation3 + $0x102] sm:$0x3] %vm3354_vm6, %v15379_v43  ;;  %3386 = vst.msk [vmem:[#allocation3 + $0x11a] sm:$0x3] %vm3354_vm6, %v15379_v43  ;;  %606 = vrot.lane.b32.xlu1 %v15962_v37, %s15378_s22  ;;  %3451 = vrot.lane.b32.xlu0 %v15964_v49, %s15377_s16 }
  0xbe   : > { %3387 = vst.msk [vmem:[#allocation3 + $0x132] sm:$0x3] %vm3354_vm6, %v15379_v43  ;;  %3388 = vst.msk [vmem:[#allocation3 + $0x14a] sm:$0x3] %vm3354_vm6, %v15379_v43 }
  0xbf   : > { %3389 = vst.msk [vmem:[#allocation3 + $0x162] sm:$0x3] %vm3354_vm6, %v15379_v43  ;;  %3390 = vst.msk [vmem:[#allocation3 + $0x17a] sm:$0x3] %vm3354_vm6, %v15379_v43 }
  0xc0   : > { %3391 = vst.msk [vmem:[#allocation3 + $0x192] sm:$0x3] %vm3354_vm6, %v15379_v43  ;;  %3392 = vst.msk [vmem:[#allocation3 + $0x1aa] sm:$0x3] %vm3354_vm6, %v15379_v43 }
  0xc1   : > { %18502 = vst [vmem:[#allocation12_spill] sm:$0xff] %v15880_v18  ;;  %18503 = vst [vmem:[#allocation13_spill] sm:$0xff] %v15899_v19  ;;  %3449 = vrot.lane.b32.xlu1 %v15979_v61, %s15377_s16  ;;  %608 = vrot.lane.b32.xlu0 %v15981_v52, %s15378_s22 }
  0xc2   : > { %3346 = vst.msk [vmem:[#allocation3 + $0x28] sm:$0xf] %vm3342_vm7, %v15379_v43  ;;  %3343 = vst.msk [vmem:[#allocation3 + $0x10] sm:$0xf] %vm3342_vm7, %v15379_v43 }
  0xc3   : > { %3350 = vst.msk [vmem:[#allocation3 + $0x1c0] sm:$0xf] %vm3342_vm7, %v15379_v43  ;;  %3353 = vst.msk [vmem:[#allocation3 + $0x1d8] sm:$0xf] %vm3342_vm7, %v15379_v43 }
  0xc4   : > { %3376 = vst.msk [vmem:[#allocation3 + $0x2a] sm:$0x3] %vm3354_vm6, %v15379_v43  ;;  %3375 = vst.msk [vmem:[#allocation3 + $0x12] sm:$0x3] %vm3354_vm6, %v15379_v43 }
  0xc5   : > { %3453 = vrot.lane.b32.xlu1 %v15993_v33, %s15377_s16  ;;  %612 = vrot.lane.b32.xlu0 %v15995_v32, %s15378_s22  ;;  %3393 = vst.msk [vmem:[#allocation3 + $0x1c2] sm:$0x3] %vm3354_vm6, %v15379_v43  ;;  %3394 = vst.msk [vmem:[#allocation3 + $0x1da] sm:$0x3] %vm3354_vm6, %v15379_v43  ;;  %v16085_v43 = vld [vmem:[%s15496_s14 + $0x78] sm:$0xff]   ;;  %s15380_s14 = smov 108  }
  0xc6   : > { %18505 = vst [vmem:[#allocation15_spill] sm:$0xff] %v16085_v43  ;;  %v18474_v62 = vunpack.c.l.bf16 %v16085_v43  ;;  %v18476_v57 = vunpack.c.h.bf16 %v16085_v43 }
  0xc8   : > { %v435_v60 = vmul.f32 %v18474_v62, %v15509_v7 }
  0xc9   : > { %610 = vrot.lane.b32.xlu1 %v16005_v50, %s15378_s22  ;;  %3395 = vrot.lane.b32.xlu0 %v15569_v35, %s15377_s16 }
  0xca   : > { %v476_v6 = vadd.f32 %v15522_v13, %v435_v60  ;;  %v436_v60 = vmul.f32 %v18476_v57, %v15509_v7 }
  0xcc   : > { %v16105_v39 = vmax.f32 %v476_v6, 0.0  ;;  %v477_v47 = vadd.f32 %v15522_v13, %v436_v60 }
  0xcd   : > { %614 = vrot.lane.b32.xlu1 %v16017_v42, %s15378_s22  ;;  %616 = vrot.lane.b32.xlu0 %v15539_v22, %s15378_s22 }
  0xce   : > { %v16123_v6 = vmax.f32 %v477_v47, 0.0 }
  0xd1   : > { %3397 = vrot.lane.b32.xlu1 %v15619_v58, %s15377_s16  ;;  %620 = vrot.lane.b32.xlu0 %v15537_v21, %s15378_s22 }
  0xd5   : > { %618 = vrot.lane.b32.xlu1 %v15567_v34, %s15378_s22  ;;  %3399 = vrot.lane.b32.xlu0 %v15642_v12, %s15377_s16 }
  0xd9   : > { %622 = vrot.lane.b32.xlu1 %v15592_v45, %s15378_s22  ;;  %3403 = vrot.lane.b32.xlu0 %v15632_v63, %s15377_s16 }
  0xdd   : > { %3401 = vrot.lane.b32.xlu1 %v15644_v16, %s15377_s16  ;;  %624 = vrot.lane.b32.xlu0 %v15594_v46, %s15378_s22 }
  0xe1   : > { %3405 = vrot.lane.b32.xlu1 %v15634_v0, %s15377_s16  ;;  %628 = vrot.lane.b32.xlu0 %v15621_v59, %s15378_s22 }
  0xe5   : > { %626 = vrot.lane.b32.xlu1 %v15647_v17, %s15378_s22  ;;  %3407 = vrot.lane.b32.xlu0 %v15904_v29, %s15377_s16 }
  0xe9   : > { %630 = vrot.lane.b32.xlu1 %v15672_v40, %s15378_s22  ;;  %3411 = vrot.lane.b32.xlu0 %v15925_v14, %s15377_s16 }
  0xed   : > { %3409 = vrot.lane.b32.xlu1 %v15944_v23, %s15377_s16  ;;  %632 = vrot.lane.b32.xlu0 %v15864_v53, %s15378_s22 }
  0xf1   : > { %3413 = vrot.lane.b32.xlu1 %v15962_v37, %s15377_s16  ;;  %636 = vrot.lane.b32.xlu0 %v15882_v24, %s15378_s22 }
  0xf5   : > { %634 = vrot.lane.b32.xlu1 %v15902_v48, %s15378_s22  ;;  %3415 = vrot.lane.b32.xlu0 %v15981_v52, %s15377_s16 }
  0xf9   : > { %638 = vrot.lane.b32.xlu1 %v15923_v55, %s15378_s22  ;;  %3419 = vrot.lane.b32.xlu0 %v15995_v32, %s15377_s16 }
  0xfd   : > { %3417 = vrot.lane.b32.xlu1 %v16005_v50, %s15377_s16  ;;  %640 = vrot.lane.b32.xlu0 %v15946_v8, %s15378_s22 }
 0x101   : > { %3421 = vrot.lane.b32.xlu1 %v16017_v42, %s15377_s16  ;;  %644 = vrot.lane.b32.xlu0 %v15964_v49, %s15378_s22 }
 0x103   : > { %v3428_v26 = vpop.permute.xlu0 %3427  ;;  %v3424_v9 = vpop.permute.xlu1 %3423 }
 0x104   : > { %3508 = vst.msk [vmem:[#allocation3 + $0xf2] sm:$0xff] %vm3339_vm1, %v3428_v26  ;;  %3506 = vst.msk [vmem:[#allocation3 + $0xda] sm:$0xff] %vm3339_vm1, %v3424_v9 }
 0x105   : > { %642 = vrot.lane.b32.xlu1 %v15979_v61, %s15378_s22  ;;  %3455 = vrot.lane.b32.xlu0 %v16105_v39, %s15377_s16 }
 0x107   : > { %v3426_v62 = vpop.permute.xlu1 %3425  ;;  %v589_v38 = vpop.permute.xlu0 %588 }
 0x108   : > { %3507 = vst.msk [vmem:[#allocation3 + $0xe2] sm:$0xff] %vm3339_vm1, %v3426_v62 }
 0x109   : > { %685 = vst.msk [vmem:[#allocation2 + $0x19] sm:$0xff] %vm510_vm3, %v589_v38  ;;  %646 = vrot.lane.b32.xlu1 %v15993_v33, %s15378_s22  ;;  %648 = vrot.lane.b32.xlu0 %v16105_v39, %s15378_s22 }
 0x10b   : > { %v3430_v9 = vpop.permute.xlu1 %3429  ;;  %v3432_v26 = vpop.permute.xlu0 %3431  ;;  %v5535_v38 = vld [vmem:[#allocation3 + $0xda] sm:$0xff]  ;;  %v5537_v60 = vld [vmem:[#allocation3 + $0xf2] sm:$0xff] }
 0x10c   : > { %3509 = vst.msk [vmem:[#allocation3 + $0xfa] sm:$0xff] %vm3339_vm1, %v3430_v9  ;;  %3510 = vst.msk [vmem:[#allocation3 + $0x10a] sm:$0xff] %vm3339_vm1, %v3432_v26 }
 0x10d   : > { %3457 = vrot.lane.b32.xlu1 %v16123_v6, %s15377_s16  ;;  %10892 = vrot.lane.b32.xlu0 %v10852_v27, %s15380_s14  ;;  %v10856_v27 = vpack.c.bf16 %v15962_v37, %v15925_v14  ;;  %v16156_v14 = vld [vmem:[%s18440_s5 + $0x12] sm:$0x3]  ;;  %v10858_v37 = vpack.c.bf16 %v16017_v42, %v15995_v32  ;;  %v10857_v42 = vpack.c.bf16 %v16005_v50, %v15981_v52 }
 0x10f   : > { %v591_v7 = vpop.permute.xlu1 %590  ;;  %v3436_v13 = vpop.permute.xlu0 %3435  ;;  %v5536_v62 = vld [vmem:[#allocation3 + $0xe2] sm:$0xff] }
 0x110   : > { %686 = vst.msk [vmem:[#allocation2 + $0x21] sm:$0xff] %vm510_vm3, %v591_v7  ;;  %v5559_v47 = vpack.c.bf16 %v5536_v62, %v5535_v38  ;;  %v5912_v7 = vsel %vm3671_vm0, %v16015_v56, 0  ;;  %v768_v56 = vld [vmem:[#allocation2 + $0x19] sm:$0xff]  ;;  %v10862_v62 = vpack.c.bf16 %v15672_v40, %v15621_v59  ;;  %v10861_v59 = vpack.c.bf16 %v15647_v17, %v15594_v46 }
 0x111   : > { %3512 = vst.msk [vmem:[#allocation3 + $0x122] sm:$0xff] %vm3339_vm1, %v3436_v13  ;;  %650 = vrot.lane.b32.xlu1 %v16123_v6, %s15378_s22  ;;  %10896 = vrot.lane.b32.xlu0 %v10854_v28, %s15380_s14  ;;  %v10855_v28 = vpack.c.bf16 %v15944_v23, %v15904_v29  ;;  %v16174_v29 = vld [vmem:[%s18438_s3 + $0x8] sm:$0xf]  ;;  %v10864_v40 = vpack.c.bf16 %v15923_v55, %v15882_v24 }
 0x112   : > { %13574 = vmatprep.mubr.msk.bf16.mxu1 %vm3339_vm1, %v5559_v47  ;;  %v10863_v46 = vpack.c.bf16 %v15902_v48, %v15864_v53  ;;  %v10866_v17 = vpack.c.bf16 %v15993_v33, %v15964_v49  ;;  %v10865_v53 = vpack.c.bf16 %v15979_v61, %v15946_v8 }
 0x113   : > { %v3434_v35 = vpop.permute.xlu1 %3433  ;;  %v593_v58 = vpop.permute.xlu0 %592  ;;  %v5538_v9 = vld [vmem:[#allocation3 + $0xfa] sm:$0xff] }
 0x114   : > { %3511 = vst.msk [vmem:[#allocation3 + $0x112] sm:$0xff] %vm3339_vm1, %v3434_v35  ;;  %v5560_v26 = vpack.c.bf16 %v5538_v9, %v5537_v60 }
 0x115   : > { %687 = vst.msk [vmem:[#allocation2 + $0x31] sm:$0xff] %vm510_vm3, %v593_v58  ;;  %10894 = vrot.lane.b32.xlu1 %v10853_v36, %s15380_s14  ;;  %10900 = vrot.lane.b32.xlu0 %v10856_v27, %s15380_s14  ;;  %v1078_v36 = vsel %vm864_vm2, %v16024_v5, 0  ;;  %v5539_v5 = vld [vmem:[#allocation3 + $0x10a] sm:$0xff]  ;;  %v18506_v27 = vpack.c.bf16 %v15567_v34, %v15539_v22 }
 0x116   : > { %13575 = vmatmul.mubr.msk.bf16.vlgmr.msra.gmra.mrb[0].mxu1 %vm3339_vm1, %v5560_v26 }
 0x117   : > { %v3438_v63 = vpop.permute.xlu1 %3437  ;;  %v597_v0 = vpop.permute.xlu0 %596  ;;  %v769_v12 = vld [vmem:[#allocation2 + $0x21] sm:$0xff]  ;;  %13591 = vmatpush3.bf16.msra.mxu1 %v5912_v7 }
 0x118   : > { %3513 = vst.msk [vmem:[#allocation3 + $0x12a] sm:$0xff] %vm3339_vm1, %v3438_v63  ;;  %v799_v16 = vpack.c.bf16 %v769_v12, %v768_v56  ;;  %15247 = vmatprep.subr.msk.bf16.mxu1 %vm3671_vm0, %v16156_v14  ;;  %v5541_v47 = vld [vmem:[#allocation3 + $0x122] sm:$0xff] }
 0x119   : > { %689 = vst.msk [vmem:[#allocation2 + $0x49] sm:$0xff] %vm510_vm3, %v597_v0  ;;  %10898 = vrot.lane.b32.xlu1 %v10855_v28, %s15380_s14  ;;  %10904 = vrot.lane.b32.xlu0 %v10858_v37, %s15380_s14  ;;  %v10867_v37 = vpack.c.bf16 %v16123_v6, %v16105_v39 }
 0x11a   : > { %13015 = vmatmul.mubr.msk.bf16.vlgmr.msra.gmra.mrb[0].mxu0 %vm510_vm3, %v799_v16 }
 0x11b   : > { %v595_v23 = vpop.permute.xlu1 %594  ;;  %v3440_v32 = vpop.permute.xlu0 %3439  ;;  %v5540_v13 = vld [vmem:[#allocation3 + $0x112] sm:$0xff]  ;;  %13047 = vmatpush3.bf16.msra.mxu0 %v1078_v36 }
 0x11c   : > { %688 = vst.msk [vmem:[#allocation2 + $0x39] sm:$0xff] %vm510_vm3, %v595_v23  ;;  %v5561_v38 = vpack.c.bf16 %v5540_v13, %v5539_v5  ;;  %15230 = vmatprep.subr.msk.bf16.mxu0 %vm864_vm2, %v16174_v29 }
 0x11d   : > { %3514 = vst.msk [vmem:[#allocation3 + $0x13a] sm:$0xff] %vm3339_vm1, %v3440_v32  ;;  %10902 = vrot.lane.b32.xlu1 %v10857_v42, %s15380_s14  ;;  %10908 = vrot.lane.b32.xlu0 %v10860_v44, %s15380_s14  ;;  %v770_v44 = vld [vmem:[#allocation2 + $0x31] sm:$0xff] }
 0x11e   : > { %13578 = vmatprep.mubr.msk.bf16.mxu1 %vm3339_vm1, %v5561_v38 }
 0x11f   : > { %v599_v50 = vpop.permute.xlu1 %598  ;;  %v3444_v52 = vpop.permute.xlu0 %3443  ;;  %v5542_v35 = vld [vmem:[#allocation3 + $0x12a] sm:$0xff] }
 0x120   : > { %690 = vst.msk [vmem:[#allocation2 + $0x51] sm:$0xff] %vm510_vm3, %v599_v50  ;;  %v5562_v58 = vpack.c.bf16 %v5542_v35, %v5541_v47  ;;  %v772_v24 = vld [vmem:[#allocation2 + $0x49] sm:$0xff] }
 0x121   : > { %3516 = vst.msk [vmem:[#allocation3 + $0x152] sm:$0xff] %vm3339_vm1, %v3444_v52  ;;  %10906 = vrot.lane.b32.xlu1 %v18506_v27, %s15380_s14  ;;  %10912 = vrot.lane.b32.xlu0 %v10862_v62, %s15380_s14  ;;  %v5813_v35 = vld [vmem:[#allocation3 + $0x1b] sm:$0xff] }
 0x122   : > { %13579 = vmatmul.mubr.msk.bf16.gmra.mrb[4].mxu1 %vm3339_vm1, %v5562_v58  ;;  %v5814_v58 = vld [vmem:[#allocation3 + $0x23] sm:$0xff] }
 0x123   : > { %v3442_v21 = vpop.permute.xlu1 %3441  ;;  %v601_v45 = vpop.permute.xlu0 %600  ;;  %v771_v60 = vld [vmem:[#allocation2 + $0x39] sm:$0xff] }
 0x124   : > { %3515 = vst.msk [vmem:[#allocation3 + $0x142] sm:$0xff] %vm3339_vm1, %v3442_v21  ;;  %v800_v22 = vpack.c.bf16 %v771_v60, %v770_v44  ;;  %v5543_v48 = vld [vmem:[#allocation3 + $0x13a] sm:$0xff] }
 0x125   : > { %691 = vst.msk [vmem:[#allocation2 + $0x61] sm:$0xff] %vm510_vm3, %v601_v45  ;;  %10910 = vrot.lane.b32.xlu1 %v10861_v59, %s15380_s14  ;;  %10916 = vrot.lane.b32.xlu0 %v10864_v40, %s15380_s14  ;;  %v5845_v40 = vpack.c.bf16 %v5814_v58, %v5813_v35 }
 0x126   : > { %13018 = vmatprep.mubr.msk.bf16.mxu0 %vm510_vm3, %v800_v22 }
 0x127   : > { %v3446_v34 = vpop.permute.xlu1 %3445  ;;  %v605_v9 = vpop.permute.xlu0 %604  ;;  %v773_v55 = vld [vmem:[#allocation2 + $0x51] sm:$0xff] }
 0x128   : > { %3517 = vst.msk [vmem:[#allocation3 + $0x15a] sm:$0xff] %vm3339_vm1, %v3446_v34  ;;  %v801_v26 = vpack.c.bf16 %v773_v55, %v772_v24  ;;  %v5545_v56 = vld [vmem:[#allocation3 + $0x152] sm:$0xff] }
 0x129   : > { %693 = vst.msk [vmem:[#allocation2 + $0x79] sm:$0xff] %vm510_vm3, %v605_v9  ;;  %10914 = vrot.lane.b32.xlu1 %v10863_v46, %s15380_s14  ;;  %10920 = vrot.lane.b32.xlu0 %v10866_v17, %s15380_s14 }
 0x12a   : > { %13019 = vmatmul.mubr.msk.bf16.gmra.mrb[4].mxu0 %vm510_vm3, %v801_v26 }
 0x12b   : > { %v603_v7 = vpop.permute.xlu1 %602  ;;  %v3448_v63 = vpop.permute.xlu0 %3447  ;;  %v5544_v49 = vld [vmem:[#allocation3 + $0x142] sm:$0xff] }
 0x12c   : > { %692 = vst.msk [vmem:[#allocation2 + $0x69] sm:$0xff] %vm510_vm3, %v603_v7  ;;  %v5563_v33 = vpack.c.bf16 %v5544_v49, %v5543_v48  ;;  %v774_v36 = vld [vmem:[#allocation2 + $0x61] sm:$0xff] }
 0x12d   : > { %3518 = vst.msk [vmem:[#allocation3 + $0x16a] sm:$0xff] %vm3339_vm1, %v3448_v63  ;;  %10918 = vrot.lane.b32.xlu1 %v10865_v53, %s15380_s14 }
 0x12e   : > { %13582 = vmatprep.mubr.msk.bf16.mxu1 %vm3339_vm1, %v5563_v33 }
 0x12f   : > { %v607_v0 = vpop.permute.xlu1 %606  ;;  %v3452_v28 = vpop.permute.xlu0 %3451  ;;  %v5546_v12 = vld [vmem:[#allocation3 + $0x15a] sm:$0xff] }
 0x130   : > { %694 = vst.msk [vmem:[#allocation2 + $0x81] sm:$0xff] %vm510_vm3, %v607_v0  ;;  %v5564_v8 = vpack.c.bf16 %v5546_v12, %v5545_v56  ;;  %v776_v42 = vld [vmem:[#allocation2 + $0x79] sm:$0xff]  ;;  %v6206_v0 = vsel %vm3671_vm0, %v16156_v14, 0 }
 0x131   : > { %3520 = vst.msk [vmem:[#allocation3 + $0x182] sm:$0xff] %vm3339_vm1, %v3452_v28  ;;  %10922 = vrot.lane.b32.xlu1 %v10867_v37, %s15380_s14  ;;  %v16255_v28 = vld [vmem:[%s18440_s5 + $0x14] sm:$0x3]  ;;  %s11665_s14 = sshll.u32 %s18132_s28, 4  ;;  %s18386_s14 = int_to_ptr.vmem [resolvable:$true] %s11665_s14 }
 0x132   : > { %13583 = vmatmul.mubr.msk.bf16.gmra.mrb[8].mxu1 %vm3339_vm1, %v5564_v8  ;;  %s15312_s22 = scalar_lea.vmem %s18386_s14, 4096 }
 0x133   : > { %v3450_v61 = vpop.permute.xlu1 %3449  ;;  %v609_v16 = vpop.permute.xlu0 %608  ;;  %v775_v23 = vld [vmem:[#allocation2 + $0x69] sm:$0xff]  ;;  %p15313_p11 = scmp.ne.s32.totalorder %s18386_s14, %s15312_s22 }
 0x134   : > { %3519 = vst.msk [vmem:[#allocation3 + $0x172] sm:$0xff] %vm3339_vm1, %v3450_v61  ;;  %v802_v39 = vpack.c.bf16 %v775_v23, %v774_v36  ;;  %v5547_v52 = vld [vmem:[#allocation3 + $0x16a] sm:$0xff] }
 0x135   : > { %695 = vst.msk [vmem:[#allocation2 + $0x91] sm:$0xff] %vm510_vm3, %v609_v16  ;;  %p15314_p12 = pnand %p15313_p11, %p15473_p5 }
 0x136   : > { %13022 = vmatprep.mubr.msk.bf16.mxu0 %vm510_vm3, %v802_v39 }
 0x137   : > { %v3454_v6 = vpop.permute.xlu1 %3453  ;;  %v613_v32 = vpop.permute.xlu0 %612  ;;  %v777_v5 = vld [vmem:[#allocation2 + $0x81] sm:$0xff]  ;;  %p15315_p13 = pneg %p15314_p12 }
 0x138   : > { %3521 = vst.msk [vmem:[#allocation3 + $0x18a] sm:$0xff] %vm3339_vm1, %v3454_v6  ;;  %v803_v13 = vpack.c.bf16 %v777_v5, %v776_v42  ;;  %v5549_v45 = vld [vmem:[#allocation3 + $0x182] sm:$0xff] }
 0x139   : > { %697 = vst.msk [vmem:[#allocation2 + $0xa9] sm:$0xff] %vm510_vm3, %v613_v32 }
 0x13a   : > { %13023 = vmatmul.mubr.msk.bf16.gmra.mrb[8].mxu0 %vm510_vm3, %v803_v13 }
 0x13b   : > { %v611_v38 = vpop.permute.xlu1 %610  ;;  %v3396_v50 = vpop.permute.xlu0 %3395  ;;  %v5548_v62 = vld [vmem:[#allocation3 + $0x172] sm:$0xff] }
 0x13c   : > { %696 = vst.msk [vmem:[#allocation2 + $0x99] sm:$0xff] %vm510_vm3, %v611_v38  ;;  %v5565_v47 = vpack.c.bf16 %v5548_v62, %v5547_v52  ;;  %v778_v34 = vld [vmem:[#allocation2 + $0x91] sm:$0xff] }
 0x13d   : > { %3492 = vst.msk [vmem:[#allocation3 + $0x32] sm:$0xff] %vm3339_vm1, %v3396_v50 }
 0x13e   : > { %13586 = vmatprep.mubr.msk.bf16.mxu1 %vm3339_vm1, %v5565_v47 }
 0x13f   : > { %v615_v27 = vpop.permute.xlu1 %614  ;;  %v617_v21 = vpop.permute.xlu0 %616  ;;  %v5550_v59 = vld [vmem:[#allocation3 + $0x18a] sm:$0xff] }
 0x140   : > { %698 = vst.msk [vmem:[#allocation2 + $0xb1] sm:$0xff] %vm510_vm3, %v615_v27  ;;  %699 = vst.msk [vmem:[#allocation2 + $0xc1] sm:$0xff] %vm510_vm3, %v617_v21  ;;  %v5566_v44 = vpack.c.bf16 %v5550_v59, %v5549_v45  ;;  %v780_v55 = vld [vmem:[#allocation2 + $0xa9] sm:$0xff] }
 0x142   : > { %13587 = vmatmul.mubr.msk.bf16.gmra.mrb[12].mxu1 %vm3339_vm1, %v5566_v44 }
 0x143   : > { %v3398_v60 = vpop.permute.xlu1 %3397  ;;  %v621_v22 = vpop.permute.xlu0 %620  ;;  %v779_v9 = vld [vmem:[#allocation2 + $0x99] sm:$0xff]  ;;  %13592 = vmatprep.mubr.msk.bf16.mxu1 %vm3339_vm1, %v5845_v40 }
 0x144   : > { %3493 = vst.msk [vmem:[#allocation3 + $0x3a] sm:$0xff] %vm3339_vm1, %v3398_v60  ;;  %v804_v46 = vpack.c.bf16 %v779_v9, %v778_v34 }
 0x145   : > { %701 = vst.msk [vmem:[#allocation2 + $0xd9] sm:$0xff] %vm510_vm3, %v621_v22 }
 0x146   : > { %13026 = vmatprep.mubr.msk.bf16.mxu0 %vm510_vm3, %v804_v46 }
 0x147   : > { %v619_v17 = vpop.permute.xlu1 %618  ;;  %v3400_v24 = vpop.permute.xlu0 %3399  ;;  %v781_v26 = vld [vmem:[#allocation2 + $0xb1] sm:$0xff]  ;;  %v782_v12 = vld [vmem:[#allocation2 + $0xc1] sm:$0xff] }
 0x148   : > { %700 = vst.msk [vmem:[#allocation2 + $0xc9] sm:$0xff] %vm510_vm3, %v619_v17  ;;  %v805_v7 = vpack.c.bf16 %v781_v26, %v780_v55 }
 0x149   : > { %3494 = vst.msk [vmem:[#allocation3 + $0x4a] sm:$0xff] %vm3339_vm1, %v3400_v24 }
 0x14a   : > { %13027 = vmatmul.mubr.msk.bf16.gmra.mrb[12].mxu0 %vm510_vm3, %v805_v7 }
 0x14b   : > { %v623_v63 = vpop.permute.xlu1 %622  ;;  %v3404_v53 = vpop.permute.xlu0 %3403  ;;  %v5815_v48 = vld [vmem:[#allocation3 + $0x33] sm:$0xff]  ;;  %v5816_v49 = vld [vmem:[#allocation3 + $0x3b] sm:$0xff] }
 0x14c   : > { %702 = vst.msk [vmem:[#allocation2 + $0xe1] sm:$0xff] %vm510_vm3, %v623_v63  ;;  %v5846_v33 = vpack.c.bf16 %v5816_v49, %v5815_v48  ;;  %v784_v36 = vld [vmem:[#allocation2 + $0xd9] sm:$0xff] }
 0x14d   : > { %3496 = vst.msk [vmem:[#allocation3 + $0x62] sm:$0xff] %vm3339_vm1, %v3404_v53 }
 0x14e   : > { %13593 = vmatmul.mubr.msk.bf16.vlgmr.msra.gmra.mrb[16].mxu1 %vm3339_vm1, %v5846_v33 }
 0x14f   : > { %v3402_v37 = vpop.permute.xlu1 %3401  ;;  %v625_v56 = vpop.permute.xlu0 %624  ;;  %v783_v8 = vld [vmem:[#allocation2 + $0xc9] sm:$0xff]  ;;  %13625 = vmatpush3.bf16.msra.mxu1 %v6206_v0 }
 0x150   : > { %3495 = vst.msk [vmem:[#allocation3 + $0x52] sm:$0xff] %vm3339_vm1, %v3402_v37  ;;  %v806_v61 = vpack.c.bf16 %v783_v8, %v782_v12  ;;  %15248 = vmatprep.subr.msk.bf16.mxu1 %vm3671_vm0, %v16255_v28 }
 0x151   : > { %703 = vst.msk [vmem:[#allocation2 + $0xf1] sm:$0xff] %vm510_vm3, %v625_v56 }
 0x152   : > { %13030 = vmatprep.mubr.msk.bf16.mxu0 %vm510_vm3, %v806_v61 }
 0x153   : > { %v3406_v14 = vpop.permute.xlu1 %3405  ;;  %v629_v16 = vpop.permute.xlu0 %628  ;;  %v785_v23 = vld [vmem:[#allocation2 + $0xe1] sm:$0xff] }
 0x154   : > { %3497 = vst.msk [vmem:[#allocation3 + $0x6a] sm:$0xff] %vm3339_vm1, %v3406_v14  ;;  %v807_v39 = vpack.c.bf16 %v785_v23, %v784_v36 }
 0x155   : > { %705 = vst.msk [vmem:[#allocation2 + $0x109] sm:$0xff] %vm510_vm3, %v629_v16 }
 0x156   : > { %13031 = vmatmul.mubr.msk.bf16.gmra.mrb[16].mxu0 %vm510_vm3, %v807_v39 }
 0x157   : > { %v627_v6 = vpop.permute.xlu1 %626  ;;  %v3408_v32 = vpop.permute.xlu0 %3407  ;;  %v5817_v42 = vld [vmem:[#allocation3 + $0x4b] sm:$0xff]  ;;  %v5818_v5 = vld [vmem:[#allocation3 + $0x53] sm:$0xff] }
 0x158   : > { %704 = vst.msk [vmem:[#allocation2 + $0xf9] sm:$0xff] %vm510_vm3, %v627_v6  ;;  %v5847_v13 = vpack.c.bf16 %v5818_v5, %v5817_v42  ;;  %v786_v27 = vld [vmem:[#allocation2 + $0xf1] sm:$0xff] }
 0x159   : > { %3498 = vst.msk [vmem:[#allocation3 + $0x7a] sm:$0xff] %vm3339_vm1, %v3408_v32  ;;  %v5829_v32 = vld [vmem:[#allocation3 + $0xdb] sm:$0xff]  ;;  %v5830_v42 = vld [vmem:[#allocation3 + $0xe3] sm:$0xff] }
 0x15a   : > { %13596 = vmatprep.mubr.msk.bf16.mxu1 %vm3339_vm1, %v5847_v13 }
 0x15b   : > { %v631_v38 = vpop.permute.xlu1 %630  ;;  %v3412_v50 = vpop.permute.xlu0 %3411  ;;  %v5819_v52 = vld [vmem:[#allocation3 + $0x63] sm:$0xff]  ;;  %v5820_v62 = vld [vmem:[#allocation3 + $0x6b] sm:$0xff] }
 0x15c   : > { %706 = vst.msk [vmem:[#allocation2 + $0x111] sm:$0xff] %vm510_vm3, %v631_v38  ;;  %v5848_v47 = vpack.c.bf16 %v5820_v62, %v5819_v52  ;;  %v788_v44 = vld [vmem:[#allocation2 + $0x109] sm:$0xff]  ;;  %v5853_v62 = vpack.c.bf16 %v5830_v42, %v5829_v32 }
 0x15d   : > { %3500 = vst.msk [vmem:[#allocation3 + $0x92] sm:$0xff] %vm3339_vm1, %v3412_v50  ;;  %v723_v32 = vld [vmem:[#allocation2 + $0x48] sm:$0xff] }
 0x15e   : > { %13597 = vmatmul.mubr.msk.bf16.gmra.mrb[20].mxu1 %vm3339_vm1, %v5848_v47 }
 0x15f   : > { %v3410_v35 = vpop.permute.xlu1 %3409  ;;  %v633_v58 = vpop.permute.xlu0 %632  ;;  %v787_v21 = vld [vmem:[#allocation2 + $0xf9] sm:$0xff] }
 0x160   : > { %3499 = vst.msk [vmem:[#allocation3 + $0x82] sm:$0xff] %vm3339_vm1, %v3410_v35  ;;  %v808_v45 = vpack.c.bf16 %v787_v21, %v786_v27  ;;  %v717_v21 = vld [vmem:[#allocation2] sm:$0xff] }
 0x161   : > { %707 = vst.msk [vmem:[#allocation2 + $0x121] sm:$0xff] %vm510_vm3, %v633_v58 }
 0x162   : > { %13034 = vmatprep.mubr.msk.bf16.mxu0 %vm510_vm3, %v808_v45  ;;  %v718_v45 = vld [vmem:[#allocation2 + $0x8] sm:$0xff] }
 0x163   : > { %v3414_v59 = vpop.permute.xlu1 %3413  ;;  %v637_v40 = vpop.permute.xlu0 %636  ;;  %v789_v60 = vld [vmem:[#allocation2 + $0x111] sm:$0xff] }
 0x164   : > { %3501 = vst.msk [vmem:[#allocation3 + $0x9a] sm:$0xff] %vm3339_vm1, %v3414_v59  ;;  %v809_v22 = vpack.c.bf16 %v789_v60, %v788_v44  ;;  %v5831_v59 = vld [vmem:[#allocation3 + $0xf3] sm:$0xff]  ;;  %v5833_v44 = vld [vmem:[#allocation3 + $0x10b] sm:$0xff] }
 0x165   : > { %709 = vst.msk [vmem:[#allocation2 + $0x139] sm:$0xff] %vm510_vm3, %v637_v40  ;;  %v5832_v40 = vld [vmem:[#allocation3 + $0xfb] sm:$0xff]  ;;  %v5834_v60 = vld [vmem:[#allocation3 + $0x113] sm:$0xff] }
 0x166   : > { %13035 = vmatmul.mubr.msk.bf16.gmra.mrb[20].mxu0 %vm510_vm3, %v809_v22 }
 0x167   : > { %v635_v34 = vpop.permute.xlu1 %634  ;;  %v3416_v9 = vpop.permute.xlu0 %3415  ;;  %v5821_v46 = vld [vmem:[#allocation3 + $0x7b] sm:$0xff]  ;;  %v5822_v17 = vld [vmem:[#allocation3 + $0x83] sm:$0xff] }
 0x168   : > { %708 = vst.msk [vmem:[#allocation2 + $0x129] sm:$0xff] %vm510_vm3, %v635_v34  ;;  %v5849_v24 = vpack.c.bf16 %v5822_v17, %v5821_v46  ;;  %v790_v33 = vld [vmem:[#allocation2 + $0x121] sm:$0xff]  ;;  %v749_v46 = vpack.c.bf16 %v718_v45, %v717_v21  ;;  %v727_v21 = vld [vmem:[#allocation2 + $0x78] sm:$0xff] }
 0x169   : > { %3502 = vst.msk [vmem:[#allocation3 + $0xaa] sm:$0xff] %vm3339_vm1, %v3416_v9 }
 0x16a   : > { %13600 = vmatprep.mubr.msk.bf16.mxu1 %vm3339_vm1, %v5849_v24  ;;  %v5854_v24 = vpack.c.bf16 %v5832_v40, %v5831_v59 }
 0x16b   : > { %v639_v55 = vpop.permute.xlu1 %638  ;;  %v3420_v26 = vpop.permute.xlu0 %3419  ;;  %v5823_v7 = vld [vmem:[#allocation3 + $0x93] sm:$0xff]  ;;  %v5824_v63 = vld [vmem:[#allocation3 + $0x9b] sm:$0xff] }
 0x16c   : > { %710 = vst.msk [vmem:[#allocation2 + $0x141] sm:$0xff] %vm510_vm3, %v639_v55  ;;  %v5850_v53 = vpack.c.bf16 %v5824_v63, %v5823_v7  ;;  %v792_v8 = vld [vmem:[#allocation2 + $0x139] sm:$0xff]  ;;  %v5855_v55 = vpack.c.bf16 %v5834_v60, %v5833_v44  ;;  %v729_v44 = vld [vmem:[#allocation2 + $0x90] sm:$0xff] }
 0x16d   : > { %3504 = vst.msk [vmem:[#allocation3 + $0xc2] sm:$0xff] %vm3339_vm1, %v3420_v26  ;;  %v720_v26 = vld [vmem:[#allocation2 + $0x20] sm:$0xff]  ;;  %v5835_v7 = vld [vmem:[#allocation3 + $0x123] sm:$0xff] }
 0x16e   : > { %13601 = vmatmul.mubr.msk.bf16.gmra.mrb[24].mxu1 %vm3339_vm1, %v5850_v53  ;;  %v5836_v63 = vld [vmem:[#allocation3 + $0x12b] sm:$0xff] }
 0x16f   : > { %v3418_v48 = vpop.permute.xlu1 %3417  ;;  %v641_v49 = vpop.permute.xlu0 %640  ;;  %v791_v0 = vld [vmem:[#allocation2 + $0x129] sm:$0xff]  ;;  %v722_v53 = vld [vmem:[#allocation2 + $0x38] sm:$0xff] }
 0x170   : > { %3503 = vst.msk [vmem:[#allocation3 + $0xb2] sm:$0xff] %vm3339_vm1, %v3418_v48  ;;  %v810_v37 = vpack.c.bf16 %v791_v0, %v790_v33  ;;  %v719_v48 = vld [vmem:[#allocation2 + $0x18] sm:$0xff] }
 0x171   : > { %711 = vst.msk [vmem:[#allocation2 + $0x151] sm:$0xff] %vm510_vm3, %v641_v49  ;;  %v5837_v49 = vld [vmem:[#allocation3 + $0x13b] sm:$0xff]  ;;  %v5838_v33 = vld [vmem:[#allocation3 + $0x143] sm:$0xff]  ;;  %v16304_v0 = vpack.c.bf16 %v720_v26, %v719_v48 }
 0x172   : > { %13038 = vmatprep.mubr.msk.bf16.mxu0 %vm510_vm3, %v810_v37  ;;  %v1340_v37 = vsel %vm864_vm2, %v16174_v29, 0  ;;  %v724_v29 = vld [vmem:[#allocation2 + $0x50] sm:$0xff] }
 0x173   : > { %v3422_v56 = vpop.permute.xlu1 %3421  ;;  %v645_v12 = vpop.permute.xlu0 %644  ;;  %v793_v61 = vld [vmem:[#allocation2 + $0x141] sm:$0xff]  ;;  %v16323_v42 = vpack.c.bf16 %v724_v29, %v723_v32  ;;  %v6116_v29 = vld [vmem:[#allocation3 + $0x84] sm:$0xff] }
 0x174   : > { %3505 = vst.msk [vmem:[#allocation3 + $0xca] sm:$0xff] %vm3339_vm1, %v3422_v56  ;;  %v811_v14 = vpack.c.bf16 %v793_v61, %v792_v8  ;;  %v5856_v56 = vpack.c.bf16 %v5836_v63, %v5835_v7  ;;  %v16313_v61 = vld [vmem:[%s18438_s3 + $0xc] sm:$0xf]  ;;  %v733_v63 = vld [vmem:[#allocation2 + $0xc0] sm:$0xff] }
 0x175   : > { %713 = vst.msk [vmem:[#allocation2 + $0x169] sm:$0xff] %vm510_vm3, %v645_v12  ;;  %v721_v12 = vld [vmem:[#allocation2 + $0x30] sm:$0xff] }
 0x176   : > { %13039 = vmatmul.mubr.msk.bf16.gmra.mrb[24].mxu0 %vm510_vm3, %v811_v14  ;;  %v16308_v8 = vpack.c.bf16 %v722_v53, %v721_v12  ;;  %v5857_v14 = vpack.c.bf16 %v5838_v33, %v5837_v49  ;;  %v6500_v49 = vsel %vm3671_vm0, %v16255_v28, 0  ;;  %v16355_v33 = vld [vmem:[%s18440_s5 + $0x16] sm:$0x3]  ;;  %v6114_v12 = vld [vmem:[#allocation3 + $0x6c] sm:$0xff] }
 0x177   : > { %v643_v16 = vpop.permute.xlu1 %642  ;;  %v3456_v36 = vpop.permute.xlu0 %3455  ;;  %v5825_v23 = vld [vmem:[#allocation3 + $0xab] sm:$0xff]  ;;  %v5826_v39 = vld [vmem:[#allocation3 + $0xb3] sm:$0xff] }
 0x178   : > { %712 = vst.msk [vmem:[#allocation2 + $0x159] sm:$0xff] %vm510_vm3, %v643_v16  ;;  %v5851_v6 = vpack.c.bf16 %v5826_v39, %v5825_v23  ;;  %v794_v35 = vld [vmem:[#allocation2 + $0x151] sm:$0xff]  ;;  %v5839_v16 = vld [vmem:[#allocation3 + $0x153] sm:$0xff]  ;;  %v5841_v39 = vld [vmem:[#allocation3 + $0x16b] sm:$0xff] }
 0x179   : > { %3522 = vst.msk [vmem:[#allocation3 + $0x19a] sm:$0xff] %vm3339_vm1, %v3456_v36  ;;  %v5840_v36 = vld [vmem:[#allocation3 + $0x15b] sm:$0xff]  ;;  %v738_v28 = vld [vmem:[#allocation2 + $0xf8] sm:$0xff] }
 0x17a   : > { %13604 = vmatprep.mubr.msk.bf16.mxu1 %vm3339_vm1, %v5851_v6  ;;  %v726_v23 = vld [vmem:[#allocation2 + $0x68] sm:$0xff] }
 0x17b   : > { %v647_v5 = vpop.permute.xlu1 %646  ;;  %v649_v13 = vpop.permute.xlu0 %648  ;;  %v5827_v38 = vld [vmem:[#allocation3 + $0xc3] sm:$0xff]  ;;  %v5828_v50 = vld [vmem:[#allocation3 + $0xcb] sm:$0xff]  ;;  %v5842_v6 = vld [vmem:[#allocation3 + $0x173] sm:$0xff] }
 0x17c   : > { %714 = vst.msk [vmem:[#allocation2 + $0x171] sm:$0xff] %vm510_vm3, %v647_v5  ;;  %715 = vst.msk [vmem:[#allocation2 + $0x181] sm:$0xff] %vm510_vm3, %v649_v13  ;;  %v5852_v52 = vpack.c.bf16 %v5828_v50, %v5827_v38  ;;  %v796_v34 = vld [vmem:[#allocation2 + $0x169] sm:$0xff]  ;;  %v5858_v5 = vpack.c.bf16 %v5840_v36, %v5839_v16  ;;  %v725_v13 = vld [vmem:[#allocation2 + $0x60] sm:$0xff]  ;;  %v5859_v50 = vpack.c.bf16 %v5842_v6, %v5841_v39 }
 0x17d   : > { %v16325_v38 = vpack.c.bf16 %v726_v23, %v725_v13  ;;  %v735_v16 = vld [vmem:[#allocation2 + $0xd8] sm:$0xff]  ;;  %v737_v39 = vld [vmem:[#allocation2 + $0xf0] sm:$0xff]  ;;  %v6117_v13 = vld [vmem:[#allocation3 + $0x94] sm:$0xff] }
 0x17e   : > { %13605 = vmatmul.mubr.msk.bf16.gmra.mrb[28].mxu1 %vm3339_vm1, %v5852_v52  ;;  %v6107_v52 = vld [vmem:[#allocation3 + $0x1c] sm:$0xff]  ;;  %v16364_v6 = vpack.c.bf16 %v738_v28, %v737_v39  ;;  %v6125_v28 = vld [vmem:[#allocation3 + $0xf4] sm:$0xff] }
 0x17f   : > { %v3458_v47 = vpop.permute.xlu1 %3457  ;;  %13608 = vmatprep.mubr.msk.bf16.mxu1 %vm3339_vm1, %v5853_v62  ;;  %v795_v58 = vld [vmem:[#allocation2 + $0x159] sm:$0xff] }
 0x180   : > { %3523 = vst.msk [vmem:[#allocation3 + $0x1a2] sm:$0xff] %vm3339_vm1, %v3458_v47  ;;  %v812_v27 = vpack.c.bf16 %v795_v58, %v794_v35  ;;  %v6108_v62 = vld [vmem:[#allocation3 + $0x24] sm:$0xff]  ;;  %v728_v47 = vld [vmem:[#allocation2 + $0x80] sm:$0xff] }
 0x181   : > { %v5843_v35 = vld [vmem:[#allocation3 + $0x183] sm:$0xff]  ;;  %v5844_v58 = vld [vmem:[#allocation3 + $0x18b] sm:$0xff]  ;;  %v6139_v45 = vpack.c.bf16 %v6108_v62, %v6107_v52  ;;  %v16333_v59 = vpack.c.bf16 %v728_v47, %v727_v21  ;;  %v742_v52 = vld [vmem:[#allocation2 + $0x128] sm:$0xff] }
 0x182   : > { %13042 = vmatprep.mubr.msk.bf16.mxu0 %vm510_vm3, %v812_v27  ;;  %v730_v27 = vld [vmem:[#allocation2 + $0x98] sm:$0xff]  ;;  %v5860_v40 = vpack.c.bf16 %v5844_v58, %v5843_v35  ;;  %v6120_v47 = vld [vmem:[#allocation3 + $0xb4] sm:$0xff] }
 0x183   : > { %v651_v22 = vpop.permute.xlu1 %650  ;;  %v797_v9 = vld [vmem:[#allocation2 + $0x171] sm:$0xff]  ;;  %v16335_v60 = vpack.c.bf16 %v730_v27, %v729_v44  ;;  %v6119_v62 = vld [vmem:[#allocation3 + $0xac] sm:$0xff]  ;;  %v739_v35 = vld [vmem:[#allocation2 + $0x108] sm:$0xff] }
 0x184   : > { %716 = vst.msk [vmem:[#allocation2 + $0x189] sm:$0xff] %vm510_vm3, %v651_v22  ;;  %v813_v17 = vpack.c.bf16 %v797_v9, %v796_v34  ;;  %v732_v22 = vld [vmem:[#allocation2 + $0xb0] sm:$0xff]  ;;  %v6109_v34 = vld [vmem:[#allocation3 + $0x34] sm:$0xff] }
 0x185   : > { %v6110_v9 = vld [vmem:[#allocation3 + $0x3c] sm:$0xff]  ;;  %v741_v21 = vld [vmem:[#allocation2 + $0x120] sm:$0xff] }
 0x186   : > { %13043 = vmatmul.mubr.msk.bf16.gmra.mrb[28].mxu0 %vm510_vm3, %v813_v17  ;;  %13609 = vmatmul.mubr.msk.bf16.gmra.mrb[0].mxu1 %vm3339_vm1, %v5854_v24  ;;  %v6111_v17 = vld [vmem:[#allocation3 + $0x4c] sm:$0xff]  ;;  %v6112_v24 = vld [vmem:[#allocation3 + $0x54] sm:$0xff]  ;;  %v6140_v7 = vpack.c.bf16 %v6110_v9, %v6109_v34 }
 0x187   : > { %13612 = vmatprep.mubr.msk.bf16.mxu1 %vm3339_vm1, %v5855_v55  ;;  %13048 = vmatprep.mubr.msk.bf16.mxu0 %vm510_vm3, %v749_v46  ;;  %v734_v46 = vld [vmem:[#allocation2 + $0xc8] sm:$0xff]  ;;  %v6141_v48 = vpack.c.bf16 %v6112_v24, %v6111_v17  ;;  %v744_v44 = vld [vmem:[#allocation2 + $0x140] sm:$0xff]  ;;  %v746_v9 = vld [vmem:[#allocation2 + $0x158] sm:$0xff] }
 0x188   : > { %v731_v55 = vld [vmem:[#allocation2 + $0xa8] sm:$0xff]  ;;  %v16345_v53 = vpack.c.bf16 %v734_v46, %v733_v63  ;;  %v6122_v34 = vld [vmem:[#allocation3 + $0xcc] sm:$0xff]  ;;  %v6124_v17 = vld [vmem:[#allocation3 + $0xe4] sm:$0xff] }
 0x189   : > { %v16343_v26 = vpack.c.bf16 %v732_v22, %v731_v55  ;;  %v6121_v22 = vld [vmem:[#allocation3 + $0xc4] sm:$0xff]  ;;  %v6123_v46 = vld [vmem:[#allocation3 + $0xdc] sm:$0xff] }
 0x18a   : > { %v743_v24 = vld [vmem:[#allocation2 + $0x138] sm:$0xff]  ;;  %v745_v63 = vld [vmem:[#allocation2 + $0x150] sm:$0xff] }
 0x18b   : > { %v16382_v55 = vpack.c.bf16 %v744_v44, %v743_v24  ;;  %v1248_v24 = vld [vmem:[#allocation2 + $0x52] sm:$0xff] }
 0x18e   : > { %13049 = vmatmul.mubr.msk.bf16.vlgmr.msra.gmra.mrb[0].mxu0 %vm510_vm3, %v16304_v0  ;;  %13613 = vmatmul.mubr.msk.bf16.gmra.mrb[4].mxu1 %vm3339_vm1, %v5856_v56  ;;  %v6113_v56 = vld [vmem:[#allocation3 + $0x64] sm:$0xff] }
 0x18f   : > { %13081 = vmatpush3.bf16.msra.mxu0 %v1340_v37  ;;  %13052 = vmatprep.mubr.msk.bf16.mxu0 %vm510_vm3, %v16308_v8  ;;  %v736_v37 = vld [vmem:[#allocation2 + $0xe0] sm:$0xff]  ;;  %v6142_v23 = vpack.c.bf16 %v6114_v12, %v6113_v56  ;;  %v1242_v56 = vld [vmem:[#allocation2 + $0xa] sm:$0xff] }
 0x190   : > { %13616 = vmatprep.mubr.msk.bf16.mxu1 %vm3339_vm1, %v5857_v14  ;;  %15231 = vmatprep.subr.msk.bf16.mxu0 %vm864_vm2, %v16313_v61  ;;  %v6115_v14 = vld [vmem:[#allocation3 + $0x7c] sm:$0xff]  ;;  %v16362_v36 = vpack.c.bf16 %v736_v37, %v735_v16  ;;  %v1241_v37 = vld [vmem:[#allocation2 + $0x2] sm:$0xff] }
 0x191   : > { %v6143_v32 = vpack.c.bf16 %v6116_v29, %v6115_v14  ;;  %v748_v12 = vld [vmem:[#allocation2 + $0x170] sm:$0xff]  ;;  %v6127_v29 = vld [vmem:[#allocation3 + $0x10c] sm:$0xff]  ;;  %v6128_v16 = vld [vmem:[#allocation3 + $0x114] sm:$0xff]  ;;  %v1273_v39 = vpack.c.bf16 %v1242_v56, %v1241_v37 }
 0x192   : > { %v6126_v14 = vld [vmem:[#allocation3 + $0xfc] sm:$0xff]  ;;  %v6135_v56 = vld [vmem:[#allocation3 + $0x16c] sm:$0xff] }
 0x193   : > { %v1250_v37 = vld [vmem:[#allocation2 + $0x6a] sm:$0xff] }
 0x196   : > { %13053 = vmatmul.mubr.msk.bf16.gmra.mrb[4].mxu0 %vm510_vm3, %v16323_v42  ;;  %13617 = vmatmul.mubr.msk.bf16.gmra.mrb[8].mxu1 %vm3339_vm1, %v5858_v5  ;;  %v740_v5 = vld [vmem:[#allocation2 + $0x110] sm:$0xff] }
 0x197   : > { %13056 = vmatprep.mubr.msk.bf16.mxu0 %vm510_vm3, %v16325_v38  ;;  %13620 = vmatprep.mubr.msk.bf16.mxu1 %vm3339_vm1, %v5859_v50  ;;  %v6118_v50 = vld [vmem:[#allocation3 + $0x9c] sm:$0xff]  ;;  %v16372_v58 = vpack.c.bf16 %v740_v5, %v739_v35  ;;  %v6148_v5 = vpack.c.bf16 %v6126_v14, %v6125_v28 }
 0x198   : > { %v6144_v27 = vpack.c.bf16 %v6118_v50, %v6117_v13  ;;  %v6149_v13 = vpack.c.bf16 %v6128_v16, %v6127_v29  ;;  %v1243_v50 = vld [vmem:[#allocation2 + $0x1a] sm:$0xff]  ;;  %v1245_v35 = vld [vmem:[#allocation2 + $0x32] sm:$0xff] }
 0x19e   : > { %13057 = vmatmul.mubr.msk.bf16.gmra.mrb[8].mxu0 %vm510_vm3, %v16333_v59  ;;  %13621 = vmatmul.mubr.msk.bf16.gmra.mrb[12].mxu1 %vm3339_vm1, %v5860_v40  ;;  %v6145_v40 = vpack.c.bf16 %v6120_v47, %v6119_v62  ;;  %v6129_v62 = vld [vmem:[#allocation3 + $0x124] sm:$0xff]  ;;  %v6130_v47 = vld [vmem:[#allocation3 + $0x12c] sm:$0xff] }
 0x19f   : > { %13060 = vmatprep.mubr.msk.bf16.mxu0 %vm510_vm3, %v16335_v60  ;;  %13626 = vmatprep.mubr.msk.bf16.mxu1 %vm3339_vm1, %v6139_v45  ;;  %v16374_v45 = vpack.c.bf16 %v742_v52, %v741_v21  ;;  %v1244_v52 = vld [vmem:[#allocation2 + $0x22] sm:$0xff]  ;;  %v6131_v21 = vld [vmem:[#allocation3 + $0x13c] sm:$0xff] }
 0x1a0   : > { %v16399_v44 = vpack.c.bf16 %v1244_v52, %v1243_v50  ;;  %v1253_v50 = vld [vmem:[#allocation2 + $0x92] sm:$0xff]  ;;  %v1254_v52 = vld [vmem:[#allocation2 + $0x9a] sm:$0xff] }
 0x1a6   : > { %13061 = vmatmul.mubr.msk.bf16.gmra.mrb[12].mxu0 %vm510_vm3, %v16343_v26  ;;  %13627 = vmatmul.mubr.msk.bf16.vlgmr.msra.gmra.mrb[16].mxu1 %vm3339_vm1, %v6140_v7  ;;  %v6146_v7 = vpack.c.bf16 %v6122_v34, %v6121_v22  ;;  %v1634_v22 = vsel %vm864_vm2, %v16313_v61, 0  ;;  %v6150_v34 = vpack.c.bf16 %v6130_v47, %v6129_v62  ;;  %v1247_v61 = vld [vmem:[#allocation2 + $0x4a] sm:$0xff] }
 0x1a7   : > { %13064 = vmatprep.mubr.msk.bf16.mxu0 %vm510_vm3, %v16345_v53  ;;  %13630 = vmatprep.mubr.msk.bf16.mxu1 %vm3339_vm1, %v6141_v48  ;;  %v16384_v48 = vpack.c.bf16 %v746_v9, %v745_v63  ;;  %v6134_v63 = vld [vmem:[#allocation3 + $0x15c] sm:$0xff]  ;;  %v16418_v28 = vpack.c.bf16 %v1248_v24, %v1247_v61  ;;  %v1257_v61 = vld [vmem:[#allocation2 + $0xc2] sm:$0xff] }
 0x1a8   : > { %13659 = vmatpush3.bf16.msra.mxu1 %v6500_v49  ;;  %v6147_v49 = vpack.c.bf16 %v6124_v17, %v6123_v46  ;;  %v16408_v46 = vld [vmem:[%s18438_s3 + $0x10] sm:$0xf]  ;;  %v6402_v62 = vld [vmem:[#allocation3 + $0x38] sm:$0xff] }
 0x1a9   : > { %15249 = vmatprep.subr.msk.bf16.mxu1 %vm3671_vm0, %v16355_v33  ;;  %v1258_v24 = vld [vmem:[#allocation2 + $0xca] sm:$0xff] }
 0x1ae   : > { %13065 = vmatmul.mubr.msk.bf16.gmra.mrb[16].mxu0 %vm510_vm3, %v16362_v36  ;;  %13631 = vmatmul.mubr.msk.bf16.gmra.mrb[20].mxu1 %vm3339_vm1, %v6142_v23  ;;  %v747_v23 = vld [vmem:[#allocation2 + $0x168] sm:$0xff] }
 0x1af   : > { %13068 = vmatprep.mubr.msk.bf16.mxu0 %vm510_vm3, %v16364_v6  ;;  %13634 = vmatprep.mubr.msk.bf16.mxu1 %vm3339_vm1, %v6143_v32  ;;  %v16392_v32 = vpack.c.bf16 %v748_v12, %v747_v23  ;;  %v6136_v12 = vld [vmem:[#allocation3 + $0x174] sm:$0xff]  ;;  %v1251_v23 = vld [vmem:[#allocation2 + $0x7a] sm:$0xff] }
 0x1b0   : > { %v6153_v16 = vpack.c.bf16 %v6136_v12, %v6135_v56  ;;  %v6405_v56 = vld [vmem:[#allocation3 + $0x60] sm:$0xff]  ;;  %v16440_v12 = vpack.c.bf16 %v1258_v24, %v1257_v61  ;;  %v6412_v24 = vld [vmem:[#allocation3 + $0xb0] sm:$0xff] }
 0x1b1   : > { %v1264_v61 = vld [vmem:[#allocation2 + $0x112] sm:$0xff] }
 0x1b6   : > { %13069 = vmatmul.mubr.msk.bf16.gmra.mrb[20].mxu0 %vm510_vm3, %v16372_v58  ;;  %13635 = vmatmul.mubr.msk.bf16.gmra.mrb[24].mxu1 %vm3339_vm1, %v6144_v27  ;;  %v1246_v27 = vld [vmem:[#allocation2 + $0x3a] sm:$0xff] }
 0x1b7   : > { %13072 = vmatprep.mubr.msk.bf16.mxu0 %vm510_vm3, %v16374_v45  ;;  %13638 = vmatprep.mubr.msk.bf16.mxu1 %vm3339_vm1, %v6145_v40  ;;  %v6132_v40 = vld [vmem:[#allocation3 + $0x144] sm:$0xff]  ;;  %v16403_v9 = vpack.c.bf16 %v1246_v27, %v1245_v35  ;;  %v6401_v27 = vld [vmem:[#allocation3 + $0x30] sm:$0xff] }
 0x1b8   : > { %v6151_v17 = vpack.c.bf16 %v6132_v40, %v6131_v21  ;;  %v16430_v21 = vpack.c.bf16 %v1254_v52, %v1253_v50  ;;  %v6433_v40 = vpack.c.bf16 %v6402_v62, %v6401_v27  ;;  %v1262_v50 = vld [vmem:[#allocation2 + $0xfa] sm:$0xff]  ;;  %v6410_v52 = vld [vmem:[#allocation3 + $0x98] sm:$0xff] }
 0x1b9   : > { %v6407_v62 = vld [vmem:[#allocation3 + $0x78] sm:$0xff] }
 0x1be   : > { %13073 = vmatmul.mubr.msk.bf16.gmra.mrb[24].mxu0 %vm510_vm3, %v16382_v55  ;;  %13639 = vmatmul.mubr.msk.bf16.gmra.mrb[28].mxu1 %vm3339_vm1, %v6146_v7  ;;  %v6133_v7 = vld [vmem:[#allocation3 + $0x154] sm:$0xff] }
 0x1bf   : > { %13076 = vmatprep.mubr.msk.bf16.mxu0 %vm510_vm3, %v16384_v48  ;;  %13642 = vmatprep.mubr.msk.bf16.mxu1 %vm3339_vm1, %v6147_v49  ;;  %v1249_v49 = vld [vmem:[#allocation2 + $0x62] sm:$0xff]  ;;  %v6152_v14 = vpack.c.bf16 %v6134_v63, %v6133_v7  ;;  %v6406_v7 = vld [vmem:[#allocation3 + $0x68] sm:$0xff] }
 0x1c0   : > { %v16420_v29 = vpack.c.bf16 %v1250_v37, %v1249_v49  ;;  %v6403_v63 = vld [vmem:[#allocation3 + $0x48] sm:$0xff] }
 0x1c6   : > { %13077 = vmatmul.mubr.msk.bf16.gmra.mrb[28].mxu0 %vm510_vm3, %v16392_v32  ;;  %13643 = vmatmul.mubr.msk.bf16.gmra.mrb[0].mxu1 %vm3339_vm1, %v6148_v5  ;;  %v6137_v5 = vld [vmem:[#allocation3 + $0x184] sm:$0xff] }
 0x1c7   : > { %13646 = vmatprep.mubr.msk.bf16.mxu1 %vm3339_vm1, %v6149_v13  ;;  %13082 = vmatprep.mubr.msk.bf16.mxu0 %vm510_vm3, %v1273_v39  ;;  %v1252_v39 = vld [vmem:[#allocation2 + $0x82] sm:$0xff] }
 0x1c8   : > { %v6138_v13 = vld [vmem:[#allocation3 + $0x18c] sm:$0xff]  ;;  %v16428_v47 = vpack.c.bf16 %v1252_v39, %v1251_v23  ;;  %v16450_v23 = vld [vmem:[%s18440_s5 + $0x18] sm:$0x3] }
 0x1c9   : > { %v6154_v35 = vpack.c.bf16 %v6138_v13, %v6137_v5  ;;  %v1259_v39 = vld [vmem:[#allocation2 + $0xda] sm:$0xff]  ;;  %v1260_v5 = vld [vmem:[#allocation2 + $0xe2] sm:$0xff]  ;;  %v6408_v13 = vld [vmem:[#allocation3 + $0x80] sm:$0xff] }
 0x1ca   : > { %v6436_v27 = vpack.c.bf16 %v6408_v13, %v6407_v62  ;;  %v1269_v62 = vld [vmem:[#allocation2 + $0x152] sm:$0xff] }
 0x1ce   : > { %13083 = vmatmul.mubr.msk.bf16.vlgmr.msra.gmra.mrb[0].mxu0 %vm510_vm3, %v16399_v44  ;;  %13647 = vmatmul.mubr.msk.bf16.gmra.mrb[4].mxu1 %vm3339_vm1, %v6150_v34  ;;  %v1256_v34 = vld [vmem:[#allocation2 + $0xb2] sm:$0xff] }
 0x1cf   : > { %13115 = vmatpush3.bf16.msra.mxu0 %v1634_v22  ;;  %13086 = vmatprep.mubr.msk.bf16.mxu0 %vm510_vm3, %v16403_v9  ;;  %v1255_v22 = vld [vmem:[#allocation2 + $0xaa] sm:$0xff] }
 0x1d0   : > { %13650 = vmatprep.mubr.msk.bf16.mxu1 %vm3339_vm1, %v6151_v17  ;;  %15232 = vmatprep.subr.msk.bf16.mxu0 %vm864_vm2, %v16408_v46  ;;  %v6404_v17 = vld [vmem:[#allocation3 + $0x50] sm:$0xff]  ;;  %v16438_v49 = vpack.c.bf16 %v1256_v34, %v1255_v22 }
 0x1d1   : > { %v6434_v37 = vpack.c.bf16 %v6404_v17, %v6403_v63  ;;  %v1263_v17 = vld [vmem:[#allocation2 + $0x10a] sm:$0xff] }
 0x1d2   : > { %v1266_v63 = vld [vmem:[#allocation2 + $0x12a] sm:$0xff] }
 0x1d6   : > { %13087 = vmatmul.mubr.msk.bf16.gmra.mrb[4].mxu0 %vm510_vm3, %v16418_v28  ;;  %13651 = vmatmul.mubr.msk.bf16.gmra.mrb[8].mxu1 %vm3339_vm1, %v6152_v14  ;;  %v6435_v14 = vpack.c.bf16 %v6406_v7, %v6405_v56  ;;  %v1265_v7 = vld [vmem:[#allocation2 + $0x122] sm:$0xff]  ;;  %v6411_v56 = vld [vmem:[#allocation3 + $0xa8] sm:$0xff] }
 0x1d7   : > { %13090 = vmatprep.mubr.msk.bf16.mxu0 %vm510_vm3, %v16420_v29  ;;  %13654 = vmatprep.mubr.msk.bf16.mxu1 %vm3339_vm1, %v6153_v16  ;;  %v6794_v16 = vsel %vm3671_vm0, %v16355_v33, 0  ;;  %v1261_v33 = vld [vmem:[#allocation2 + $0xf2] sm:$0xff] }
 0x1d8   : > { %v16459_v22 = vpack.c.bf16 %v1262_v50, %v1261_v33  ;;  %v1267_v33 = vld [vmem:[#allocation2 + $0x13a] sm:$0xff]  ;;  %v1268_v50 = vld [vmem:[#allocation2 + $0x142] sm:$0xff] }
 0x1de   : > { %13091 = vmatmul.mubr.msk.bf16.gmra.mrb[8].mxu0 %vm510_vm3, %v16428_v47  ;;  %13655 = vmatmul.mubr.msk.bf16.gmra.mrb[12].mxu1 %vm3339_vm1, %v6154_v35  ;;  %v16457_v35 = vpack.c.bf16 %v1260_v5, %v1259_v39  ;;  %v6413_v39 = vld [vmem:[#allocation3 + $0xc0] sm:$0xff]  ;;  %v16469_v5 = vpack.c.bf16 %v1266_v63, %v1265_v7 }
 0x1df   : > { %13094 = vmatprep.mubr.msk.bf16.mxu0 %vm510_vm3, %v16430_v21  ;;  %13660 = vmatprep.mubr.msk.bf16.mxu1 %vm3339_vm1, %v6433_v40  ;;  %v6409_v40 = vld [vmem:[#allocation3 + $0x90] sm:$0xff] }
 0x1e0   : > { %v6437_v34 = vpack.c.bf16 %v6410_v52, %v6409_v40  ;;  %v6416_v52 = vld [vmem:[#allocation3 + $0xe0] sm:$0xff]  ;;  %v6418_v40 = vld [vmem:[#allocation3 + $0xf8] sm:$0xff] }
 0x1e6   : > { %13095 = vmatmul.mubr.msk.bf16.gmra.mrb[12].mxu0 %vm510_vm3, %v16438_v49  ;;  %13661 = vmatmul.mubr.msk.bf16.vlgmr.msra.gmra.mrb[16].mxu1 %vm3339_vm1, %v6434_v37  ;;  %v6414_v37 = vld [vmem:[#allocation3 + $0xc8] sm:$0xff] }
 0x1e7   : > { %13098 = vmatprep.mubr.msk.bf16.mxu0 %vm510_vm3, %v16440_v12  ;;  %13664 = vmatprep.mubr.msk.bf16.mxu1 %vm3339_vm1, %v6435_v14  ;;  %v16467_v14 = vpack.c.bf16 %v1264_v61, %v1263_v17  ;;  %v6439_v13 = vpack.c.bf16 %v6414_v37, %v6413_v39  ;;  %v16477_v17 = vpack.c.bf16 %v1268_v50, %v1267_v33  ;;  %v1271_v37 = vld [vmem:[#allocation2 + $0x16a] sm:$0xff]  ;;  %v6422_v39 = vld [vmem:[#allocation3 + $0x128] sm:$0xff] }
 0x1e8   : > { %13693 = vmatpush3.bf16.msra.mxu1 %v6794_v16  ;;  %v6438_v16 = vpack.c.bf16 %v6412_v24, %v6411_v56  ;;  %v6417_v24 = vld [vmem:[#allocation3 + $0xf0] sm:$0xff]  ;;  %v1272_v56 = vld [vmem:[#allocation2 + $0x172] sm:$0xff] }
 0x1e9   : > { %15250 = vmatprep.subr.msk.bf16.mxu1 %vm3671_vm0, %v16450_v23  ;;  %v6441_v63 = vpack.c.bf16 %v6418_v40, %v6417_v24  ;;  %v16487_v33 = vpack.c.bf16 %v1272_v56, %v1271_v37  ;;  %v6423_v40 = vld [vmem:[#allocation3 + $0x138] sm:$0xff]  ;;  %v16500_v37 = vld [vmem:[%s18438_s3 + $0x14] sm:$0xf]  ;;  %v6430_v56 = vld [vmem:[#allocation3 + $0x188] sm:$0xff] }
 0x1ee   : > { %13099 = vmatmul.mubr.msk.bf16.gmra.mrb[16].mxu0 %vm510_vm3, %v16457_v35  ;;  %13665 = vmatmul.mubr.msk.bf16.gmra.mrb[20].mxu1 %vm3339_vm1, %v6436_v27  ;;  %v1270_v27 = vld [vmem:[#allocation2 + $0x15a] sm:$0xff] }
 0x1ef   : > { %13102 = vmatprep.mubr.msk.bf16.mxu0 %vm510_vm3, %v16459_v22  ;;  %13668 = vmatprep.mubr.msk.bf16.mxu1 %vm3339_vm1, %v6437_v34  ;;  %v6415_v34 = vld [vmem:[#allocation3 + $0xd8] sm:$0xff]  ;;  %v16479_v7 = vpack.c.bf16 %v1270_v27, %v1269_v62  ;;  %v6424_v27 = vld [vmem:[#allocation3 + $0x140] sm:$0xff] }
 0x1f0   : > { %v6440_v61 = vpack.c.bf16 %v6416_v52, %v6415_v34  ;;  %v6421_v52 = vld [vmem:[#allocation3 + $0x120] sm:$0xff]  ;;  %v6426_v34 = vld [vmem:[#allocation3 + $0x158] sm:$0xff]  ;;  %v6444_v24 = vpack.c.bf16 %v6424_v27, %v6423_v40 }
 0x1f1   : > { %v6443_v62 = vpack.c.bf16 %v6422_v39, %v6421_v52  ;;  %v6431_v52 = vld [vmem:[#allocation3 + $0x198] sm:$0xff] }
 0x1f2   : > { %v6695_v27 = vld [vmem:[#allocation3 + $0x31] sm:$0xff] }
 0x1f6   : > { %13103 = vmatmul.mubr.msk.bf16.gmra.mrb[20].mxu0 %vm510_vm3, %v16467_v14  ;;  %13669 = vmatmul.mubr.msk.bf16.gmra.mrb[24].mxu1 %vm3339_vm1, %v6438_v16  ;;  %v6420_v16 = vld [vmem:[#allocation3 + $0x110] sm:$0xff] }
 0x1f7   : > { %13106 = vmatprep.mubr.msk.bf16.mxu0 %vm510_vm3, %v16469_v5  ;;  %13672 = vmatprep.mubr.msk.bf16.mxu1 %vm3339_vm1, %v6439_v13  ;;  %v6419_v13 = vld [vmem:[#allocation3 + $0x108] sm:$0xff] }
 0x1f8   : > { %v6442_v50 = vpack.c.bf16 %v6420_v16, %v6419_v13  ;;  %v6427_v16 = vld [vmem:[#allocation3 + $0x168] sm:$0xff]  ;;  %v6429_v13 = vld [vmem:[#allocation3 + $0x180] sm:$0xff] }
 0x1fe   : > { %13107 = vmatmul.mubr.msk.bf16.gmra.mrb[24].mxu0 %vm510_vm3, %v16477_v17  ;;  %13673 = vmatmul.mubr.msk.bf16.gmra.mrb[28].mxu1 %vm3339_vm1, %v6440_v61  ;;  %v1928_v61 = vsel %vm864_vm2, %v16408_v46, 0  ;;  %v6428_v46 = vld [vmem:[#allocation3 + $0x170] sm:$0xff] }
 0x1ff   : > { %13110 = vmatprep.mubr.msk.bf16.mxu0 %vm510_vm3, %v16479_v7  ;;  %13676 = vmatprep.mubr.msk.bf16.mxu1 %vm3339_vm1, %v6441_v63  ;;  %v6425_v63 = vld [vmem:[#allocation3 + $0x150] sm:$0xff]  ;;  %v6446_v39 = vpack.c.bf16 %v6428_v46, %v6427_v16  ;;  %v6701_v46 = vld [vmem:[#allocation3 + $0x79] sm:$0xff] }
 0x206   : > { %13111 = vmatmul.mubr.msk.bf16.gmra.mrb[28].mxu0 %vm510_vm3, %v16487_v33  ;;  %13677 = vmatmul.mubr.msk.bf16.gmra.mrb[0].mxu1 %vm3339_vm1, %v6442_v50  ;;  %v6447_v50 = vpack.c.bf16 %v6430_v56, %v6429_v13  ;;  %v6703_v56 = vld [vmem:[#allocation3 + $0x91] sm:$0xff]  ;;  %v6705_v13 = vld [vmem:[#allocation3 + $0xa9] sm:$0xff] }
 0x207   : > { %13116 = vmatprep.mubr.msk.bf16.mxu0 %vm510_vm3, %v16304_v0  ;;  %13680 = vmatprep.mubr.msk.bf16.mxu1 %vm3339_vm1, %v6443_v62  ;;  %v6445_v0 = vpack.c.bf16 %v6426_v34, %v6425_v63  ;;  %v6697_v34 = vld [vmem:[#allocation3 + $0x49] sm:$0xff] }
 0x20e   : > { %13117 = vmatmul.mubr.msk.bf16.vlgmr.msra.gmra.mrb[0].mxu0 %vm510_vm3, %v16308_v8  ;;  %13681 = vmatmul.mubr.msk.bf16.gmra.mrb[4].mxu1 %vm3339_vm1, %v6444_v24  ;;  %v6432_v8 = vld [vmem:[#allocation3 + $0x1a0] sm:$0xff] }
 0x20f   : > { %13149 = vmatpush3.bf16.msra.mxu0 %v1928_v61  ;;  %13120 = vmatprep.mubr.msk.bf16.mxu0 %vm510_vm3, %v16323_v42  ;;  %v6696_v42 = vld [vmem:[#allocation3 + $0x39] sm:$0xff]  ;;  %v6448_v62 = vpack.c.bf16 %v6432_v8, %v6431_v52  ;;  %v6699_v24 = vld [vmem:[#allocation3 + $0x61] sm:$0xff] }
 0x210   : > { %13684 = vmatprep.mubr.msk.bf16.mxu1 %vm3339_vm1, %v6445_v0  ;;  %15233 = vmatprep.subr.msk.bf16.mxu0 %vm864_vm2, %v16500_v37  ;;  %v6727_v40 = vpack.c.bf16 %v6696_v42, %v6695_v27  ;;  %v7088_v0 = vsel %vm3671_vm0, %v16450_v23, 0  ;;  %v6704_v23 = vld [vmem:[#allocation3 + $0x99] sm:$0xff]  ;;  %v6707_v8 = vld [vmem:[#allocation3 + $0xc1] sm:$0xff]  ;;  %v6711_v27 = vld [vmem:[#allocation3 + $0xf1] sm:$0xff] }
 0x211   : > { %v6731_v16 = vpack.c.bf16 %v6704_v23, %v6703_v56  ;;  %v6709_v52 = vld [vmem:[#allocation3 + $0xd9] sm:$0xff]  ;;  %v1831_v56 = vld [vmem:[#allocation2 + $0x31] sm:$0xff] }
 0x216   : > { %13121 = vmatmul.mubr.msk.bf16.gmra.mrb[4].mxu0 %vm510_vm3, %v16325_v38  ;;  %13685 = vmatmul.mubr.msk.bf16.gmra.mrb[8].mxu1 %vm3339_vm1, %v6446_v39  ;;  %v6698_v38 = vld [vmem:[#allocation3 + $0x51] sm:$0xff]  ;;  %v6708_v39 = vld [vmem:[#allocation3 + $0xc9] sm:$0xff] }
 0x217   : > { %13124 = vmatprep.mubr.msk.bf16.mxu0 %vm510_vm3, %v16333_v59  ;;  %13688 = vmatprep.mubr.msk.bf16.mxu1 %vm3339_vm1, %v6447_v50  ;;  %v6700_v59 = vld [vmem:[#allocation3 + $0x69] sm:$0xff]  ;;  %v6728_v61 = vpack.c.bf16 %v6698_v38, %v6697_v34  ;;  %v6733_v42 = vpack.c.bf16 %v6708_v39, %v6707_v8  ;;  %v1830_v38 = vld [vmem:[#allocation2 + $0x21] sm:$0xff]  ;;  %v1833_v8 = vld [vmem:[#allocation2 + $0x49] sm:$0xff] }
 0x218   : > { %v6729_v63 = vpack.c.bf16 %v6700_v59, %v6699_v24  ;;  %v6716_v59 = vld [vmem:[#allocation3 + $0x129] sm:$0xff] }
 0x219   : > { %v1565_v34 = vld [vmem:[#allocation2 + $0x180] sm:$0xff] }
 0x21e   : > { %13125 = vmatmul.mubr.msk.bf16.gmra.mrb[8].mxu0 %vm510_vm3, %v16335_v60  ;;  %13689 = vmatmul.mubr.msk.bf16.gmra.mrb[12].mxu1 %vm3339_vm1, %v6448_v62  ;;  %v16530_v60 = vld [vmem:[%s18440_s5 + $0x1a] sm:$0x3] }
 0x21f   : > { %13128 = vmatprep.mubr.msk.bf16.mxu0 %vm510_vm3, %v16343_v26  ;;  %13694 = vmatprep.mubr.msk.bf16.mxu1 %vm3339_vm1, %v6727_v40  ;;  %v6702_v26 = vld [vmem:[#allocation3 + $0x81] sm:$0xff] }
 0x226   : > { %13129 = vmatmul.mubr.msk.bf16.gmra.mrb[12].mxu0 %vm510_vm3, %v16345_v53  ;;  %13695 = vmatmul.mubr.msk.bf16.vlgmr.msra.gmra.mrb[16].mxu1 %vm3339_vm1, %v6728_v61  ;;  %v6730_v53 = vpack.c.bf16 %v6702_v26, %v6701_v46  ;;  %v6713_v61 = vld [vmem:[#allocation3 + $0x109] sm:$0xff]  ;;  %v6715_v26 = vld [vmem:[#allocation3 + $0x121] sm:$0xff] }
 0x227   : > { %13132 = vmatprep.mubr.msk.bf16.mxu0 %vm510_vm3, %v16362_v36  ;;  %13698 = vmatprep.mubr.msk.bf16.mxu1 %vm3339_vm1, %v6729_v63  ;;  %v6706_v36 = vld [vmem:[#allocation3 + $0xb1] sm:$0xff]  ;;  %v6718_v46 = vld [vmem:[#allocation3 + $0x141] sm:$0xff] }
 0x228   : > { %13727 = vmatpush3.bf16.msra.mxu1 %v7088_v0  ;;  %v6732_v50 = vpack.c.bf16 %v6706_v36, %v6705_v13  ;;  %v1829_v0 = vld [vmem:[#allocation2 + $0x19] sm:$0xff]  ;;  %v6720_v36 = vld [vmem:[#allocation3 + $0x159] sm:$0xff]  ;;  %v2222_v13 = vsel %vm864_vm2, %v16500_v37, 0 }
 0x229   : > { %15251 = vmatprep.subr.msk.bf16.mxu1 %vm3671_vm0, %v16530_v60  ;;  %v1861_v23 = vpack.c.bf16 %v1830_v38, %v1829_v0  ;;  %v1836_v37 = vld [vmem:[#allocation2 + $0x69] sm:$0xff] }
 0x22e   : > { %13133 = vmatmul.mubr.msk.bf16.gmra.mrb[16].mxu0 %vm510_vm3, %v16364_v6  ;;  %13699 = vmatmul.mubr.msk.bf16.gmra.mrb[20].mxu1 %vm3339_vm1, %v6730_v53  ;;  %v6710_v6 = vld [vmem:[#allocation3 + $0xe1] sm:$0xff] }
 0x22f   : > { %13136 = vmatprep.mubr.msk.bf16.mxu0 %vm510_vm3, %v16372_v58  ;;  %13702 = vmatprep.mubr.msk.bf16.mxu1 %vm3339_vm1, %v6731_v16  ;;  %v6712_v58 = vld [vmem:[#allocation3 + $0xf9] sm:$0xff]  ;;  %v6734_v62 = vpack.c.bf16 %v6710_v6, %v6709_v52  ;;  %v1834_v53 = vld [vmem:[#allocation2 + $0x51] sm:$0xff]  ;;  %v6719_v6 = vld [vmem:[#allocation3 + $0x151] sm:$0xff] }
 0x230   : > { %v6735_v40 = vpack.c.bf16 %v6712_v58, %v6711_v27  ;;  %v6717_v16 = vld [vmem:[#allocation3 + $0x139] sm:$0xff]  ;;  %v16571_v58 = vld [vmem:[%s18438_s3 + $0x18] sm:$0xf]  ;;  %v6739_v52 = vpack.c.bf16 %v6720_v36, %v6719_v6  ;;  %v1838_v27 = vld [vmem:[#allocation2 + $0x81] sm:$0xff] }
 0x231   : > { %v1841_v36 = vld [vmem:[#allocation2 + $0xa9] sm:$0xff] }
 0x232   : > { %v1844_v6 = vld [vmem:[#allocation2 + $0xc9] sm:$0xff] }
 0x236   : > { %13137 = vmatmul.mubr.msk.bf16.gmra.mrb[20].mxu0 %vm510_vm3, %v16374_v45  ;;  %13703 = vmatmul.mubr.msk.bf16.gmra.mrb[24].mxu1 %vm3339_vm1, %v6732_v50  ;;  %v1566_v45 = vld [vmem:[#allocation2 + $0x188] sm:$0xff]  ;;  %v6738_v50 = vpack.c.bf16 %v6718_v46, %v6717_v16  ;;  %v1839_v46 = vld [vmem:[#allocation2 + $0x91] sm:$0xff] }
 0x237   : > { %13140 = vmatprep.mubr.msk.bf16.mxu0 %vm510_vm3, %v16382_v55  ;;  %13706 = vmatprep.mubr.msk.bf16.mxu1 %vm3339_vm1, %v6733_v42  ;;  %v6714_v55 = vld [vmem:[#allocation3 + $0x111] sm:$0xff]  ;;  %v16555_v24 = vpack.c.bf16 %v1566_v45, %v1565_v34  ;;  %v16566_v42 = vpack.c.bf16 %v1834_v53, %v1833_v8  ;;  %v1837_v34 = vld [vmem:[#allocation2 + $0x79] sm:$0xff]  ;;  %v6725_v53 = vld [vmem:[#allocation3 + $0x199] sm:$0xff] }
 0x238   : > { %v6736_v63 = vpack.c.bf16 %v6714_v55, %v6713_v61  ;;  %v1835_v45 = vld [vmem:[#allocation2 + $0x61] sm:$0xff]  ;;  %v6721_v55 = vld [vmem:[#allocation3 + $0x169] sm:$0xff]  ;;  %v6723_v61 = vld [vmem:[#allocation3 + $0x181] sm:$0xff] }
 0x239   : > { %v16581_v38 = vpack.c.bf16 %v1836_v37, %v1835_v45  ;;  %v1846_v37 = vld [vmem:[#allocation2 + $0xe1] sm:$0xff] }
 0x23e   : > { %13141 = vmatmul.mubr.msk.bf16.gmra.mrb[24].mxu0 %vm510_vm3, %v16384_v48  ;;  %13707 = vmatmul.mubr.msk.bf16.gmra.mrb[28].mxu1 %vm3339_vm1, %v6734_v62  ;;  %v6737_v48 = vpack.c.bf16 %v6716_v59, %v6715_v26  ;;  %v6722_v62 = vld [vmem:[#allocation3 + $0x171] sm:$0xff]  ;;  %v1840_v26 = vld [vmem:[#allocation2 + $0x99] sm:$0xff] }
 0x23f   : > { %13144 = vmatprep.mubr.msk.bf16.mxu0 %vm510_vm3, %v16392_v32  ;;  %13710 = vmatprep.mubr.msk.bf16.mxu1 %vm3339_vm1, %v6735_v40  ;;  %v1832_v32 = vld [vmem:[#allocation2 + $0x39] sm:$0xff]  ;;  %v6740_v59 = vpack.c.bf16 %v6722_v62, %v6721_v55 }
 0x240   : > { %v16562_v39 = vpack.c.bf16 %v1832_v32, %v1831_v56  ;;  %v6724_v40 = vld [vmem:[#allocation3 + $0x189] sm:$0xff]  ;;  %v6990_v32 = vld [vmem:[#allocation3 + $0x3a] sm:$0xff]  ;;  %v16591_v56 = vpack.c.bf16 %v1840_v26, %v1839_v46  ;;  %v7382_v26 = vsel %vm3671_vm0, %v16530_v60, 0 }
 0x241   : > { %v6741_v0 = vpack.c.bf16 %v6724_v40, %v6723_v61  ;;  %v6994_v62 = vld [vmem:[#allocation3 + $0x6a] sm:$0xff]  ;;  %v1850_v60 = vld [vmem:[#allocation2 + $0x111] sm:$0xff] }
 0x242   : > { %v6991_v40 = vld [vmem:[#allocation3 + $0x4a] sm:$0xff]  ;;  %v6998_v46 = vld [vmem:[#allocation3 + $0x9a] sm:$0xff] }
 0x246   : > { %13145 = vmatmul.mubr.msk.bf16.gmra.mrb[28].mxu0 %vm510_vm3, %v16555_v24  ;;  %13711 = vmatmul.mubr.msk.bf16.gmra.mrb[0].mxu1 %vm3339_vm1, %v6736_v63  ;;  %v16583_v63 = vpack.c.bf16 %v1838_v27, %v1837_v34  ;;  %v1843_v27 = vld [vmem:[#allocation2 + $0xc1] sm:$0xff]  ;;  %v6993_v34 = vld [vmem:[#allocation3 + $0x62] sm:$0xff] }
 0x247   : > { %13150 = vmatprep.mubr.msk.bf16.mxu0 %vm510_vm3, %v1861_v23  ;;  %13714 = vmatprep.mubr.msk.bf16.mxu1 %vm3339_vm1, %v6737_v48  ;;  %v6726_v23 = vld [vmem:[#allocation3 + $0x1a1] sm:$0xff]  ;;  %v16601_v45 = vpack.c.bf16 %v1844_v6, %v1843_v27  ;;  %v6997_v6 = vld [vmem:[#allocation3 + $0x92] sm:$0xff] }
 0x248   : > { %v1842_v48 = vld [vmem:[#allocation2 + $0xb1] sm:$0xff]  ;;  %v6742_v16 = vpack.c.bf16 %v6726_v23, %v6725_v53  ;;  %v16613_v23 = vld [vmem:[%s18440_s5 + $0x1c] sm:$0x3]  ;;  %v7000_v27 = vld [vmem:[#allocation3 + $0xb2] sm:$0xff] }
 0x249   : > { %v1847_v53 = vld [vmem:[#allocation2 + $0xf1] sm:$0xff] }
 0x24e   : > { %13151 = vmatmul.mubr.msk.bf16.vlgmr.msra.gmra.mrb[0].mxu0 %vm510_vm3, %v16562_v39  ;;  %13715 = vmatmul.mubr.msk.bf16.gmra.mrb[4].mxu1 %vm3339_vm1, %v6738_v50  ;;  %v16593_v50 = vpack.c.bf16 %v1842_v48, %v1841_v36  ;;  %v1848_v48 = vld [vmem:[#allocation2 + $0xf9] sm:$0xff] }
 0x24f   : > { %13183 = vmatpush3.bf16.msra.mxu0 %v2222_v13  ;;  %13154 = vmatprep.mubr.msk.bf16.mxu0 %vm510_vm3, %v16566_v42  ;;  %v6989_v13 = vld [vmem:[#allocation3 + $0x32] sm:$0xff]  ;;  %v16620_v36 = vpack.c.bf16 %v1848_v48, %v1847_v53  ;;  %v1853_v48 = vld [vmem:[#allocation2 + $0x139] sm:$0xff] }
 0x250   : > { %13718 = vmatprep.mubr.msk.bf16.mxu1 %vm3339_vm1, %v6739_v52  ;;  %15234 = vmatprep.subr.msk.bf16.mxu0 %vm864_vm2, %v16571_v58  ;;  %v7021_v8 = vpack.c.bf16 %v6990_v32, %v6989_v13  ;;  %v6992_v52 = vld [vmem:[#allocation3 + $0x52] sm:$0xff]  ;;  %v6996_v32 = vld [vmem:[#allocation3 + $0x82] sm:$0xff] }
 0x251   : > { %v7022_v55 = vpack.c.bf16 %v6992_v52, %v6991_v40  ;;  %v1854_v40 = vld [vmem:[#allocation2 + $0x141] sm:$0xff]  ;;  %v1856_v53 = vld [vmem:[#allocation2 + $0x159] sm:$0xff] }
 0x256   : > { %13155 = vmatmul.mubr.msk.bf16.gmra.mrb[4].mxu0 %vm510_vm3, %v16581_v38  ;;  %13719 = vmatmul.mubr.msk.bf16.gmra.mrb[8].mxu1 %vm3339_vm1, %v6740_v59  ;;  %v1845_v59 = vld [vmem:[#allocation2 + $0xd9] sm:$0xff] }
 0x257   : > { %13158 = vmatprep.mubr.msk.bf16.mxu0 %vm510_vm3, %v16583_v63  ;;  %13722 = vmatprep.mubr.msk.bf16.mxu1 %vm3339_vm1, %v6741_v0  ;;  %v16603_v61 = vpack.c.bf16 %v1846_v37, %v1845_v59  ;;  %v7023_v0 = vpack.c.bf16 %v6994_v62, %v6993_v34  ;;  %v7025_v37 = vpack.c.bf16 %v6998_v46, %v6997_v6  ;;  %v1852_v62 = vld [vmem:[#allocation2 + $0x129] sm:$0xff]  ;;  %v1851_v59 = vld [vmem:[#allocation2 + $0x121] sm:$0xff]  ;;  %v1855_v6 = vld [vmem:[#allocation2 + $0x151] sm:$0xff] }
 0x258   : > { %v6999_v34 = vld [vmem:[#allocation3 + $0xaa] sm:$0xff] }
 0x25e   : > { %13159 = vmatmul.mubr.msk.bf16.gmra.mrb[8].mxu0 %vm510_vm3, %v16591_v56  ;;  %13723 = vmatmul.mubr.msk.bf16.gmra.mrb[12].mxu1 %vm3339_vm1, %v6742_v16  ;;  %v6995_v16 = vld [vmem:[#allocation3 + $0x7a] sm:$0xff] }
 0x25f   : > { %13162 = vmatprep.mubr.msk.bf16.mxu0 %vm510_vm3, %v16593_v50  ;;  %13728 = vmatprep.mubr.msk.bf16.mxu1 %vm3339_vm1, %v7021_v8  ;;  %v7024_v13 = vpack.c.bf16 %v6996_v32, %v6995_v16  ;;  %v1849_v8 = vld [vmem:[#allocation2 + $0x109] sm:$0xff]  ;;  %v7001_v32 = vld [vmem:[#allocation3 + $0xc2] sm:$0xff] }
 0x260   : > { %v16622_v52 = vpack.c.bf16 %v1850_v60, %v1849_v8  ;;  %v16632_v60 = vpack.c.bf16 %v1854_v40, %v1853_v48  ;;  %v7004_v16 = vld [vmem:[#allocation3 + $0xe2] sm:$0xff]  ;;  %v7006_v8 = vld [vmem:[#allocation3 + $0xfa] sm:$0xff]  ;;  %v7008_v48 = vld [vmem:[#allocation3 + $0x112] sm:$0xff] }
 0x261   : > { %v1857_v40 = vld [vmem:[#allocation2 + $0x169] sm:$0xff] }
 0x266   : > { %13163 = vmatmul.mubr.msk.bf16.gmra.mrb[12].mxu0 %vm510_vm3, %v16601_v45  ;;  %13729 = vmatmul.mubr.msk.bf16.vlgmr.msra.gmra.mrb[16].mxu1 %vm3339_vm1, %v7022_v55  ;;  %v7002_v55 = vld [vmem:[#allocation3 + $0xca] sm:$0xff] }
 0x267   : > { %13166 = vmatprep.mubr.msk.bf16.mxu0 %vm510_vm3, %v16603_v61  ;;  %13732 = vmatprep.mubr.msk.bf16.mxu1 %vm3339_vm1, %v7023_v0  ;;  %v16630_v0 = vpack.c.bf16 %v1852_v62, %v1851_v59  ;;  %v7027_v46 = vpack.c.bf16 %v7002_v55, %v7001_v32  ;;  %v16640_v62 = vpack.c.bf16 %v1856_v53, %v1855_v6  ;;  %v7005_v55 = vld [vmem:[#allocation3 + $0xf2] sm:$0xff]  ;;  %v7010_v32 = vld [vmem:[#allocation3 + $0x12a] sm:$0xff]  ;;  %v7009_v6 = vld [vmem:[#allocation3 + $0x122] sm:$0xff] }
 0x268   : > { %13761 = vmatpush3.bf16.msra.mxu1 %v7382_v26  ;;  %v7026_v26 = vpack.c.bf16 %v7000_v27, %v6999_v34  ;;  %v7029_v34 = vpack.c.bf16 %v7006_v8, %v7005_v55  ;;  %v7007_v53 = vld [vmem:[#allocation3 + $0x10a] sm:$0xff]  ;;  %v7031_v8 = vpack.c.bf16 %v7010_v32, %v7009_v6  ;;  %v2517_v55 = vsel %vm864_vm2, %v16571_v58, 0  ;;  %v7016_v58 = vld [vmem:[#allocation3 + $0x172] sm:$0xff] }
 0x269   : > { %15252 = vmatprep.subr.msk.bf16.mxu1 %vm3671_vm0, %v16613_v23  ;;  %v7018_v32 = vld [vmem:[#allocation3 + $0x18a] sm:$0xff] }
 0x26e   : > { %13167 = vmatmul.mubr.msk.bf16.gmra.mrb[16].mxu0 %vm510_vm3, %v16620_v36  ;;  %13733 = vmatmul.mubr.msk.bf16.gmra.mrb[20].mxu1 %vm3339_vm1, %v7024_v13  ;;  %v1858_v13 = vld [vmem:[#allocation2 + $0x171] sm:$0xff] }
 0x26f   : > { %13170 = vmatprep.mubr.msk.bf16.mxu0 %vm510_vm3, %v16622_v52  ;;  %13736 = vmatprep.mubr.msk.bf16.mxu1 %vm3339_vm1, %v7025_v37  ;;  %v7003_v37 = vld [vmem:[#allocation3 + $0xda] sm:$0xff]  ;;  %v16642_v59 = vpack.c.bf16 %v1858_v13, %v1857_v40  ;;  %v7030_v13 = vpack.c.bf16 %v7008_v48, %v7007_v53  ;;  %v16663_v48 = vld [vmem:[%s18438_s3 + $0x1c] sm:$0xf] }
 0x270   : > { %v7028_v27 = vpack.c.bf16 %v7004_v16, %v7003_v37  ;;  %v7012_v37 = vld [vmem:[#allocation3 + $0x142] sm:$0xff]  ;;  %v7014_v40 = vld [vmem:[#allocation3 + $0x15a] sm:$0xff] }
 0x276   : > { %13171 = vmatmul.mubr.msk.bf16.gmra.mrb[20].mxu0 %vm510_vm3, %v16630_v0  ;;  %13737 = vmatmul.mubr.msk.bf16.gmra.mrb[24].mxu1 %vm3339_vm1, %v7026_v26  ;;  %v1860_v26 = vld [vmem:[#allocation2 + $0x189] sm:$0xff] }
 0x277   : > { %13174 = vmatprep.mubr.msk.bf16.mxu0 %vm510_vm3, %v16632_v60  ;;  %13740 = vmatprep.mubr.msk.bf16.mxu1 %vm3339_vm1, %v7027_v46  ;;  %v1859_v46 = vld [vmem:[#allocation2 + $0x181] sm:$0xff] }
 0x278   : > { %v16650_v16 = vpack.c.bf16 %v1860_v26, %v1859_v46  ;;  %v7013_v26 = vld [vmem:[#allocation3 + $0x152] sm:$0xff]  ;;  %v7015_v46 = vld [vmem:[#allocation3 + $0x16a] sm:$0xff] }
 0x279   : > { %v7034_v53 = vpack.c.bf16 %v7016_v58, %v7015_v46  ;;  %v7676_v58 = vsel %vm3671_vm0, %v16613_v23, 0  ;;  %v7291_v23 = vld [vmem:[#allocation3 + $0x93] sm:$0xff] }
 0x27e   : > { %13175 = vmatmul.mubr.msk.bf16.gmra.mrb[24].mxu0 %vm510_vm3, %v16640_v62  ;;  %13741 = vmatmul.mubr.msk.bf16.gmra.mrb[28].mxu1 %vm3339_vm1, %v7028_v27  ;;  %v7011_v27 = vld [vmem:[#allocation3 + $0x13a] sm:$0xff] }
 0x27f   : > { %13178 = vmatprep.mubr.msk.bf16.mxu0 %vm510_vm3, %v16642_v59  ;;  %13744 = vmatprep.mubr.msk.bf16.mxu1 %vm3339_vm1, %v7029_v34  ;;  %v7032_v34 = vpack.c.bf16 %v7012_v37, %v7011_v27  ;;  %v7019_v37 = vld [vmem:[#allocation3 + $0x19a] sm:$0xff] }
 0x286   : > { %13179 = vmatmul.mubr.msk.bf16.gmra.mrb[28].mxu0 %vm510_vm3, %v16650_v16  ;;  %13745 = vmatmul.mubr.msk.bf16.gmra.mrb[0].mxu1 %vm3339_vm1, %v7030_v13  ;;  %v7017_v13 = vld [vmem:[#allocation3 + $0x182] sm:$0xff] }
 0x287   : > { %13184 = vmatprep.mubr.msk.bf16.mxu0 %vm510_vm3, %v16399_v44  ;;  %13748 = vmatprep.mubr.msk.bf16.mxu1 %vm3339_vm1, %v7031_v8  ;;  %v7033_v44 = vpack.c.bf16 %v7014_v40, %v7013_v26  ;;  %v7035_v6 = vpack.c.bf16 %v7018_v32, %v7017_v13  ;;  %v7284_v8 = vld [vmem:[#allocation3 + $0x3b] sm:$0xff]  ;;  %v7290_v32 = vld [vmem:[#allocation3 + $0x83] sm:$0xff]  ;;  %v7294_v13 = vld [vmem:[#allocation3 + $0xb3] sm:$0xff] }
 0x28e   : > { %13185 = vmatmul.mubr.msk.bf16.vlgmr.msra.gmra.mrb[0].mxu0 %vm510_vm3, %v16403_v9  ;;  %13749 = vmatmul.mubr.msk.bf16.gmra.mrb[4].mxu1 %vm3339_vm1, %v7032_v34  ;;  %v7020_v9 = vld [vmem:[#allocation3 + $0x1a2] sm:$0xff]  ;;  %v7288_v34 = vld [vmem:[#allocation3 + $0x6b] sm:$0xff] }
 0x28f   : > { %13217 = vmatpush3.bf16.msra.mxu0 %v2517_v55  ;;  %13188 = vmatprep.mubr.msk.bf16.mxu0 %vm510_vm3, %v16418_v28  ;;  %v7283_v28 = vld [vmem:[#allocation3 + $0x33] sm:$0xff]  ;;  %v7036_v27 = vpack.c.bf16 %v7020_v9, %v7019_v37  ;;  %v7287_v55 = vld [vmem:[#allocation3 + $0x63] sm:$0xff]  ;;  %v7296_v9 = vld [vmem:[#allocation3 + $0xcb] sm:$0xff] }
 0x290   : > { %13752 = vmatprep.mubr.msk.bf16.mxu1 %vm3339_vm1, %v7033_v44  ;;  %15235 = vmatprep.subr.msk.bf16.mxu0 %vm864_vm2, %v16663_v48  ;;  %v7315_v40 = vpack.c.bf16 %v7284_v8, %v7283_v28  ;;  %v7317_v44 = vpack.c.bf16 %v7288_v34, %v7287_v55  ;;  %v7299_v37 = vld [vmem:[#allocation3 + $0xf3] sm:$0xff]  ;;  %v2419_v34 = vld [vmem:[#allocation2 + $0x38] sm:$0xff] }
 0x291   : > { %v7302_v55 = vld [vmem:[#allocation3 + $0x113] sm:$0xff] }
 0x296   : > { %13189 = vmatmul.mubr.msk.bf16.gmra.mrb[4].mxu0 %vm510_vm3, %v16420_v29  ;;  %13753 = vmatmul.mubr.msk.bf16.gmra.mrb[8].mxu1 %vm3339_vm1, %v7034_v53  ;;  %v7285_v29 = vld [vmem:[#allocation3 + $0x4b] sm:$0xff] }
 0x297   : > { %13192 = vmatprep.mubr.msk.bf16.mxu0 %vm510_vm3, %v16428_v47  ;;  %13756 = vmatprep.mubr.msk.bf16.mxu1 %vm3339_vm1, %v7035_v6  ;;  %v7286_v47 = vld [vmem:[#allocation3 + $0x53] sm:$0xff]  ;;  %v7295_v6 = vld [vmem:[#allocation3 + $0xc3] sm:$0xff] }
 0x298   : > { %v7316_v26 = vpack.c.bf16 %v7286_v47, %v7285_v29  ;;  %v7321_v8 = vpack.c.bf16 %v7296_v9, %v7295_v6  ;;  %v2154_v47 = vld [vmem:[#allocation2 + $0x18a] sm:$0xff] }
 0x299   : > { %v7308_v6 = vld [vmem:[#allocation3 + $0x15b] sm:$0xff] }
 0x29e   : > { %13193 = vmatmul.mubr.msk.bf16.gmra.mrb[8].mxu0 %vm510_vm3, %v16430_v21  ;;  %13757 = vmatmul.mubr.msk.bf16.gmra.mrb[12].mxu1 %vm3339_vm1, %v7036_v27  ;;  %v16693_v21 = vld [vmem:[%s18440_s5 + $0x1e] sm:$0x3]  ;;  %v7300_v27 = vld [vmem:[#allocation3 + $0xfb] sm:$0xff] }
 0x29f   : > { %13196 = vmatprep.mubr.msk.bf16.mxu0 %vm510_vm3, %v16438_v49  ;;  %13762 = vmatprep.mubr.msk.bf16.mxu1 %vm3339_vm1, %v7315_v40  ;;  %v7289_v49 = vld [vmem:[#allocation3 + $0x7b] sm:$0xff]  ;;  %v7323_v29 = vpack.c.bf16 %v7300_v27, %v7299_v37  ;;  %v16730_v37 = vld [vmem:[%s18438_s3 + $0x20] sm:$0xf] }
 0x2a0   : > { %v7318_v46 = vpack.c.bf16 %v7290_v32, %v7289_v49  ;;  %v2418_v32 = vld [vmem:[#allocation2 + $0x30] sm:$0xff] }
 0x2a6   : > { %13197 = vmatmul.mubr.msk.bf16.gmra.mrb[12].mxu0 %vm510_vm3, %v16440_v12  ;;  %13763 = vmatmul.mubr.msk.bf16.vlgmr.msra.gmra.mrb[16].mxu1 %vm3339_vm1, %v7316_v26  ;;  %v7292_v12 = vld [vmem:[#allocation3 + $0x9b] sm:$0xff]  ;;  %v7303_v26 = vld [vmem:[#allocation3 + $0x123] sm:$0xff] }
 0x2a7   : > { %13200 = vmatprep.mubr.msk.bf16.mxu0 %vm510_vm3, %v16457_v35  ;;  %13766 = vmatprep.mubr.msk.bf16.mxu1 %vm3339_vm1, %v7317_v44  ;;  %v7319_v53 = vpack.c.bf16 %v7292_v12, %v7291_v23  ;;  %v7293_v35 = vld [vmem:[#allocation3 + $0xab] sm:$0xff]  ;;  %v2450_v23 = vpack.c.bf16 %v2419_v34, %v2418_v32  ;;  %v7305_v12 = vld [vmem:[#allocation3 + $0x13b] sm:$0xff] }
 0x2a8   : > { %13795 = vmatpush3.bf16.msra.mxu1 %v7676_v58  ;;  %v7320_v28 = vpack.c.bf16 %v7294_v13, %v7293_v35  ;;  %v7304_v44 = vld [vmem:[#allocation3 + $0x12b] sm:$0xff]  ;;  %v2420_v35 = vld [vmem:[#allocation2 + $0x48] sm:$0xff] }
 0x2a9   : > { %15253 = vmatprep.subr.msk.bf16.mxu1 %vm3671_vm0, %v16693_v21  ;;  %v7307_v13 = vld [vmem:[#allocation3 + $0x153] sm:$0xff] }
 0x2aa   : > { %v7327_v27 = vpack.c.bf16 %v7308_v6, %v7307_v13 }
 0x2ae   : > { %13201 = vmatmul.mubr.msk.bf16.gmra.mrb[16].mxu0 %vm510_vm3, %v16459_v22  ;;  %13767 = vmatmul.mubr.msk.bf16.gmra.mrb[20].mxu1 %vm3339_vm1, %v7318_v46  ;;  %v7297_v22 = vld [vmem:[#allocation3 + $0xdb] sm:$0xff]  ;;  %v7306_v46 = vld [vmem:[#allocation3 + $0x143] sm:$0xff] }
 0x2af   : > { %13204 = vmatprep.mubr.msk.bf16.mxu0 %vm510_vm3, %v16467_v14  ;;  %13770 = vmatprep.mubr.msk.bf16.mxu1 %vm3339_vm1, %v7319_v53  ;;  %v7298_v14 = vld [vmem:[#allocation3 + $0xe3] sm:$0xff]  ;;  %v2423_v53 = vld [vmem:[#allocation2 + $0x68] sm:$0xff] }
 0x2b0   : > { %v7322_v40 = vpack.c.bf16 %v7298_v14, %v7297_v22  ;;  %v2422_v22 = vld [vmem:[#allocation2 + $0x60] sm:$0xff] }
 0x2b1   : > { %v2452_v14 = vpack.c.bf16 %v2423_v53, %v2422_v22  ;;  %v7578_v53 = vld [vmem:[#allocation3 + $0x3c] sm:$0xff]  ;;  %v2433_v22 = vld [vmem:[#allocation2 + $0xe0] sm:$0xff] }
 0x2b6   : > { %13205 = vmatmul.mubr.msk.bf16.gmra.mrb[20].mxu0 %vm510_vm3, %v16469_v5  ;;  %13771 = vmatmul.mubr.msk.bf16.gmra.mrb[24].mxu1 %vm3339_vm1, %v7320_v28  ;;  %v7301_v5 = vld [vmem:[#allocation3 + $0x10b] sm:$0xff]  ;;  %v2811_v28 = vsel %vm864_vm2, %v16663_v48, 0 }
 0x2b7   : > { %13208 = vmatprep.mubr.msk.bf16.mxu0 %vm510_vm3, %v16477_v17  ;;  %13774 = vmatprep.mubr.msk.bf16.mxu1 %vm3339_vm1, %v7321_v8  ;;  %v2153_v17 = vld [vmem:[#allocation2 + $0x182] sm:$0xff]  ;;  %v7324_v49 = vpack.c.bf16 %v7302_v55, %v7301_v5  ;;  %v7326_v8 = vpack.c.bf16 %v7306_v46, %v7305_v12  ;;  %v2427_v5 = vld [vmem:[#allocation2 + $0x98] sm:$0xff] }
 0x2b8   : > { %v16718_v58 = vpack.c.bf16 %v2154_v47, %v2153_v17  ;;  %v2425_v48 = vld [vmem:[#allocation2 + $0x80] sm:$0xff]  ;;  %v7311_v17 = vld [vmem:[#allocation3 + $0x183] sm:$0xff]  ;;  %v2431_v12 = vld [vmem:[#allocation2 + $0xc8] sm:$0xff] }
 0x2b9   : > { %v7312_v47 = vld [vmem:[#allocation3 + $0x18b] sm:$0xff]  ;;  %v7577_v46 = vld [vmem:[#allocation3 + $0x34] sm:$0xff] }
 0x2ba   : > { %v2424_v55 = vld [vmem:[#allocation2 + $0x78] sm:$0xff]  ;;  %v7329_v32 = vpack.c.bf16 %v7312_v47, %v7311_v17 }
 0x2bb   : > { %v2453_v34 = vpack.c.bf16 %v2425_v48, %v2424_v55  ;;  %v2435_v48 = vld [vmem:[#allocation2 + $0xf8] sm:$0xff]  ;;  %v2434_v55 = vld [vmem:[#allocation2 + $0xf0] sm:$0xff] }
 0x2be   : > { %13209 = vmatmul.mubr.msk.bf16.gmra.mrb[24].mxu0 %vm510_vm3, %v16479_v7  ;;  %13775 = vmatmul.mubr.msk.bf16.gmra.mrb[28].mxu1 %vm3339_vm1, %v7322_v40  ;;  %v7325_v7 = vpack.c.bf16 %v7304_v44, %v7303_v26  ;;  %v7309_v40 = vld [vmem:[#allocation3 + $0x16b] sm:$0xff]  ;;  %v2426_v44 = vld [vmem:[#allocation2 + $0x90] sm:$0xff] }
 0x2bf   : > { %13212 = vmatprep.mubr.msk.bf16.mxu0 %vm510_vm3, %v16487_v33  ;;  %13778 = vmatprep.mubr.msk.bf16.mxu1 %vm3339_vm1, %v7323_v29  ;;  %v2421_v33 = vld [vmem:[#allocation2 + $0x50] sm:$0xff]  ;;  %v7310_v29 = vld [vmem:[#allocation3 + $0x173] sm:$0xff] }
 0x2c0   : > { %v2451_v9 = vpack.c.bf16 %v2421_v33, %v2420_v35  ;;  %v7328_v26 = vpack.c.bf16 %v7310_v29, %v7309_v40  ;;  %v7314_v33 = vld [vmem:[#allocation3 + $0x1a3] sm:$0xff]  ;;  %v2428_v35 = vld [vmem:[#allocation2 + $0xa8] sm:$0xff]  ;;  %v7582_v29 = vld [vmem:[#allocation3 + $0x6c] sm:$0xff] }
 0x2c1   : > { %v7581_v40 = vld [vmem:[#allocation3 + $0x64] sm:$0xff] }
 0x2c6   : > { %13213 = vmatmul.mubr.msk.bf16.gmra.mrb[28].mxu0 %vm510_vm3, %v16718_v58  ;;  %13779 = vmatmul.mubr.msk.bf16.gmra.mrb[0].mxu1 %vm3339_vm1, %v7324_v49  ;;  %v2454_v49 = vpack.c.bf16 %v2427_v5, %v2426_v44  ;;  %v2432_v5 = vld [vmem:[#allocation2 + $0xd8] sm:$0xff]  ;;  %v7971_v44 = vsel %vm3671_vm0, %v16693_v21, 0  ;;  %v2439_v21 = vld [vmem:[#allocation2 + $0x128] sm:$0xff] }
 0x2c7   : > { %13218 = vmatprep.mubr.msk.bf16.mxu0 %vm510_vm3, %v2450_v23  ;;  %13782 = vmatprep.mubr.msk.bf16.mxu1 %vm3339_vm1, %v7325_v7  ;;  %v2429_v23 = vld [vmem:[#allocation2 + $0xb0] sm:$0xff]  ;;  %v2457_v17 = vpack.c.bf16 %v2433_v22, %v2432_v5  ;;  %v7588_v22 = vld [vmem:[#allocation3 + $0xb4] sm:$0xff] }
 0x2c8   : > { %v7313_v7 = vld [vmem:[#allocation3 + $0x19b] sm:$0xff]  ;;  %v2455_v13 = vpack.c.bf16 %v2429_v23, %v2428_v35 }
 0x2c9   : > { %v7330_v6 = vpack.c.bf16 %v7314_v33, %v7313_v7  ;;  %v7583_v23 = vld [vmem:[#allocation3 + $0x7c] sm:$0xff]  ;;  %v7584_v7 = vld [vmem:[#allocation3 + $0x84] sm:$0xff]  ;;  %v7585_v33 = vld [vmem:[#allocation3 + $0x94] sm:$0xff] }
 0x2ca   : > { %v7612_v35 = vpack.c.bf16 %v7584_v7, %v7583_v23  ;;  %v7594_v23 = vld [vmem:[#allocation3 + $0xfc] sm:$0xff] }
 0x2cb   : > { %v2444_v7 = vld [vmem:[#allocation2 + $0x168] sm:$0xff] }
 0x2ce   : > { %13219 = vmatmul.mubr.msk.bf16.vlgmr.msra.gmra.mrb[0].mxu0 %vm510_vm3, %v2451_v9  ;;  %13783 = vmatmul.mubr.msk.bf16.gmra.mrb[4].mxu1 %vm3339_vm1, %v7326_v8  ;;  %v2430_v9 = vld [vmem:[#allocation2 + $0xc0] sm:$0xff]  ;;  %v7609_v8 = vpack.c.bf16 %v7578_v53, %v7577_v46  ;;  %v2436_v46 = vld [vmem:[#allocation2 + $0x108] sm:$0xff] }
 0x2cf   : > { %13251 = vmatpush3.bf16.msra.mxu0 %v2811_v28  ;;  %13222 = vmatprep.mubr.msk.bf16.mxu0 %vm510_vm3, %v2452_v14  ;;  %v2456_v28 = vpack.c.bf16 %v2431_v12, %v2430_v9  ;;  %v7579_v14 = vld [vmem:[#allocation3 + $0x4c] sm:$0xff]  ;;  %v7586_v12 = vld [vmem:[#allocation3 + $0x9c] sm:$0xff] }
 0x2d0   : > { %13786 = vmatprep.mubr.msk.bf16.mxu1 %vm3339_vm1, %v7327_v27  ;;  %15236 = vmatprep.subr.msk.bf16.mxu0 %vm864_vm2, %v16730_v37  ;;  %v7580_v27 = vld [vmem:[#allocation3 + $0x54] sm:$0xff]  ;;  %v7613_v9 = vpack.c.bf16 %v7586_v12, %v7585_v33 }
 0x2d1   : > { %v7610_v47 = vpack.c.bf16 %v7580_v27, %v7579_v14  ;;  %v2443_v14 = vld [vmem:[#allocation2 + $0x158] sm:$0xff] }
 0x2d2   : > { %v7589_v27 = vld [vmem:[#allocation3 + $0xc4] sm:$0xff] }
 0x2d6   : > { %13223 = vmatmul.mubr.msk.bf16.gmra.mrb[4].mxu0 %vm510_vm3, %v2453_v34  ;;  %13787 = vmatmul.mubr.msk.bf16.gmra.mrb[8].mxu1 %vm3339_vm1, %v7328_v26  ;;  %v2458_v34 = vpack.c.bf16 %v2435_v48, %v2434_v55  ;;  %v7611_v26 = vpack.c.bf16 %v7582_v29, %v7581_v40  ;;  %v7590_v48 = vld [vmem:[#allocation3 + $0xcc] sm:$0xff] }
 0x2d7   : > { %13226 = vmatprep.mubr.msk.bf16.mxu0 %vm510_vm3, %v2454_v49  ;;  %13790 = vmatprep.mubr.msk.bf16.mxu1 %vm3339_vm1, %v7329_v32  ;;  %v16753_v49 = vld [vmem:[%s18440_s5 + $0x20] sm:$0x3]  ;;  %v2437_v32 = vld [vmem:[#allocation2 + $0x110] sm:$0xff]  ;;  %v2440_v40 = vld [vmem:[#allocation2 + $0x138] sm:$0xff]  ;;  %v7615_v55 = vpack.c.bf16 %v7590_v48, %v7589_v27 }
 0x2d8   : > { %v2459_v53 = vpack.c.bf16 %v2437_v32, %v2436_v46  ;;  %v7593_v32 = vld [vmem:[#allocation3 + $0xf4] sm:$0xff]  ;;  %v2448_v46 = vld [vmem:[#allocation2 + $0x198] sm:$0xff]  ;;  %v7602_v48 = vld [vmem:[#allocation3 + $0x15c] sm:$0xff] }
 0x2d9   : > { %v7617_v12 = vpack.c.bf16 %v7594_v23, %v7593_v32  ;;  %v7601_v27 = vld [vmem:[#allocation3 + $0x154] sm:$0xff]  ;;  %v7872_v23 = vld [vmem:[#allocation3 + $0x48] sm:$0xff] }
 0x2de   : > { %13227 = vmatmul.mubr.msk.bf16.gmra.mrb[8].mxu0 %vm510_vm3, %v2455_v13  ;;  %13791 = vmatmul.mubr.msk.bf16.gmra.mrb[12].mxu1 %vm3339_vm1, %v7330_v6  ;;  %v2438_v13 = vld [vmem:[#allocation2 + $0x120] sm:$0xff] }
 0x2df   : > { %13230 = vmatprep.mubr.msk.bf16.mxu0 %vm510_vm3, %v2456_v28  ;;  %13796 = vmatprep.mubr.msk.bf16.mxu1 %vm3339_vm1, %v7609_v8  ;;  %v2460_v6 = vpack.c.bf16 %v2439_v21, %v2438_v13  ;;  %v2441_v28 = vld [vmem:[#allocation2 + $0x140] sm:$0xff] }
 0x2e0   : > { %v7587_v8 = vld [vmem:[#allocation3 + $0xac] sm:$0xff]  ;;  %v2461_v29 = vpack.c.bf16 %v2441_v28, %v2440_v40  ;;  %v7596_v13 = vld [vmem:[#allocation3 + $0x114] sm:$0xff]  ;;  %v3105_v40 = vsel %vm864_vm2, %v16730_v37, 0 }
 0x2e1   : > { %v7614_v5 = vpack.c.bf16 %v7588_v22, %v7587_v8  ;;  %v7598_v28 = vld [vmem:[#allocation3 + $0x12c] sm:$0xff] }
 0x2e2   : > { %v7603_v37 = vld [vmem:[#allocation3 + $0x16c] sm:$0xff] }
 0x2e6   : > { %13231 = vmatmul.mubr.msk.bf16.gmra.mrb[12].mxu0 %vm510_vm3, %v2457_v17  ;;  %13797 = vmatmul.mubr.msk.bf16.vlgmr.msra.gmra.mrb[16].mxu1 %vm3339_vm1, %v7610_v47  ;;  %v2442_v17 = vld [vmem:[#allocation2 + $0x150] sm:$0xff] }
 0x2e7   : > { %13234 = vmatprep.mubr.msk.bf16.mxu0 %vm510_vm3, %v2458_v34  ;;  %13800 = vmatprep.mubr.msk.bf16.mxu1 %vm3339_vm1, %v7611_v26  ;;  %v2462_v47 = vpack.c.bf16 %v2443_v14, %v2442_v17  ;;  %v2445_v34 = vld [vmem:[#allocation2 + $0x170] sm:$0xff]  ;;  %v7604_v17 = vld [vmem:[#allocation3 + $0x174] sm:$0xff] }
 0x2e8   : > { %13829 = vmatpush3.bf16.msra.mxu1 %v7971_v44  ;;  %v7591_v26 = vld [vmem:[#allocation3 + $0xdc] sm:$0xff]  ;;  %v7592_v44 = vld [vmem:[#allocation3 + $0xe4] sm:$0xff]  ;;  %v2463_v21 = vpack.c.bf16 %v2445_v34, %v2444_v7  ;;  %v7622_v34 = vpack.c.bf16 %v7604_v17, %v7603_v37 }
 0x2e9   : > { %15254 = vmatprep.subr.msk.bf16.mxu1 %vm3671_vm0, %v16753_v49  ;;  %v7616_v33 = vpack.c.bf16 %v7592_v44, %v7591_v26  ;;  %v7600_v14 = vld [vmem:[#allocation3 + $0x144] sm:$0xff]  ;;  %v7873_v44 = vld [vmem:[#allocation3 + $0x50] sm:$0xff] }
 0x2ea   : > { %v16798_v7 = vpack.c.bf16 %v7873_v44, %v7872_v23  ;;  %v3006_v37 = vld [vmem:[#allocation2 + $0x32] sm:$0xff]  ;;  %v3007_v17 = vld [vmem:[#allocation2 + $0x3a] sm:$0xff]  ;;  %v7895_v44 = vld [vmem:[#allocation3 + $0x158] sm:$0xff] }
 0x2eb   : > { %v3011_v23 = vld [vmem:[#allocation2 + $0x6a] sm:$0xff] }
 0x2ee   : > { %13235 = vmatmul.mubr.msk.bf16.gmra.mrb[16].mxu0 %vm510_vm3, %v2459_v53  ;;  %13801 = vmatmul.mubr.msk.bf16.gmra.mrb[20].mxu1 %vm3339_vm1, %v7612_v35  ;;  %v2449_v53 = vld [vmem:[#allocation2 + $0x1a0] sm:$0xff] }
 0x2ef   : > { %13238 = vmatprep.mubr.msk.bf16.mxu0 %vm510_vm3, %v2460_v6  ;;  %13804 = vmatprep.mubr.msk.bf16.mxu1 %vm3339_vm1, %v7613_v9  ;;  %v7595_v35 = vld [vmem:[#allocation3 + $0x10c] sm:$0xff]  ;;  %v2465_v6 = vpack.c.bf16 %v2449_v53, %v2448_v46  ;;  %v7597_v9 = vld [vmem:[#allocation3 + $0x124] sm:$0xff]  ;;  %v8265_v53 = vsel %vm3671_vm0, %v16753_v49, 0 }
 0x2f0   : > { %v7618_v8 = vpack.c.bf16 %v7596_v13, %v7595_v35  ;;  %v7619_v22 = vpack.c.bf16 %v7598_v28, %v7597_v9  ;;  %v7878_v49 = vld [vmem:[#allocation3 + $0x90] sm:$0xff]  ;;  %v7880_v13 = vld [vmem:[#allocation3 + $0xa8] sm:$0xff]  ;;  %v7885_v9 = vld [vmem:[#allocation3 + $0xe0] sm:$0xff] }
 0x2f1   : > { %v7882_v28 = vld [vmem:[#allocation3 + $0xc0] sm:$0xff] }
 0x2f6   : > { %13239 = vmatmul.mubr.msk.bf16.gmra.mrb[20].mxu0 %vm510_vm3, %v2461_v29  ;;  %13805 = vmatmul.mubr.msk.bf16.gmra.mrb[24].mxu1 %vm3339_vm1, %v7614_v5  ;;  %v16782_v5 = vld [vmem:[%s18440_s5 + $0x2] sm:$0x3] }
 0x2f7   : > { %13242 = vmatprep.mubr.msk.bf16.mxu0 %vm510_vm3, %v2462_v47  ;;  %13808 = vmatprep.mubr.msk.bf16.mxu1 %vm3339_vm1, %v7615_v55  ;;  %v7605_v47 = vld [vmem:[#allocation3 + $0x184] sm:$0xff]  ;;  %v7606_v55 = vld [vmem:[#allocation3 + $0x18c] sm:$0xff] }
 0x2f8   : > { %v7623_v26 = vpack.c.bf16 %v7606_v55, %v7605_v47  ;;  %v7893_v47 = vld [vmem:[#allocation3 + $0x140] sm:$0xff] }
 0x2f9   : > { %v7890_v55 = vld [vmem:[#allocation3 + $0x120] sm:$0xff] }
 0x2fe   : > { %13243 = vmatmul.mubr.msk.bf16.gmra.mrb[24].mxu0 %vm510_vm3, %v2463_v21  ;;  %13809 = vmatmul.mubr.msk.bf16.gmra.mrb[28].mxu1 %vm3339_vm1, %v7616_v33  ;;  %v7874_v21 = vld [vmem:[#allocation3 + $0x60] sm:$0xff] }
 0x2ff   : > { %13246 = vmatprep.mubr.msk.bf16.mxu0 %vm510_vm3, %v16555_v24  ;;  %13812 = vmatprep.mubr.msk.bf16.mxu1 %vm3339_vm1, %v7617_v12  ;;  %v7599_v24 = vld [vmem:[#allocation3 + $0x13c] sm:$0xff] }
 0x300   : > { %v7620_v29 = vpack.c.bf16 %v7600_v14, %v7599_v24  ;;  %v7876_v12 = vld [vmem:[#allocation3 + $0x78] sm:$0xff]  ;;  %v7886_v14 = vld [vmem:[#allocation3 + $0xf0] sm:$0xff] }
 0x306   : > { %13247 = vmatmul.mubr.msk.bf16.gmra.mrb[28].mxu0 %vm510_vm3, %v2465_v6  ;;  %13813 = vmatmul.mubr.msk.bf16.gmra.mrb[0].mxu1 %vm3339_vm1, %v7618_v8 }
 0x307   : > { %13252 = vmatprep.mubr.msk.bf16.mxu0 %vm510_vm3, %v16562_v39  ;;  %13816 = vmatprep.mubr.msk.bf16.mxu1 %vm3339_vm1, %v7619_v22  ;;  %v7621_v39 = vpack.c.bf16 %v7602_v48, %v7601_v27  ;;  %v7884_v22 = vld [vmem:[#allocation3 + $0xd8] sm:$0xff]  ;;  %v7888_v48 = vld [vmem:[#allocation3 + $0x108] sm:$0xff] }
 0x308   : > { %v16842_v24 = vpack.c.bf16 %v7885_v9, %v7884_v22  ;;  %v7899_v9 = vld [vmem:[#allocation3 + $0x188] sm:$0xff] }
 0x309   : > { %v3015_v22 = vld [vmem:[#allocation2 + $0x9a] sm:$0xff] }
 0x30e   : > { %13253 = vmatmul.mubr.msk.bf16.vlgmr.msra.gmra.mrb[0].mxu0 %vm510_vm3, %v16566_v42  ;;  %13817 = vmatmul.mubr.msk.bf16.gmra.mrb[4].mxu1 %vm3339_vm1, %v7620_v29  ;;  %v7607_v42 = vld [vmem:[#allocation3 + $0x19c] sm:$0xff]  ;;  %v7891_v29 = vld [vmem:[#allocation3 + $0x128] sm:$0xff] }
 0x30f   : > { %13285 = vmatpush3.bf16.msra.mxu0 %v3105_v40  ;;  %13256 = vmatprep.mubr.msk.bf16.mxu0 %vm510_vm3, %v16581_v38  ;;  %v7608_v38 = vld [vmem:[#allocation3 + $0x1a4] sm:$0xff] }
 0x310   : > { %13820 = vmatprep.mubr.msk.bf16.mxu1 %vm3339_vm1, %v7621_v39  ;;  %15237 = vmatprep.subr.msk.bf16.mxu0 %vm3671_vm0, %v16782_v5  ;;  %v7624_v32 = vpack.c.bf16 %v7608_v38, %v7607_v42  ;;  %v3009_v38 = vld [vmem:[#allocation2 + $0x52] sm:$0xff] }
 0x316   : > { %13257 = vmatmul.mubr.msk.bf16.gmra.mrb[4].mxu0 %vm510_vm3, %v16583_v63  ;;  %13821 = vmatmul.mubr.msk.bf16.gmra.mrb[8].mxu1 %vm3339_vm1, %v7622_v34  ;;  %v7875_v63 = vld [vmem:[#allocation3 + $0x68] sm:$0xff]  ;;  %v16864_v34 = vpack.c.bf16 %v7891_v29, %v7890_v55 }
 0x317   : > { %13260 = vmatprep.mubr.msk.bf16.mxu0 %vm510_vm3, %v16591_v56  ;;  %13824 = vmatprep.mubr.msk.bf16.mxu1 %vm3339_vm1, %v7623_v26  ;;  %v7877_v56 = vld [vmem:[#allocation3 + $0x80] sm:$0xff]  ;;  %v16807_v33 = vpack.c.bf16 %v7875_v63, %v7874_v21  ;;  %v3038_v26 = vpack.c.bf16 %v3007_v17, %v3006_v37  ;;  %v7894_v63 = vld [vmem:[#allocation3 + $0x150] sm:$0xff]  ;;  %v7903_v37 = vld [vmem:[#allocation3 + $0x1b8] sm:$0xff] }
 0x318   : > { %v16809_v46 = vpack.c.bf16 %v7877_v56, %v7876_v12  ;;  %v7897_v56 = vld [vmem:[#allocation3 + $0x170] sm:$0xff]  ;;  %v3673_v12 = vsel %vm3671_vm0, %v16782_v5, 0  ;;  %v3016_v17 = vld [vmem:[#allocation2 + $0xaa] sm:$0xff] }
 0x319   : > { %v3012_v5 = vld [vmem:[#allocation2 + $0x7a] sm:$0xff] }
 0x31e   : > { %13261 = vmatmul.mubr.msk.bf16.gmra.mrb[8].mxu0 %vm510_vm3, %v16593_v50  ;;  %13825 = vmatmul.mubr.msk.bf16.gmra.mrb[12].mxu1 %vm3339_vm1, %v7624_v32  ;;  %v16820_v50 = vld [vmem:[%s18440_s5 + $0x22] sm:$0x3] }
 0x31f   : > { %13264 = vmatprep.mubr.msk.bf16.mxu0 %vm510_vm3, %v16601_v45  ;;  %13830 = vmatprep.mubr.msk.bf16.mxu1 %vm3339_vm1, %v16798_v7  ;;  %v7879_v45 = vld [vmem:[#allocation3 + $0x98] sm:$0xff] }
 0x320   : > { %v16828_v35 = vpack.c.bf16 %v7879_v45, %v7878_v49  ;;  %v3010_v32 = vld [vmem:[#allocation2 + $0x62] sm:$0xff]  ;;  %v16881_v49 = vld [vmem:[%s18440_s5] sm:$0x3] }
 0x321   : > { %v3040_v45 = vpack.c.bf16 %v3011_v23, %v3010_v32 }
 0x326   : > { %13265 = vmatmul.mubr.msk.bf16.gmra.mrb[12].mxu0 %vm510_vm3, %v16603_v61  ;;  %13831 = vmatmul.mubr.msk.bf16.vlgmr.msra.gmra.mrb[16].mxu1 %vm3339_vm1, %v16807_v33  ;;  %v7881_v61 = vld [vmem:[#allocation3 + $0xb0] sm:$0xff] }
 0x327   : > { %13268 = vmatprep.mubr.msk.bf16.mxu0 %vm510_vm3, %v16620_v36  ;;  %13834 = vmatprep.mubr.msk.bf16.mxu1 %vm3339_vm1, %v16809_v46  ;;  %v16830_v6 = vpack.c.bf16 %v7881_v61, %v7880_v13  ;;  %v7883_v36 = vld [vmem:[#allocation3 + $0xc8] sm:$0xff] }
 0x328   : > { %13863 = vmatpush3.bf16.msra.mxu1 %v8265_v53  ;;  %v16840_v8 = vpack.c.bf16 %v7883_v36, %v7882_v28  ;;  %v16876_v53 = vpack.c.bf16 %v7895_v44, %v7894_v63  ;;  %v7896_v61 = vld [vmem:[#allocation3 + $0x168] sm:$0xff]  ;;  %v3013_v36 = vld [vmem:[#allocation2 + $0x82] sm:$0xff] }
 0x329   : > { %15255 = vmatprep.subr.msk.bf16.mxu1 %vm3671_vm0, %v16820_v50  ;;  %v16886_v13 = vpack.c.bf16 %v7897_v56, %v7896_v61  ;;  %v3014_v28 = vld [vmem:[#allocation2 + $0x92] sm:$0xff]  ;;  %v3020_v63 = vld [vmem:[#allocation2 + $0xda] sm:$0xff]  ;;  %v3021_v56 = vld [vmem:[#allocation2 + $0xe2] sm:$0xff] }
 0x32a   : > { %v8166_v44 = vld [vmem:[#allocation3 + $0x49] sm:$0xff]  ;;  %v8171_v61 = vld [vmem:[#allocation3 + $0x81] sm:$0xff] }
 0x32e   : > { %13269 = vmatmul.mubr.msk.bf16.gmra.mrb[16].mxu0 %vm510_vm3, %v16622_v52  ;;  %13835 = vmatmul.mubr.msk.bf16.gmra.mrb[20].mxu1 %vm3339_vm1, %v16828_v35  ;;  %v7887_v52 = vld [vmem:[#allocation3 + $0xf8] sm:$0xff] }
 0x32f   : > { %13272 = vmatprep.mubr.msk.bf16.mxu0 %vm510_vm3, %v16630_v0  ;;  %13838 = vmatprep.mubr.msk.bf16.mxu1 %vm3339_vm1, %v16830_v6  ;;  %v7889_v0 = vld [vmem:[#allocation3 + $0x110] sm:$0xff]  ;;  %v16852_v27 = vpack.c.bf16 %v7887_v52, %v7886_v14  ;;  %v7901_v52 = vld [vmem:[#allocation3 + $0x1a0] sm:$0xff]  ;;  %v3041_v14 = vpack.c.bf16 %v3013_v36, %v3012_v5  ;;  %v3045_v36 = vpack.c.bf16 %v3021_v56, %v3020_v63 }
 0x330   : > { %v16854_v40 = vpack.c.bf16 %v7889_v0, %v7888_v48  ;;  %v7898_v0 = vld [vmem:[#allocation3 + $0x180] sm:$0xff]  ;;  %v3031_v63 = vld [vmem:[#allocation2 + $0x15a] sm:$0xff] }
 0x331   : > { %v7917_v48 = vpack.c.bf16 %v7899_v9, %v7898_v0  ;;  %v8168_v5 = vld [vmem:[#allocation3 + $0x61] sm:$0xff]  ;;  %v8559_v0 = vsel %vm3671_vm0, %v16820_v50, 0  ;;  %v3026_v50 = vld [vmem:[#allocation2 + $0x122] sm:$0xff] }
 0x332   : > { %v8179_v56 = vld [vmem:[#allocation3 + $0xe1] sm:$0xff] }
 0x336   : > { %13273 = vmatmul.mubr.msk.bf16.gmra.mrb[20].mxu0 %vm510_vm3, %v16632_v60  ;;  %13839 = vmatmul.mubr.msk.bf16.gmra.mrb[24].mxu1 %vm3339_vm1, %v16840_v8  ;;  %v2742_v60 = vld [vmem:[#allocation2 + $0x199] sm:$0xff] }
 0x337   : > { %13276 = vmatprep.mubr.msk.bf16.mxu0 %vm510_vm3, %v16640_v62  ;;  %13842 = vmatprep.mubr.msk.bf16.mxu1 %vm3339_vm1, %v16842_v24  ;;  %v2743_v62 = vld [vmem:[#allocation2 + $0x1a1] sm:$0xff] }
 0x338   : > { %v2759_v39 = vpack.c.bf16 %v2743_v62, %v2742_v60  ;;  %v7900_v60 = vld [vmem:[#allocation3 + $0x198] sm:$0xff]  ;;  %v3042_v62 = vpack.c.bf16 %v3015_v22, %v3014_v28 }
 0x339   : > { %v7918_v29 = vpack.c.bf16 %v7901_v52, %v7900_v60  ;;  %v8170_v28 = vld [vmem:[#allocation3 + $0x79] sm:$0xff]  ;;  %v3025_v60 = vld [vmem:[#allocation2 + $0x112] sm:$0xff] }
 0x33a   : > { %v16906_v52 = vpack.c.bf16 %v8171_v61, %v8170_v28  ;;  %v8178_v61 = vld [vmem:[#allocation3 + $0xd9] sm:$0xff] }
 0x33b   : > { %v3032_v28 = vld [vmem:[#allocation2 + $0x16a] sm:$0xff] }
 0x33e   : > { %13277 = vmatmul.mubr.msk.bf16.gmra.mrb[24].mxu0 %vm510_vm3, %v16642_v59  ;;  %13843 = vmatmul.mubr.msk.bf16.gmra.mrb[28].mxu1 %vm3339_vm1, %v16852_v27  ;;  %v7892_v59 = vld [vmem:[#allocation3 + $0x138] sm:$0xff] }
 0x33f   : > { %13280 = vmatprep.mubr.msk.bf16.mxu0 %vm510_vm3, %v16650_v16  ;;  %13846 = vmatprep.mubr.msk.bf16.mxu1 %vm3339_vm1, %v16854_v40  ;;  %v16866_v42 = vpack.c.bf16 %v7893_v47, %v7892_v59  ;;  %v3008_v16 = vld [vmem:[#allocation2 + $0x4a] sm:$0xff]  ;;  %v3017_v47 = vld [vmem:[#allocation2 + $0xb2] sm:$0xff]  ;;  %v3018_v59 = vld [vmem:[#allocation2 + $0xc2] sm:$0xff] }
 0x340   : > { %v3039_v21 = vpack.c.bf16 %v3009_v38, %v3008_v16  ;;  %v8167_v16 = vld [vmem:[#allocation3 + $0x51] sm:$0xff]  ;;  %v3043_v38 = vpack.c.bf16 %v3017_v47, %v3016_v17 }
 0x341   : > { %v16897_v23 = vpack.c.bf16 %v8167_v16, %v8166_v44  ;;  %v3028_v16 = vld [vmem:[#allocation2 + $0x13a] sm:$0xff] }
 0x342   : > { %v8177_v44 = vld [vmem:[#allocation3 + $0xc9] sm:$0xff] }
 0x346   : > { %13281 = vmatmul.mubr.msk.bf16.gmra.mrb[28].mxu0 %vm510_vm3, %v2759_v39  ;;  %13847 = vmatmul.mubr.msk.bf16.gmra.mrb[0].mxu1 %vm3339_vm1, %v16864_v34  ;;  %v7902_v39 = vld [vmem:[#allocation3 + $0x1b0] sm:$0xff] }
 0x347   : > { %13286 = vmatprep.mubr.msk.bf16.mxu0 %vm510_vm3, %v3038_v26  ;;  %13850 = vmatprep.mubr.msk.bf16.mxu1 %vm3339_vm1, %v16866_v42  ;;  %v7919_v55 = vpack.c.bf16 %v7903_v37, %v7902_v39  ;;  %v3019_v26 = vld [vmem:[#allocation2 + $0xca] sm:$0xff]  ;;  %v8175_v39 = vld [vmem:[#allocation3 + $0xb1] sm:$0xff] }
 0x348   : > { %v3044_v32 = vpack.c.bf16 %v3019_v26, %v3018_v59  ;;  %v8172_v37 = vld [vmem:[#allocation3 + $0x91] sm:$0xff] }
 0x34e   : > { %13287 = vmatmul.mubr.msk.bf16.vlgmr.msra.gmra.mrb[0].mxu0 %vm510_vm3, %v3039_v21  ;;  %13851 = vmatmul.mubr.msk.bf16.gmra.mrb[4].mxu1 %vm3339_vm1, %v16876_v53  ;;  %v8169_v21 = vld [vmem:[#allocation3 + $0x69] sm:$0xff] }
 0x34f   : > { %13319 = vmatpush3.bf16.msra.mxu0 %v3673_v12  ;;  %13290 = vmatprep.mubr.msk.bf16.mxu0 %vm510_vm3, %v3040_v45  ;;  %v3022_v12 = vld [vmem:[#allocation2 + $0xf2] sm:$0xff]  ;;  %v3023_v45 = vld [vmem:[#allocation2 + $0xfa] sm:$0xff]  ;;  %v16904_v9 = vpack.c.bf16 %v8169_v21, %v8168_v5 }
 0x350   : > { %13854 = vmatprep.mubr.msk.bf16.mxu1 %vm3339_vm1, %v16886_v13  ;;  %15238 = vmatprep.subr.msk.bf16.mxu0 %vm3671_vm0, %v16881_v49  ;;  %v3046_v22 = vpack.c.bf16 %v3023_v45, %v3022_v12  ;;  %v8176_v21 = vld [vmem:[#allocation3 + $0xc1] sm:$0xff] }
 0x351   : > { %v16933_v45 = vpack.c.bf16 %v8177_v44, %v8176_v21  ;;  %v8187_v44 = vld [vmem:[#allocation3 + $0x141] sm:$0xff]  ;;  %v8186_v21 = vld [vmem:[#allocation3 + $0x139] sm:$0xff] }
 0x356   : > { %13291 = vmatmul.mubr.msk.bf16.gmra.mrb[4].mxu0 %vm510_vm3, %v3041_v14  ;;  %13855 = vmatmul.mubr.msk.bf16.gmra.mrb[8].mxu1 %vm3339_vm1, %v7917_v48  ;;  %v16916_v14 = vld [vmem:[%s18440_s5 + $0x24] sm:$0x3]  ;;  %v3024_v48 = vld [vmem:[#allocation2 + $0x10a] sm:$0xff] }
 0x357   : > { %13294 = vmatprep.mubr.msk.bf16.mxu0 %vm510_vm3, %v3042_v62  ;;  %13858 = vmatprep.mubr.msk.bf16.mxu1 %vm3339_vm1, %v7918_v29  ;;  %v8173_v62 = vld [vmem:[#allocation3 + $0x99] sm:$0xff]  ;;  %v3047_v17 = vpack.c.bf16 %v3025_v60, %v3024_v48  ;;  %v8183_v48 = vld [vmem:[#allocation3 + $0x111] sm:$0xff] }
 0x358   : > { %v3027_v29 = vld [vmem:[#allocation2 + $0x12a] sm:$0xff]  ;;  %v16923_v47 = vpack.c.bf16 %v8173_v62, %v8172_v37  ;;  %v8180_v60 = vld [vmem:[#allocation3 + $0xf1] sm:$0xff] }
 0x359   : > { %v3048_v59 = vpack.c.bf16 %v3027_v29, %v3026_v50  ;;  %v8182_v29 = vld [vmem:[#allocation3 + $0x109] sm:$0xff] }
 0x35a   : > { %v3036_v37 = vld [vmem:[#allocation2 + $0x19a] sm:$0xff] }
 0x35e   : > { %13295 = vmatmul.mubr.msk.bf16.gmra.mrb[8].mxu0 %vm510_vm3, %v3043_v38  ;;  %13859 = vmatmul.mubr.msk.bf16.gmra.mrb[12].mxu1 %vm3339_vm1, %v7919_v55  ;;  %v8174_v55 = vld [vmem:[#allocation3 + $0xa9] sm:$0xff]  ;;  %v3029_v38 = vld [vmem:[#allocation2 + $0x142] sm:$0xff] }
 0x35f   : > { %13298 = vmatprep.mubr.msk.bf16.mxu0 %vm510_vm3, %v3044_v32  ;;  %13864 = vmatprep.mubr.msk.bf16.mxu1 %vm3339_vm1, %v16897_v23  ;;  %v16925_v26 = vpack.c.bf16 %v8175_v39, %v8174_v55  ;;  %v3030_v32 = vld [vmem:[#allocation2 + $0x152] sm:$0xff]  ;;  %v3049_v12 = vpack.c.bf16 %v3029_v38, %v3028_v16  ;;  %v16945_v39 = vpack.c.bf16 %v8183_v48, %v8182_v29  ;;  %v8191_v48 = vld [vmem:[#allocation3 + $0x171] sm:$0xff] }
 0x360   : > { %v3050_v5 = vpack.c.bf16 %v3031_v63, %v3030_v32  ;;  %v3573_v55 = vld [vmem:[#allocation3 + $0x1] sm:$0xff]  ;;  %v8185_v16 = vld [vmem:[#allocation3 + $0x129] sm:$0xff]  ;;  %v3577_v29 = vld [vmem:[#allocation3 + $0x31] sm:$0xff] }
 0x361   : > { %v8184_v32 = vld [vmem:[#allocation3 + $0x121] sm:$0xff] }
 0x366   : > { %13299 = vmatmul.mubr.msk.bf16.gmra.mrb[12].mxu0 %vm510_vm3, %v3045_v36  ;;  %13865 = vmatmul.mubr.msk.bf16.vlgmr.msra.gmra.mrb[16].mxu1 %vm3339_vm1, %v16904_v9  ;;  %v16935_v36 = vpack.c.bf16 %v8179_v56, %v8178_v61  ;;  %v16954_v56 = vpack.c.bf16 %v8185_v16, %v8184_v32  ;;  %v3576_v61 = vld [vmem:[#allocation3 + $0x21] sm:$0xff]  ;;  %v8194_v32 = vld [vmem:[#allocation3 + $0x199] sm:$0xff] }
 0x367   : > { %13302 = vmatprep.mubr.msk.bf16.mxu0 %vm510_vm3, %v3046_v22  ;;  %13868 = vmatprep.mubr.msk.bf16.mxu1 %vm3339_vm1, %v16906_v52  ;;  %v3033_v22 = vld [vmem:[#allocation2 + $0x172] sm:$0xff] }
 0x368   : > { %13897 = vmatpush3.bf16.msra.mxu1 %v8559_v0  ;;  %v8181_v0 = vld [vmem:[#allocation3 + $0xf9] sm:$0xff]  ;;  %v3051_v62 = vpack.c.bf16 %v3033_v22, %v3032_v28  ;;  %v8195_v16 = vld [vmem:[#allocation3 + $0x1a1] sm:$0xff] }
 0x369   : > { %15256 = vmatprep.subr.msk.bf16.mxu1 %vm3671_vm0, %v16916_v14  ;;  %v16943_v50 = vpack.c.bf16 %v8181_v0, %v8180_v60  ;;  %v3578_v22 = vld [vmem:[#allocation3 + $0x39] sm:$0xff]  ;;  %v8188_v0 = vld [vmem:[#allocation3 + $0x151] sm:$0xff]  ;;  %v3885_v60 = vsel %vm3671_vm0, %v16881_v49, 0  ;;  %v8193_v49 = vld [vmem:[#allocation3 + $0x189] sm:$0xff] }
 0x36e   : > { %13303 = vmatmul.mubr.msk.bf16.gmra.mrb[16].mxu0 %vm510_vm3, %v3047_v17  ;;  %13869 = vmatmul.mubr.msk.bf16.gmra.mrb[20].mxu1 %vm3339_vm1, %v16923_v47  ;;  %v3037_v17 = vld [vmem:[#allocation2 + $0x1a2] sm:$0xff] }
 0x36f   : > { %13306 = vmatprep.mubr.msk.bf16.mxu0 %vm510_vm3, %v3048_v59  ;;  %13872 = vmatprep.mubr.msk.bf16.mxu1 %vm3339_vm1, %v16925_v26  ;;  %v3574_v59 = vld [vmem:[#allocation3 + $0x9] sm:$0xff]  ;;  %v3053_v38 = vpack.c.bf16 %v3037_v17, %v3036_v37  ;;  %v3607_v37 = vpack.c.bf16 %v3578_v22, %v3577_v29 }
 0x370   : > { %v3605_v63 = vpack.c.bf16 %v3574_v59, %v3573_v55  ;;  %v8190_v17 = vld [vmem:[#allocation3 + $0x169] sm:$0xff]  ;;  %v16971_v55 = vld [vmem:[%s18440_s5 + $0x4] sm:$0x3] }
 0x371   : > { %v16976_v59 = vpack.c.bf16 %v8191_v48, %v8190_v17 }
 0x376   : > { %13307 = vmatmul.mubr.msk.bf16.gmra.mrb[20].mxu0 %vm510_vm3, %v3049_v12  ;;  %13873 = vmatmul.mubr.msk.bf16.gmra.mrb[24].mxu1 %vm3339_vm1, %v16933_v45  ;;  %v16956_v12 = vpack.c.bf16 %v8187_v44, %v8186_v21  ;;  %v8196_v21 = vld [vmem:[#allocation3 + $0x1b1] sm:$0xff] }
 0x377   : > { %13310 = vmatprep.mubr.msk.bf16.mxu0 %vm510_vm3, %v3050_v5  ;;  %13876 = vmatprep.mubr.msk.bf16.mxu1 %vm3339_vm1, %v16935_v36  ;;  %v8189_v5 = vld [vmem:[#allocation3 + $0x159] sm:$0xff] }
 0x37e   : > { %13311 = vmatmul.mubr.msk.bf16.gmra.mrb[24].mxu0 %vm510_vm3, %v3051_v62  ;;  %13877 = vmatmul.mubr.msk.bf16.gmra.mrb[28].mxu1 %vm3339_vm1, %v16943_v50  ;;  %v16966_v62 = vpack.c.bf16 %v8189_v5, %v8188_v0  ;;  %v8461_v5 = vld [vmem:[#allocation3 + $0x52] sm:$0xff]  ;;  %v8462_v0 = vld [vmem:[#allocation3 + $0x62] sm:$0xff] }
 0x37f   : > { %13314 = vmatprep.mubr.msk.bf16.mxu0 %vm510_vm3, %v16718_v58  ;;  %13880 = vmatprep.mubr.msk.bf16.mxu1 %vm3339_vm1, %v16945_v39  ;;  %v3575_v58 = vld [vmem:[#allocation3 + $0x19] sm:$0xff] }
 0x380   : > { %v3606_v28 = vpack.c.bf16 %v3576_v61, %v3575_v58  ;;  %v8197_v58 = vld [vmem:[#allocation3 + $0x1b9] sm:$0xff] }
 0x381   : > { %v8213_v61 = vpack.c.bf16 %v8197_v58, %v8196_v21  ;;  %v8474_v58 = vld [vmem:[#allocation3 + $0xf2] sm:$0xff] }
 0x386   : > { %13315 = vmatmul.mubr.msk.bf16.gmra.mrb[28].mxu0 %vm510_vm3, %v3053_v38  ;;  %13881 = vmatmul.mubr.msk.bf16.gmra.mrb[0].mxu1 %vm3339_vm1, %v16954_v56  ;;  %v8192_v38 = vld [vmem:[#allocation3 + $0x181] sm:$0xff] }
 0x387   : > { %13884 = vmatprep.mubr.msk.bf16.mxu1 %vm3339_vm1, %v16956_v12  ;;  %13320 = vmatprep.mubr.msk.bf16.mxu0 %vm3339_vm1, %v3605_v63  ;;  %v8211_v44 = vpack.c.bf16 %v8193_v49, %v8192_v38  ;;  %v8212_v63 = vpack.c.bf16 %v8195_v16, %v8194_v32  ;;  %v8468_v49 = vld [vmem:[#allocation3 + $0xaa] sm:$0xff]  ;;  %v8473_v38 = vld [vmem:[#allocation3 + $0xe2] sm:$0xff] }
 0x38e   : > { %13321 = vmatmul.mubr.msk.bf16.vlgmr.msra.gmra.mrb[32].mxu0 %vm3339_vm1, %v3606_v28  ;;  %13885 = vmatmul.mubr.msk.bf16.gmra.mrb[4].mxu1 %vm3339_vm1, %v16966_v62  ;;  %v8460_v28 = vld [vmem:[#allocation3 + $0x4a] sm:$0xff] }
 0x38f   : > { %13353 = vmatpush3.bf16.msra.mxu0 %v3885_v60  ;;  %13324 = vmatprep.mubr.msk.bf16.mxu0 %vm3339_vm1, %v3607_v37  ;;  %v16989_v22 = vpack.c.bf16 %v8461_v5, %v8460_v28  ;;  %v8464_v60 = vld [vmem:[#allocation3 + $0x7a] sm:$0xff]  ;;  %v8853_v37 = vsel %vm3671_vm0, %v16916_v14, 0  ;;  %v8469_v14 = vld [vmem:[#allocation3 + $0xb2] sm:$0xff]  ;;  %v8476_v5 = vld [vmem:[#allocation3 + $0x10a] sm:$0xff] }
 0x390   : > { %13888 = vmatprep.mubr.msk.bf16.mxu1 %vm3339_vm1, %v16976_v59  ;;  %15239 = vmatprep.subr.msk.bf16.mxu0 %vm3671_vm0, %v16971_v55  ;;  %v17021_v16 = vpack.c.bf16 %v8469_v14, %v8468_v49 }
 0x396   : > { %13325 = vmatmul.mubr.msk.bf16.gmra.mrb[36].mxu0 %vm3339_vm1, %v16897_v23  ;;  %13889 = vmatmul.mubr.msk.bf16.gmra.mrb[8].mxu1 %vm3339_vm1, %v8211_v44  ;;  %v8463_v23 = vld [vmem:[#allocation3 + $0x6a] sm:$0xff]  ;;  %v8470_v44 = vld [vmem:[#allocation3 + $0xc2] sm:$0xff] }
 0x397   : > { %13328 = vmatprep.mubr.msk.bf16.mxu0 %vm3339_vm1, %v16904_v9  ;;  %13892 = vmatprep.mubr.msk.bf16.mxu1 %vm3339_vm1, %v8212_v63  ;;  %v8465_v9 = vld [vmem:[#allocation3 + $0x82] sm:$0xff]  ;;  %v16998_v48 = vpack.c.bf16 %v8463_v23, %v8462_v0  ;;  %v8472_v63 = vld [vmem:[#allocation3 + $0xda] sm:$0xff]  ;;  %v8479_v23 = vld [vmem:[#allocation3 + $0x12a] sm:$0xff] }
 0x398   : > { %v17000_v29 = vpack.c.bf16 %v8465_v9, %v8464_v60  ;;  %v17033_v21 = vpack.c.bf16 %v8473_v38, %v8472_v63  ;;  %v8481_v9 = vld [vmem:[#allocation3 + $0x142] sm:$0xff]  ;;  %v8482_v38 = vld [vmem:[#allocation3 + $0x152] sm:$0xff]  ;;  %v4147_v63 = vsel %vm3671_vm0, %v16971_v55, 0  ;;  %v8487_v55 = vld [vmem:[#allocation3 + $0x18a] sm:$0xff] }
 0x399   : > { %v8478_v0 = vld [vmem:[#allocation3 + $0x122] sm:$0xff] }
 0x39e   : > { %13329 = vmatmul.mubr.msk.bf16.gmra.mrb[40].mxu0 %vm3339_vm1, %v16906_v52  ;;  %13893 = vmatmul.mubr.msk.bf16.gmra.mrb[12].mxu1 %vm3339_vm1, %v8213_v61  ;;  %v17011_v52 = vld [vmem:[%s18440_s5 + $0x26] sm:$0x3] }
 0x39f   : > { %13332 = vmatprep.mubr.msk.bf16.mxu0 %vm3339_vm1, %v16923_v47  ;;  %13898 = vmatprep.mubr.msk.bf16.mxu1 %vm3339_vm1, %v16989_v22  ;;  %v8467_v47 = vld [vmem:[#allocation3 + $0x9a] sm:$0xff] }
 0x3a6   : > { %13333 = vmatmul.mubr.msk.bf16.gmra.mrb[44].mxu0 %vm3339_vm1, %v16925_v26  ;;  %13899 = vmatmul.mubr.msk.bf16.vlgmr.msra.gmra.mrb[16].mxu1 %vm3339_vm1, %v16998_v48  ;;  %v8466_v26 = vld [vmem:[#allocation3 + $0x92] sm:$0xff] }
 0x3a7   : > { %13336 = vmatprep.mubr.msk.bf16.mxu0 %vm3339_vm1, %v16933_v45  ;;  %13902 = vmatprep.mubr.msk.bf16.mxu1 %vm3339_vm1, %v17000_v29  ;;  %v17019_v17 = vpack.c.bf16 %v8467_v47, %v8466_v26  ;;  %v8471_v45 = vld [vmem:[#allocation3 + $0xca] sm:$0xff]  ;;  %v8480_v47 = vld [vmem:[#allocation3 + $0x13a] sm:$0xff] }
 0x3a8   : > { %13931 = vmatpush3.bf16.msra.mxu1 %v8853_v37  ;;  %v17031_v32 = vpack.c.bf16 %v8471_v45, %v8470_v44  ;;  %v17055_v37 = vpack.c.bf16 %v8479_v23, %v8478_v0  ;;  %v17057_v14 = vpack.c.bf16 %v8481_v9, %v8480_v47  ;;  %v8483_v26 = vld [vmem:[#allocation3 + $0x15a] sm:$0xff]  ;;  %v8485_v44 = vld [vmem:[#allocation3 + $0x172] sm:$0xff]  ;;  %v8486_v23 = vld [vmem:[#allocation3 + $0x182] sm:$0xff] }
 0x3a9   : > { %15257 = vmatprep.subr.msk.bf16.mxu1 %vm3671_vm0, %v17011_v52  ;;  %v3529_v45 = vld [vmem:[#allocation3 + $0x38] sm:$0xff]  ;;  %v8505_v9 = vpack.c.bf16 %v8487_v55, %v8486_v23  ;;  %v8765_v23 = vld [vmem:[#allocation3 + $0xcb] sm:$0xff] }
 0x3aa   : > { %v8488_v0 = vld [vmem:[#allocation3 + $0x19a] sm:$0xff]  ;;  %v8490_v47 = vld [vmem:[#allocation3 + $0x1b2] sm:$0xff] }
 0x3ae   : > { %13337 = vmatmul.mubr.msk.bf16.gmra.mrb[48].mxu0 %vm3339_vm1, %v16935_v36  ;;  %13903 = vmatmul.mubr.msk.bf16.gmra.mrb[20].mxu1 %vm3339_vm1, %v17019_v17  ;;  %v8475_v36 = vld [vmem:[#allocation3 + $0xfa] sm:$0xff] }
 0x3af   : > { %13340 = vmatprep.mubr.msk.bf16.mxu0 %vm3339_vm1, %v16943_v50  ;;  %13906 = vmatprep.mubr.msk.bf16.mxu1 %vm3339_vm1, %v17021_v16  ;;  %v8477_v50 = vld [vmem:[#allocation3 + $0x112] sm:$0xff]  ;;  %v17043_v61 = vpack.c.bf16 %v8475_v36, %v8474_v58  ;;  %v17068_v36 = vpack.c.bf16 %v8483_v26, %v8482_v38  ;;  %v8484_v58 = vld [vmem:[#allocation3 + $0x16a] sm:$0xff]  ;;  %v8758_v38 = vld [vmem:[#allocation3 + $0x7b] sm:$0xff] }
 0x3b0   : > { %v17045_v28 = vpack.c.bf16 %v8477_v50, %v8476_v5  ;;  %v17073_v5 = vld [vmem:[%s18440_s5 + $0x6] sm:$0x3]  ;;  %v8754_v26 = vld [vmem:[#allocation3 + $0x4b] sm:$0xff] }
 0x3b6   : > { %13341 = vmatmul.mubr.msk.bf16.gmra.mrb[52].mxu0 %vm3339_vm1, %v16945_v39  ;;  %13907 = vmatmul.mubr.msk.bf16.gmra.mrb[24].mxu1 %vm3339_vm1, %v17031_v32  ;;  %v3524_v39 = vld [vmem:[#allocation3] sm:$0xff] }
 0x3b7   : > { %13344 = vmatprep.mubr.msk.bf16.mxu0 %vm3339_vm1, %v16954_v56  ;;  %13910 = vmatprep.mubr.msk.bf16.mxu1 %vm3339_vm1, %v17033_v21  ;;  %v3525_v56 = vld [vmem:[#allocation3 + $0x8] sm:$0xff] }
 0x3b8   : > { %v3556_v60 = vpack.c.bf16 %v3525_v56, %v3524_v39  ;;  %v17078_v39 = vpack.c.bf16 %v8485_v44, %v8484_v58  ;;  %v8489_v56 = vld [vmem:[#allocation3 + $0x1a2] sm:$0xff]  ;;  %v8763_v58 = vld [vmem:[#allocation3 + $0xb3] sm:$0xff] }
 0x3b9   : > { %v8759_v44 = vld [vmem:[#allocation3 + $0x83] sm:$0xff] }
 0x3be   : > { %13345 = vmatmul.mubr.msk.bf16.gmra.mrb[56].mxu0 %vm3339_vm1, %v16956_v12  ;;  %13911 = vmatmul.mubr.msk.bf16.gmra.mrb[28].mxu1 %vm3339_vm1, %v17043_v61  ;;  %v3526_v12 = vld [vmem:[#allocation3 + $0x18] sm:$0xff] }
 0x3bf   : > { %13348 = vmatprep.mubr.msk.bf16.mxu0 %vm3339_vm1, %v16966_v62  ;;  %13914 = vmatprep.mubr.msk.bf16.mxu1 %vm3339_vm1, %v17045_v28  ;;  %v3527_v62 = vld [vmem:[#allocation3 + $0x20] sm:$0xff] }
 0x3c0   : > { %v3557_v49 = vpack.c.bf16 %v3527_v62, %v3526_v12  ;;  %v8491_v12 = vld [vmem:[#allocation3 + $0x1ba] sm:$0xff] }
 0x3c1   : > { %v8507_v62 = vpack.c.bf16 %v8491_v12, %v8490_v47  ;;  %v8770_v12 = vld [vmem:[#allocation3 + $0x10b] sm:$0xff] }
 0x3c6   : > { %13349 = vmatmul.mubr.msk.bf16.gmra.mrb[60].mxu0 %vm3339_vm1, %v16976_v59  ;;  %13915 = vmatmul.mubr.msk.bf16.gmra.mrb[0].mxu1 %vm3339_vm1, %v17055_v37  ;;  %v3528_v59 = vld [vmem:[#allocation3 + $0x30] sm:$0xff] }
 0x3c7   : > { %13918 = vmatprep.mubr.msk.bf16.mxu1 %vm3339_vm1, %v17057_v14  ;;  %13354 = vmatprep.mubr.msk.bf16.mxu0 %vm3339_vm1, %v3556_v60  ;;  %v3558_v50 = vpack.c.bf16 %v3529_v45, %v3528_v59  ;;  %v8506_v60 = vpack.c.bf16 %v8489_v56, %v8488_v0  ;;  %v17102_v59 = vpack.c.bf16 %v8759_v44, %v8758_v38  ;;  %v8767_v0 = vld [vmem:[#allocation3 + $0xe3] sm:$0xff]  ;;  %v8774_v38 = vld [vmem:[#allocation3 + $0x13b] sm:$0xff] }
 0x3c8   : > { %v8775_v44 = vld [vmem:[#allocation3 + $0x143] sm:$0xff] }
 0x3ce   : > { %13355 = vmatmul.mubr.msk.bf16.vlgmr.msra.gmra.mrb[32].mxu0 %vm3339_vm1, %v3557_v49  ;;  %13919 = vmatmul.mubr.msk.bf16.gmra.mrb[4].mxu1 %vm3339_vm1, %v17068_v36  ;;  %v8755_v49 = vld [vmem:[#allocation3 + $0x53] sm:$0xff] }
 0x3cf   : > { %13387 = vmatpush3.bf16.msra.mxu0 %v4147_v63  ;;  %13358 = vmatprep.mubr.msk.bf16.mxu0 %vm3339_vm1, %v3558_v50  ;;  %v17091_v45 = vpack.c.bf16 %v8755_v49, %v8754_v26  ;;  %v9147_v50 = vsel %vm3671_vm0, %v17011_v52, 0  ;;  %v8761_v52 = vld [vmem:[#allocation3 + $0x9b] sm:$0xff] }
 0x3d0   : > { %13922 = vmatprep.mubr.msk.bf16.mxu1 %vm3339_vm1, %v17078_v39  ;;  %15240 = vmatprep.subr.msk.bf16.mxu0 %vm3671_vm0, %v17073_v5 }
 0x3d6   : > { %13359 = vmatmul.mubr.msk.bf16.gmra.mrb[36].mxu0 %vm3339_vm1, %v16798_v7  ;;  %13923 = vmatmul.mubr.msk.bf16.gmra.mrb[8].mxu1 %vm3339_vm1, %v8505_v9  ;;  %v8756_v7 = vld [vmem:[#allocation3 + $0x63] sm:$0xff]  ;;  %v8766_v9 = vld [vmem:[#allocation3 + $0xdb] sm:$0xff] }
 0x3d7   : > { %13362 = vmatprep.mubr.msk.bf16.mxu0 %vm3339_vm1, %v16807_v33  ;;  %13926 = vmatprep.mubr.msk.bf16.mxu1 %vm3339_vm1, %v8506_v60  ;;  %v8757_v33 = vld [vmem:[#allocation3 + $0x6b] sm:$0xff]  ;;  %v17135_v47 = vpack.c.bf16 %v8767_v0, %v8766_v9  ;;  %v8779_v0 = vld [vmem:[#allocation3 + $0x173] sm:$0xff] }
 0x3d8   : > { %v17100_v63 = vpack.c.bf16 %v8757_v33, %v8756_v7  ;;  %v8772_v7 = vld [vmem:[#allocation3 + $0x123] sm:$0xff]  ;;  %v8773_v33 = vld [vmem:[#allocation3 + $0x12b] sm:$0xff] }
 0x3d9   : > { %v8778_v9 = vld [vmem:[#allocation3 + $0x16b] sm:$0xff] }
 0x3de   : > { %13363 = vmatmul.mubr.msk.bf16.gmra.mrb[40].mxu0 %vm3339_vm1, %v16809_v46  ;;  %13927 = vmatmul.mubr.msk.bf16.gmra.mrb[12].mxu1 %vm3339_vm1, %v8507_v62  ;;  %v17113_v46 = vld [vmem:[%s18440_s5 + $0x28] sm:$0x3] }
 0x3df   : > { %13366 = vmatprep.mubr.msk.bf16.mxu0 %vm3339_vm1, %v16828_v35  ;;  %13932 = vmatprep.mubr.msk.bf16.mxu1 %vm3339_vm1, %v17091_v45  ;;  %v8760_v35 = vld [vmem:[#allocation3 + $0x93] sm:$0xff] }
 0x3e0   : > { %v17121_v55 = vpack.c.bf16 %v8761_v52, %v8760_v35  ;;  %v8771_v62 = vld [vmem:[#allocation3 + $0x113] sm:$0xff]  ;;  %v17157_v35 = vpack.c.bf16 %v8773_v33, %v8772_v7  ;;  %v17159_v52 = vpack.c.bf16 %v8775_v44, %v8774_v38  ;;  %v8782_v7 = vld [vmem:[#allocation3 + $0x19b] sm:$0xff]  ;;  %v8783_v33 = vld [vmem:[#allocation3 + $0x1a3] sm:$0xff] }
 0x3e1   : > { %v17147_v49 = vpack.c.bf16 %v8771_v62, %v8770_v12  ;;  %v17175_v62 = vld [vmem:[%s18440_s5 + $0x8] sm:$0x3]  ;;  %v8800_v44 = vpack.c.bf16 %v8783_v33, %v8782_v7 }
 0x3e6   : > { %13367 = vmatmul.mubr.msk.bf16.gmra.mrb[44].mxu0 %vm3339_vm1, %v16830_v6  ;;  %13933 = vmatmul.mubr.msk.bf16.vlgmr.msra.gmra.mrb[16].mxu1 %vm3339_vm1, %v17100_v63  ;;  %v8762_v6 = vld [vmem:[#allocation3 + $0xab] sm:$0xff] }
 0x3e7   : > { %13370 = vmatprep.mubr.msk.bf16.mxu0 %vm3339_vm1, %v16840_v8  ;;  %13936 = vmatprep.mubr.msk.bf16.mxu1 %vm3339_vm1, %v17102_v59  ;;  %v17123_v56 = vpack.c.bf16 %v8763_v58, %v8762_v6  ;;  %v8764_v8 = vld [vmem:[#allocation3 + $0xc3] sm:$0xff]  ;;  %v8776_v6 = vld [vmem:[#allocation3 + $0x153] sm:$0xff]  ;;  %v8777_v58 = vld [vmem:[#allocation3 + $0x15b] sm:$0xff] }
 0x3e8   : > { %13965 = vmatpush3.bf16.msra.mxu1 %v9147_v50  ;;  %v17133_v60 = vpack.c.bf16 %v8765_v23, %v8764_v8  ;;  %v4053_v23 = vld [vmem:[#allocation3 + $0x3a] sm:$0xff] }
 0x3e9   : > { %15258 = vmatprep.subr.msk.bf16.mxu1 %vm3671_vm0, %v17113_v46 }
 0x3ee   : > { %13371 = vmatmul.mubr.msk.bf16.gmra.mrb[48].mxu0 %vm3339_vm1, %v16842_v24  ;;  %13937 = vmatmul.mubr.msk.bf16.gmra.mrb[20].mxu1 %vm3339_vm1, %v17121_v55  ;;  %v8768_v24 = vld [vmem:[#allocation3 + $0xf3] sm:$0xff] }
 0x3ef   : > { %13374 = vmatprep.mubr.msk.bf16.mxu0 %vm3339_vm1, %v16852_v27  ;;  %13940 = vmatprep.mubr.msk.bf16.mxu1 %vm3339_vm1, %v17123_v56  ;;  %v8769_v27 = vld [vmem:[#allocation3 + $0xfb] sm:$0xff] }
 0x3f0   : > { %v17145_v26 = vpack.c.bf16 %v8769_v27, %v8768_v24  ;;  %v4441_v24 = vsel %vm3671_vm0, %v17073_v5, 0  ;;  %v4052_v27 = vld [vmem:[#allocation3 + $0x32] sm:$0xff]  ;;  %v8780_v5 = vld [vmem:[#allocation3 + $0x183] sm:$0xff] }
 0x3f1   : > { %v4082_v12 = vpack.c.bf16 %v4053_v23, %v4052_v27  ;;  %v9050_v23 = vld [vmem:[#allocation3 + $0x64] sm:$0xff]  ;;  %v9052_v27 = vld [vmem:[#allocation3 + $0x7c] sm:$0xff] }
 0x3f6   : > { %13375 = vmatmul.mubr.msk.bf16.gmra.mrb[52].mxu0 %vm3339_vm1, %v16854_v40  ;;  %13941 = vmatmul.mubr.msk.bf16.gmra.mrb[24].mxu1 %vm3339_vm1, %v17133_v60  ;;  %v4048_v40 = vld [vmem:[#allocation3 + $0x2] sm:$0xff] }
 0x3f7   : > { %13378 = vmatprep.mubr.msk.bf16.mxu0 %vm3339_vm1, %v16864_v34  ;;  %13944 = vmatprep.mubr.msk.bf16.mxu1 %vm3339_vm1, %v17135_v47  ;;  %v4049_v34 = vld [vmem:[#allocation3 + $0xa] sm:$0xff] }
 0x3f8   : > { %v4080_v50 = vpack.c.bf16 %v4049_v34, %v4048_v40  ;;  %v17180_v40 = vpack.c.bf16 %v8779_v0, %v8778_v9  ;;  %v8781_v34 = vld [vmem:[#allocation3 + $0x18b] sm:$0xff] }
 0x3f9   : > { %v8799_v38 = vpack.c.bf16 %v8781_v34, %v8780_v5  ;;  %v9051_v9 = vld [vmem:[#allocation3 + $0x6c] sm:$0xff] }
 0x3fa   : > { %v17210_v34 = vpack.c.bf16 %v9051_v9, %v9050_v23 }
 0x3fe   : > { %13379 = vmatmul.mubr.msk.bf16.gmra.mrb[56].mxu0 %vm3339_vm1, %v16866_v42  ;;  %13945 = vmatmul.mubr.msk.bf16.gmra.mrb[28].mxu1 %vm3339_vm1, %v17145_v26  ;;  %v4050_v42 = vld [vmem:[#allocation3 + $0x1a] sm:$0xff] }
 0x3ff   : > { %13382 = vmatprep.mubr.msk.bf16.mxu0 %vm3339_vm1, %v16876_v53  ;;  %13948 = vmatprep.mubr.msk.bf16.mxu1 %vm3339_vm1, %v17147_v49  ;;  %v4051_v53 = vld [vmem:[#allocation3 + $0x22] sm:$0xff] }
 0x400   : > { %v4081_v8 = vpack.c.bf16 %v4051_v53, %v4050_v42  ;;  %v8785_v42 = vld [vmem:[#allocation3 + $0x1bb] sm:$0xff] }
 0x406   : > { %13383 = vmatmul.mubr.msk.bf16.gmra.mrb[60].mxu0 %vm3339_vm1, %v16886_v13  ;;  %13949 = vmatmul.mubr.msk.bf16.gmra.mrb[0].mxu1 %vm3339_vm1, %v17157_v35  ;;  %v17170_v13 = vpack.c.bf16 %v8777_v58, %v8776_v6  ;;  %v9048_v6 = vld [vmem:[#allocation3 + $0x4c] sm:$0xff]  ;;  %v9049_v58 = vld [vmem:[#allocation3 + $0x54] sm:$0xff] }
 0x407   : > { %13952 = vmatprep.mubr.msk.bf16.mxu1 %vm3339_vm1, %v17159_v52  ;;  %13388 = vmatprep.mubr.msk.bf16.mxu0 %vm3339_vm1, %v4080_v50  ;;  %v8784_v50 = vld [vmem:[#allocation3 + $0x1b3] sm:$0xff] }
 0x408   : > { %v8801_v53 = vpack.c.bf16 %v8785_v42, %v8784_v50  ;;  %v9054_v42 = vld [vmem:[#allocation3 + $0x94] sm:$0xff] }
 0x40e   : > { %13389 = vmatmul.mubr.msk.bf16.vlgmr.msra.gmra.mrb[32].mxu0 %vm3339_vm1, %v4081_v8  ;;  %13953 = vmatmul.mubr.msk.bf16.gmra.mrb[4].mxu1 %vm3339_vm1, %v17170_v13  ;;  %v17193_v8 = vpack.c.bf16 %v9049_v58, %v9048_v6  ;;  %v9056_v58 = vld [vmem:[#allocation3 + $0xac] sm:$0xff] }
 0x40f   : > { %13421 = vmatpush3.bf16.msra.mxu0 %v4441_v24  ;;  %13392 = vmatprep.mubr.msk.bf16.mxu0 %vm3339_vm1, %v4082_v12  ;;  %v9053_v12 = vld [vmem:[#allocation3 + $0x84] sm:$0xff] }
 0x410   : > { %13956 = vmatprep.mubr.msk.bf16.mxu1 %vm3339_vm1, %v17180_v40  ;;  %15241 = vmatprep.subr.msk.bf16.mxu0 %vm3671_vm0, %v17175_v62  ;;  %v17217_v33 = vpack.c.bf16 %v9053_v12, %v9052_v27 }
 0x416   : > { %13393 = vmatmul.mubr.msk.bf16.gmra.mrb[36].mxu0 %vm3339_vm1, %v16989_v22  ;;  %13957 = vmatmul.mubr.msk.bf16.gmra.mrb[8].mxu1 %vm3339_vm1, %v8799_v38  ;;  %v17205_v22 = vld [vmem:[%s18439_s4] ss:$0 sm:$0xff]  ;;  %v9442_v38 = vsel %vm3671_vm0, %v17113_v46, 0  ;;  %v9055_v46 = vld [vmem:[#allocation3 + $0x9c] sm:$0xff] }
 0x417   : > { %13396 = vmatprep.mubr.msk.bf16.mxu0 %vm3339_vm1, %v16998_v48  ;;  %13960 = vmatprep.mubr.msk.bf16.mxu1 %vm3339_vm1, %v8800_v44  ;;  %v17227_v44 = vld [vmem:[%s18440_s5 + $0x2a] sm:$0x3] }
 0x41e   : > { %13397 = vmatmul.mubr.msk.bf16.gmra.mrb[40].mxu0 %vm3339_vm1, %v17000_v29  ;;  %13961 = vmatmul.mubr.msk.bf16.gmra.mrb[12].mxu1 %vm3339_vm1, %v8801_v53 }
 0x41f   : > { %13400 = vmatprep.mubr.msk.bf16.mxu0 %vm3339_vm1, %v17019_v17  ;;  %13966 = vmatprep.mubr.msk.bf16.mxu1 %vm3339_vm1, %v17193_v8 }
 0x421   : > { %v13288_v48 = vpop.f32.mrb[0].mxu0 }
 0x422   : > { %v3309_v0 = vadd.f32 %v13288_v48, %v17205_v22  ;;  %v3141_v24 = vpop.f32.mrb[1].mxu0  ;;  %v9057_v48 = vld [vmem:[#allocation3 + $0xb4] sm:$0xff] }
 0x423   : > { %v13289_v29 = vpop.f32.mrb[2].mxu0  ;;  %v3307_v7 = vadd.f32 %v17205_v22, %v3141_v24 }
 0x424   : > { %v3310_v5 = vadd.f32 %v13289_v29, %v17205_v22  ;;  %v3144_v17 = vpop.f32.mrb[3].mxu0  ;;  %11172 = vrot.lane.b32.xlu0 %v3309_v0, %s15376_s23  ;;  %v17239_v0 = vpack.c.bf16 %v9055_v46, %v9054_v42  ;;  %v17246_v29 = vpack.c.bf16 %v9057_v48, %v9056_v58  ;;  %v9062_v48 = vld [vmem:[#allocation3 + $0xf4] sm:$0xff] }
 0x426   : > { %13401 = vmatmul.mubr.msk.bf16.gmra.mrb[44].mxu0 %vm3339_vm1, %v17021_v16  ;;  %13967 = vmatmul.mubr.msk.bf16.vlgmr.msra.gmra.mrb[16].mxu1 %vm3339_vm1, %v17210_v34  ;;  %v3308_v16 = vadd.f32 %v17205_v22, %v3144_v17 }
 0x427   : > { %11174 = vrot.lane.b32.xlu1 %v3310_v5, %s15376_s23  ;;  %13404 = vmatprep.mubr.msk.bf16.mxu0 %vm3339_vm1, %v17031_v32  ;;  %v9058_v5 = vld [vmem:[#allocation3 + $0xc4] sm:$0xff] }
 0x428   : > { %13970 = vmatprep.mubr.msk.bf16.mxu1 %vm3339_vm1, %v17217_v33  ;;  %11168 = vrot.lane.b32.xlu0 %v3307_v7, %s15376_s23 }
 0x429   : > { %v13292_v50 = vpop.f32.mrb[4].mxu0  ;;  %13999 = vmatpush3.bf16.msra.mxu1 %v9442_v38 }
 0x42a   : > { %v3313_v53 = vadd.f32 %v13292_v50, %v17205_v22  ;;  %v3157_v6 = vpop.f32.mrb[5].mxu0  ;;  %15259 = vmatprep.subr.msk.bf16.mxu1 %vm3671_vm0, %v17227_v44  ;;  %v9061_v50 = vld [vmem:[#allocation3 + $0xe4] sm:$0xff] }
 0x42b   : > { %11170 = vrot.lane.b32.xlu1 %v3308_v16, %s15376_s23  ;;  %v13293_v32 = vpop.f32.mrb[6].mxu0  ;;  %v3311_v24 = vadd.f32 %v17205_v22, %v3157_v6  ;;  %v9060_v16 = vld [vmem:[#allocation3 + $0xdc] sm:$0xff] }
 0x42c   : > { %v3314_v23 = vadd.f32 %v13293_v32, %v17205_v22  ;;  %v3160_v9 = vpop.f32.mrb[7].mxu0  ;;  %11180 = vrot.lane.b32.xlu0 %v3313_v53, %s15376_s23  ;;  %v17266_v6 = vpack.c.bf16 %v9061_v50, %v9060_v16 }
 0x42d   : > { %v3312_v27 = vadd.f32 %v17205_v22, %v3160_v9 }
 0x42e   : > { %13405 = vmatmul.mubr.msk.bf16.gmra.mrb[48].mxu0 %vm3339_vm1, %v17033_v21  ;;  %13971 = vmatmul.mubr.msk.bf16.gmra.mrb[20].mxu1 %vm3339_vm1, %v17239_v0  ;;  %v9059_v21 = vld [vmem:[#allocation3 + $0xcc] sm:$0xff] }
 0x42f   : > { %11182 = vrot.lane.b32.xlu1 %v3314_v23, %s15376_s23  ;;  %13408 = vmatprep.mubr.msk.bf16.mxu0 %vm3339_vm1, %v17043_v61  ;;  %v17259_v46 = vpack.c.bf16 %v9059_v21, %v9058_v5 }
 0x430   : > { %13974 = vmatprep.mubr.msk.bf16.mxu1 %vm3339_vm1, %v17246_v29  ;;  %11176 = vrot.lane.b32.xlu0 %v3311_v24, %s15376_s23 }
 0x431   : > { %v13296_v12 = vpop.f32.mrb[8].mxu0 }
 0x432   : > { %v3317_v17 = vadd.f32 %v13296_v12, %v17205_v22  ;;  %v3173_v7 = vpop.f32.mrb[9].mxu0  ;;  %v9065_v12 = vld [vmem:[#allocation3 + $0x114] sm:$0xff] }
 0x433   : > { %11178 = vrot.lane.b32.xlu1 %v3312_v27, %s15376_s23  ;;  %v13297_v38 = vpop.f32.mrb[10].mxu0  ;;  %v3315_v53 = vadd.f32 %v17205_v22, %v3173_v7  ;;  %v9064_v27 = vld [vmem:[#allocation3 + $0x10c] sm:$0xff] }
 0x434   : > { %v3318_v61 = vadd.f32 %v13297_v38, %v17205_v22  ;;  %v3176_v42 = vpop.f32.mrb[11].mxu0  ;;  %11188 = vrot.lane.b32.xlu0 %v3317_v17, %s15376_s23  ;;  %v17286_v7 = vpack.c.bf16 %v9065_v12, %v9064_v27  ;;  %v9066_v38 = vld [vmem:[#allocation3 + $0x124] sm:$0xff] }
 0x435   : > { %v3316_v32 = vadd.f32 %v17205_v22, %v3176_v42  ;;  %v4343_v42 = vld [vmem:[#allocation3 + $0xb] sm:$0xff] }
 0x436   : > { %13409 = vmatmul.mubr.msk.bf16.gmra.mrb[52].mxu0 %vm3339_vm1, %v17045_v28  ;;  %13975 = vmatmul.mubr.msk.bf16.gmra.mrb[24].mxu1 %vm3339_vm1, %v17259_v46  ;;  %v9063_v28 = vld [vmem:[#allocation3 + $0xfc] sm:$0xff] }
 0x437   : > { %11190 = vrot.lane.b32.xlu1 %v3318_v61, %s15376_s23  ;;  %13412 = vmatprep.mubr.msk.bf16.mxu0 %vm3339_vm1, %v17055_v37  ;;  %v17279_v21 = vpack.c.bf16 %v9063_v28, %v9062_v48  ;;  %v4342_v61 = vld [vmem:[#allocation3 + $0x3] sm:$0xff] }
 0x438   : > { %13978 = vmatprep.mubr.msk.bf16.mxu1 %vm3339_vm1, %v17266_v6  ;;  %11184 = vrot.lane.b32.xlu0 %v3315_v53, %s15376_s23  ;;  %v9069_v48 = vld [vmem:[#allocation3 + $0x144] sm:$0xff] }
 0x439   : > { %v13300_v58 = vpop.f32.mrb[12].mxu0 }
 0x43a   : > { %v3321_v23 = vadd.f32 %v13300_v58, %v17205_v22  ;;  %v3189_v9 = vpop.f32.mrb[13].mxu0  ;;  %v9068_v58 = vld [vmem:[#allocation3 + $0x13c] sm:$0xff] }
 0x43b   : > { %11186 = vrot.lane.b32.xlu1 %v3316_v32, %s15376_s23  ;;  %v13301_v24 = vpop.f32.mrb[14].mxu0  ;;  %v3319_v17 = vadd.f32 %v17205_v22, %v3189_v9  ;;  %v17301_v27 = vpack.c.bf16 %v9069_v48, %v9068_v58  ;;  %v9072_v58 = vld [vmem:[#allocation3 + $0x16c] sm:$0xff]  ;;  %v9073_v48 = vld [vmem:[#allocation3 + $0x174] sm:$0xff] }
 0x43c   : > { %v3322_v37 = vadd.f32 %v13301_v24, %v17205_v22  ;;  %v3192_v5 = vpop.f32.mrb[15].mxu0  ;;  %11196 = vrot.lane.b32.xlu0 %v3321_v23, %s15376_s23  ;;  %v4374_v24 = vpack.c.bf16 %v4343_v42, %v4342_v61  ;;  %v4346_v42 = vld [vmem:[#allocation3 + $0x33] sm:$0xff] }
 0x43d   : > { %v3320_v16 = vadd.f32 %v17205_v22, %v3192_v5  ;;  %v4345_v5 = vld [vmem:[#allocation3 + $0x23] sm:$0xff] }
 0x43e   : > { %13413 = vmatmul.mubr.msk.bf16.gmra.mrb[56].mxu0 %vm3339_vm1, %v17057_v14  ;;  %13979 = vmatmul.mubr.msk.bf16.gmra.mrb[28].mxu1 %vm3339_vm1, %v17279_v21  ;;  %v9067_v14 = vld [vmem:[#allocation3 + $0x12c] sm:$0xff] }
 0x43f   : > { %11198 = vrot.lane.b32.xlu1 %v3322_v37, %s15376_s23  ;;  %13416 = vmatprep.mubr.msk.bf16.mxu0 %vm3339_vm1, %v17068_v36  ;;  %v17299_v9 = vpack.c.bf16 %v9067_v14, %v9066_v38  ;;  %v4344_v37 = vld [vmem:[#allocation3 + $0x1b] sm:$0xff] }
 0x440   : > { %13982 = vmatprep.mubr.msk.bf16.mxu1 %vm3339_vm1, %v17286_v7  ;;  %11192 = vrot.lane.b32.xlu0 %v3319_v17, %s15376_s23  ;;  %v4375_v61 = vpack.c.bf16 %v4345_v5, %v4344_v37  ;;  %v17325_v37 = vpack.c.bf16 %v9073_v48, %v9072_v58  ;;  %v17330_v5 = vld [vmem:[%s18440_s5 + $0xa] sm:$0x3] }
 0x441   : > { %v13304_v50 = vpop.f32.mrb[16].mxu0 }
 0x442   : > { %v3325_v53 = vadd.f32 %v13304_v50, %v17205_v22  ;;  %v3205_v32 = vpop.f32.mrb[17].mxu0  ;;  %v9071_v50 = vld [vmem:[#allocation3 + $0x15c] sm:$0xff] }
 0x443   : > { %11194 = vrot.lane.b32.xlu1 %v3320_v16, %s15376_s23  ;;  %v13305_v36 = vpop.f32.mrb[18].mxu0  ;;  %v3323_v12 = vadd.f32 %v17205_v22, %v3205_v32  ;;  %v9070_v16 = vld [vmem:[#allocation3 + $0x154] sm:$0xff] }
 0x444   : > { %v3326_v28 = vadd.f32 %v13305_v36, %v17205_v22  ;;  %v3208_v23 = vpop.f32.mrb[19].mxu0  ;;  %11204 = vrot.lane.b32.xlu0 %v3325_v53, %s15376_s23  ;;  %v4347_v32 = vld [vmem:[#allocation3 + $0x3b] sm:$0xff] }
 0x445   : > { %v3324_v17 = vadd.f32 %v17205_v22, %v3208_v23  ;;  %v4735_v23 = vsel %vm3671_vm0, %v17175_v62, 0 }
 0x446   : > { %13417 = vmatmul.mubr.msk.bf16.gmra.mrb[60].mxu0 %vm3339_vm1, %v17078_v39  ;;  %13983 = vmatmul.mubr.msk.bf16.gmra.mrb[0].mxu1 %vm3339_vm1, %v17299_v9 }
 0x447   : > { %11206 = vrot.lane.b32.xlu1 %v3326_v28, %s15376_s23  ;;  %13986 = vmatprep.mubr.msk.bf16.mxu1 %vm3339_vm1, %v17301_v27 }
 0x448   : > { %11200 = vrot.lane.b32.xlu0 %v3323_v12, %s15376_s23  ;;  %13422 = vmatprep.mubr.msk.bf16.mxu0 %vm3339_vm1, %v4374_v24  ;;  %v17320_v24 = vpack.c.bf16 %v9071_v50, %v9070_v16  ;;  %v4376_v12 = vpack.c.bf16 %v4347_v32, %v4346_v42  ;;  %v9074_v16 = vld [vmem:[#allocation3 + $0x184] sm:$0xff]  ;;  %v9075_v50 = vld [vmem:[#allocation3 + $0x18c] sm:$0xff]  ;;  %v9076_v42 = vld [vmem:[#allocation3 + $0x19c] sm:$0xff] }
 0x449   : > { %v13308_v38 = vpop.f32.mrb[20].mxu0  ;;  %v9093_v48 = vpack.c.bf16 %v9075_v50, %v9074_v16 }
 0x44a   : > { %v3329_v39 = vadd.f32 %v13308_v38, %v17205_v22  ;;  %v3221_v14 = vpop.f32.mrb[21].mxu0 }
 0x44b   : > { %11202 = vrot.lane.b32.xlu1 %v3324_v17, %s15376_s23  ;;  %v13309_v53 = vpop.f32.mrb[22].mxu0  ;;  %v3327_v17 = vadd.f32 %v17205_v22, %v3221_v14 }
 0x44c   : > { %v3330_v36 = vadd.f32 %v13309_v53, %v17205_v22  ;;  %v3224_v28 = vpop.f32.mrb[23].mxu0  ;;  %11212 = vrot.lane.b32.xlu0 %v3329_v39, %s15376_s23  ;;  %v9077_v53 = vld [vmem:[#allocation3 + $0x1a4] sm:$0xff] }
 0x44d   : > { %v3328_v62 = vadd.f32 %v17205_v22, %v3224_v28 }
 0x44e   : > { %13423 = vmatmul.mubr.msk.bf16.vlgmr.msra.gmra.mrb[32].mxu0 %vm3339_vm1, %v4375_v61  ;;  %13987 = vmatmul.mubr.msk.bf16.gmra.mrb[4].mxu1 %vm3339_vm1, %v17320_v24 }
 0x44f   : > { %13455 = vmatpush3.bf16.msra.mxu0 %v4735_v23  ;;  %11214 = vrot.lane.b32.xlu1 %v3330_v36, %s15376_s23  ;;  %v9094_v36 = vpack.c.bf16 %v9077_v53, %v9076_v42  ;;  %v9078_v23 = vld [vmem:[#allocation3 + $0x1b4] sm:$0xff] }
 0x450   : > { %13426 = vmatprep.mubr.msk.bf16.mxu0 %vm3339_vm1, %v4376_v12  ;;  %13990 = vmatprep.mubr.msk.bf16.mxu1 %vm3339_vm1, %v17325_v37  ;;  %v9079_v12 = vld [vmem:[#allocation3 + $0x1bc] sm:$0xff] }
 0x451   : > { %11208 = vrot.lane.b32.xlu0 %v3327_v17, %s15376_s23  ;;  %v13312_v38 = vpop.f32.mrb[24].mxu0  ;;  %15242 = vmatprep.subr.msk.bf16.mxu0 %vm3671_vm0, %v17330_v5  ;;  %v9095_v16 = vpack.c.bf16 %v9079_v12, %v9078_v23  ;;  %v9350_v12 = vld [vmem:[#allocation3 + $0xb0] sm:$0xff] }
 0x452   : > { %v3333_v39 = vadd.f32 %v13312_v38, %v17205_v22  ;;  %v3237_v14 = vpop.f32.mrb[25].mxu0 }
 0x453   : > { %11210 = vrot.lane.b32.xlu1 %v3328_v62, %s15376_s23  ;;  %v13313_v61 = vpop.f32.mrb[26].mxu0  ;;  %v3331_v28 = vadd.f32 %v17205_v22, %v3237_v14 }
 0x454   : > { %v3334_v32 = vadd.f32 %v13313_v61, %v17205_v22  ;;  %v3240_v58 = vpop.f32.mrb[27].mxu0  ;;  %v9343_v61 = vld [vmem:[#allocation3 + $0x60] sm:$0xff] }
 0x455   : > { %11220 = vrot.lane.b32.xlu0 %v3333_v39, %s15376_s23  ;;  %v3332_v17 = vadd.f32 %v17205_v22, %v3240_v58  ;;  %v9344_v39 = vld [vmem:[#allocation3 + $0x68] sm:$0xff]  ;;  %v9346_v58 = vld [vmem:[#allocation3 + $0x80] sm:$0xff] }
 0x456   : > { %13427 = vmatmul.mubr.msk.bf16.gmra.mrb[36].mxu0 %vm3339_vm1, %v17091_v45  ;;  %13991 = vmatmul.mubr.msk.bf16.gmra.mrb[8].mxu1 %vm3339_vm1, %v9093_v48  ;;  %v17362_v42 = vpack.c.bf16 %v9344_v39, %v9343_v61  ;;  %v9345_v48 = vld [vmem:[#allocation3 + $0x78] sm:$0xff]  ;;  %v9355_v39 = vld [vmem:[#allocation3 + $0xf0] sm:$0xff] }
 0x457   : > { %11222 = vrot.lane.b32.xlu1 %v3334_v32, %s15376_s23  ;;  %13430 = vmatprep.mubr.msk.bf16.mxu0 %vm3339_vm1, %v17100_v63 }
 0x458   : > { %13994 = vmatprep.mubr.msk.bf16.mxu1 %vm3339_vm1, %v9094_v36  ;;  %v17373_v36 = vpack.c.bf16 %v9346_v58, %v9345_v48  ;;  %v9362_v58 = vld [vmem:[#allocation3 + $0x140] sm:$0xff]  ;;  %v9361_v48 = vld [vmem:[#allocation3 + $0x138] sm:$0xff] }
 0x459   : > { %11216 = vrot.lane.b32.xlu0 %v3331_v28, %s15376_s23  ;;  %v13316_v62 = vpop.f32.mrb[28].mxu0  ;;  %v9347_v28 = vld [vmem:[#allocation3 + $0x90] sm:$0xff] }
 0x45a   : > { %v3337_v45 = vadd.f32 %v13316_v62, %v17205_v22  ;;  %v3253_v38 = vpop.f32.mrb[29].mxu0  ;;  %v9351_v62 = vld [vmem:[#allocation3 + $0xc0] sm:$0xff] }
 0x45b   : > { %11218 = vrot.lane.b32.xlu1 %v3332_v17, %s15376_s23  ;;  %v13317_v50 = vpop.f32.mrb[30].mxu0  ;;  %v3335_v53 = vadd.f32 %v17205_v22, %v3253_v38  ;;  %v9356_v38 = vld [vmem:[#allocation3 + $0xf8] sm:$0xff] }
 0x45c   : > { %v3338_v14 = vadd.f32 %v13317_v50, %v17205_v22  ;;  %v3256_v63 = vpop.f32.mrb[31].mxu0 }
 0x45d   : > { %11228 = vrot.lane.b32.xlu0 %v3337_v45, %s15376_s23  ;;  %v3336_v32 = vadd.f32 %v17205_v22, %v3256_v63  ;;  %v17386_v22 = vld [vmem:[%s18440_s5 + $0x2c] sm:$0x3]  ;;  %v9357_v63 = vld [vmem:[#allocation3 + $0x108] sm:$0xff] }
 0x45e   : > { %13431 = vmatmul.mubr.msk.bf16.gmra.mrb[40].mxu0 %vm3339_vm1, %v17102_v59  ;;  %13995 = vmatmul.mubr.msk.bf16.gmra.mrb[12].mxu1 %vm3339_vm1, %v9095_v16  ;;  %v9348_v59 = vld [vmem:[#allocation3 + $0x98] sm:$0xff] }
 0x45f   : > { %11230 = vrot.lane.b32.xlu1 %v3338_v14, %s15376_s23  ;;  %13434 = vmatprep.mubr.msk.bf16.mxu0 %vm3339_vm1, %v17121_v55  ;;  %v17375_v23 = vpack.c.bf16 %v9348_v59, %v9347_v28  ;;  %v9736_v55 = vsel %vm3671_vm0, %v17227_v44, 0  ;;  %v9349_v44 = vld [vmem:[#allocation3 + $0xa8] sm:$0xff]  ;;  %v9353_v16 = vld [vmem:[#allocation3 + $0xd8] sm:$0xff]  ;;  %v17408_v14 = vpack.c.bf16 %v9356_v38, %v9355_v39 }
 0x460   : > { %14000 = vmatprep.mubr.msk.bf16.mxu1 %vm3339_vm1, %v17362_v42  ;;  %v17394_v17 = vpack.c.bf16 %v9350_v12, %v9349_v44  ;;  %v9364_v59 = vld [vmem:[#allocation3 + $0x158] sm:$0xff]  ;;  %v9363_v12 = vld [vmem:[#allocation3 + $0x150] sm:$0xff]  ;;  %v9368_v39 = vld [vmem:[#allocation3 + $0x188] sm:$0xff] }
 0x461   : > { %11224 = vrot.lane.b32.xlu0 %v3335_v53, %s15376_s23  ;;  %v9359_v53 = vld [vmem:[#allocation3 + $0x120] sm:$0xff]  ;;  %v9366_v44 = vld [vmem:[#allocation3 + $0x170] sm:$0xff] }
 0x462   : > { %v4641_v38 = vld [vmem:[#allocation3 + $0x3c] sm:$0xff] }
 0x463   : > { %11226 = vrot.lane.b32.xlu1 %v3336_v32, %s15376_s23 }
 0x466   : > { %13435 = vmatmul.mubr.msk.bf16.gmra.mrb[44].mxu0 %vm3339_vm1, %v17123_v56  ;;  %14001 = vmatmul.mubr.msk.bf16.vlgmr.msra.gmra.mrb[16].mxu1 %vm3339_vm1, %v17373_v36  ;;  %v9352_v56 = vld [vmem:[#allocation3 + $0xc8] sm:$0xff] }
 0x467   : > { %13438 = vmatprep.mubr.msk.bf16.mxu0 %vm3339_vm1, %v17133_v60  ;;  %14004 = vmatprep.mubr.msk.bf16.mxu1 %vm3339_vm1, %v17375_v23  ;;  %v17396_v45 = vpack.c.bf16 %v9352_v56, %v9351_v62  ;;  %v9354_v60 = vld [vmem:[#allocation3 + $0xe0] sm:$0xff]  ;;  %v17432_v56 = vpack.c.bf16 %v9364_v59, %v9363_v12  ;;  %v9369_v59 = vld [vmem:[#allocation3 + $0x198] sm:$0xff]  ;;  %v9373_v12 = vld [vmem:[#allocation3 + $0x1c8] sm:$0xff] }
 0x468   : > { %14033 = vmatpush3.bf16.msra.mxu1 %v9736_v55  ;;  %v17406_v50 = vpack.c.bf16 %v9354_v60, %v9353_v16  ;;  %v17430_v55 = vpack.c.bf16 %v9362_v58, %v9361_v48  ;;  %v4640_v60 = vld [vmem:[#allocation3 + $0x34] sm:$0xff]  ;;  %v9365_v16 = vld [vmem:[#allocation3 + $0x168] sm:$0xff]  ;;  %v9370_v58 = vld [vmem:[#allocation3 + $0x1a0] sm:$0xff] }
 0x469   : > { %15260 = vmatprep.subr.msk.bf16.mxu1 %vm3671_vm0, %v17386_v22 }
 0x46e   : > { %13439 = vmatmul.mubr.msk.bf16.gmra.mrb[48].mxu0 %vm3339_vm1, %v17135_v47  ;;  %14005 = vmatmul.mubr.msk.bf16.gmra.mrb[20].mxu1 %vm3339_vm1, %v17394_v17  ;;  %v9358_v47 = vld [vmem:[#allocation3 + $0x110] sm:$0xff] }
 0x46f   : > { %13442 = vmatprep.mubr.msk.bf16.mxu0 %vm3339_vm1, %v17145_v26  ;;  %14008 = vmatprep.mubr.msk.bf16.mxu1 %vm3339_vm1, %v17396_v45  ;;  %v9360_v26 = vld [vmem:[#allocation3 + $0x128] sm:$0xff]  ;;  %v17418_v61 = vpack.c.bf16 %v9358_v47, %v9357_v63  ;;  %v5030_v47 = vsel %vm3671_vm0, %v17330_v5, 0  ;;  %v9367_v63 = vld [vmem:[#allocation3 + $0x180] sm:$0xff]  ;;  %v9371_v5 = vld [vmem:[#allocation3 + $0x1b0] sm:$0xff] }
 0x470   : > { %v17420_v32 = vpack.c.bf16 %v9360_v26, %v9359_v53  ;;  %v4670_v26 = vpack.c.bf16 %v4641_v38, %v4640_v60  ;;  %v17448_v53 = vld [vmem:[%s18440_s5 + $0xc] sm:$0x3] }
 0x471   : > { %v9639_v38 = vld [vmem:[#allocation3 + $0x79] sm:$0xff] }
 0x476   : > { %13443 = vmatmul.mubr.msk.bf16.gmra.mrb[52].mxu0 %vm3339_vm1, %v17147_v49  ;;  %14009 = vmatmul.mubr.msk.bf16.gmra.mrb[24].mxu1 %vm3339_vm1, %v17406_v50  ;;  %v4636_v49 = vld [vmem:[#allocation3 + $0x4] sm:$0xff] }
 0x477   : > { %13446 = vmatprep.mubr.msk.bf16.mxu0 %vm3339_vm1, %v17157_v35  ;;  %14012 = vmatprep.mubr.msk.bf16.mxu1 %vm3339_vm1, %v17408_v14  ;;  %v4637_v35 = vld [vmem:[#allocation3 + $0xc] sm:$0xff] }
 0x478   : > { %v4668_v28 = vpack.c.bf16 %v4637_v35, %v4636_v49  ;;  %v17453_v49 = vpack.c.bf16 %v9368_v39, %v9367_v63  ;;  %v9372_v35 = vld [vmem:[#allocation3 + $0x1b8] sm:$0xff] }
 0x479   : > { %v9389_v48 = vpack.c.bf16 %v9372_v35, %v9371_v5  ;;  %v9641_v39 = vld [vmem:[#allocation3 + $0x91] sm:$0xff]  ;;  %v9645_v5 = vld [vmem:[#allocation3 + $0xc1] sm:$0xff] }
 0x47e   : > { %13447 = vmatmul.mubr.msk.bf16.gmra.mrb[56].mxu0 %vm3339_vm1, %v17159_v52  ;;  %14013 = vmatmul.mubr.msk.bf16.gmra.mrb[28].mxu1 %vm3339_vm1, %v17418_v61  ;;  %v4638_v52 = vld [vmem:[#allocation3 + $0x1c] sm:$0xff] }
 0x47f   : > { %13450 = vmatprep.mubr.msk.bf16.mxu0 %vm3339_vm1, %v17170_v13  ;;  %14016 = vmatprep.mubr.msk.bf16.mxu1 %vm3339_vm1, %v17420_v32  ;;  %v4639_v13 = vld [vmem:[#allocation3 + $0x24] sm:$0xff] }
 0x480   : > { %v4669_v62 = vpack.c.bf16 %v4639_v13, %v4638_v52  ;;  %v9374_v52 = vld [vmem:[#allocation3 + $0x1d0] sm:$0xff] }
 0x481   : > { %v9390_v13 = vpack.c.bf16 %v9374_v52, %v9373_v12  ;;  %v9651_v52 = vld [vmem:[#allocation3 + $0x109] sm:$0xff] }
 0x486   : > { %13451 = vmatmul.mubr.msk.bf16.gmra.mrb[60].mxu0 %vm3339_vm1, %v17180_v40  ;;  %14017 = vmatmul.mubr.msk.bf16.gmra.mrb[0].mxu1 %vm3339_vm1, %v17430_v55  ;;  %v17443_v40 = vpack.c.bf16 %v9366_v44, %v9365_v16  ;;  %v9638_v44 = vld [vmem:[#allocation3 + $0x69] sm:$0xff] }
 0x487   : > { %14020 = vmatprep.mubr.msk.bf16.mxu1 %vm3339_vm1, %v17432_v56  ;;  %13456 = vmatprep.mubr.msk.bf16.mxu0 %vm3339_vm1, %v4668_v28  ;;  %v9388_v28 = vpack.c.bf16 %v9370_v58, %v9369_v59  ;;  %v9650_v58 = vld [vmem:[#allocation3 + $0xf9] sm:$0xff] }
 0x488   : > { %v9647_v59 = vld [vmem:[#allocation3 + $0xd9] sm:$0xff] }
 0x48e   : > { %13457 = vmatmul.mubr.msk.bf16.vlgmr.msra.gmra.mrb[32].mxu0 %vm3339_vm1, %v4669_v62  ;;  %14021 = vmatmul.mubr.msk.bf16.gmra.mrb[4].mxu1 %vm3339_vm1, %v17443_v40  ;;  %v9637_v62 = vld [vmem:[#allocation3 + $0x61] sm:$0xff] }
 0x48f   : > { %13489 = vmatpush3.bf16.msra.mxu0 %v5030_v47  ;;  %13460 = vmatprep.mubr.msk.bf16.mxu0 %vm3339_vm1, %v4670_v26  ;;  %v17466_v60 = vpack.c.bf16 %v9638_v44, %v9637_v62  ;;  %v10030_v26 = vsel %vm3671_vm0, %v17386_v22, 0  ;;  %v9643_v22 = vld [vmem:[#allocation3 + $0xa9] sm:$0xff]  ;;  %v9653_v44 = vld [vmem:[#allocation3 + $0x121] sm:$0xff] }
 0x490   : > { %14024 = vmatprep.mubr.msk.bf16.mxu1 %vm3339_vm1, %v17453_v49  ;;  %15243 = vmatprep.subr.msk.bf16.mxu0 %vm3671_vm0, %v17448_v53 }
 0x496   : > { %13461 = vmatmul.mubr.msk.bf16.gmra.mrb[36].mxu0 %vm3339_vm1, %v17193_v8  ;;  %14025 = vmatmul.mubr.msk.bf16.gmra.mrb[8].mxu1 %vm3339_vm1, %v9388_v28  ;;  %v9640_v8 = vld [vmem:[#allocation3 + $0x81] sm:$0xff]  ;;  %v9649_v28 = vld [vmem:[#allocation3 + $0xf1] sm:$0xff] }
 0x497   : > { %13464 = vmatprep.mubr.msk.bf16.mxu0 %vm3339_vm1, %v17210_v34  ;;  %14028 = vmatprep.mubr.msk.bf16.mxu1 %vm3339_vm1, %v9389_v48  ;;  %v9642_v34 = vld [vmem:[#allocation3 + $0x99] sm:$0xff]  ;;  %v17475_v16 = vpack.c.bf16 %v9640_v8, %v9639_v38  ;;  %v17510_v12 = vpack.c.bf16 %v9650_v58, %v9649_v28  ;;  %v9656_v8 = vld [vmem:[#allocation3 + $0x141] sm:$0xff]  ;;  %v9662_v58 = vld [vmem:[#allocation3 + $0x189] sm:$0xff]  ;;  %v5324_v28 = vsel %vm3671_vm0, %v17448_v53, 0 }
 0x498   : > { %v17477_v47 = vpack.c.bf16 %v9642_v34, %v9641_v39  ;;  %v9658_v34 = vld [vmem:[#allocation3 + $0x159] sm:$0xff] }
 0x499   : > { %v9655_v38 = vld [vmem:[#allocation3 + $0x139] sm:$0xff] }
 0x49a   : > { %v9666_v53 = vld [vmem:[#allocation3 + $0x1b9] sm:$0xff] }
 0x49e   : > { %13465 = vmatmul.mubr.msk.bf16.gmra.mrb[40].mxu0 %vm3339_vm1, %v17217_v33  ;;  %14029 = vmatmul.mubr.msk.bf16.gmra.mrb[12].mxu1 %vm3339_vm1, %v9390_v13  ;;  %v17488_v33 = vld [vmem:[%s18440_s5 + $0x2e] sm:$0x3] }
 0x49f   : > { %13468 = vmatprep.mubr.msk.bf16.mxu0 %vm3339_vm1, %v17239_v0  ;;  %14034 = vmatprep.mubr.msk.bf16.mxu1 %vm3339_vm1, %v17466_v60  ;;  %v9644_v0 = vld [vmem:[#allocation3 + $0xb1] sm:$0xff] }
 0x4a0   : > { %v17496_v63 = vpack.c.bf16 %v9644_v0, %v9643_v22  ;;  %v9657_v0 = vld [vmem:[#allocation3 + $0x151] sm:$0xff] }
 0x4a1   : > { %v4936_v22 = vld [vmem:[#allocation3 + $0x50] sm:$0xff] }
 0x4a6   : > { %13469 = vmatmul.mubr.msk.bf16.gmra.mrb[44].mxu0 %vm3339_vm1, %v17246_v29  ;;  %14035 = vmatmul.mubr.msk.bf16.vlgmr.msra.gmra.mrb[16].mxu1 %vm3339_vm1, %v17475_v16  ;;  %v9646_v29 = vld [vmem:[#allocation3 + $0xc9] sm:$0xff] }
 0x4a7   : > { %13472 = vmatprep.mubr.msk.bf16.mxu0 %vm3339_vm1, %v17259_v46  ;;  %14038 = vmatprep.mubr.msk.bf16.mxu1 %vm3339_vm1, %v17477_v47  ;;  %v17498_v35 = vpack.c.bf16 %v9646_v29, %v9645_v5  ;;  %v9648_v46 = vld [vmem:[#allocation3 + $0xe1] sm:$0xff]  ;;  %v17534_v29 = vpack.c.bf16 %v9658_v34, %v9657_v0  ;;  %v4933_v5 = vld [vmem:[#allocation3 + $0x30] sm:$0xff]  ;;  %v9663_v34 = vld [vmem:[#allocation3 + $0x199] sm:$0xff] }
 0x4a8   : > { %14067 = vmatpush3.bf16.msra.mxu1 %v10030_v26  ;;  %v17508_v48 = vpack.c.bf16 %v9648_v46, %v9647_v59  ;;  %v17532_v26 = vpack.c.bf16 %v9656_v8, %v9655_v38  ;;  %v9659_v46 = vld [vmem:[#allocation3 + $0x169] sm:$0xff]  ;;  %v9664_v8 = vld [vmem:[#allocation3 + $0x1a1] sm:$0xff] }
 0x4a9   : > { %15261 = vmatprep.subr.msk.bf16.mxu1 %vm3671_vm0, %v17488_v33  ;;  %v9667_v0 = vld [vmem:[#allocation3 + $0x1c9] sm:$0xff] }
 0x4ae   : > { %13473 = vmatmul.mubr.msk.bf16.gmra.mrb[48].mxu0 %vm3339_vm1, %v17266_v6  ;;  %14039 = vmatmul.mubr.msk.bf16.gmra.mrb[20].mxu1 %vm3339_vm1, %v17496_v63  ;;  %v9652_v6 = vld [vmem:[#allocation3 + $0x111] sm:$0xff] }
 0x4af   : > { %13476 = vmatprep.mubr.msk.bf16.mxu0 %vm3339_vm1, %v17279_v21  ;;  %14042 = vmatprep.mubr.msk.bf16.mxu1 %vm3339_vm1, %v17498_v35  ;;  %v9654_v21 = vld [vmem:[#allocation3 + $0x129] sm:$0xff]  ;;  %v17520_v13 = vpack.c.bf16 %v9652_v6, %v9651_v52  ;;  %v9661_v52 = vld [vmem:[#allocation3 + $0x181] sm:$0xff] }
 0x4b0   : > { %v17522_v62 = vpack.c.bf16 %v9654_v21, %v9653_v44  ;;  %v17550_v44 = vpack.c.bf16 %v9662_v58, %v9661_v52  ;;  %v9933_v58 = vld [vmem:[#allocation3 + $0x7a] sm:$0xff] }
 0x4b6   : > { %13477 = vmatmul.mubr.msk.bf16.gmra.mrb[52].mxu0 %vm3339_vm1, %v17286_v7  ;;  %14043 = vmatmul.mubr.msk.bf16.gmra.mrb[24].mxu1 %vm3339_vm1, %v17508_v48  ;;  %v4931_v7 = vld [vmem:[#allocation3 + $0x18] sm:$0xff] }
 0x4b7   : > { %13480 = vmatprep.mubr.msk.bf16.mxu0 %vm3339_vm1, %v17299_v9  ;;  %14046 = vmatprep.mubr.msk.bf16.mxu1 %vm3339_vm1, %v17510_v12  ;;  %v4932_v9 = vld [vmem:[#allocation3 + $0x20] sm:$0xff] }
 0x4b8   : > { %v4963_v39 = vpack.c.bf16 %v4932_v9, %v4931_v7  ;;  %v9665_v7 = vld [vmem:[#allocation3 + $0x1b1] sm:$0xff]  ;;  %v15311_v9 = vld [vmem:[%s18440_s5 + $0xe] sm:$0x3] }
 0x4b9   : > { %v9683_v38 = vpack.c.bf16 %v9666_v53, %v9665_v7  ;;  %v9939_v7 = vld [vmem:[#allocation3 + $0xc2] sm:$0xff] }
 0x4be   : > { %13481 = vmatmul.mubr.msk.bf16.gmra.mrb[56].mxu0 %vm3339_vm1, %v17301_v27  ;;  %14047 = vmatmul.mubr.msk.bf16.gmra.mrb[28].mxu1 %vm3339_vm1, %v17520_v13  ;;  %v4934_v27 = vld [vmem:[#allocation3 + $0x38] sm:$0xff] }
 0x4bf   : > { %13484 = vmatprep.mubr.msk.bf16.mxu0 %vm3339_vm1, %v17320_v24  ;;  %14050 = vmatprep.mubr.msk.bf16.mxu1 %vm3339_vm1, %v17522_v62  ;;  %v9660_v24 = vld [vmem:[#allocation3 + $0x171] sm:$0xff]  ;;  %v4964_v59 = vpack.c.bf16 %v4934_v27, %v4933_v5  ;;  %v9931_v5 = vld [vmem:[#allocation3 + $0x62] sm:$0xff] }
 0x4c0   : > { %v17545_v6 = vpack.c.bf16 %v9660_v24, %v9659_v46  ;;  %v9668_v27 = vld [vmem:[#allocation3 + $0x1d1] sm:$0xff] }
 0x4c1   : > { %v9684_v24 = vpack.c.bf16 %v9668_v27, %v9667_v0  ;;  %v9945_v0 = vld [vmem:[#allocation3 + $0x10a] sm:$0xff] }
 0x4c6   : > { %13485 = vmatmul.mubr.msk.bf16.gmra.mrb[60].mxu0 %vm3339_vm1, %v17325_v37  ;;  %14051 = vmatmul.mubr.msk.bf16.gmra.mrb[0].mxu1 %vm3339_vm1, %v17532_v26  ;;  %v4935_v37 = vld [vmem:[#allocation3 + $0x48] sm:$0xff] }
 0x4c7   : > { %14054 = vmatprep.mubr.msk.bf16.mxu1 %vm3339_vm1, %v17534_v29  ;;  %13490 = vmatprep.mubr.msk.bf16.mxu0 %vm3339_vm1, %v4963_v39  ;;  %v4965_v21 = vpack.c.bf16 %v4936_v22, %v4935_v37  ;;  %v9682_v39 = vpack.c.bf16 %v9664_v8, %v9663_v34  ;;  %v9932_v22 = vld [vmem:[#allocation3 + $0x6a] sm:$0xff]  ;;  %v9941_v8 = vld [vmem:[#allocation3 + $0xda] sm:$0xff] }
 0x4c8   : > { %v17565_v46 = vpack.c.bf16 %v9932_v22, %v9931_v5  ;;  %v9950_v5 = vld [vmem:[#allocation3 + $0x142] sm:$0xff] }
 0x4ce   : > { %13491 = vmatmul.mubr.msk.bf16.vlgmr.msra.gmra.mrb[32].mxu0 %vm3339_vm1, %v4964_v59  ;;  %14055 = vmatmul.mubr.msk.bf16.gmra.mrb[4].mxu1 %vm3339_vm1, %v17545_v6 }
 0x4cf   : > { %13523 = vmatpush3.bf16.msra.mxu0 %v5324_v28  ;;  %13494 = vmatprep.mubr.msk.bf16.mxu0 %vm3339_vm1, %v4965_v21  ;;  %v9935_v28 = vld [vmem:[#allocation3 + $0x92] sm:$0xff]  ;;  %v10324_v21 = vsel %vm3671_vm0, %v17488_v33, 0  ;;  %v9937_v33 = vld [vmem:[#allocation3 + $0xaa] sm:$0xff] }
 0x4d0   : > { %14058 = vmatprep.mubr.msk.bf16.mxu1 %vm3339_vm1, %v17550_v44  ;;  %15244 = vmatprep.subr.msk.bf16.mxu0 %vm3671_vm0, %v15311_v9  ;;  %v9944_v9 = vld [vmem:[#allocation3 + $0xfa] sm:$0xff] }
 0x4d6   : > { %13495 = vmatmul.mubr.msk.bf16.gmra.mrb[36].mxu0 %vm3339_vm1, %v17362_v42  ;;  %14059 = vmatmul.mubr.msk.bf16.gmra.mrb[8].mxu1 %vm3339_vm1, %v9682_v39  ;;  %v9934_v42 = vld [vmem:[#allocation3 + $0x82] sm:$0xff] }
 0x4d7   : > { %13498 = vmatprep.mubr.msk.bf16.mxu0 %vm3339_vm1, %v17373_v36  ;;  %14062 = vmatprep.mubr.msk.bf16.mxu1 %vm3339_vm1, %v9683_v38  ;;  %v9936_v36 = vld [vmem:[#allocation3 + $0x9a] sm:$0xff]  ;;  %v17574_v59 = vpack.c.bf16 %v9934_v42, %v9933_v58  ;;  %v9943_v38 = vld [vmem:[#allocation3 + $0xf2] sm:$0xff] }
 0x4d8   : > { %v17576_v37 = vpack.c.bf16 %v9936_v36, %v9935_v28  ;;  %v9969_v39 = vpack.c.bf16 %v9944_v9, %v9943_v38  ;;  %v9952_v42 = vld [vmem:[#allocation3 + $0x15a] sm:$0xff] }
 0x4d9   : > { %v9949_v36 = vld [vmem:[#allocation3 + $0x13a] sm:$0xff] }
 0x4da   : > { %v9972_v28 = vpack.c.bf16 %v9950_v5, %v9949_v36  ;;  %v10226_v36 = vld [vmem:[#allocation3 + $0x6b] sm:$0xff] }
 0x4de   : > { %13499 = vmatmul.mubr.msk.bf16.gmra.mrb[40].mxu0 %vm3339_vm1, %v17375_v23  ;;  %14063 = vmatmul.mubr.msk.bf16.gmra.mrb[12].mxu1 %vm3339_vm1, %v9684_v24  ;;  %v17587_v23 = vld [vmem:[%s18440_s5 + $0x30] sm:$0x3]  ;;  %v9947_v24 = vld [vmem:[#allocation3 + $0x122] sm:$0xff] }
 0x4df   : > { %13502 = vmatprep.mubr.msk.bf16.mxu0 %vm3339_vm1, %v17394_v17  ;;  %14068 = vmatprep.mubr.msk.bf16.mxu1 %vm3339_vm1, %v17565_v46  ;;  %v9938_v17 = vld [vmem:[#allocation3 + $0xb2] sm:$0xff] }
 0x4e0   : > { %v17595_v52 = vpack.c.bf16 %v9938_v17, %v9937_v33  ;;  %v5227_v33 = vld [vmem:[#allocation3 + $0x31] sm:$0xff] }
 0x4e6   : > { %13503 = vmatmul.mubr.msk.bf16.gmra.mrb[44].mxu0 %vm3339_vm1, %v17396_v45  ;;  %14069 = vmatmul.mubr.msk.bf16.vlgmr.msra.gmra.mrb[16].mxu1 %vm3339_vm1, %v17574_v59  ;;  %v9940_v45 = vld [vmem:[#allocation3 + $0xca] sm:$0xff] }
 0x4e7   : > { %13506 = vmatprep.mubr.msk.bf16.mxu0 %vm3339_vm1, %v17406_v50  ;;  %14072 = vmatprep.mubr.msk.bf16.mxu1 %vm3339_vm1, %v17576_v37  ;;  %v17597_v53 = vpack.c.bf16 %v9940_v45, %v9939_v7  ;;  %v9942_v50 = vld [vmem:[#allocation3 + $0xe2] sm:$0xff]  ;;  %v5230_v45 = vld [vmem:[#allocation3 + $0x51] sm:$0xff] }
 0x4e8   : > { %14101 = vmatpush3.bf16.msra.mxu1 %v10324_v21  ;;  %v9968_v34 = vpack.c.bf16 %v9942_v50, %v9941_v8  ;;  %v9951_v21 = vld [vmem:[#allocation3 + $0x152] sm:$0xff]  ;;  %v9953_v7 = vld [vmem:[#allocation3 + $0x16a] sm:$0xff] }
 0x4e9   : > { %15262 = vmatprep.subr.msk.bf16.mxu1 %vm3671_vm0, %v17587_v23  ;;  %v9973_v17 = vpack.c.bf16 %v9952_v42, %v9951_v21  ;;  %v9956_v50 = vld [vmem:[#allocation3 + $0x18a] sm:$0xff]  ;;  %v10230_v21 = vld [vmem:[#allocation3 + $0x9b] sm:$0xff] }
 0x4ea   : > { %v10225_v42 = vld [vmem:[#allocation3 + $0x63] sm:$0xff] }
 0x4ee   : > { %13507 = vmatmul.mubr.msk.bf16.gmra.mrb[48].mxu0 %vm3339_vm1, %v17408_v14  ;;  %14073 = vmatmul.mubr.msk.bf16.gmra.mrb[20].mxu1 %vm3339_vm1, %v17595_v52  ;;  %v9946_v14 = vld [vmem:[#allocation3 + $0x112] sm:$0xff] }
 0x4ef   : > { %13510 = vmatprep.mubr.msk.bf16.mxu0 %vm3339_vm1, %v17418_v61  ;;  %14076 = vmatprep.mubr.msk.bf16.mxu1 %vm3339_vm1, %v17597_v53  ;;  %v9948_v61 = vld [vmem:[#allocation3 + $0x12a] sm:$0xff]  ;;  %v9970_v27 = vpack.c.bf16 %v9946_v14, %v9945_v0  ;;  %v9960_v0 = vld [vmem:[#allocation3 + $0x1ba] sm:$0xff] }
 0x4f0   : > { %v9971_v22 = vpack.c.bf16 %v9948_v61, %v9947_v24  ;;  %v9959_v61 = vld [vmem:[#allocation3 + $0x1b2] sm:$0xff]  ;;  %v9957_v24 = vld [vmem:[#allocation3 + $0x19a] sm:$0xff] }
 0x4f6   : > { %13511 = vmatmul.mubr.msk.bf16.gmra.mrb[52].mxu0 %vm3339_vm1, %v17420_v32  ;;  %14077 = vmatmul.mubr.msk.bf16.gmra.mrb[24].mxu1 %vm3339_vm1, %v9968_v34  ;;  %v5225_v32 = vld [vmem:[#allocation3 + $0x19] sm:$0xff]  ;;  %v5229_v34 = vld [vmem:[#allocation3 + $0x49] sm:$0xff] }
 0x4f7   : > { %13514 = vmatprep.mubr.msk.bf16.mxu0 %vm3339_vm1, %v17430_v55  ;;  %14080 = vmatprep.mubr.msk.bf16.mxu1 %vm3339_vm1, %v9969_v39  ;;  %v5226_v55 = vld [vmem:[#allocation3 + $0x21] sm:$0xff]  ;;  %v5259_v38 = vpack.c.bf16 %v5230_v45, %v5229_v34 }
 0x4f8   : > { %v5257_v58 = vpack.c.bf16 %v5226_v55, %v5225_v32  ;;  %v9955_v39 = vld [vmem:[#allocation3 + $0x182] sm:$0xff]  ;;  %v9962_v55 = vld [vmem:[#allocation3 + $0x1d2] sm:$0xff] }
 0x4f9   : > { %v9975_v14 = vpack.c.bf16 %v9956_v50, %v9955_v39  ;;  %v10233_v45 = vld [vmem:[#allocation3 + $0xc3] sm:$0xff]  ;;  %v10242_v39 = vld [vmem:[#allocation3 + $0x12b] sm:$0xff] }
 0x4fe   : > { %13515 = vmatmul.mubr.msk.bf16.gmra.mrb[56].mxu0 %vm3339_vm1, %v17432_v56  ;;  %14081 = vmatmul.mubr.msk.bf16.gmra.mrb[28].mxu1 %vm3339_vm1, %v9970_v27  ;;  %v5228_v56 = vld [vmem:[#allocation3 + $0x39] sm:$0xff]  ;;  %v9958_v27 = vld [vmem:[#allocation3 + $0x1a2] sm:$0xff] }
 0x4ff   : > { %13518 = vmatprep.mubr.msk.bf16.mxu0 %vm3339_vm1, %v17443_v40  ;;  %14084 = vmatprep.mubr.msk.bf16.mxu1 %vm3339_vm1, %v9971_v22  ;;  %v9954_v40 = vld [vmem:[#allocation3 + $0x172] sm:$0xff]  ;;  %v5258_v9 = vpack.c.bf16 %v5228_v56, %v5227_v33  ;;  %v9977_v22 = vpack.c.bf16 %v9960_v0, %v9959_v61  ;;  %v9976_v32 = vpack.c.bf16 %v9958_v27, %v9957_v24  ;;  %v10243_v0 = vld [vmem:[#allocation3 + $0x13b] sm:$0xff]  ;;  %v10244_v27 = vld [vmem:[#allocation3 + $0x143] sm:$0xff] }
 0x500   : > { %v9974_v8 = vpack.c.bf16 %v9954_v40, %v9953_v7  ;;  %v10618_v40 = vsel %vm3671_vm0, %v17587_v23, 0  ;;  %v10234_v33 = vld [vmem:[#allocation3 + $0xcb] sm:$0xff]  ;;  %v10237_v23 = vld [vmem:[#allocation3 + $0xf3] sm:$0xff] }
 0x501   : > { %v10261_v50 = vpack.c.bf16 %v10234_v33, %v10233_v45  ;;  %v10245_v24 = vld [vmem:[#allocation3 + $0x153] sm:$0xff]  ;;  %v10252_v45 = vld [vmem:[#allocation3 + $0x1a3] sm:$0xff] }
 0x506   : > { %13519 = vmatmul.mubr.msk.bf16.gmra.mrb[60].mxu0 %vm3339_vm1, %v17453_v49  ;;  %14085 = vmatmul.mubr.msk.bf16.gmra.mrb[0].mxu1 %vm3339_vm1, %v9972_v28  ;;  %v17627_v49 = vld [vmem:[%s18442_s7] sm:$0xf] }
 0x507   : > { %14088 = vmatprep.mubr.msk.bf16.mxu1 %vm3339_vm1, %v9973_v17  ;;  %13524 = vmatprep.mubr.msk.bf16.mxu0 %vm3339_vm1, %v5257_v58  ;;  %v10257_v58 = vpack.c.bf16 %v10226_v36, %v10225_v42  ;;  %v10229_v28 = vld [vmem:[#allocation3 + $0x93] sm:$0xff] }
 0x508   : > { %v10259_v56 = vpack.c.bf16 %v10230_v21, %v10229_v28  ;;  %v5524_v42 = vld [vmem:[#allocation3 + $0x52] sm:$0xff]  ;;  %v10973_v21 = vsel %vm864_vm2, %v17627_v49, 0 }
 0x509   : > { %v5521_v36 = vld [vmem:[#allocation3 + $0x32] sm:$0xff] }
 0x50e   : > { %13525 = vmatmul.mubr.msk.bf16.vlgmr.msra.gmra.mrb[32].mxu0 %vm3339_vm1, %v5258_v9  ;;  %14089 = vmatmul.mubr.msk.bf16.gmra.mrb[4].mxu1 %vm3339_vm1, %v9974_v8  ;;  %v10238_v9 = vld [vmem:[#allocation3 + $0xfb] sm:$0xff] }
 0x50f   : > { %13557 = vmatpush3.bf16.msra.mxu0 %v15640_v11  ;;  %13528 = vmatprep.mubr.msk.bf16.mxu0 %vm3339_vm1, %v5259_v38  ;;  %v9961_v11 = vld [vmem:[#allocation3 + $0x1ca] sm:$0xff]  ;;  %v10263_v34 = vpack.c.bf16 %v10238_v9, %v10237_v23 }
 0x510   : > { %14092 = vmatprep.mubr.msk.bf16.mxu1 %vm3339_vm1, %v9975_v14  ;;  %15263 = vmatprep.subr.msk.bf16.mxu0 %vm864_vm2, %v17627_v49  ;;  %v9978_v5 = vpack.c.bf16 %v9962_v55, %v9961_v11  ;;  %v10241_v38 = vld [vmem:[#allocation3 + $0x123] sm:$0xff]  ;;  %v10266_v11 = vpack.c.bf16 %v10244_v27, %v10243_v0  ;;  %v10255_v49 = vld [vmem:[#allocation3 + $0x1cb] sm:$0xff] }
 0x511   : > { %v10265_v61 = vpack.c.bf16 %v10242_v39, %v10241_v38  ;;  %v10520_v23 = vld [vmem:[#allocation3 + $0x6c] sm:$0xff]  ;;  %v10893_v38 = vpop.permute.xlu0 %10892  ;;  %v10527_v39 = vld [vmem:[#allocation3 + $0xc4] sm:$0xff] }
 0x512   : > { %v10530_v27 = vld [vmem:[#allocation3 + $0xe4] sm:$0xff] }
 0x515   : > { %v10897_v0 = vpop.permute.xlu0 %10896 }
 0x516   : > { %13529 = vmatmul.mubr.msk.bf16.gmra.mrb[36].mxu0 %vm3339_vm1, %v17466_v60  ;;  %14093 = vmatmul.mubr.msk.bf16.gmra.mrb[8].mxu1 %vm3339_vm1, %v9976_v32  ;;  %v10227_v60 = vld [vmem:[#allocation3 + $0x7b] sm:$0xff] }
 0x517   : > { %13532 = vmatprep.mubr.msk.bf16.mxu0 %vm3339_vm1, %v17475_v16  ;;  %14096 = vmatprep.mubr.msk.bf16.mxu1 %vm3339_vm1, %v9977_v22  ;;  %v10228_v16 = vld [vmem:[#allocation3 + $0x83] sm:$0xff]  ;;  %v10246_v22 = vld [vmem:[#allocation3 + $0x15b] sm:$0xff] }
 0x518   : > { %v10258_v17 = vpack.c.bf16 %v10228_v16, %v10227_v60  ;;  %v10267_v55 = vpack.c.bf16 %v10246_v22, %v10245_v24  ;;  %v10250_v60 = vld [vmem:[#allocation3 + $0x18b] sm:$0xff]  ;;  %v10531_v24 = vld [vmem:[#allocation3 + $0xf4] sm:$0xff]  ;;  %v10532_v22 = vld [vmem:[#allocation3 + $0xfc] sm:$0xff] }
 0x51e   : > { %13533 = vmatmul.mubr.msk.bf16.gmra.mrb[40].mxu0 %vm3339_vm1, %v17477_v47  ;;  %14097 = vmatmul.mubr.msk.bf16.gmra.mrb[12].mxu1 %vm3339_vm1, %v9978_v5  ;;  %v10231_v47 = vld [vmem:[#allocation3 + $0xab] sm:$0xff]  ;;  %v10248_v5 = vld [vmem:[#allocation3 + $0x173] sm:$0xff] }
 0x51f   : > { %13536 = vmatprep.mubr.msk.bf16.mxu0 %vm3339_vm1, %v17496_v63  ;;  %14102 = vmatprep.mubr.msk.bf16.mxu1 %vm3339_vm1, %v10257_v58  ;;  %v10232_v63 = vld [vmem:[#allocation3 + $0xb3] sm:$0xff]  ;;  %v10249_v58 = vld [vmem:[#allocation3 + $0x183] sm:$0xff] }
 0x520   : > { %v10260_v7 = vpack.c.bf16 %v10232_v63, %v10231_v47  ;;  %v10254_v47 = vld [vmem:[#allocation3 + $0x1bb] sm:$0xff] }
 0x521   : > { %v10251_v63 = vld [vmem:[#allocation3 + $0x19b] sm:$0xff] }
 0x526   : > { %13537 = vmatmul.mubr.msk.bf16.gmra.mrb[44].mxu0 %vm3339_vm1, %v17498_v35  ;;  %14103 = vmatmul.mubr.msk.bf16.vlgmr.msra.gmra.mrb[16].mxu1 %vm3339_vm1, %v10258_v17  ;;  %v10235_v35 = vld [vmem:[#allocation3 + $0xdb] sm:$0xff]  ;;  %v5523_v17 = vld [vmem:[#allocation3 + $0x4a] sm:$0xff] }
 0x527   : > { %13540 = vmatprep.mubr.msk.bf16.mxu0 %vm3339_vm1, %v17508_v48  ;;  %14106 = vmatprep.mubr.msk.bf16.mxu1 %vm3339_vm1, %v10259_v56  ;;  %v10236_v48 = vld [vmem:[#allocation3 + $0xe3] sm:$0xff]  ;;  %v10269_v56 = vpack.c.bf16 %v10250_v60, %v10249_v58 }
 0x528   : > { %14135 = vmatpush3.bf16.msra.mxu1 %v10618_v40  ;;  %v10262_v8 = vpack.c.bf16 %v10236_v48, %v10235_v35  ;;  %v10253_v40 = vld [vmem:[#allocation3 + $0x1b3] sm:$0xff]  ;;  %v10519_v48 = vld [vmem:[#allocation3 + $0x64] sm:$0xff] }
 0x529   : > { %v10271_v33 = vpack.c.bf16 %v10254_v47, %v10253_v40  ;;  %v10551_v9 = vpack.c.bf16 %v10520_v23, %v10519_v48 }
 0x52e   : > { %13541 = vmatmul.mubr.msk.bf16.gmra.mrb[48].mxu0 %vm3339_vm1, %v17510_v12  ;;  %14107 = vmatmul.mubr.msk.bf16.gmra.mrb[20].mxu1 %vm3339_vm1, %v10260_v7  ;;  %v10239_v12 = vld [vmem:[#allocation3 + $0x10b] sm:$0xff]  ;;  %v10270_v7 = vpack.c.bf16 %v10252_v45, %v10251_v63 }
 0x52f   : > { %13544 = vmatprep.mubr.msk.bf16.mxu0 %vm3339_vm1, %v17520_v13  ;;  %14110 = vmatprep.mubr.msk.bf16.mxu1 %vm3339_vm1, %v10261_v50  ;;  %v10240_v13 = vld [vmem:[#allocation3 + $0x113] sm:$0xff] }
 0x530   : > { %v10264_v14 = vpack.c.bf16 %v10240_v13, %v10239_v12  ;;  %v10256_v50 = vld [vmem:[#allocation3 + $0x1d3] sm:$0xff] }
 0x531   : > { %v10272_v35 = vpack.c.bf16 %v10256_v50, %v10255_v49  ;;  %v10543_v49 = vld [vmem:[#allocation3 + $0x184] sm:$0xff]  ;;  %v10544_v50 = vld [vmem:[#allocation3 + $0x18c] sm:$0xff] }
 0x532   : > { %v10563_v23 = vpack.c.bf16 %v10544_v50, %v10543_v49 }
 0x536   : > { %13545 = vmatmul.mubr.msk.bf16.gmra.mrb[52].mxu0 %vm3339_vm1, %v17522_v62  ;;  %14111 = vmatmul.mubr.msk.bf16.gmra.mrb[24].mxu1 %vm3339_vm1, %v10262_v8  ;;  %v5519_v62 = vld [vmem:[#allocation3 + $0x1a] sm:$0xff] }
 0x537   : > { %13548 = vmatprep.mubr.msk.bf16.mxu0 %vm3339_vm1, %v17532_v26  ;;  %14114 = vmatprep.mubr.msk.bf16.mxu1 %vm3339_vm1, %v10263_v34  ;;  %v5520_v26 = vld [vmem:[#allocation3 + $0x22] sm:$0xff]  ;;  %v10523_v8 = vld [vmem:[#allocation3 + $0x94] sm:$0xff] }
 0x538   : > { %v5551_v32 = vpack.c.bf16 %v5520_v26, %v5519_v62  ;;  %v10524_v34 = vld [vmem:[#allocation3 + $0x9c] sm:$0xff]  ;;  %v10895_v62 = vpop.permute.xlu1 %10894 }
 0x539   : > { %v10553_v13 = vpack.c.bf16 %v10524_v34, %v10523_v8  ;;  %v10545_v8 = vld [vmem:[#allocation3 + $0x19c] sm:$0xff]  ;;  %v10546_v34 = vld [vmem:[#allocation3 + $0x1a4] sm:$0xff] }
 0x53e   : > { %13549 = vmatmul.mubr.msk.bf16.gmra.mrb[56].mxu0 %vm3339_vm1, %v17534_v29  ;;  %14115 = vmatmul.mubr.msk.bf16.gmra.mrb[28].mxu1 %vm3339_vm1, %v10264_v14  ;;  %v5522_v29 = vld [vmem:[#allocation3 + $0x3a] sm:$0xff]  ;;  %v10528_v14 = vld [vmem:[#allocation3 + $0xcc] sm:$0xff] }
 0x53f   : > { %13552 = vmatprep.mubr.msk.bf16.mxu0 %vm3339_vm1, %v17545_v6  ;;  %14118 = vmatprep.mubr.msk.bf16.mxu1 %vm3339_vm1, %v10265_v61  ;;  %v10247_v6 = vld [vmem:[#allocation3 + $0x16b] sm:$0xff]  ;;  %v5552_v16 = vpack.c.bf16 %v5522_v29, %v5521_v36  ;;  %v10555_v26 = vpack.c.bf16 %v10528_v14, %v10527_v39  ;;  %v10901_v29 = vpop.permute.xlu0 %10900  ;;  %v10550_v39 = vld [vmem:[#allocation3 + $0x1d4] sm:$0xff] }
 0x540   : > { %v10268_v28 = vpack.c.bf16 %v10248_v5, %v10247_v6  ;;  %v10533_v6 = vld [vmem:[#allocation3 + $0x10c] sm:$0xff]  ;;  %v10534_v5 = vld [vmem:[#allocation3 + $0x114] sm:$0xff] }
 0x541   : > { %v10536_v36 = vld [vmem:[#allocation3 + $0x12c] sm:$0xff]  ;;  %v10558_v58 = vpack.c.bf16 %v10534_v5, %v10533_v6 }
 0x546   : > { %13553 = vmatmul.mubr.msk.bf16.gmra.mrb[60].mxu0 %vm3339_vm1, %v17550_v44  ;;  %14119 = vmatmul.mubr.msk.bf16.gmra.mrb[0].mxu1 %vm3339_vm1, %v10266_v11  ;;  %v5553_v44 = vpack.c.bf16 %v5524_v42, %v5523_v17  ;;  %v10899_v11 = vpop.permute.xlu1 %10898  ;;  %v10535_v42 = vld [vmem:[#allocation3 + $0x124] sm:$0xff] }
 0x547   : > { %14122 = vmatprep.mubr.msk.bf16.mxu1 %vm3339_vm1, %v10267_v55  ;;  %13558 = vmatprep.mubr.msk.bf16.mxu0 %vm3339_vm1, %v5551_v32  ;;  %v10557_v55 = vpack.c.bf16 %v10532_v22, %v10531_v24  ;;  %v10538_v17 = vld [vmem:[#allocation3 + $0x144] sm:$0xff] }
 0x54a   : > { %v10903_v60 = vpop.permute.xlu1 %10902 }
 0x54e   : > { %13559 = vmatmul.mubr.msk.bf16.vlgmr.msra.gmra.mrb[32].mxu0 %vm3339_vm1, %v5552_v16  ;;  %14123 = vmatmul.mubr.msk.bf16.gmra.mrb[4].mxu1 %vm3339_vm1, %v10268_v28  ;;  %v10559_v16 = vpack.c.bf16 %v10536_v36, %v10535_v42  ;;  %v10905_v28 = vpop.permute.xlu0 %10904  ;;  %v10907_v47 = vpop.permute.xlu1 %10906 }
 0x54f   : > { %14169 = vmatpush3.bf16.msra.mxu0 %v10973_v21  ;;  %13562 = vmatprep.mubr.msk.bf16.mxu0 %vm3339_vm1, %v5553_v44  ;;  %v10537_v21 = vld [vmem:[#allocation3 + $0x13c] sm:$0xff]  ;;  %v10539_v44 = vld [vmem:[#allocation3 + $0x154] sm:$0xff] }
 0x550   : > { %14126 = vmatprep.mubr.msk.bf16.mxu1 %vm3339_vm1, %v10269_v56  ;;  %v10540_v56 = vld [vmem:[#allocation3 + $0x15c] sm:$0xff]  ;;  %v10560_v40 = vpack.c.bf16 %v10538_v17, %v10537_v21 }
 0x551   : > { %v10561_v63 = vpack.c.bf16 %v10540_v56, %v10539_v44 }
 0x552   : > { %v10909_v45 = vpop.permute.xlu0 %10908  ;;  %v10911_v48 = vpop.permute.xlu1 %10910 }
 0x556   : > { %13563 = vmatmul.mubr.msk.bf16.gmra.mrb[36].mxu0 %vm3339_vm1, %v17565_v46  ;;  %14127 = vmatmul.mubr.msk.bf16.gmra.mrb[8].mxu1 %vm3339_vm1, %v10270_v7  ;;  %v10521_v46 = vld [vmem:[#allocation3 + $0x7c] sm:$0xff]  ;;  %v10542_v7 = vld [vmem:[#allocation3 + $0x174] sm:$0xff] }
 0x557   : > { %13566 = vmatprep.mubr.msk.bf16.mxu0 %vm3339_vm1, %v17574_v59  ;;  %14130 = vmatprep.mubr.msk.bf16.mxu1 %vm3339_vm1, %v10271_v33  ;;  %v10522_v59 = vld [vmem:[#allocation3 + $0x84] sm:$0xff]  ;;  %v10541_v33 = vld [vmem:[#allocation3 + $0x16c] sm:$0xff] }
 0x558   : > { %v10552_v12 = vpack.c.bf16 %v10522_v59, %v10521_v46  ;;  %v10547_v46 = vld [vmem:[#allocation3 + $0x1b4] sm:$0xff]  ;;  %v10548_v59 = vld [vmem:[#allocation3 + $0x1bc] sm:$0xff] }
 0x55e   : > { %13567 = vmatmul.mubr.msk.bf16.gmra.mrb[40].mxu0 %vm3339_vm1, %v17576_v37  ;;  %14131 = vmatmul.mubr.msk.bf16.gmra.mrb[12].mxu1 %vm3339_vm1, %v10272_v35  ;;  %v10525_v37 = vld [vmem:[#allocation3 + $0xac] sm:$0xff]  ;;  %v10562_v35 = vpack.c.bf16 %v10542_v7, %v10541_v33 }
 0x55f   : > { %13570 = vmatprep.mubr.msk.bf16.mxu0 %vm3339_vm1, %v17595_v52  ;;  %14136 = vmatprep.mubr.msk.bf16.mxu1 %vm3339_vm1, %v10551_v9  ;;  %v10526_v52 = vld [vmem:[#allocation3 + $0xb4] sm:$0xff]  ;;  %v10913_v9 = vpop.permute.xlu0 %10912 }
 0x560   : > { %v10554_v61 = vpack.c.bf16 %v10526_v52, %v10525_v37  ;;  %v10549_v52 = vld [vmem:[#allocation3 + $0x1cc] sm:$0xff] }
 0x561   : > { %v10566_v14 = vpack.c.bf16 %v10550_v39, %v10549_v52 }
 0x563   : > { %v10917_v37 = vpop.permute.xlu0 %10916 }
 0x566   : > { %13571 = vmatmul.mubr.msk.bf16.gmra.mrb[44].mxu0 %vm3339_vm1, %v17597_v53  ;;  %14137 = vmatmul.mubr.msk.bf16.vlgmr.msra.gmra.mrb[16].mxu1 %vm3339_vm1, %v10552_v12  ;;  %v10529_v53 = vld [vmem:[#allocation3 + $0xdc] sm:$0xff]  ;;  %v10565_v12 = vpack.c.bf16 %v10548_v59, %v10547_v46 }
 0x567   : > { %14140 = vmatprep.mubr.msk.bf16.mxu1 %vm3339_vm1, %v10553_v13  ;;  %14170 = vmatprep.mubr.msk.bf16.mxu0 %vm510_vm3, %v10893_v38  ;;  %v10556_v32 = vpack.c.bf16 %v10530_v27, %v10529_v53  ;;  %v10564_v13 = vpack.c.bf16 %v10546_v34, %v10545_v8  ;;  %v10915_v38 = vpop.permute.xlu1 %10914 }
 0x56e   : > { %14141 = vmatmul.mubr.msk.bf16.gmra.mrb[20].mxu1 %vm3339_vm1, %v10554_v61  ;;  %14171 = vmatmul.mubr.msk.bf16.vlgmr.msra.gmra.mrb[64].mxu0 %vm510_vm3, %v10895_v62  ;;  %v10919_v61 = vpop.permute.xlu1 %10918  ;;  %v10921_v62 = vpop.permute.xlu0 %10920 }
 0x56f   : > { %14144 = vmatprep.mubr.msk.bf16.mxu1 %vm3339_vm1, %v10555_v26  ;;  %14174 = vmatprep.mubr.msk.bf16.mxu0 %vm510_vm3, %v10897_v0 }
 0x572   : > { %v10923_v26 = vpop.permute.xlu1 %10922 }
 0x576   : > { %14145 = vmatmul.mubr.msk.bf16.gmra.mrb[24].mxu1 %vm3339_vm1, %v10556_v32  ;;  %14175 = vmatmul.mubr.msk.bf16.gmra.mrb[68].mxu0 %vm510_vm3, %v10899_v11 }
 0x577   : > { %14148 = vmatprep.mubr.msk.bf16.mxu1 %vm3339_vm1, %v10557_v55  ;;  %14178 = vmatprep.mubr.msk.bf16.mxu0 %vm510_vm3, %v10901_v29 }
 0x57e   : > { %14149 = vmatmul.mubr.msk.bf16.gmra.mrb[28].mxu1 %vm3339_vm1, %v10558_v58  ;;  %14179 = vmatmul.mubr.msk.bf16.gmra.mrb[72].mxu0 %vm510_vm3, %v10903_v60 }
 0x57f   : > { %14152 = vmatprep.mubr.msk.bf16.mxu1 %vm3339_vm1, %v10559_v16  ;;  %14182 = vmatprep.mubr.msk.bf16.mxu0 %vm510_vm3, %v10905_v28 }
 0x586   : > { %14153 = vmatmul.mubr.msk.bf16.gmra.mrb[0].mxu1 %vm3339_vm1, %v10560_v40  ;;  %14183 = vmatmul.mubr.msk.bf16.gmra.mrb[76].mxu0 %vm510_vm3, %v10907_v47 }
 0x587   : > { %14156 = vmatprep.mubr.msk.bf16.mxu1 %vm3339_vm1, %v10561_v63  ;;  %14186 = vmatprep.mubr.msk.bf16.mxu0 %vm510_vm3, %v10909_v45 }
 0x58e   : > { %14157 = vmatmul.mubr.msk.bf16.gmra.mrb[4].mxu1 %vm3339_vm1, %v10562_v35  ;;  %14187 = vmatmul.mubr.msk.bf16.gmra.mrb[80].mxu0 %vm510_vm3, %v10911_v48 }
 0x58f   : > { %14160 = vmatprep.mubr.msk.bf16.mxu1 %vm3339_vm1, %v10563_v23  ;;  %14190 = vmatprep.mubr.msk.bf16.mxu0 %vm510_vm3, %v10913_v9 }
 0x596   : > { %14161 = vmatmul.mubr.msk.bf16.gmra.mrb[8].mxu1 %vm3339_vm1, %v10564_v13  ;;  %14191 = vmatmul.mubr.msk.bf16.gmra.mrb[84].mxu0 %vm510_vm3, %v10915_v38 }
 0x597   : > { %14194 = vmatprep.mubr.msk.bf16.mxu0 %vm510_vm3, %v10917_v37  ;;  %14164 = vmatprep.mubr.msk.bf16.mxu1 %vm3339_vm1, %v10565_v12  ;;  %v17767_v37 = vld [vmem:[%s18443_s8] ss:$0 sm:$0xff] }
 0x59e   : > { %14165 = vmatmul.mubr.msk.bf16.gmra.mrb[12].mxu1 %vm3339_vm1, %v10566_v14  ;;  %14195 = vmatmul.mubr.msk.bf16.gmra.mrb[88].mxu0 %vm510_vm3, %v10919_v61 }
 0x59f   : > { %14198 = vmatprep.mubr.msk.bf16.mxu0 %vm510_vm3, %v10921_v62 }
 0x5a6   : > { %14199 = vmatmul.mubr.msk.bf16.gmra.mrb[92].mxu0 %vm510_vm3, %v10923_v26 }
 0x601   : > { %v17730_v0 = vpop.f32.mrb[48].mxu0 }
 0x602   : > { %v17732_v53 = vpop.f32.mrb[49].mxu0 }
 0x603   : > { %v17734_v27 = vpop.f32.mrb[50].mxu0 }
 0x604   : > { %v17736_v24 = vpop.f32.mrb[51].mxu0 }
 0x609   : > { %v17738_v22 = vpop.f32.mrb[52].mxu0 }
 0x60a   : > { %v17740_v32 = vpop.f32.mrb[53].mxu0 }
 0x60b   : > { %v17742_v11 = vpop.f32.mrb[54].mxu0 }
 0x60c   : > { %v17744_v55 = vpop.f32.mrb[55].mxu0 }
 0x611   : > { %v17746_v29 = vpop.f32.mrb[56].mxu0 }
 0x612   : > { %v17748_v6 = vpop.f32.mrb[57].mxu0 }
 0x613   : > { %v17750_v5 = vpop.f32.mrb[58].mxu0 }
 0x614   : > { %v17752_v42 = vpop.f32.mrb[59].mxu0 }
 0x619   : > { %v17754_v36 = vpop.f32.mrb[60].mxu0 }
 0x61a   : > { %v17756_v58 = vpop.f32.mrb[61].mxu0 }
 0x61b   : > { %v17758_v60 = vpop.f32.mrb[62].mxu0 }
 0x61c   : > { %v17760_v16 = vpop.f32.mrb[63].mxu0 }
 0x621   : > { %v13560_v28 = vpop.f32.mrb[32].mxu0 }
 0x622   : > { %v5654_v21 = vpop.f32.mrb[33].mxu0 }
 0x623   : > { %v13561_v17 = vpop.f32.mrb[34].mxu0 }
 0x624   : > { %v5657_v44 = vpop.f32.mrb[35].mxu0 }
 0x629   : > { %v13564_v56 = vpop.f32.mrb[36].mxu0 }
 0x62a   : > { %v5670_v40 = vpop.f32.mrb[37].mxu0 }
 0x62b   : > { %v13565_v47 = vpop.f32.mrb[38].mxu0 }
 0x62c   : > { %v5673_v63 = vpop.f32.mrb[39].mxu0 }
 0x631   : > { %v13568_v45 = vpop.f32.mrb[40].mxu0 }
 0x632   : > { %v5686_v33 = vpop.f32.mrb[41].mxu0 }
 0x633   : > { %v13569_v7 = vpop.f32.mrb[42].mxu0 }
 0x634   : > { %v5689_v49 = vpop.f32.mrb[43].mxu0 }
 0x639   : > { %v13572_v50 = vpop.f32.mrb[44].mxu0  ;;  %v14138_v35 = vpop.f32.mrb[16].mxu1 }
 0x63a   : > { %v14204_v48 = vadd.f32 %v14138_v35, %v13560_v28  ;;  %v5702_v23 = vpop.f32.mrb[45].mxu0  ;;  %v10654_v9 = vpop.f32.mrb[17].mxu1 }
 0x63b   : > { %v14205_v46 = vadd.f32 %v10654_v9, %v5654_v21  ;;  %v13573_v59 = vpop.f32.mrb[46].mxu0  ;;  %v14139_v8 = vpop.f32.mrb[18].mxu1 }
 0x63c   : > { %v14206_v34 = vadd.f32 %v14139_v8, %v13561_v17  ;;  %v17762_v12 = vpop.f32.mrb[47].mxu0  ;;  %v10657_v13 = vpop.f32.mrb[19].mxu1 }
 0x63d   : > { %v14207_v38 = vadd.f32 %v10657_v13, %v5657_v44 }
 0x641   : > { %v14142_v52 = vpop.f32.mrb[20].mxu1  ;;  %v14172_v39 = vpop.f32.mrb[64].mxu0 }
 0x642   : > { %v17769_v14 = vadd.f32 %v14142_v52, %v13564_v56  ;;  %v11018_v61 = vadd.f32 %v14172_v39, %v17767_v37  ;;  %v10670_v62 = vpop.f32.mrb[21].mxu1  ;;  %v11009_v26 = vpop.f32.mrb[65].mxu0 }
 0x643   : > { %v17772_v28 = vadd.f32 %v10670_v62, %v5670_v40  ;;  %v14143_v21 = vpop.f32.mrb[22].mxu1  ;;  %v14173_v17 = vpop.f32.mrb[66].mxu0  ;;  %v11010_v56 = vadd.f32 %v17767_v37, %v11009_v26  ;;  %v17785_v40 = vld [vmem:[%s18441_s6] ss:$0 sm:$0xff] }
 0x644   : > { %v17774_v35 = vadd.f32 %v14143_v21, %v13565_v47  ;;  %v11021_v44 = vadd.f32 %v14173_v17, %v17767_v37  ;;  %v10673_v9 = vpop.f32.mrb[23].mxu1  ;;  %11428 = vrot.lane.b32.xlu0 %v11018_v61, %s15381_s21  ;;  %v11012_v8 = vpop.f32.mrb[67].mxu0  ;;  %v10822_v61 = vadd.f32 %v14204_v48, %v17785_v40 }
 0x645   : > { %v17778_v13 = vadd.f32 %v10673_v9, %v5673_v63  ;;  %v11013_v47 = vadd.f32 %v17767_v37, %v11012_v8  ;;  %v10823_v9 = vadd.f32 %v14206_v34, %v17785_v40 }
 0x646   : > { %11430 = vrot.lane.b32.xlu1 %v11021_v44, %s15381_s21 }
 0x648   : > { %11424 = vrot.lane.b32.xlu0 %v11010_v56, %s15381_s21 }
 0x649   : > { %v14146_v52 = vpop.f32.mrb[24].mxu1  ;;  %v14176_v39 = vpop.f32.mrb[68].mxu0 }
 0x64a   : > { %v17790_v62 = vadd.f32 %v14146_v52, %v13568_v45  ;;  %v10686_v63 = vpop.f32.mrb[25].mxu1  ;;  %11426 = vrot.lane.b32.xlu1 %v11013_v47, %s15381_s21  ;;  %v11025_v26 = vpop.f32.mrb[69].mxu0  ;;  %v10820_v45 = vadd.f32 %v14205_v46, %v17785_v40  ;;  %v10821_v52 = vadd.f32 %v14207_v38, %v17785_v40 }
 0x64b   : > { %v17793_v21 = vadd.f32 %v10686_v63, %v5686_v33  ;;  %v14147_v17 = vpop.f32.mrb[26].mxu1  ;;  %v14177_v44 = vpop.f32.mrb[70].mxu0  ;;  %v11034_v63 = vadd.f32 %v14176_v39, %v17767_v37  ;;  %v11026_v39 = vadd.f32 %v17767_v37, %v11025_v26 }
 0x64c   : > { %v17796_v57 = vadd.f32 %v14147_v17, %v13569_v7  ;;  %v10689_v8 = vpop.f32.mrb[27].mxu1  ;;  %11300 = vrot.lane.b32.xlu0 %v10822_v61, %s15382_s25  ;;  %v11028_v56 = vpop.f32.mrb[71].mxu0  ;;  %v11037_v43 = vadd.f32 %v14177_v44, %v17767_v37 }
 0x64d   : > { %v17799_v48 = vadd.f32 %v10689_v8, %v5689_v49  ;;  %v17803_v47 = vpop.permute.xlu0 %11172  ;;  %v17805_v33 = vpop.permute.xlu1 %11174 }
 0x64e   : > { %11302 = vrot.lane.b32.xlu1 %v10823_v9, %s15382_s25  ;;  %v10831_v2 = vadd.f32 %v17796_v57, %v17785_v40  ;;  %v10828_v57 = vadd.f32 %v17793_v21, %v17785_v40 }
 0x650   : > { %11296 = vrot.lane.b32.xlu0 %v10820_v45, %s15382_s25 }
 0x651   : > { %v14150_v7 = vpop.f32.mrb[28].mxu1  ;;  %v14180_v34 = vpop.f32.mrb[72].mxu0 }
 0x652   : > { %v17810_v61 = vadd.f32 %v14150_v7, %v13572_v50  ;;  %v10702_v49 = vpop.f32.mrb[29].mxu1  ;;  %11298 = vrot.lane.b32.xlu1 %v10821_v52, %s15382_s25  ;;  %v17813_v46 = vpop.f32.mrb[73].mxu0  ;;  %v11029_v7 = vadd.f32 %v17767_v37, %v11028_v56  ;;  %v10827_v56 = vadd.f32 %v17774_v35, %v17785_v40 }
 0x653   : > { %v17815_v17 = vadd.f32 %v10702_v49, %v5702_v23  ;;  %v14151_v9 = vpop.f32.mrb[30].mxu1  ;;  %v14181_v8 = vpop.f32.mrb[74].mxu0 }
 0x654   : > { %v17818_v38 = vadd.f32 %v14151_v9, %v13573_v59  ;;  %v10705_v45 = vpop.f32.mrb[31].mxu1  ;;  %11436 = vrot.lane.b32.xlu0 %v11034_v63, %s15381_s21  ;;  %v11044_v19 = vpop.f32.mrb[75].mxu0  ;;  %v10826_v63 = vadd.f32 %v17769_v14, %v17785_v40  ;;  %v11053_v20 = vadd.f32 %v14181_v8, %v17767_v37  ;;  %v11042_v8 = vadd.f32 %v17767_v37, %v17813_v46 }
 0x655   : > { %v17822_v50 = vadd.f32 %v10705_v45, %v17762_v12  ;;  %v17826_v52 = vpop.permute.xlu0 %11168  ;;  %v17828_v23 = vpop.permute.xlu1 %11170  ;;  %v10830_v46 = vadd.f32 %v17790_v62, %v17785_v40 }
 0x656   : > { %11438 = vrot.lane.b32.xlu1 %v11037_v43, %s15381_s21 }
 0x658   : > { %11432 = vrot.lane.b32.xlu0 %v11026_v39, %s15381_s21 }
 0x659   : > { %v14154_v59 = vpop.f32.mrb[0].mxu1  ;;  %v17832_v44 = vpop.f32.mrb[76].mxu0 }
 0x65a   : > { %v14220_v12 = vadd.f32 %v14154_v59, %v17730_v0  ;;  %v10718_v49 = vpop.f32.mrb[1].mxu1  ;;  %11434 = vrot.lane.b32.xlu1 %v11029_v7, %s15381_s21  ;;  %v17838_v43 = vpop.f32.mrb[77].mxu0  ;;  %v10824_v59 = vadd.f32 %v17772_v28, %v17785_v40  ;;  %v11050_v28 = vadd.f32 %v14180_v34, %v17767_v37  ;;  %v11066_v21 = vadd.f32 %v17832_v44, %v17767_v37 }
 0x65b   : > { %v14221_v26 = vadd.f32 %v10718_v49, %v17732_v53  ;;  %v14155_v9 = vpop.f32.mrb[2].mxu1  ;;  %v17841_v45 = vpop.f32.mrb[78].mxu0  ;;  %v10825_v49 = vadd.f32 %v17778_v13, %v17785_v40 }
 0x65c   : > { %v17846_v39 = vadd.f32 %v14220_v12, %v17785_v40  ;;  %v14222_v14 = vadd.f32 %v14155_v9, %v17734_v27  ;;  %v10721_v1 = vpop.f32.mrb[3].mxu1  ;;  %11308 = vrot.lane.b32.xlu0 %v10826_v63, %s15382_s25  ;;  %v17850_v0 = vpop.f32.mrb[79].mxu0  ;;  %v11069_v15 = vadd.f32 %v17841_v45, %v17767_v37 }
 0x65d   : > { %v17853_v7 = vadd.f32 %v14221_v26, %v17785_v40  ;;  %v14223_v53 = vadd.f32 %v10721_v1, %v17736_v24  ;;  %v17865_v12 = vpop.permute.xlu0 %11180  ;;  %v17867_v63 = vpop.permute.xlu1 %11182 }
 0x65e   : > { %v17859_v35 = vadd.f32 %v14222_v14, %v17785_v40  ;;  %11310 = vrot.lane.b32.xlu1 %v10827_v56, %s15382_s25 }
 0x65f   : > { %v17863_v27 = vadd.f32 %v14223_v53, %v17785_v40 }
 0x660   : > { %11304 = vrot.lane.b32.xlu0 %v10824_v59, %s15382_s25 }
 0x661   : > { %v14158_v1 = vpop.f32.mrb[4].mxu1  ;;  %v14188_v24 = vpop.f32.mrb[80].mxu0 }
 0x662   : > { %v14224_v26 = vadd.f32 %v14158_v1, %v17738_v22  ;;  %v17875_v9 = vadd.f32 %v14188_v24, %v17767_v37  ;;  %v10734_v56 = vpop.f32.mrb[5].mxu1  ;;  %11306 = vrot.lane.b32.xlu1 %v10825_v49, %s15382_s25  ;;  %v11073_v14 = vpop.f32.mrb[81].mxu0 }
 0x663   : > { %v14225_v53 = vadd.f32 %v10734_v56, %v17740_v32  ;;  %v17880_v18 = vadd.f32 %v17767_v37, %v11073_v14  ;;  %v14159_v13 = vpop.f32.mrb[6].mxu1  ;;  %v14189_v59 = vpop.f32.mrb[82].mxu0 }
 0x664   : > { %v17884_v34 = vadd.f32 %v14224_v26, %v17785_v40  ;;  %v14226_v22 = vadd.f32 %v14159_v13, %v17742_v11  ;;  %v17888_v1 = vadd.f32 %v14189_v59, %v17767_v37  ;;  %v10737_v24 = vpop.f32.mrb[7].mxu1  ;;  %11444 = vrot.lane.b32.xlu0 %v11050_v28, %s15381_s21  ;;  %v11076_v49 = vpop.f32.mrb[83].mxu0 }
 0x665   : > { %v17892_v32 = vadd.f32 %v14225_v53, %v17785_v40  ;;  %v14227_v56 = vadd.f32 %v10737_v24, %v17744_v55  ;;  %v17896_v14 = vadd.f32 %v17767_v37, %v11076_v49  ;;  %v17907_v28 = vpop.permute.xlu0 %11176  ;;  %v17909_v53 = vpop.permute.xlu1 %11178  ;;  %v11045_v55 = vadd.f32 %v17767_v37, %v11044_v19 }
 0x666   : > { %v17901_v11 = vadd.f32 %v14226_v22, %v17785_v40  ;;  %11446 = vrot.lane.b32.xlu1 %v11053_v20, %s15381_s21 }
 0x667   : > { %v17905_v26 = vadd.f32 %v14227_v56, %v17785_v40 }
 0x668   : > { %11440 = vrot.lane.b32.xlu0 %v11042_v8, %s15381_s21 }
 0x669   : > { %v14162_v13 = vpop.f32.mrb[8].mxu1  ;;  %v14192_v59 = vpop.f32.mrb[84].mxu0 }
 0x66a   : > { %v14228_v22 = vadd.f32 %v14162_v13, %v17746_v29  ;;  %v17917_v20 = vadd.f32 %v14192_v59, %v17767_v37  ;;  %v10750_v24 = vpop.f32.mrb[9].mxu1  ;;  %11442 = vrot.lane.b32.xlu1 %v11045_v55, %s15381_s21  ;;  %v11089_v49 = vpop.f32.mrb[85].mxu0 }
 0x66b   : > { %v14229_v56 = vadd.f32 %v10750_v24, %v17748_v6  ;;  %v17922_v19 = vadd.f32 %v17767_v37, %v11089_v49  ;;  %v14163_v8 = vpop.f32.mrb[10].mxu1  ;;  %v14193_v54 = vpop.f32.mrb[86].mxu0 }
 0x66c   : > { %v17927_v62 = vadd.f32 %v14228_v22, %v17785_v40  ;;  %v14230_v29 = vadd.f32 %v14163_v8, %v17750_v5  ;;  %v17931_v13 = vadd.f32 %v14193_v54, %v17767_v37  ;;  %v10753_v55 = vpop.f32.mrb[11].mxu1  ;;  %11316 = vrot.lane.b32.xlu0 %v10830_v46, %s15382_s25  ;;  %v11092_v6 = vpop.f32.mrb[87].mxu0 }
 0x66d   : > { %v17935_v59 = vadd.f32 %v14229_v56, %v17785_v40  ;;  %v14231_v24 = vadd.f32 %v10753_v55, %v17752_v42  ;;  %v17939_v49 = vadd.f32 %v17767_v37, %v11092_v6  ;;  %v17950_v46 = vpop.permute.xlu0 %11188  ;;  %v17952_v22 = vpop.permute.xlu1 %11190  ;;  %v10829_v42 = vadd.f32 %v17799_v48, %v17785_v40 }
 0x66e   : > { %v17944_v5 = vadd.f32 %v14230_v29, %v17785_v40  ;;  %11318 = vrot.lane.b32.xlu1 %v10831_v2, %s15382_s25 }
 0x66f   : > { %v17948_v54 = vadd.f32 %v14231_v24, %v17785_v40 }
 0x670   : > { %11312 = vrot.lane.b32.xlu0 %v10828_v57, %s15382_s25 }
 0x671   : > { %v14166_v56 = vpop.f32.mrb[12].mxu1  ;;  %v14196_v8 = vpop.f32.mrb[88].mxu0 }
 0x672   : > { %v14232_v29 = vadd.f32 %v14166_v56, %v17754_v36  ;;  %v17961_v2 = vadd.f32 %v14196_v8, %v17767_v37  ;;  %v10766_v55 = vpop.f32.mrb[13].mxu1  ;;  %11314 = vrot.lane.b32.xlu1 %v10829_v42, %s15382_s25  ;;  %v11105_v6 = vpop.f32.mrb[89].mxu0 }
 0x673   : > { %v14233_v24 = vadd.f32 %v10766_v55, %v17756_v58  ;;  %v17966_v48 = vadd.f32 %v17767_v37, %v11105_v6  ;;  %v14167_v57 = vpop.f32.mrb[14].mxu1  ;;  %v14197_v10 = vpop.f32.mrb[90].mxu0 }
 0x674   : > { %v17971_v44 = vadd.f32 %v14232_v29, %v17785_v40  ;;  %v14234_v36 = vadd.f32 %v14167_v57, %v17758_v60  ;;  %v17975_v56 = vadd.f32 %v14197_v10, %v17767_v37  ;;  %v10769_v42 = vpop.f32.mrb[15].mxu1  ;;  %11452 = vrot.lane.b32.xlu0 %v11066_v21, %s15381_s21  ;;  %v11108_v58 = vpop.f32.mrb[91].mxu0  ;;  %v11058_v29 = vadd.f32 %v17767_v37, %v17838_v43 }
 0x675   : > { %v17979_v8 = vadd.f32 %v14233_v24, %v17785_v40  ;;  %v14235_v55 = vadd.f32 %v10769_v42, %v17760_v16  ;;  %v11109_v6 = vadd.f32 %v17767_v37, %v11108_v58  ;;  %v17983_v45 = vpop.permute.xlu0 %11184  ;;  %v17994_v21 = vpop.permute.xlu1 %11186  ;;  %v11061_v16 = vadd.f32 %v17767_v37, %v17850_v0 }
 0x676   : > { %v17988_v60 = vadd.f32 %v14234_v36, %v17785_v40  ;;  %11454 = vrot.lane.b32.xlu1 %v11069_v15, %s15381_s21  ;;  %v10834_v57 = vadd.f32 %v17810_v61, %v17785_v40  ;;  %v10835_v0 = vadd.f32 %v17818_v38, %v17785_v40 }
 0x677   : > { %v17992_v10 = vadd.f32 %v14235_v55, %v17785_v40 }
 0x678   : > { %11448 = vrot.lane.b32.xlu0 %v11058_v29, %s15381_s21 }
 0x679   : > { %v14200_v24 = vpop.f32.mrb[92].mxu0  ;;  %v18006_v58 = vpop.permute.xlu0 %11196 }
 0x67a   : > { %v18002_v43 = vadd.f32 %v14200_v24, %v17767_v37  ;;  %11450 = vrot.lane.b32.xlu1 %v11061_v16, %s15381_s21  ;;  %v11121_v15 = vpop.f32.mrb[93].mxu0  ;;  %v18015_v24 = vpop.permute.xlu1 %11198  ;;  %v10832_v16 = vadd.f32 %v17815_v17, %v17785_v40 }
 0x67b   : > { %v11122_v36 = vadd.f32 %v17767_v37, %v11121_v15  ;;  %v14201_v42 = vpop.f32.mrb[94].mxu0  ;;  %v10833_v15 = vadd.f32 %v17822_v50, %v17785_v40 }
 0x67c   : > { %v18011_v55 = vadd.f32 %v14201_v42, %v17767_v37  ;;  %11324 = vrot.lane.b32.xlu0 %v10834_v57, %s15382_s25  ;;  %v11124_v61 = vpop.f32.mrb[95].mxu0 }
 0x67d   : > { %v11125_v29 = vadd.f32 %v17767_v37, %v11124_v61  ;;  %v18023_v38 = vpop.permute.xlu0 %11192 }
 0x67e   : > { %11326 = vrot.lane.b32.xlu1 %v10835_v0, %s15382_s25  ;;  %v18026_v57 = vpop.permute.xlu1 %11194 }
 0x680   : > { %11320 = vrot.lane.b32.xlu0 %v10832_v16, %s15382_s25 }
 0x681   : > { %v18032_v37 = vpop.permute.xlu0 %11204 }
 0x682   : > { %11322 = vrot.lane.b32.xlu1 %v10833_v15, %s15382_s25  ;;  %v18036_v40 = vpop.permute.xlu1 %11206 }
 0x684   : > { %11460 = vrot.lane.b32.xlu0 %v17875_v9, %s15381_s21 }
 0x685   : > { %v18042_v17 = vpop.permute.xlu0 %11200 }
 0x686   : > { %11462 = vrot.lane.b32.xlu1 %v17888_v1, %s15381_s21  ;;  %v18046_v50 = vpop.permute.xlu1 %11202 }
 0x688   : > { %11456 = vrot.lane.b32.xlu0 %v17880_v18, %s15381_s21 }
 0x689   : > { %v18052_v18 = vpop.permute.xlu0 %11212 }
 0x68a   : > { %11458 = vrot.lane.b32.xlu1 %v17896_v14, %s15381_s21  ;;  %v18056_v9 = vpop.permute.xlu1 %11214 }
 0x68c   : > { %11332 = vrot.lane.b32.xlu0 %v17846_v39, %s15382_s25 }
 0x68d   : > { %v18062_v39 = vpop.permute.xlu0 %11208 }
 0x68e   : > { %11334 = vrot.lane.b32.xlu1 %v17859_v35, %s15382_s25 }
 0x690   : > { %11328 = vrot.lane.b32.xlu0 %v17853_v7, %s15382_s25  ;;  %v18066_v7 = vpop.permute.xlu1 %11210 }
 0x691   : > { %v18072_v35 = vpop.permute.xlu0 %11220 }
 0x692   : > { %11330 = vrot.lane.b32.xlu1 %v17863_v27, %s15382_s25 }
 0x694   : > { %11468 = vrot.lane.b32.xlu0 %v17917_v20, %s15381_s21  ;;  %v18076_v27 = vpop.permute.xlu1 %11222 }
 0x695   : > { %v18082_v1 = vpop.permute.xlu0 %11216 }
 0x696   : > { %11470 = vrot.lane.b32.xlu1 %v17931_v13, %s15381_s21 }
 0x698   : > { %11464 = vrot.lane.b32.xlu0 %v17922_v19, %s15381_s21 }
 0x69a   : > { %11466 = vrot.lane.b32.xlu1 %v17939_v49, %s15381_s21 }
 0x69c   : > { %11340 = vrot.lane.b32.xlu0 %v17884_v34, %s15382_s25  ;;  %v18086_v34 = vpop.permute.xlu1 %11218 }
 0x69e   : > { %11342 = vrot.lane.b32.xlu1 %v17901_v11, %s15382_s25 }
 0x6a0   : > { %11336 = vrot.lane.b32.xlu0 %v17892_v32, %s15382_s25  ;;  %v18091_v32 = vpop.permute.xlu0 %11228  ;;  %v18095_v14 = vpop.permute.xlu1 %11230 }
 0x6a2   : > { %11338 = vrot.lane.b32.xlu1 %v17905_v26, %s15382_s25 }
 0x6a4   : > { %11476 = vrot.lane.b32.xlu0 %v17961_v2, %s15381_s21  ;;  %v18101_v11 = vpop.permute.xlu0 %11224  ;;  %v18105_v26 = vpop.permute.xlu1 %11226  ;;  %v18508_v2 = vunpack.c.h.bf16 %v15559_v30 }
 0x6a6   : > { %11478 = vrot.lane.b32.xlu1 %v17975_v56, %s15381_s21 }
 0x6a8   : > { %11472 = vrot.lane.b32.xlu0 %v17966_v48, %s15381_s21  ;;  %v11523_v48 = vsel %vm510_vm3, %v18508_v2, %v17805_v33 }
 0x6aa   : > { %11474 = vrot.lane.b32.xlu1 %v11109_v6, %s15381_s21 }
 0x6ac   : > { %11348 = vrot.lane.b32.xlu0 %v17927_v62, %s15382_s25 }
 0x6ae   : > { %11350 = vrot.lane.b32.xlu1 %v17944_v5, %s15382_s25 }
 0x6b0   : > { %11344 = vrot.lane.b32.xlu0 %v17935_v59, %s15382_s25  ;;  %v18507_v59 = vunpack.c.l.bf16 %v15559_v30  ;;  %v18509_v30 = vunpack.c.l.bf16 %v15505_v4 }
 0x6b2   : > { %11346 = vrot.lane.b32.xlu1 %v17948_v54, %s15382_s25  ;;  %v11522_v49 = vsel %vm510_vm3, %v18507_v59, %v17803_v47  ;;  %v11520_v33 = vsel %vm510_vm3, %v18509_v30, %v17826_v52 }
 0x6b4   : > { %11480 = vrot.lane.b32.xlu0 %v11122_v36, %s15381_s21 }
 0x6b6   : > { %11482 = vrot.lane.b32.xlu1 %v11125_v29, %s15381_s21  ;;  %v11429_v20 = vpop.permute.xlu0 %11428 }
 0x6b8   : > { %v11431_v19 = vpop.permute.xlu1 %11430  ;;  %11356 = vrot.lane.b32.xlu0 %v17971_v44, %s15382_s25 }
 0x6ba   : > { %11358 = vrot.lane.b32.xlu1 %v17988_v60, %s15382_s25  ;;  %v11425_v62 = vpop.permute.xlu0 %11424 }
 0x6bc   : > { %v11427_v13 = vpop.permute.xlu1 %11426  ;;  %11352 = vrot.lane.b32.xlu0 %v17979_v8, %s15382_s25 }
 0x6be   : > { %11354 = vrot.lane.b32.xlu1 %v17992_v10, %s15382_s25  ;;  %v11301_v5 = vpop.permute.xlu0 %11300  ;;  %v18510_v10 = vunpack.c.h.bf16 %v15505_v4  ;;  %v18511_v4 = vunpack.c.l.bf16 %v15666_v31  ;;  %s15316_s25 = sshll.u32 %s15383_s24, 4  ;;  %s15317_s25 = int_to_ptr.vmem [resolvable:$false] %s15316_s25 }
 0x6bf   : > { %v11555_v54 = vsel %vm11552_vm8, %v11522_v49, %v11301_v5  ;;  %s15318_s27 = scalar_lea.vmem %s15317_s25, 8192  ;;  %p15319_p0 = scmp.lt.s32.totalorder %s18386_s14, %s15317_s25 }
 0x6c0   : > { %v11588_v44 = vsel %vm11585_vm9, %v11555_v54, %v11429_v20  ;;  %v11303_v56 = vpop.permute.xlu1 %11302  ;;  %11484 = vrot.lane.b32.xlu0 %v18002_v43, %s15381_s21  ;;  %v11521_v43 = vsel %vm510_vm3, %v18510_v10, %v17828_v23  ;;  %v11526_v23 = vsel %vm510_vm3, %v18511_v4, %v17865_v12  ;;  %v18513_v12 = vunpack.c.l.bf16 %v15544_v25  ;;  %p15320_p1 = scmp.lt.s32.totalorder %s15318_s27, %s15312_s22 }
 0x6c1   : > { %11621 = vst.msk [vmem:[%s18132_s28 + $0x10] sm:$0xff] %vm11618_vm10, %v11588_v44  ;;  %v11556_v47 = vsel %vm11552_vm8, %v11523_v48, %v11303_v56 }
 0x6c2   : > { %v11589_v8 = vsel %vm11585_vm9, %v11556_v47, %v11431_v19  ;;  %11486 = vrot.lane.b32.xlu1 %v18011_v55, %s15381_s21  ;;  %v11297_v6 = vpop.permute.xlu0 %11296  ;;  %v18512_v19 = vunpack.c.h.bf16 %v15666_v31  ;;  %v11524_v5 = vsel %vm510_vm3, %v18513_v12, %v17907_v28  ;;  %v18520_v12 = vunpack.c.h.bf16 %v15502_v3  ;;  %s18393_s21 = scalar_lea.sflag [#allocation5], %s323_s26  ;;  %p15321_p2 = por %p15320_p1, %p15319_p0 }
 0x6c3   : > { %11622 = vst.msk [vmem:[%s18132_s28 + $0x18] sm:$0xff] %vm11618_vm10, %v11589_v8  ;;  %v11553_v60 = vsel %vm11552_vm8, %v11520_v33, %v11297_v6 }
 0x6c4   : > { %v11586_v36 = vsel %vm11585_vm9, %v11553_v60, %v11425_v62  ;;  %v11299_v42 = vpop.permute.xlu1 %11298  ;;  %v11527_v62 = vsel %vm510_vm3, %v18512_v19, %v17867_v63  ;;  %v18514_v63 = vunpack.c.h.bf16 %v15544_v25  ;;  %v18515_v25 = vunpack.c.l.bf16 %v15921_v41  ;;  %p15322_p3 = pnand %p15321_p2, %p15315_p13 }
 0x6c5   : > { %11619 = vst.msk [vmem:[%s18132_s28] sm:$0xff] %vm11618_vm10, %v11586_v36  ;;  %v11554_v52 = vsel %vm11552_vm8, %v11521_v43, %v11299_v42  ;;  %v18516_v43 = vunpack.c.h.bf16 %v15921_v41 }
 0x6c6   : > { %v11587_v0 = vsel %vm11585_vm9, %v11554_v52, %v11427_v13  ;;  %v11437_v55 = vpop.permute.xlu0 %11436  ;;  %v11525_v48 = vsel %vm510_vm3, %v18514_v63, %v17909_v53  ;;  %v11530_v53 = vsel %vm510_vm3, %v18515_v25, %v17950_v46  ;;  %v18517_v46 = vunpack.c.l.bf16 %v15789_v51  ;;  %v18521_v63 = vld [vmem:[#allocation14_spill] sm:$0xff] }
 0x6c7   : > { %11620 = vst.msk [vmem:[%s18132_s28 + $0x8] sm:$0xff] %vm11618_vm10, %v11587_v0  ;;  %v11531_v36 = vsel %vm510_vm3, %v18516_v43, %v17952_v22  ;;  %v18518_v22 = vunpack.c.h.bf16 %v15789_v51  ;;  %v18519_v51 = vunpack.c.l.bf16 %v15502_v3 }
 0x6c8   : > { %v11439_v61 = vpop.permute.xlu1 %11438 }
 0x6ca   : > { %v11433_v29 = vpop.permute.xlu0 %11432 }
 0x6cc   : > { %v11435_v16 = vpop.permute.xlu1 %11434 }
 0x6ce   : > { %v11309_v15 = vpop.permute.xlu0 %11308 }
 0x6cf   : > { %v11559_v20 = vsel %vm11552_vm8, %v11526_v23, %v11309_v15 }
 0x6d0   : > { %v11592_v13 = vsel %vm11585_vm9, %v11559_v20, %v11437_v55  ;;  %v11311_v59 = vpop.permute.xlu1 %11310  ;;  %v11528_v55 = vsel %vm510_vm3, %v18517_v46, %v17983_v45 }
 0x6d1   : > { %11625 = vst.msk [vmem:[%s18132_s28 + $0x30] sm:$0xff] %vm11618_vm10, %v11592_v13  ;;  %v11560_v49 = vsel %vm11552_vm8, %v11527_v62, %v11311_v59 }
 0x6d2   : > { %v11593_v54 = vsel %vm11585_vm9, %v11560_v49, %v11439_v61  ;;  %v11305_v2 = vpop.permute.xlu0 %11304 }
 0x6d3   : > { %11626 = vst.msk [vmem:[%s18132_s28 + $0x38] sm:$0xff] %vm11618_vm10, %v11593_v54  ;;  %v11557_v31 = vsel %vm11552_vm8, %v11524_v5, %v11305_v2  ;;  %v11535_v5 = vsel %vm510_vm3, %v18520_v12, %v18015_v24  ;;  %v18523_v24 = vunpack.c.h.bf16 %v18521_v63 }
 0x6d4   : > { %v11590_v44 = vsel %vm11585_vm9, %v11557_v31, %v11433_v29  ;;  %v11307_v56 = vpop.permute.xlu1 %11306 }
 0x6d5   : > { %11623 = vst.msk [vmem:[%s18132_s28 + $0x20] sm:$0xff] %vm11618_vm10, %v11590_v44  ;;  %v11558_v28 = vsel %vm11552_vm8, %v11525_v48, %v11307_v56 }
 0x6d6   : > { %v11591_v47 = vsel %vm11585_vm9, %v11558_v28, %v11435_v16  ;;  %v11445_v30 = vpop.permute.xlu0 %11444  ;;  %v11529_v16 = vsel %vm510_vm3, %v18518_v22, %v17994_v21  ;;  %v11534_v21 = vsel %vm510_vm3, %v18519_v51, %v18006_v58  ;;  %v18522_v58 = vunpack.c.l.bf16 %v18521_v63  ;;  %v18530_v51 = vld [vmem:[#allocation10_spill] sm:$0xff]  ;;  %v18533_v63 = vld [vmem:[#allocation9_spill] sm:$0xff] }
 0x6d7   : > { %11624 = vst.msk [vmem:[%s18132_s28 + $0x28] sm:$0xff] %vm11618_vm10, %v11591_v47  ;;  %v11533_v28 = vsel %vm510_vm3, %v18523_v24, %v18026_v57  ;;  %v18532_v12 = vunpack.c.h.bf16 %v18530_v51 }
 0x6d8   : > { %v11447_v33 = vpop.permute.xlu1 %11446  ;;  %v11532_v48 = vsel %vm510_vm3, %v18522_v58, %v18023_v38 }
 0x6da   : > { %v11441_v8 = vpop.permute.xlu0 %11440 }
 0x6dc   : > { %v11443_v6 = vpop.permute.xlu1 %11442 }
 0x6de   : > { %v11317_v60 = vpop.permute.xlu0 %11316 }
 0x6df   : > { %v11563_v10 = vsel %vm11552_vm8, %v11530_v53, %v11317_v60  ;;  %v18524_v60 = vld [vmem:[#allocation8_spill] sm:$0xff] }
 0x6e0   : > { %v11596_v42 = vsel %vm11585_vm9, %v11563_v10, %v11445_v30  ;;  %v11319_v52 = vpop.permute.xlu1 %11318  ;;  %v18525_v57 = vunpack.c.l.bf16 %v18524_v60 }
 0x6e1   : > { %11629 = vst.msk [vmem:[%s18132_s28 + $0x50] sm:$0xff] %vm11618_vm10, %v11596_v42  ;;  %v11564_v0 = vsel %vm11552_vm8, %v11531_v36, %v11319_v52  ;;  %v18526_v42 = vunpack.c.h.bf16 %v18524_v60 }
 0x6e2   : > { %v11597_v61 = vsel %vm11585_vm9, %v11564_v0, %v11447_v33  ;;  %v11313_v29 = vpop.permute.xlu0 %11312  ;;  %v11538_v10 = vsel %vm510_vm3, %v18525_v57, %v18032_v37 }
 0x6e3   : > { %11630 = vst.msk [vmem:[%s18132_s28 + $0x58] sm:$0xff] %vm11618_vm10, %v11597_v61  ;;  %v11561_v41 = vsel %vm11552_vm8, %v11528_v55, %v11313_v29  ;;  %v11539_v52 = vsel %vm510_vm3, %v18526_v42, %v18036_v40  ;;  %v18527_v61 = vld [vmem:[#allocation7_spill] sm:$0xff] }
 0x6e4   : > { %v11594_v4 = vsel %vm11585_vm9, %v11561_v41, %v11441_v8  ;;  %v11315_v23 = vpop.permute.xlu1 %11314  ;;  %v18528_v37 = vunpack.c.l.bf16 %v18527_v61 }
 0x6e5   : > { %11627 = vst.msk [vmem:[%s18132_s28 + $0x40] sm:$0xff] %vm11618_vm10, %v11594_v4  ;;  %v11562_v45 = vsel %vm11552_vm8, %v11529_v16, %v11315_v23  ;;  %v18529_v16 = vunpack.c.h.bf16 %v18527_v61 }
 0x6e6   : > { %v11595_v15 = vsel %vm11585_vm9, %v11562_v45, %v11443_v6  ;;  %v11453_v20 = vpop.permute.xlu0 %11452  ;;  %v11536_v29 = vsel %vm510_vm3, %v18528_v37, %v18042_v17 }
 0x6e7   : > { %11628 = vst.msk [vmem:[%s18132_s28 + $0x48] sm:$0xff] %vm11618_vm10, %v11595_v15  ;;  %v11537_v4 = vsel %vm510_vm3, %v18529_v16, %v18046_v50  ;;  %v18531_v50 = vunpack.c.l.bf16 %v18530_v51 }
 0x6e8   : > { %v11455_v19 = vpop.permute.xlu1 %11454 }
 0x6ea   : > { %v11449_v62 = vpop.permute.xlu0 %11448 }
 0x6ec   : > { %v11451_v13 = vpop.permute.xlu1 %11450 }
 0x6ee   : > { %v11325_v59 = vpop.permute.xlu0 %11324 }
 0x6ef   : > { %v11567_v49 = vsel %vm11552_vm8, %v11534_v21, %v11325_v59  ;;  %v11542_v21 = vsel %vm510_vm3, %v18531_v50, %v18052_v18  ;;  %v18534_v18 = vunpack.c.l.bf16 %v18533_v63  ;;  %v18545_v50 = vld [vmem:[#allocation15_spill] sm:$0xff] }
 0x6f0   : > { %v11600_v54 = vsel %vm11585_vm9, %v11567_v49, %v11453_v20  ;;  %v11327_v2 = vpop.permute.xlu1 %11326 }
 0x6f1   : > { %11633 = vst.msk [vmem:[%s18132_s28 + $0x70] sm:$0xff] %vm11618_vm10, %v11600_v54  ;;  %v11568_v31 = vsel %vm11552_vm8, %v11535_v5, %v11327_v2  ;;  %v11543_v5 = vsel %vm510_vm3, %v18532_v12, %v18056_v9  ;;  %v11540_v58 = vsel %vm510_vm3, %v18534_v18, %v18062_v39 }
 0x6f2   : > { %v11601_v44 = vsel %vm11585_vm9, %v11568_v31, %v11455_v19  ;;  %v11321_v56 = vpop.permute.xlu0 %11320 }
 0x6f3   : > { %11634 = vst.msk [vmem:[%s18132_s28 + $0x78] sm:$0xff] %vm11618_vm10, %v11601_v44  ;;  %v11565_v3 = vsel %vm11552_vm8, %v11532_v48, %v11321_v56  ;;  %v18535_v56 = vunpack.c.h.bf16 %v18533_v63 }
 0x6f4   : > { %v11598_v47 = vsel %vm11585_vm9, %v11565_v3, %v11449_v62  ;;  %v11323_v30 = vpop.permute.xlu1 %11322 }
 0x6f5   : > { %11631 = vst.msk [vmem:[%s18132_s28 + $0x60] sm:$0xff] %vm11618_vm10, %v11598_v47  ;;  %v11566_v38 = vsel %vm11552_vm8, %v11533_v28, %v11323_v30  ;;  %v11541_v3 = vsel %vm510_vm3, %v18535_v56, %v18066_v7 }
 0x6f6   : > { %v11599_v33 = vsel %vm11585_vm9, %v11566_v38, %v11451_v13  ;;  %v11461_v8 = vpop.permute.xlu0 %11460 }
 0x6f7   : > { %11632 = vst.msk [vmem:[%s18132_s28 + $0x68] sm:$0xff] %vm11618_vm10, %v11599_v33 }
 0x6f8   : > { %v11463_v6 = vpop.permute.xlu1 %11462 }
 0x6fa   : > { %v11457_v25 = vpop.permute.xlu0 %11456 }
 0x6fc   : > { %v11459_v53 = vpop.permute.xlu1 %11458 }
 0x6fe   : > { %v11333_v43 = vpop.permute.xlu0 %11332 }
 0x6ff   : > { %v11571_v36 = vsel %vm11552_vm8, %v11538_v10, %v11333_v43 }
 0x700   : > { %v11604_v0 = vsel %vm11585_vm9, %v11571_v36, %v11461_v8  ;;  %v11335_v46 = vpop.permute.xlu1 %11334 }
 0x701   : > { %11637 = vst.msk [vmem:[%s18132_s28 + $0x90] sm:$0xff] %vm11618_vm10, %v11604_v0  ;;  %v11572_v55 = vsel %vm11552_vm8, %v11539_v52, %v11335_v46  ;;  %v18539_v52 = vld [vmem:[#allocation11_spill] sm:$0xff] }
 0x702   : > { %v11605_v41 = vsel %vm11585_vm9, %v11572_v55, %v11463_v6  ;;  %v11329_v22 = vpop.permute.xlu0 %11328  ;;  %v18536_v6 = vld [vmem:[#allocation12_spill] sm:$0xff]  ;;  %v18541_v61 = vunpack.c.h.bf16 %v18539_v52 }
 0x703   : > { %11638 = vst.msk [vmem:[%s18132_s28 + $0x98] sm:$0xff] %vm11618_vm10, %v11605_v41  ;;  %v11569_v40 = vsel %vm11552_vm8, %v11536_v29, %v11329_v22  ;;  %v18537_v7 = vunpack.c.l.bf16 %v18536_v6  ;;  %v18538_v57 = vunpack.c.h.bf16 %v18536_v6 }
 0x704   : > { %v11602_v23 = vsel %vm11585_vm9, %v11569_v40, %v11457_v25  ;;  %v11331_v45 = vpop.permute.xlu1 %11330  ;;  %v11545_v37 = vsel %vm510_vm3, %v18541_v61, %v18086_v34  ;;  %v18542_v34 = vld [vmem:[#allocation13_spill] sm:$0xff] }
 0x705   : > { %11635 = vst.msk [vmem:[%s18132_s28 + $0x80] sm:$0xff] %vm11618_vm10, %v11602_v23  ;;  %v11570_v17 = vsel %vm11552_vm8, %v11537_v4, %v11331_v45  ;;  %v11546_v25 = vsel %vm510_vm3, %v18537_v7, %v18072_v35  ;;  %v11547_v10 = vsel %vm510_vm3, %v18538_v57, %v18076_v27  ;;  %v18540_v35 = vunpack.c.l.bf16 %v18539_v52 }
 0x706   : > { %v11603_v15 = vsel %vm11585_vm9, %v11570_v17, %v11459_v53  ;;  %v11469_v20 = vpop.permute.xlu0 %11468  ;;  %v18543_v45 = vunpack.c.l.bf16 %v18542_v34 }
 0x707   : > { %11636 = vst.msk [vmem:[%s18132_s28 + $0x88] sm:$0xff] %vm11618_vm10, %v11603_v15  ;;  %v11544_v0 = vsel %vm510_vm3, %v18540_v35, %v18082_v1 }
 0x708   : > { %v11471_v19 = vpop.permute.xlu1 %11470  ;;  %v11548_v17 = vsel %vm510_vm3, %v18543_v45, %v18101_v11 }
 0x70a   : > { %v11465_v62 = vpop.permute.xlu0 %11464 }
 0x70c   : > { %v11467_v13 = vpop.permute.xlu1 %11466 }
 0x70e   : > { %v11341_v59 = vpop.permute.xlu0 %11340 }
 0x70f   : > { %v11575_v49 = vsel %vm11552_vm8, %v11542_v21, %v11341_v59  ;;  %v18546_v21 = vunpack.c.l.bf16 %v18545_v50 }
 0x710   : > { %v11608_v54 = vsel %vm11585_vm9, %v11575_v49, %v11469_v20  ;;  %v11343_v2 = vpop.permute.xlu1 %11342 }
 0x711   : > { %11641 = vst.msk [vmem:[%s18132_s28 + $0xb0] sm:$0xff] %vm11618_vm10, %v11608_v54  ;;  %v11576_v31 = vsel %vm11552_vm8, %v11543_v5, %v11343_v2  ;;  %v11550_v59 = vsel %vm510_vm3, %v18546_v21, %v18091_v32  ;;  %v18547_v5 = vunpack.c.h.bf16 %v18545_v50 }
 0x712   : > { %v11609_v48 = vsel %vm11585_vm9, %v11576_v31, %v11471_v19  ;;  %v11337_v44 = vpop.permute.xlu0 %11336  ;;  %v18544_v19 = vunpack.c.h.bf16 %v18542_v34 }
 0x713   : > { %11642 = vst.msk [vmem:[%s18132_s28 + $0xb8] sm:$0xff] %vm11618_vm10, %v11609_v48  ;;  %v11573_v9 = vsel %vm11552_vm8, %v11540_v58, %v11337_v44  ;;  %v11551_v54 = vsel %vm510_vm3, %v18547_v5, %v18095_v14 }
 0x714   : > { %v11606_v24 = vsel %vm11585_vm9, %v11573_v9, %v11465_v62  ;;  %v11339_v28 = vpop.permute.xlu1 %11338  ;;  %v11549_v62 = vsel %vm510_vm3, %v18544_v19, %v18105_v26 }
 0x715   : > { %11639 = vst.msk [vmem:[%s18132_s28 + $0xa0] sm:$0xff] %vm11618_vm10, %v11606_v24  ;;  %v11574_v39 = vsel %vm11552_vm8, %v11541_v3, %v11339_v28 }
 0x716   : > { %v11607_v47 = vsel %vm11585_vm9, %v11574_v39, %v11467_v13  ;;  %v11477_v30 = vpop.permute.xlu0 %11476 }
 0x717   : > { %11640 = vst.msk [vmem:[%s18132_s28 + $0xa8] sm:$0xff] %vm11618_vm10, %v11607_v47 }
 0x718   : > { %v11479_v38 = vpop.permute.xlu1 %11478 }
 0x71a   : > { %v11473_v33 = vpop.permute.xlu0 %11472 }
 0x71c   : > { %v11475_v8 = vpop.permute.xlu1 %11474 }
 0x71e   : > { %v11349_v53 = vpop.permute.xlu0 %11348 }
 0x71f   : > { %v11579_v60 = vsel %vm11552_vm8, %v11546_v25, %v11349_v53 }
 0x720   : > { %v11612_v43 = vsel %vm11585_vm9, %v11579_v60, %v11477_v30  ;;  %v11351_v36 = vpop.permute.xlu1 %11350 }
 0x721   : > { %11645 = vst.msk [vmem:[%s18132_s28 + $0xd0] sm:$0xff] %vm11618_vm10, %v11612_v43  ;;  %v11580_v42 = vsel %vm11552_vm8, %v11547_v10, %v11351_v36 }
 0x722   : > { %v11613_v46 = vsel %vm11585_vm9, %v11580_v42, %v11479_v38  ;;  %v11345_v55 = vpop.permute.xlu0 %11344 }
 0x723   : > { %11646 = vst.msk [vmem:[%s18132_s28 + $0xd8] sm:$0xff] %vm11618_vm10, %v11613_v46  ;;  %v11577_v27 = vsel %vm11552_vm8, %v11544_v0, %v11345_v55 }
 0x724   : > { %v11610_v29 = vsel %vm11585_vm9, %v11577_v27, %v11473_v33  ;;  %v11347_v41 = vpop.permute.xlu1 %11346 }
 0x725   : > { %11643 = vst.msk [vmem:[%s18132_s28 + $0xc0] sm:$0xff] %vm11618_vm10, %v11610_v29  ;;  %v11578_v1 = vsel %vm11552_vm8, %v11545_v37, %v11347_v41 }
 0x726   : > { %v11611_v22 = vsel %vm11585_vm9, %v11578_v1, %v11475_v8  ;;  %v11481_v40 = vpop.permute.xlu0 %11480 }
 0x727   : > { %11644 = vst.msk [vmem:[%s18132_s28 + $0xc8] sm:$0xff] %vm11618_vm10, %v11611_v22 }
 0x728   : > { %v11483_v16 = vpop.permute.xlu1 %11482 }
 0x72a   : > { %v11357_v4 = vpop.permute.xlu0 %11356 }
 0x72b   : > { %v11583_v49 = vsel %vm11552_vm8, %v11550_v59, %v11357_v4 }
 0x72c   : > { %v11359_v23 = vpop.permute.xlu1 %11358 }
 0x72d   : > { %v11584_v2 = vsel %vm11552_vm8, %v11551_v54, %v11359_v23 }
 0x72e   : > { %v11353_v15 = vpop.permute.xlu0 %11352 }
 0x72f   : > { %v11581_v20 = vsel %vm11552_vm8, %v11548_v17, %v11353_v15 }
 0x730   : > { %v11614_v13 = vsel %vm11585_vm9, %v11581_v20, %v11481_v40  ;;  %v11355_v51 = vpop.permute.xlu1 %11354 }
 0x731   : > { %11647 = vst.msk [vmem:[%s18132_s28 + $0xe0] sm:$0xff] %vm11618_vm10, %v11614_v13  ;;  %v11582_v11 = vsel %vm11552_vm8, %v11549_v62, %v11355_v51 }
 0x732   : > { %v11615_v26 = vsel %vm11585_vm9, %v11582_v11, %v11483_v16  ;;  %v11485_v12 = vpop.permute.xlu0 %11484 }
 0x733   : > { %11648 = vst.msk [vmem:[%s18132_s28 + $0xe8] sm:$0xff] %vm11618_vm10, %v11615_v26  ;;  %v11616_v32 = vsel %vm11585_vm9, %v11583_v49, %v11485_v12 }
 0x734   : > { %11649 = vst.msk [vmem:[%s18132_s28 + $0xf0] sm:$0xff] %vm11618_vm10, %v11616_v32  ;;  %v11487_v31 = vpop.permute.xlu1 %11486 }
 0x735   : > { %v11617_v14 = vsel %vm11585_vm9, %v11584_v2, %v11487_v31 }
 0x736   : > { %11650 = vst.msk [vmem:[%s18132_s28 + $0xf8] sm:$0xff] %vm11618_vm10, %v11617_v14 }
 0x737   : > { %15325 = shalt.err (!%p15322_p3)
}
 0x738   : > { %s15326_s26 = scalar_lea.hbm %s18381_s17, 4096  ;;  %s15330_s13 = scalar_lea.hbm %s18444_s9, 8192 }
 0x739   : > { %p15327_p4 = scmp.ne.s32.totalorder %s18381_s17, %s15326_s26  ;;  %p15331_p9 = scmp.lt.u32.totalorder %s18381_s17, %s18444_s9 }
 0x73a   : > { %p15332_p10 = scmp.lt.u32.totalorder %s15330_s13, %s15326_s26  ;;  %p15334_p12 = scmp.lt.u32.totalorder %s15326_s26, %s18381_s17 }
 0x73b   : > { %p15328_p7 = pnand %p15327_p4, %p15473_p5 }
 0x73c   : > { %p15333_p11 = por %p15332_p10, %p15331_p9 }
 0x73d   : > { %p15329_p8 = pneg %p15328_p7 }
 0x73e   : > { %p15335_p13 = por %p15334_p12, %p15333_p11 }
 0x740   : > { %p15336_p0 = pnand %p15335_p13, %p15329_p8 }
 0x742   : > { %15339 = shalt.err (!%p15336_p0)
}
 0x743   : > { %s15384_s22 = smov 128  }
 0x744   : > { %15264 = dma.vmem_to_hbm [thread:$0]  (%p15473_p5), %s18386_s14, 4096, %s18381_s17, %s18393_s21, %s15384_s22, %s15384_s22, %s15376_s23  }
 0x745 PF: > { %p15270_p1 = scmp.ge.s32.totalorder %s15374_s12, 2  ;;  %s11680_s25 = sand.u32 1, %s15362_s30  }
 0x746   : > { %s11681_s27 = scalar_lea.sflag [#allocation5], %s11680_s25 }
 0x747   : > { %p15267_p2 = pnand %p15270_p1, %p15477_p6 }
 0x749   : > { %15357 = dma.done.wait (!%p15267_p2), %s11681_s27, 4096  }
 0x74a   : > { %15359 = vsyncadd (!%p15267_p2), %s11681_s27, 4294963200  ;;  %p19_p3 = scmp.ge.s32.totalorder %s15460_s15, 4   ;;  %s18548_s30 = smov %s15366_s10 }
 0x74b   : > { %s18549_s10 = smov %s15370_s11  ;;  %s18550_s11 = smov %s15471_s18 }
 0x74c   : > { %s18551_s12 = smov %s15460_s15  ;;  %21 = sbr.rel (!%p19_p3) target bundleno = 3 (0x3), region = 131 }
 0x753   :  { %11686 = vsyncpa [#allocation5], 1 }
 0x754   :  { %11688 = vsyncpa [#allocation5 + $0x1], 1 }

</bundles_post_ra>
